<compile_context>
chip_gen: v7x
topology: tpu7x:2x2x1
jax: 0.10.0
libtpu: 0.0.40
codegen_flags: <defaults>
</compile_context>

<pallas_src>
import functools

import jax
import jax.numpy as jnp
from jax import lax
from jax.experimental import pallas as pl
from jax.experimental.pallas import tpu as pltpu

NEG_SLOPE = 0.2   # LeakyReLU negative slope
BN_EPS = 1e-5     # BatchNorm2d default eps


# --------------------------------- kernel ---------------------------------- #
def _high_block_kernel(x_ref, w_ref, b_ref, o_ref, act_a, act_b, *, H, W, C):
    # x_ref : (LEN, C)      zero-padded input, rows = flattened (H+2, W+2) grid
    # w_ref : (3, 9, C, C)  conv(+BN) weights, [stage, tap(kh*3+kw), Cin, Cout]
    # b_ref : (3, 1, C)     folded biases
    # o_ref : (H*(W+2), C)  block output in the extended (wrap-column) layout
    # act_a, act_b : VMEM scratch (LEN, C) f32 -- padded intermediate activations
    P = W + 2
    HP = H * P

    # Columns j >= W of the extended output grid are wrap-around garbage; they
    # must be zeroed before feeding the next conv (re-applies the zero padding).
    col = lax.broadcasted_iota(jnp.int32, (HP, 1), 0) % P
    valid = col < W

    def conv_bn_lrelu(src_ref, stage):
        acc = jnp.zeros((HP, C), jnp.float32)
        for t in range(9):                      # static unroll over the 9 taps
            kh, kw = t // 3, t % 3
            off = kh * P + kw
            tap = src_ref[off:off + HP, :].astype(jnp.float32)
            acc = acc + jnp.dot(tap, w_ref[stage, t],
                                preferred_element_type=jnp.float32)
        acc = acc + b_ref[stage]                # folded conv bias + BatchNorm
        return jnp.where(acc >= 0.0, acc, acc * NEG_SLOPE)

    def write_padded(dst_ref, y):
        dst_ref[...] = jnp.zeros_like(dst_ref)            # zero pad borders
        dst_ref[P + 1:P + 1 + HP, :] = jnp.where(valid, y, 0.0)

    y1 = conv_bn_lrelu(x_ref, 0)
    write_padded(act_a, y1)
    y2 = conv_bn_lrelu(act_a, 1)
    write_padded(act_b, y2)
    y3 = conv_bn_lrelu(act_b, 2)

    # residual:  out = 0.2 * y3 + x   (x interior in the same extended layout)
    x_in = x_ref[P + 1:P + 1 + HP, :].astype(jnp.float32)
    o_ref[...] = (y3 * 0.2 + x_in).astype(o_ref.dtype)


# --------------------------------- wrapper --------------------------------- #
def high_block_forward(x_nchw, params):
    """Forward pass of `high_block` (NCHW in / NCHW out, eval-mode BatchNorm)."""
    n, c, h, w = x_nchw.shape
    p = w + 2
    hp = h * p
    length = ((h + 2) * p + 2 + 7) // 8 * 8   # flattened padded rows (+tap tail)

    x = jnp.transpose(x_nchw, (0, 2, 3, 1))                     # NCHW -> NHWC
    xpad = jnp.pad(x, ((0, 0), (1, 1), (1, 1), (0, 0)))         # (N, H+2, W+2, C)
    x_flat = xpad.reshape(n, (h + 2) * p, c)
    x_flat = jnp.pad(x_flat, ((0, 0), (0, length - (h + 2) * p), (0, 0)))

    # Fold BatchNorm (running stats) into each conv's weights / bias.
    ws, bs = [], []
    for i in range(3):
        s = params[f"gamma{i}"] / jnp.sqrt(params[f"var{i}"] + BN_EPS)   # (C,)
        wf = params[f"w{i}"] * s                                         # HWIO, scale Cout
        bf = (params[f"b{i}"] - params[f"mean{i}"]) * s + params[f"beta{i}"]
        ws.append(wf.reshape(9, c, c))
        bs.append(bf.reshape(1, c))
    w_all = jnp.stack(ws, 0).astype(jnp.float32)   # (3, 9, C, C)
    b_all = jnp.stack(bs, 0).astype(jnp.float32)   # (3, 1, C)

    kernel = functools.partial(_high_block_kernel, H=h, W=w, C=c)
    out_ext = pl.pallas_call(
        kernel,
        out_shape=jax.ShapeDtypeStruct((n, hp, c), x.dtype),
        grid_spec=pltpu.PrefetchScalarGridSpec(
            num_scalar_prefetch=0,
            grid=(n,),
            in_specs=[
                pl.BlockSpec((None, length, c), lambda i: (i, 0, 0)),
                pl.BlockSpec((3, 9, c, c), lambda i: (0, 0, 0, 0)),
                pl.BlockSpec((3, 1, c), lambda i: (0, 0, 0)),
            ],
            out_specs=pl.BlockSpec((None, hp, c), lambda i: (i, 0, 0)),
            scratch_shapes=[pltpu.VMEM((length, c), jnp.float32),
                            pltpu.VMEM((length, c), jnp.float32)],
        ),
        compiler_params=pltpu.CompilerParams(
            dimension_semantics=("parallel",)),
    )(x_flat, w_all, b_all)

    out = out_ext.reshape(n, h, p, c)[:, :, :w, :]   # drop the 2 wrap columns
    return jnp.transpose(out, (0, 3, 1, 2))          # NHWC -> NCHW


# -------------------------- params + pure-JAX reference --------------------- #
def init_high_block_params(key, c):
    """Deterministic synthetic parameters (same shapes as the PyTorch module)."""
    params = {}
    for i in range(3):
        key, kw_, kb, kg, kbe, km, kv = jax.random.split(key, 7)
        bound = 1.0 / jnp.sqrt(c * 9.0)
        params[f"w{i}"] = jax.random.uniform(kw_, (3, 3, c, c), jnp.float32,
                                             -bound, bound)      # HWIO
        params[f"b{i}"] = jax.random.uniform(kb, (c,), jnp.float32, -bound, bound)
        params[f"gamma{i}"] = jax.random.uniform(kg, (c,), jnp.float32, 0.5, 1.5)
        params[f"beta{i}"] = jax.random.uniform(kbe, (c,), jnp.float32, -0.2, 0.2)
        params[f"mean{i}"] = 0.1 * jax.random.normal(km, (c,), jnp.float32)
        params[f"var{i}"] = jax.random.uniform(kv, (c,), jnp.float32, 0.5, 1.5)
    return params


def _ref_high_block(x_nchw, params):
    """Pure-JAX reference: 3x (conv3x3 -> eval BN -> LeakyReLU), then 0.2*y + x."""
    x = jnp.transpose(x_nchw, (0, 2, 3, 1))
    act = x
    for i in range(3):
        y = lax.conv_general_dilated(
            act, params[f"w{i}"], (1, 1), "SAME",
            dimension_numbers=("NHWC", "HWIO", "NHWC")) + params[f"b{i}"]
        y = ((y - params[f"mean{i}"]) / jnp.sqrt(params[f"var{i}"] + BN_EPS)
             * params[f"gamma{i}"] + params[f"beta{i}"])
        act = jnp.where(y >= 0.0, y, y * NEG_SLOPE)
    return jnp.transpose(act * 0.2 + x, (0, 3, 1, 2))


if __name__ == "__main__":
    N, C, H, W = 2, 4, 16, 16
    key = jax.random.PRNGKey(0)
    key, kx = jax.random.split(key)
    x = jax.random.normal(kx, (N, C, H, W), jnp.float32)
    params = init_high_block_params(key, C)

    out = jax.block_until_ready(high_block_forward(x, params))
    ref = jax.block_until_ready(_ref_high_block(x, params))

    assert out.shape == (N, C, H, W)
    assert jnp.allclose(out, ref, atol=1e-3, rtol=1e-3), "mismatch vs JAX reference"
    print("KERNEL_OK")
</pallas_src>

<mosaic_0001>
module attributes {stable_mosaic.version = 11 : i64} {
  func.func @_high_block_kernel(%arg0: i32, %arg1: memref<1x328x4xf32, #tpu.memory_space<vmem>>, %arg2: memref<3x9x4x4xf32, #tpu.memory_space<vmem>>, %arg3: memref<3x1x4xf32, #tpu.memory_space<vmem>>, %arg4: memref<1x288x4xf32, #tpu.memory_space<vmem>>, %arg5: memref<328x4xf32, #tpu.memory_space<vmem>>, %arg6: memref<328x4xf32, #tpu.memory_space<vmem>>) attributes {dimension_semantics = [#tpu.dimension_semantics<parallel>], iteration_bounds = array<i64: 2>, scalar_prefetch = 0 : i64, scratch_operands = 2 : i64, tpu.core_type = #tpu.core_type<tc>, window_params = [{transform_indices = @transform_0, window_bounds = array<i64: 1, 328, 4>}, {pipeline_mode = #tpu.pipeline_mode<synchronous>, transform_indices = @transform_1, window_bounds = array<i64: 3, 9, 4, 4>}, {pipeline_mode = #tpu.pipeline_mode<synchronous>, transform_indices = @transform_2, window_bounds = array<i64: 3, 1, 4>}, {transform_indices = @transform_3, window_bounds = array<i64: 1, 288, 4>}]} {
    %0 = tpu.iota {dimensions = array<i32: 0>} : vector<288x1xi32>
    %c18_i32 = arith.constant 18 : i32
    %c0_i32 = arith.constant 0 : i32
    %1 = arith.cmpi eq, %c18_i32, %c0_i32 : i32
    %c1_i32 = arith.constant 1 : i32
    %2 = arith.select %1, %c1_i32, %c18_i32 : i32
    %3 = vector.broadcast %2 : i32 to vector<288x1xi32>
    %4 = arith.remsi %0, %3 : vector<288x1xi32>
    %c0_i32_0 = arith.constant 0 : i32
    %5 = vector.broadcast %c0_i32_0 : i32 to vector<288x1xi32>
    %6 = arith.cmpi ne, %4, %5 : vector<288x1xi32>
    %c0_i32_1 = arith.constant 0 : i32
    %7 = vector.broadcast %c0_i32_1 : i32 to vector<288x1xi32>
    %8 = arith.cmpi slt, %4, %7 : vector<288x1xi32>
    %c0_i32_2 = arith.constant 0 : i32
    %9 = arith.cmpi slt, %2, %c0_i32_2 : i32
    %10 = vector.broadcast %9 : i1 to vector<288x1xi1>
    %11 = vector.broadcast %10 : vector<288x1xi1> to vector<288x1xi1>
    %12 = arith.xori %8, %11 : vector<288x1xi1>
    %13 = arith.andi %12, %6 : vector<288x1xi1>
    %14 = vector.broadcast %2 : i32 to vector<288x1xi32>
    %15 = arith.addi %4, %14 : vector<288x1xi32>
    %16 = arith.select %13, %15, %4 : vector<288x1xi1>, vector<288x1xi32>
    %c16_i32 = arith.constant 16 : i32
    %17 = vector.broadcast %c16_i32 : i32 to vector<288x1xi32>
    %18 = arith.cmpi slt, %16, %17 : vector<288x1xi32>
    %cst = arith.constant 0.000000e+00 : f32
    %19 = vector.broadcast %cst : f32 to vector<288x4xf32>
    %c0 = arith.constant 0 : index
    %c0_3 = arith.constant 0 : index
    %c0_4 = arith.constant 0 : index
    %20 = vector.load %arg1[%c0, %c0_3, %c0_4] : memref<1x328x4xf32, #tpu.memory_space<vmem>>, vector<1x288x4xf32>
    %21 = vector.shape_cast %20 : vector<1x288x4xf32> to vector<288x4xf32>
    %c0_5 = arith.constant 0 : index
    %c0_6 = arith.constant 0 : index
    %c0_7 = arith.constant 0 : index
    %c0_8 = arith.constant 0 : index
    %22 = vector.load %arg2[%c0_5, %c0_6, %c0_7, %c0_8] : memref<3x9x4x4xf32, #tpu.memory_space<vmem>>, vector<1x1x4x4xf32>
    %23 = vector.shape_cast %22 : vector<1x1x4x4xf32> to vector<4x4xf32>
    %cst_9 = arith.constant dense<0.000000e+00> : vector<288x4xf32>
    %24 = tpu.matmul %21, %23, %cst_9 {dimension_numbers = #tpu.dot_dimension_numbers<[1], [0], [0], [1], [0, 0, 1, 1], [], []>} : vector<288x4xf32>, vector<4x4xf32>, vector<288x4xf32> -> vector<288x4xf32>
    %25 = arith.addf %19, %24 : vector<288x4xf32>
    %c0_10 = arith.constant 0 : index
    %c1 = arith.constant 1 : index
    %c0_11 = arith.constant 0 : index
    %26 = vector.load %arg1[%c0_10, %c1, %c0_11] : memref<1x328x4xf32, #tpu.memory_space<vmem>>, vector<1x288x4xf32>
    %27 = vector.shape_cast %26 : vector<1x288x4xf32> to vector<288x4xf32>
    %c0_12 = arith.constant 0 : index
    %c1_13 = arith.constant 1 : index
    %c0_14 = arith.constant 0 : index
    %c0_15 = arith.constant 0 : index
    %28 = vector.load %arg2[%c0_12, %c1_13, %c0_14, %c0_15] : memref<3x9x4x4xf32, #tpu.memory_space<vmem>>, vector<1x1x4x4xf32>
    %29 = vector.shape_cast %28 : vector<1x1x4x4xf32> to vector<4x4xf32>
    %cst_16 = arith.constant dense<0.000000e+00> : vector<288x4xf32>
    %30 = tpu.matmul %27, %29, %cst_16 {dimension_numbers = #tpu.dot_dimension_numbers<[1], [0], [0], [1], [0, 0, 1, 1], [], []>} : vector<288x4xf32>, vector<4x4xf32>, vector<288x4xf32> -> vector<288x4xf32>
    %31 = arith.addf %25, %30 : vector<288x4xf32>
    %c0_17 = arith.constant 0 : index
    %c2 = arith.constant 2 : index
    %c0_18 = arith.constant 0 : index
    %32 = vector.load %arg1[%c0_17, %c2, %c0_18] : memref<1x328x4xf32, #tpu.memory_space<vmem>>, vector<1x288x4xf32>
    %33 = vector.shape_cast %32 : vector<1x288x4xf32> to vector<288x4xf32>
    %c0_19 = arith.constant 0 : index
    %c2_20 = arith.constant 2 : index
    %c0_21 = arith.constant 0 : index
    %c0_22 = arith.constant 0 : index
    %34 = vector.load %arg2[%c0_19, %c2_20, %c0_21, %c0_22] : memref<3x9x4x4xf32, #tpu.memory_space<vmem>>, vector<1x1x4x4xf32>
    %35 = vector.shape_cast %34 : vector<1x1x4x4xf32> to vector<4x4xf32>
    %cst_23 = arith.constant dense<0.000000e+00> : vector<288x4xf32>
    %36 = tpu.matmul %33, %35, %cst_23 {dimension_numbers = #tpu.dot_dimension_numbers<[1], [0], [0], [1], [0, 0, 1, 1], [], []>} : vector<288x4xf32>, vector<4x4xf32>, vector<288x4xf32> -> vector<288x4xf32>
    %37 = arith.addf %31, %36 : vector<288x4xf32>
    %c0_24 = arith.constant 0 : index
    %c18 = arith.constant 18 : index
    %c0_25 = arith.constant 0 : index
    %38 = vector.load %arg1[%c0_24, %c18, %c0_25] : memref<1x328x4xf32, #tpu.memory_space<vmem>>, vector<1x288x4xf32>
    %39 = vector.shape_cast %38 : vector<1x288x4xf32> to vector<288x4xf32>
    %c0_26 = arith.constant 0 : index
    %c3 = arith.constant 3 : index
    %c0_27 = arith.constant 0 : index
    %c0_28 = arith.constant 0 : index
    %40 = vector.load %arg2[%c0_26, %c3, %c0_27, %c0_28] : memref<3x9x4x4xf32, #tpu.memory_space<vmem>>, vector<1x1x4x4xf32>
    %41 = vector.shape_cast %40 : vector<1x1x4x4xf32> to vector<4x4xf32>
    %cst_29 = arith.constant dense<0.000000e+00> : vector<288x4xf32>
    %42 = tpu.matmul %39, %41, %cst_29 {dimension_numbers = #tpu.dot_dimension_numbers<[1], [0], [0], [1], [0, 0, 1, 1], [], []>} : vector<288x4xf32>, vector<4x4xf32>, vector<288x4xf32> -> vector<288x4xf32>
    %43 = arith.addf %37, %42 : vector<288x4xf32>
    %c0_30 = arith.constant 0 : index
    %c19 = arith.constant 19 : index
    %c0_31 = arith.constant 0 : index
    %44 = vector.load %arg1[%c0_30, %c19, %c0_31] : memref<1x328x4xf32, #tpu.memory_space<vmem>>, vector<1x288x4xf32>
    %45 = vector.shape_cast %44 : vector<1x288x4xf32> to vector<288x4xf32>
    %c0_32 = arith.constant 0 : index
    %c4 = arith.constant 4 : index
    %c0_33 = arith.constant 0 : index
    %c0_34 = arith.constant 0 : index
    %46 = vector.load %arg2[%c0_32, %c4, %c0_33, %c0_34] : memref<3x9x4x4xf32, #tpu.memory_space<vmem>>, vector<1x1x4x4xf32>
    %47 = vector.shape_cast %46 : vector<1x1x4x4xf32> to vector<4x4xf32>
    %cst_35 = arith.constant dense<0.000000e+00> : vector<288x4xf32>
    %48 = tpu.matmul %45, %47, %cst_35 {dimension_numbers = #tpu.dot_dimension_numbers<[1], [0], [0], [1], [0, 0, 1, 1], [], []>} : vector<288x4xf32>, vector<4x4xf32>, vector<288x4xf32> -> vector<288x4xf32>
    %49 = arith.addf %43, %48 : vector<288x4xf32>
    %c0_36 = arith.constant 0 : index
    %c20 = arith.constant 20 : index
    %c0_37 = arith.constant 0 : index
    %50 = vector.load %arg1[%c0_36, %c20, %c0_37] : memref<1x328x4xf32, #tpu.memory_space<vmem>>, vector<1x288x4xf32>
    %51 = vector.shape_cast %50 : vector<1x288x4xf32> to vector<288x4xf32>
    %c0_38 = arith.constant 0 : index
    %c5 = arith.constant 5 : index
    %c0_39 = arith.constant 0 : index
    %c0_40 = arith.constant 0 : index
    %52 = vector.load %arg2[%c0_38, %c5, %c0_39, %c0_40] : memref<3x9x4x4xf32, #tpu.memory_space<vmem>>, vector<1x1x4x4xf32>
    %53 = vector.shape_cast %52 : vector<1x1x4x4xf32> to vector<4x4xf32>
    %cst_41 = arith.constant dense<0.000000e+00> : vector<288x4xf32>
    %54 = tpu.matmul %51, %53, %cst_41 {dimension_numbers = #tpu.dot_dimension_numbers<[1], [0], [0], [1], [0, 0, 1, 1], [], []>} : vector<288x4xf32>, vector<4x4xf32>, vector<288x4xf32> -> vector<288x4xf32>
    %55 = arith.addf %49, %54 : vector<288x4xf32>
    %c0_42 = arith.constant 0 : index
    %c36 = arith.constant 36 : index
    %c0_43 = arith.constant 0 : index
    %56 = vector.load %arg1[%c0_42, %c36, %c0_43] : memref<1x328x4xf32, #tpu.memory_space<vmem>>, vector<1x288x4xf32>
    %57 = vector.shape_cast %56 : vector<1x288x4xf32> to vector<288x4xf32>
    %c0_44 = arith.constant 0 : index
    %c6 = arith.constant 6 : index
    %c0_45 = arith.constant 0 : index
    %c0_46 = arith.constant 0 : index
    %58 = vector.load %arg2[%c0_44, %c6, %c0_45, %c0_46] : memref<3x9x4x4xf32, #tpu.memory_space<vmem>>, vector<1x1x4x4xf32>
    %59 = vector.shape_cast %58 : vector<1x1x4x4xf32> to vector<4x4xf32>
    %cst_47 = arith.constant dense<0.000000e+00> : vector<288x4xf32>
    %60 = tpu.matmul %57, %59, %cst_47 {dimension_numbers = #tpu.dot_dimension_numbers<[1], [0], [0], [1], [0, 0, 1, 1], [], []>} : vector<288x4xf32>, vector<4x4xf32>, vector<288x4xf32> -> vector<288x4xf32>
    %61 = arith.addf %55, %60 : vector<288x4xf32>
    %c0_48 = arith.constant 0 : index
    %c37 = arith.constant 37 : index
    %c0_49 = arith.constant 0 : index
    %62 = vector.load %arg1[%c0_48, %c37, %c0_49] : memref<1x328x4xf32, #tpu.memory_space<vmem>>, vector<1x288x4xf32>
    %63 = vector.shape_cast %62 : vector<1x288x4xf32> to vector<288x4xf32>
    %c0_50 = arith.constant 0 : index
    %c7 = arith.constant 7 : index
    %c0_51 = arith.constant 0 : index
    %c0_52 = arith.constant 0 : index
    %64 = vector.load %arg2[%c0_50, %c7, %c0_51, %c0_52] : memref<3x9x4x4xf32, #tpu.memory_space<vmem>>, vector<1x1x4x4xf32>
    %65 = vector.shape_cast %64 : vector<1x1x4x4xf32> to vector<4x4xf32>
    %cst_53 = arith.constant dense<0.000000e+00> : vector<288x4xf32>
    %66 = tpu.matmul %63, %65, %cst_53 {dimension_numbers = #tpu.dot_dimension_numbers<[1], [0], [0], [1], [0, 0, 1, 1], [], []>} : vector<288x4xf32>, vector<4x4xf32>, vector<288x4xf32> -> vector<288x4xf32>
    %67 = arith.addf %61, %66 : vector<288x4xf32>
    %c0_54 = arith.constant 0 : index
    %c38 = arith.constant 38 : index
    %c0_55 = arith.constant 0 : index
    %68 = vector.load %arg1[%c0_54, %c38, %c0_55] : memref<1x328x4xf32, #tpu.memory_space<vmem>>, vector<1x288x4xf32>
    %69 = vector.shape_cast %68 : vector<1x288x4xf32> to vector<288x4xf32>
    %c0_56 = arith.constant 0 : index
    %c8 = arith.constant 8 : index
    %c0_57 = arith.constant 0 : index
    %c0_58 = arith.constant 0 : index
    %70 = vector.load %arg2[%c0_56, %c8, %c0_57, %c0_58] : memref<3x9x4x4xf32, #tpu.memory_space<vmem>>, vector<1x1x4x4xf32>
    %71 = vector.shape_cast %70 : vector<1x1x4x4xf32> to vector<4x4xf32>
    %cst_59 = arith.constant dense<0.000000e+00> : vector<288x4xf32>
    %72 = tpu.matmul %69, %71, %cst_59 {dimension_numbers = #tpu.dot_dimension_numbers<[1], [0], [0], [1], [0, 0, 1, 1], [], []>} : vector<288x4xf32>, vector<4x4xf32>, vector<288x4xf32> -> vector<288x4xf32>
    %73 = arith.addf %67, %72 : vector<288x4xf32>
    %c0_60 = arith.constant 0 : index
    %c0_61 = arith.constant 0 : index
    %c0_62 = arith.constant 0 : index
    %74 = vector.load %arg3[%c0_60, %c0_61, %c0_62] : memref<3x1x4xf32, #tpu.memory_space<vmem>>, vector<1x1x4xf32>
    %75 = vector.shape_cast %74 : vector<1x1x4xf32> to vector<1x4xf32>
    %76 = vector.broadcast %75 : vector<1x4xf32> to vector<288x4xf32>
    %77 = arith.addf %73, %76 : vector<288x4xf32>
    %cst_63 = arith.constant 0.000000e+00 : f32
    %78 = vector.broadcast %cst_63 : f32 to vector<288x4xf32>
    %79 = arith.cmpf oge, %77, %78 : vector<288x4xf32>
    %cst_64 = arith.constant 2.000000e-01 : f32
    %80 = vector.broadcast %cst_64 : f32 to vector<288x4xf32>
    %81 = arith.mulf %77, %80 : vector<288x4xf32>
    %82 = arith.select %79, %77, %81 : vector<288x4xi1>, vector<288x4xf32>
    %cst_65 = arith.constant 0.000000e+00 : f32
    %83 = vector.broadcast %cst_65 : f32 to vector<328x4xf32>
    %c0_66 = arith.constant 0 : index
    %c0_67 = arith.constant 0 : index
    %84 = vector.load %arg5[%c0_66, %c0_67] : memref<328x4xf32, #tpu.memory_space<vmem>>, vector<328x4xf32>
    tpu.vector_store %arg5[%c0_66, %c0_67], %83 {strides = array<i32>} : memref<328x4xf32, #tpu.memory_space<vmem>>, vector<328x4xf32>,
    %cst_68 = arith.constant 0.000000e+00 : f32
    %85 = vector.shape_cast %18 : vector<288x1xi1> to vector<288x1xi1>
    %86 = vector.broadcast %85 : vector<288x1xi1> to vector<288x4xi1>
    %87 = vector.broadcast %cst_68 : f32 to vector<288x4xf32>
    %88 = arith.select %86, %82, %87 : vector<288x4xi1>, vector<288x4xf32>
    %c19_69 = arith.constant 19 : index
    %c0_70 = arith.constant 0 : index
    %89 = vector.load %arg5[%c19_69, %c0_70] : memref<328x4xf32, #tpu.memory_space<vmem>>, vector<288x4xf32>
    tpu.vector_store %arg5[%c19_69, %c0_70], %88 {strides = array<i32>} : memref<328x4xf32, #tpu.memory_space<vmem>>, vector<288x4xf32>,
    %cst_71 = arith.constant 0.000000e+00 : f32
    %90 = vector.broadcast %cst_71 : f32 to vector<288x4xf32>
    %c0_72 = arith.constant 0 : index
    %c0_73 = arith.constant 0 : index
    %91 = vector.load %arg5[%c0_72, %c0_73] : memref<328x4xf32, #tpu.memory_space<vmem>>, vector<288x4xf32>
    %c1_74 = arith.constant 1 : index
    %c0_75 = arith.constant 0 : index
    %c0_76 = arith.constant 0 : index
    %c0_77 = arith.constant 0 : index
    %92 = vector.load %arg2[%c1_74, %c0_75, %c0_76, %c0_77] : memref<3x9x4x4xf32, #tpu.memory_space<vmem>>, vector<1x1x4x4xf32>
    %93 = vector.shape_cast %92 : vector<1x1x4x4xf32> to vector<4x4xf32>
    %cst_78 = arith.constant dense<0.000000e+00> : vector<288x4xf32>
    %94 = tpu.matmul %91, %93, %cst_78 {dimension_numbers = #tpu.dot_dimension_numbers<[1], [0], [0], [1], [0, 0, 1, 1], [], []>} : vector<288x4xf32>, vector<4x4xf32>, vector<288x4xf32> -> vector<288x4xf32>
    %95 = arith.addf %90, %94 : vector<288x4xf32>
    %c1_79 = arith.constant 1 : index
    %c0_80 = arith.constant 0 : index
    %96 = vector.load %arg5[%c1_79, %c0_80] : memref<328x4xf32, #tpu.memory_space<vmem>>, vector<288x4xf32>
    %c1_81 = arith.constant 1 : index
    %c1_82 = arith.constant 1 : index
    %c0_83 = arith.constant 0 : index
    %c0_84 = arith.constant 0 : index
    %97 = vector.load %arg2[%c1_81, %c1_82, %c0_83, %c0_84] : memref<3x9x4x4xf32, #tpu.memory_space<vmem>>, vector<1x1x4x4xf32>
    %98 = vector.shape_cast %97 : vector<1x1x4x4xf32> to vector<4x4xf32>
    %cst_85 = arith.constant dense<0.000000e+00> : vector<288x4xf32>
    %99 = tpu.matmul %96, %98, %cst_85 {dimension_numbers = #tpu.dot_dimension_numbers<[1], [0], [0], [1], [0, 0, 1, 1], [], []>} : vector<288x4xf32>, vector<4x4xf32>, vector<288x4xf32> -> vector<288x4xf32>
    %100 = arith.addf %95, %99 : vector<288x4xf32>
    %c2_86 = arith.constant 2 : index
    %c0_87 = arith.constant 0 : index
    %101 = vector.load %arg5[%c2_86, %c0_87] : memref<328x4xf32, #tpu.memory_space<vmem>>, vector<288x4xf32>
    %c1_88 = arith.constant 1 : index
    %c2_89 = arith.constant 2 : index
    %c0_90 = arith.constant 0 : index
    %c0_91 = arith.constant 0 : index
    %102 = vector.load %arg2[%c1_88, %c2_89, %c0_90, %c0_91] : memref<3x9x4x4xf32, #tpu.memory_space<vmem>>, vector<1x1x4x4xf32>
    %103 = vector.shape_cast %102 : vector<1x1x4x4xf32> to vector<4x4xf32>
    %cst_92 = arith.constant dense<0.000000e+00> : vector<288x4xf32>
    %104 = tpu.matmul %101, %103, %cst_92 {dimension_numbers = #tpu.dot_dimension_numbers<[1], [0], [0], [1], [0, 0, 1, 1], [], []>} : vector<288x4xf32>, vector<4x4xf32>, vector<288x4xf32> -> vector<288x4xf32>
    %105 = arith.addf %100, %104 : vector<288x4xf32>
    %c18_93 = arith.constant 18 : index
    %c0_94 = arith.constant 0 : index
    %106 = vector.load %arg5[%c18_93, %c0_94] : memref<328x4xf32, #tpu.memory_space<vmem>>, vector<288x4xf32>
    %c1_95 = arith.constant 1 : index
    %c3_96 = arith.constant 3 : index
    %c0_97 = arith.constant 0 : index
    %c0_98 = arith.constant 0 : index
    %107 = vector.load %arg2[%c1_95, %c3_96, %c0_97, %c0_98] : memref<3x9x4x4xf32, #tpu.memory_space<vmem>>, vector<1x1x4x4xf32>
    %108 = vector.shape_cast %107 : vector<1x1x4x4xf32> to vector<4x4xf32>
    %cst_99 = arith.constant dense<0.000000e+00> : vector<288x4xf32>
    %109 = tpu.matmul %106, %108, %cst_99 {dimension_numbers = #tpu.dot_dimension_numbers<[1], [0], [0], [1], [0, 0, 1, 1], [], []>} : vector<288x4xf32>, vector<4x4xf32>, vector<288x4xf32> -> vector<288x4xf32>
    %110 = arith.addf %105, %109 : vector<288x4xf32>
    %c19_100 = arith.constant 19 : index
    %c0_101 = arith.constant 0 : index
    %111 = vector.load %arg5[%c19_100, %c0_101] : memref<328x4xf32, #tpu.memory_space<vmem>>, vector<288x4xf32>
    %c1_102 = arith.constant 1 : index
    %c4_103 = arith.constant 4 : index
    %c0_104 = arith.constant 0 : index
    %c0_105 = arith.constant 0 : index
    %112 = vector.load %arg2[%c1_102, %c4_103, %c0_104, %c0_105] : memref<3x9x4x4xf32, #tpu.memory_space<vmem>>, vector<1x1x4x4xf32>
    %113 = vector.shape_cast %112 : vector<1x1x4x4xf32> to vector<4x4xf32>
    %cst_106 = arith.constant dense<0.000000e+00> : vector<288x4xf32>
    %114 = tpu.matmul %111, %113, %cst_106 {dimension_numbers = #tpu.dot_dimension_numbers<[1], [0], [0], [1], [0, 0, 1, 1], [], []>} : vector<288x4xf32>, vector<4x4xf32>, vector<288x4xf32> -> vector<288x4xf32>
    %115 = arith.addf %110, %114 : vector<288x4xf32>
    %c20_107 = arith.constant 20 : index
    %c0_108 = arith.constant 0 : index
    %116 = vector.load %arg5[%c20_107, %c0_108] : memref<328x4xf32, #tpu.memory_space<vmem>>, vector<288x4xf32>
    %c1_109 = arith.constant 1 : index
    %c5_110 = arith.constant 5 : index
    %c0_111 = arith.constant 0 : index
    %c0_112 = arith.constant 0 : index
    %117 = vector.load %arg2[%c1_109, %c5_110, %c0_111, %c0_112] : memref<3x9x4x4xf32, #tpu.memory_space<vmem>>, vector<1x1x4x4xf32>
    %118 = vector.shape_cast %117 : vector<1x1x4x4xf32> to vector<4x4xf32>
    %cst_113 = arith.constant dense<0.000000e+00> : vector<288x4xf32>
    %119 = tpu.matmul %116, %118, %cst_113 {dimension_numbers = #tpu.dot_dimension_numbers<[1], [0], [0], [1], [0, 0, 1, 1], [], []>} : vector<288x4xf32>, vector<4x4xf32>, vector<288x4xf32> -> vector<288x4xf32>
    %120 = arith.addf %115, %119 : vector<288x4xf32>
    %c36_114 = arith.constant 36 : index
    %c0_115 = arith.constant 0 : index
    %121 = vector.load %arg5[%c36_114, %c0_115] : memref<328x4xf32, #tpu.memory_space<vmem>>, vector<288x4xf32>
    %c1_116 = arith.constant 1 : index
    %c6_117 = arith.constant 6 : index
    %c0_118 = arith.constant 0 : index
    %c0_119 = arith.constant 0 : index
    %122 = vector.load %arg2[%c1_116, %c6_117, %c0_118, %c0_119] : memref<3x9x4x4xf32, #tpu.memory_space<vmem>>, vector<1x1x4x4xf32>
    %123 = vector.shape_cast %122 : vector<1x1x4x4xf32> to vector<4x4xf32>
    %cst_120 = arith.constant dense<0.000000e+00> : vector<288x4xf32>
    %124 = tpu.matmul %121, %123, %cst_120 {dimension_numbers = #tpu.dot_dimension_numbers<[1], [0], [0], [1], [0, 0, 1, 1], [], []>} : vector<288x4xf32>, vector<4x4xf32>, vector<288x4xf32> -> vector<288x4xf32>
    %125 = arith.addf %120, %124 : vector<288x4xf32>
    %c37_121 = arith.constant 37 : index
    %c0_122 = arith.constant 0 : index
    %126 = vector.load %arg5[%c37_121, %c0_122] : memref<328x4xf32, #tpu.memory_space<vmem>>, vector<288x4xf32>
    %c1_123 = arith.constant 1 : index
    %c7_124 = arith.constant 7 : index
    %c0_125 = arith.constant 0 : index
    %c0_126 = arith.constant 0 : index
    %127 = vector.load %arg2[%c1_123, %c7_124, %c0_125, %c0_126] : memref<3x9x4x4xf32, #tpu.memory_space<vmem>>, vector<1x1x4x4xf32>
    %128 = vector.shape_cast %127 : vector<1x1x4x4xf32> to vector<4x4xf32>
    %cst_127 = arith.constant dense<0.000000e+00> : vector<288x4xf32>
    %129 = tpu.matmul %126, %128, %cst_127 {dimension_numbers = #tpu.dot_dimension_numbers<[1], [0], [0], [1], [0, 0, 1, 1], [], []>} : vector<288x4xf32>, vector<4x4xf32>, vector<288x4xf32> -> vector<288x4xf32>
    %130 = arith.addf %125, %129 : vector<288x4xf32>
    %c38_128 = arith.constant 38 : index
    %c0_129 = arith.constant 0 : index
    %131 = vector.load %arg5[%c38_128, %c0_129] : memref<328x4xf32, #tpu.memory_space<vmem>>, vector<288x4xf32>
    %c1_130 = arith.constant 1 : index
    %c8_131 = arith.constant 8 : index
    %c0_132 = arith.constant 0 : index
    %c0_133 = arith.constant 0 : index
    %132 = vector.load %arg2[%c1_130, %c8_131, %c0_132, %c0_133] : memref<3x9x4x4xf32, #tpu.memory_space<vmem>>, vector<1x1x4x4xf32>
    %133 = vector.shape_cast %132 : vector<1x1x4x4xf32> to vector<4x4xf32>
    %cst_134 = arith.constant dense<0.000000e+00> : vector<288x4xf32>
    %134 = tpu.matmul %131, %133, %cst_134 {dimension_numbers = #tpu.dot_dimension_numbers<[1], [0], [0], [1], [0, 0, 1, 1], [], []>} : vector<288x4xf32>, vector<4x4xf32>, vector<288x4xf32> -> vector<288x4xf32>
    %135 = arith.addf %130, %134 : vector<288x4xf32>
    %c1_135 = arith.constant 1 : index
    %c0_136 = arith.constant 0 : index
    %c0_137 = arith.constant 0 : index
    %136 = vector.load %arg3[%c1_135, %c0_136, %c0_137] : memref<3x1x4xf32, #tpu.memory_space<vmem>>, vector<1x1x4xf32>
    %137 = vector.shape_cast %136 : vector<1x1x4xf32> to vector<1x4xf32>
    %138 = vector.broadcast %137 : vector<1x4xf32> to vector<288x4xf32>
    %139 = arith.addf %135, %138 : vector<288x4xf32>
    %cst_138 = arith.constant 0.000000e+00 : f32
    %140 = vector.broadcast %cst_138 : f32 to vector<288x4xf32>
    %141 = arith.cmpf oge, %139, %140 : vector<288x4xf32>
    %cst_139 = arith.constant 2.000000e-01 : f32
    %142 = vector.broadcast %cst_139 : f32 to vector<288x4xf32>
    %143 = arith.mulf %139, %142 : vector<288x4xf32>
    %144 = arith.select %141, %139, %143 : vector<288x4xi1>, vector<288x4xf32>
    %cst_140 = arith.constant 0.000000e+00 : f32
    %145 = vector.broadcast %cst_140 : f32 to vector<328x4xf32>
    %c0_141 = arith.constant 0 : index
    %c0_142 = arith.constant 0 : index
    %146 = vector.load %arg6[%c0_141, %c0_142] : memref<328x4xf32, #tpu.memory_space<vmem>>, vector<328x4xf32>
    tpu.vector_store %arg6[%c0_141, %c0_142], %145 {strides = array<i32>} : memref<328x4xf32, #tpu.memory_space<vmem>>, vector<328x4xf32>,
    %cst_143 = arith.constant 0.000000e+00 : f32
    %147 = vector.shape_cast %18 : vector<288x1xi1> to vector<288x1xi1>
    %148 = vector.broadcast %147 : vector<288x1xi1> to vector<288x4xi1>
    %149 = vector.broadcast %cst_143 : f32 to vector<288x4xf32>
    %150 = arith.select %148, %144, %149 : vector<288x4xi1>, vector<288x4xf32>
    %c19_144 = arith.constant 19 : index
    %c0_145 = arith.constant 0 : index
    %151 = vector.load %arg6[%c19_144, %c0_145] : memref<328x4xf32, #tpu.memory_space<vmem>>, vector<288x4xf32>
    tpu.vector_store %arg6[%c19_144, %c0_145], %150 {strides = array<i32>} : memref<328x4xf32, #tpu.memory_space<vmem>>, vector<288x4xf32>,
    %cst_146 = arith.constant 0.000000e+00 : f32
    %152 = vector.broadcast %cst_146 : f32 to vector<288x4xf32>
    %c0_147 = arith.constant 0 : index
    %c0_148 = arith.constant 0 : index
    %153 = vector.load %arg6[%c0_147, %c0_148] : memref<328x4xf32, #tpu.memory_space<vmem>>, vector<288x4xf32>
    %c2_149 = arith.constant 2 : index
    %c0_150 = arith.constant 0 : index
    %c0_151 = arith.constant 0 : index
    %c0_152 = arith.constant 0 : index
    %154 = vector.load %arg2[%c2_149, %c0_150, %c0_151, %c0_152] : memref<3x9x4x4xf32, #tpu.memory_space<vmem>>, vector<1x1x4x4xf32>
    %155 = vector.shape_cast %154 : vector<1x1x4x4xf32> to vector<4x4xf32>
    %cst_153 = arith.constant dense<0.000000e+00> : vector<288x4xf32>
    %156 = tpu.matmul %153, %155, %cst_153 {dimension_numbers = #tpu.dot_dimension_numbers<[1], [0], [0], [1], [0, 0, 1, 1], [], []>} : vector<288x4xf32>, vector<4x4xf32>, vector<288x4xf32> -> vector<288x4xf32>
    %157 = arith.addf %152, %156 : vector<288x4xf32>
    %c1_154 = arith.constant 1 : index
    %c0_155 = arith.constant 0 : index
    %158 = vector.load %arg6[%c1_154, %c0_155] : memref<328x4xf32, #tpu.memory_space<vmem>>, vector<288x4xf32>
    %c2_156 = arith.constant 2 : index
    %c1_157 = arith.constant 1 : index
    %c0_158 = arith.constant 0 : index
    %c0_159 = arith.constant 0 : index
    %159 = vector.load %arg2[%c2_156, %c1_157, %c0_158, %c0_159] : memref<3x9x4x4xf32, #tpu.memory_space<vmem>>, vector<1x1x4x4xf32>
    %160 = vector.shape_cast %159 : vector<1x1x4x4xf32> to vector<4x4xf32>
    %cst_160 = arith.constant dense<0.000000e+00> : vector<288x4xf32>
    %161 = tpu.matmul %158, %160, %cst_160 {dimension_numbers = #tpu.dot_dimension_numbers<[1], [0], [0], [1], [0, 0, 1, 1], [], []>} : vector<288x4xf32>, vector<4x4xf32>, vector<288x4xf32> -> vector<288x4xf32>
    %162 = arith.addf %157, %161 : vector<288x4xf32>
    %c2_161 = arith.constant 2 : index
    %c0_162 = arith.constant 0 : index
    %163 = vector.load %arg6[%c2_161, %c0_162] : memref<328x4xf32, #tpu.memory_space<vmem>>, vector<288x4xf32>
    %c2_163 = arith.constant 2 : index
    %c2_164 = arith.constant 2 : index
    %c0_165 = arith.constant 0 : index
    %c0_166 = arith.constant 0 : index
    %164 = vector.load %arg2[%c2_163, %c2_164, %c0_165, %c0_166] : memref<3x9x4x4xf32, #tpu.memory_space<vmem>>, vector<1x1x4x4xf32>
    %165 = vector.shape_cast %164 : vector<1x1x4x4xf32> to vector<4x4xf32>
    %cst_167 = arith.constant dense<0.000000e+00> : vector<288x4xf32>
    %166 = tpu.matmul %163, %165, %cst_167 {dimension_numbers = #tpu.dot_dimension_numbers<[1], [0], [0], [1], [0, 0, 1, 1], [], []>} : vector<288x4xf32>, vector<4x4xf32>, vector<288x4xf32> -> vector<288x4xf32>
    %167 = arith.addf %162, %166 : vector<288x4xf32>
    %c18_168 = arith.constant 18 : index
    %c0_169 = arith.constant 0 : index
    %168 = vector.load %arg6[%c18_168, %c0_169] : memref<328x4xf32, #tpu.memory_space<vmem>>, vector<288x4xf32>
    %c2_170 = arith.constant 2 : index
    %c3_171 = arith.constant 3 : index
    %c0_172 = arith.constant 0 : index
    %c0_173 = arith.constant 0 : index
    %169 = vector.load %arg2[%c2_170, %c3_171, %c0_172, %c0_173] : memref<3x9x4x4xf32, #tpu.memory_space<vmem>>, vector<1x1x4x4xf32>
    %170 = vector.shape_cast %169 : vector<1x1x4x4xf32> to vector<4x4xf32>
    %cst_174 = arith.constant dense<0.000000e+00> : vector<288x4xf32>
    %171 = tpu.matmul %168, %170, %cst_174 {dimension_numbers = #tpu.dot_dimension_numbers<[1], [0], [0], [1], [0, 0, 1, 1], [], []>} : vector<288x4xf32>, vector<4x4xf32>, vector<288x4xf32> -> vector<288x4xf32>
    %172 = arith.addf %167, %171 : vector<288x4xf32>
    %c19_175 = arith.constant 19 : index
    %c0_176 = arith.constant 0 : index
    %173 = vector.load %arg6[%c19_175, %c0_176] : memref<328x4xf32, #tpu.memory_space<vmem>>, vector<288x4xf32>
    %c2_177 = arith.constant 2 : index
    %c4_178 = arith.constant 4 : index
    %c0_179 = arith.constant 0 : index
    %c0_180 = arith.constant 0 : index
    %174 = vector.load %arg2[%c2_177, %c4_178, %c0_179, %c0_180] : memref<3x9x4x4xf32, #tpu.memory_space<vmem>>, vector<1x1x4x4xf32>
    %175 = vector.shape_cast %174 : vector<1x1x4x4xf32> to vector<4x4xf32>
    %cst_181 = arith.constant dense<0.000000e+00> : vector<288x4xf32>
    %176 = tpu.matmul %173, %175, %cst_181 {dimension_numbers = #tpu.dot_dimension_numbers<[1], [0], [0], [1], [0, 0, 1, 1], [], []>} : vector<288x4xf32>, vector<4x4xf32>, vector<288x4xf32> -> vector<288x4xf32>
    %177 = arith.addf %172, %176 : vector<288x4xf32>
    %c20_182 = arith.constant 20 : index
    %c0_183 = arith.constant 0 : index
    %178 = vector.load %arg6[%c20_182, %c0_183] : memref<328x4xf32, #tpu.memory_space<vmem>>, vector<288x4xf32>
    %c2_184 = arith.constant 2 : index
    %c5_185 = arith.constant 5 : index
    %c0_186 = arith.constant 0 : index
    %c0_187 = arith.constant 0 : index
    %179 = vector.load %arg2[%c2_184, %c5_185, %c0_186, %c0_187] : memref<3x9x4x4xf32, #tpu.memory_space<vmem>>, vector<1x1x4x4xf32>
    %180 = vector.shape_cast %179 : vector<1x1x4x4xf32> to vector<4x4xf32>
    %cst_188 = arith.constant dense<0.000000e+00> : vector<288x4xf32>
    %181 = tpu.matmul %178, %180, %cst_188 {dimension_numbers = #tpu.dot_dimension_numbers<[1], [0], [0], [1], [0, 0, 1, 1], [], []>} : vector<288x4xf32>, vector<4x4xf32>, vector<288x4xf32> -> vector<288x4xf32>
    %182 = arith.addf %177, %181 : vector<288x4xf32>
    %c36_189 = arith.constant 36 : index
    %c0_190 = arith.constant 0 : index
    %183 = vector.load %arg6[%c36_189, %c0_190] : memref<328x4xf32, #tpu.memory_space<vmem>>, vector<288x4xf32>
    %c2_191 = arith.constant 2 : index
    %c6_192 = arith.constant 6 : index
    %c0_193 = arith.constant 0 : index
    %c0_194 = arith.constant 0 : index
    %184 = vector.load %arg2[%c2_191, %c6_192, %c0_193, %c0_194] : memref<3x9x4x4xf32, #tpu.memory_space<vmem>>, vector<1x1x4x4xf32>
    %185 = vector.shape_cast %184 : vector<1x1x4x4xf32> to vector<4x4xf32>
    %cst_195 = arith.constant dense<0.000000e+00> : vector<288x4xf32>
    %186 = tpu.matmul %183, %185, %cst_195 {dimension_numbers = #tpu.dot_dimension_numbers<[1], [0], [0], [1], [0, 0, 1, 1], [], []>} : vector<288x4xf32>, vector<4x4xf32>, vector<288x4xf32> -> vector<288x4xf32>
    %187 = arith.addf %182, %186 : vector<288x4xf32>
    %c37_196 = arith.constant 37 : index
    %c0_197 = arith.constant 0 : index
    %188 = vector.load %arg6[%c37_196, %c0_197] : memref<328x4xf32, #tpu.memory_space<vmem>>, vector<288x4xf32>
    %c2_198 = arith.constant 2 : index
    %c7_199 = arith.constant 7 : index
    %c0_200 = arith.constant 0 : index
    %c0_201 = arith.constant 0 : index
    %189 = vector.load %arg2[%c2_198, %c7_199, %c0_200, %c0_201] : memref<3x9x4x4xf32, #tpu.memory_space<vmem>>, vector<1x1x4x4xf32>
    %190 = vector.shape_cast %189 : vector<1x1x4x4xf32> to vector<4x4xf32>
    %cst_202 = arith.constant dense<0.000000e+00> : vector<288x4xf32>
    %191 = tpu.matmul %188, %190, %cst_202 {dimension_numbers = #tpu.dot_dimension_numbers<[1], [0], [0], [1], [0, 0, 1, 1], [], []>} : vector<288x4xf32>, vector<4x4xf32>, vector<288x4xf32> -> vector<288x4xf32>
    %192 = arith.addf %187, %191 : vector<288x4xf32>
    %c38_203 = arith.constant 38 : index
    %c0_204 = arith.constant 0 : index
    %193 = vector.load %arg6[%c38_203, %c0_204] : memref<328x4xf32, #tpu.memory_space<vmem>>, vector<288x4xf32>
    %c2_205 = arith.constant 2 : index
    %c8_206 = arith.constant 8 : index
    %c0_207 = arith.constant 0 : index
    %c0_208 = arith.constant 0 : index
    %194 = vector.load %arg2[%c2_205, %c8_206, %c0_207, %c0_208] : memref<3x9x4x4xf32, #tpu.memory_space<vmem>>, vector<1x1x4x4xf32>
    %195 = vector.shape_cast %194 : vector<1x1x4x4xf32> to vector<4x4xf32>
    %cst_209 = arith.constant dense<0.000000e+00> : vector<288x4xf32>
    %196 = tpu.matmul %193, %195, %cst_209 {dimension_numbers = #tpu.dot_dimension_numbers<[1], [0], [0], [1], [0, 0, 1, 1], [], []>} : vector<288x4xf32>, vector<4x4xf32>, vector<288x4xf32> -> vector<288x4xf32>
    %197 = arith.addf %192, %196 : vector<288x4xf32>
    %c2_210 = arith.constant 2 : index
    %c0_211 = arith.constant 0 : index
    %c0_212 = arith.constant 0 : index
    %198 = vector.load %arg3[%c2_210, %c0_211, %c0_212] : memref<3x1x4xf32, #tpu.memory_space<vmem>>, vector<1x1x4xf32>
    %199 = vector.shape_cast %198 : vector<1x1x4xf32> to vector<1x4xf32>
    %200 = vector.broadcast %199 : vector<1x4xf32> to vector<288x4xf32>
    %201 = arith.addf %197, %200 : vector<288x4xf32>
    %cst_213 = arith.constant 0.000000e+00 : f32
    %202 = vector.broadcast %cst_213 : f32 to vector<288x4xf32>
    %203 = arith.cmpf oge, %201, %202 : vector<288x4xf32>
    %cst_214 = arith.constant 2.000000e-01 : f32
    %204 = vector.broadcast %cst_214 : f32 to vector<288x4xf32>
    %205 = arith.mulf %201, %204 : vector<288x4xf32>
    %206 = arith.select %203, %201, %205 : vector<288x4xi1>, vector<288x4xf32>
    %c0_215 = arith.constant 0 : index
    %c19_216 = arith.constant 19 : index
    %c0_217 = arith.constant 0 : index
    %207 = vector.load %arg1[%c0_215, %c19_216, %c0_217] : memref<1x328x4xf32, #tpu.memory_space<vmem>>, vector<1x288x4xf32>
    %208 = vector.shape_cast %207 : vector<1x288x4xf32> to vector<288x4xf32>
    %cst_218 = arith.constant 2.000000e-01 : f32
    %209 = vector.broadcast %cst_218 : f32 to vector<288x4xf32>
    %210 = arith.mulf %206, %209 : vector<288x4xf32>
    %211 = arith.addf %210, %208 : vector<288x4xf32>
    %c0_219 = arith.constant 0 : index
    %c0_220 = arith.constant 0 : index
    %c0_221 = arith.constant 0 : index
    %212 = vector.load %arg4[%c0_219, %c0_220, %c0_221] : memref<1x288x4xf32, #tpu.memory_space<vmem>>, vector<1x288x4xf32>
    %213 = vector.shape_cast %212 : vector<1x288x4xf32> to vector<288x4xf32>
    %214 = vector.shape_cast %211 : vector<288x4xf32> to vector<1x288x4xf32>
    tpu.vector_store %arg4[%c0_219, %c0_220, %c0_221], %214 {strides = array<i32>} : memref<1x288x4xf32, #tpu.memory_space<vmem>>, vector<1x288x4xf32>,
    return
  }
  func.func @transform_0(%arg0: i32) -> (i32, i32, i32) {
    %c0_i32 = arith.constant 0 : i32
    %c0_i32_0 = arith.constant 0 : i32
    %c0_i32_1 = arith.constant 0 : i32
    return %arg0, %c0_i32, %c0_i32_0 : i32, i32, i32
  }
  func.func @transform_1(%arg0: i32) -> (i32, i32, i32, i32) {
    %c0_i32 = arith.constant 0 : i32
    %c0_i32_0 = arith.constant 0 : i32
    %c0_i32_1 = arith.constant 0 : i32
    %c0_i32_2 = arith.constant 0 : i32
    %c0_i32_3 = arith.constant 0 : i32
    return %c0_i32, %c0_i32_0, %c0_i32_1, %c0_i32_2 : i32, i32, i32, i32
  }
  func.func @transform_2(%arg0: i32) -> (i32, i32, i32) {
    %c0_i32 = arith.constant 0 : i32
    %c0_i32_0 = arith.constant 0 : i32
    %c0_i32_1 = arith.constant 0 : i32
    %c0_i32_2 = arith.constant 0 : i32
    return %c0_i32, %c0_i32_0, %c0_i32_1 : i32, i32, i32
  }
  func.func @transform_3(%arg0: i32) -> (i32, i32, i32) {
    %c0_i32 = arith.constant 0 : i32
    %c0_i32_0 = arith.constant 0 : i32
    %c0_i32_1 = arith.constant 0 : i32
    return %arg0, %c0_i32, %c0_i32_0 : i32, i32, i32
  }
}

</mosaic_0001>

<bundles_post_ra>
// kernel: tpu_custom_call.1
= control target key start
LH: loop header
LB: loop body
LE: loop exit
PB: predicated region body
PF: predicated region fallthrough
CT: control target
= control target key end

     0   :  { %s17696_s12 = smov 0   ;;  %s21511_s0 = inlined_call_operand.vmem [shape: f32[2,328,4], index: 0, kind: input, shape index: {}]   ;;  %s21512_s1 = inlined_call_operand.vmem [shape: f32[3,9,4,4], index: 1, kind: input, shape index: {}]   ;;  %s21513_s2 = inlined_call_operand.vmem [shape: f32[3,1,4], index: 2, kind: input, shape index: {}]   ;;  %s21514_s3 = inlined_call_operand.vmem [shape: f32[2,288,4], index: 3, kind: output, shape index: {}]  }
   0x1 LB: > { %s13167_s13 = sadd.s32 4294967295, %s17673_s12   ;;  %p13171_p0 = scmp.ge.s32.totalorder %s17673_s12, 1  ;;  %s17673_s12 = sphi %s17696_s12, %s13_s12  }
   0x2   : > { %p137_p1 = scmp.lt.s32.totalorder %s17673_s12, 3 }
   0x4   : > { %p138_p2 = pnand %p13171_p0, %p137_p1 }
   0x6   : > { %141 = sbr.rel (%p138_p2) target bundleno = 2197 (0x895), region = 32 }
   0xd   : > { %v13174_v0 = vld [vmem:[%s21512_s1 + $0x4] sm:$0xf]  ;;  %vm21516_vm0 = vcmask 1043456   ;;  %v17710_v1 = vld [vmem:[%s21512_s1 + $0x10] sm:$0xf]  ;;  %p161_p3 = scmp.lt.s32.totalorder %s13167_s13, 1 }
   0xe   : > { %15205 = vmatprep.subr.msk.mxu1 %vm21516_vm0, %v13174_v0  ;;  %15429 = vmatprep.subr.msk.mxu0 %vm21516_vm0, %v17710_v1  ;;  %v856_v2 = vld [vmem:[%s21512_s1] sm:$0xf]  ;;  %v13363_v3 = vld [vmem:[%s21512_s1 + $0x14] sm:$0xf]  ;;  %vm21515_vm1 = vcmask 31744  }
   0xf   : > { %15206 = vmatpush3.msk.msra.mxu1 %vm21516_vm0, %v13174_v0  ;;  %15430 = vmatpush3.msk.msra.mxu0 %vm21516_vm0, %v17710_v1  ;;  %s22740_s13 = smov (!%p161_p3, %s13167_s13), 1  ;;  %v17747_v10 = vld [vmem:[%s21512_s1 + $0x18] sm:$0xf]  ;;  %v17752_v11 = vld [vmem:[%s21512_s1 + $0x8] sm:$0xf] }
  0x10   : > { %15261 = vmatprep.subr.msk.mxu1 %vm21516_vm0, %v856_v2  ;;  %15485 = vmatprep.subr.msk.mxu0 %vm21516_vm0, %v13363_v3  ;;  %s17583_s22 = smul.u32 328, %s22740_s13  ;;  %v17835_v48 = vld [vmem:[%s21512_s1 + $0x1c] sm:$0xf] }
  0x11   : > { %s17584_s5 = smul.u32 288, %s22740_s13 }
  0x12   : > { %s17732_s25 = scalar_lea.vmem %s21511_s0, %s17583_s22 }
  0x13   : > { %v857_v4 = vld [vmem:[%s17732_s25 + $0x1] sm:$0xff]  ;;  %v2469_v5 = vld [vmem:[%s17732_s25 + $0x13] sm:$0xff]  ;;  %v858_v6 = vld [vmem:[%s17732_s25 + $0x9] sm:$0xff]  ;;  %s21368_s13 = scalar_lea.vmem %s21514_s3, %s17584_s5 }
  0x14   : > { %15207 = vmatprep.mubr.msk.f32.mxu1 %vm21515_vm1, %v857_v4  ;;  %15431 = vmatprep.mubr.msk.f32.mxu0 %vm21515_vm1, %v2469_v5  ;;  %v2470_v7 = vld [vmem:[%s17732_s25 + $0x1b] sm:$0xff]  ;;  %v859_v8 = vld [vmem:[%s17732_s25 + $0x11] sm:$0xff]  ;;  %v2471_v9 = vld [vmem:[%s17732_s25 + $0x23] sm:$0xff] }
  0x15   : > { %15208 = vmatmul.mubr.msk.f32.vlgmr.msra.gmra.mrb[0].mxu1 %vm21515_vm1, %v858_v6  ;;  %15432 = vmatmul.mubr.msk.f32.vlgmr.msra.gmra.mrb[0].mxu0 %vm21515_vm1, %v2470_v7  ;;  %v860_v12 = vld [vmem:[%s17732_s25 + $0x19] sm:$0xff]  ;;  %v2472_v13 = vld [vmem:[%s17732_s25 + $0x2b] sm:$0xff]  ;;  %v861_v14 = vld [vmem:[%s17732_s25 + $0x21] sm:$0xff] }
  0x16   : > { %15262 = vmatpush3.msk.msra.mxu1 %vm21516_vm0, %v856_v2  ;;  %15486 = vmatpush3.msk.msra.mxu0 %vm21516_vm0, %v13363_v3  ;;  %v2473_v15 = vld [vmem:[%s17732_s25 + $0x33] sm:$0xff]  ;;  %v862_v16 = vld [vmem:[%s17732_s25 + $0x29] sm:$0xff]  ;;  %v2474_v17 = vld [vmem:[%s17732_s25 + $0x3b] sm:$0xff] }
  0x17   : > { %15210 = vmatprep.mubr.msk.f32.mxu1 %vm21515_vm1, %v859_v8  ;;  %15434 = vmatprep.mubr.msk.f32.mxu0 %vm21515_vm1, %v2471_v9  ;;  %v863_v18 = vld [vmem:[%s17732_s25 + $0x31] sm:$0xff]  ;;  %v2475_v19 = vld [vmem:[%s17732_s25 + $0x43] sm:$0xff]  ;;  %v864_v20 = vld [vmem:[%s17732_s25 + $0x39] sm:$0xff] }
  0x18   : > { %15541 = vmatprep.subr.msk.mxu0 %vm21516_vm0, %v17747_v10  ;;  %15317 = vmatprep.subr.msk.mxu1 %vm21516_vm0, %v17752_v11  ;;  %v2476_v21 = vld [vmem:[%s17732_s25 + $0x4b] sm:$0xff]  ;;  %v865_v22 = vld [vmem:[%s17732_s25 + $0x41] sm:$0xff]  ;;  %v2477_v23 = vld [vmem:[%s17732_s25 + $0x53] sm:$0xff] }
  0x19   : > { %15211 = vmatmul.mubr.msk.f32.gmra.mrb[2].mxu1 %vm21515_vm1, %v860_v12  ;;  %15435 = vmatmul.mubr.msk.f32.gmra.mrb[2].mxu0 %vm21515_vm1, %v2472_v13  ;;  %v866_v24 = vld [vmem:[%s17732_s25 + $0x49] sm:$0xff]  ;;  %v2478_v25 = vld [vmem:[%s17732_s25 + $0x5b] sm:$0xff]  ;;  %v867_v26 = vld [vmem:[%s17732_s25 + $0x51] sm:$0xff] }
  0x1a   : > { %15213 = vmatprep.mubr.msk.f32.mxu1 %vm21515_vm1, %v861_v14  ;;  %15437 = vmatprep.mubr.msk.f32.mxu0 %vm21515_vm1, %v2473_v15  ;;  %v2479_v27 = vld [vmem:[%s17732_s25 + $0x63] sm:$0xff]  ;;  %v868_v28 = vld [vmem:[%s17732_s25 + $0x59] sm:$0xff]  ;;  %v2480_v29 = vld [vmem:[%s17732_s25 + $0x6b] sm:$0xff] }
  0x1b   : > { %v869_v30 = vld [vmem:[%s17732_s25 + $0x61] sm:$0xff]  ;;  %v2481_v31 = vld [vmem:[%s17732_s25 + $0x73] sm:$0xff]  ;;  %v870_v32 = vld [vmem:[%s17732_s25 + $0x69] sm:$0xff] }
  0x1c   : > { %v2482_v33 = vld [vmem:[%s17732_s25 + $0x7b] sm:$0xff]  ;;  %v871_v34 = vld [vmem:[%s17732_s25 + $0x71] sm:$0xff]  ;;  %v2483_v35 = vld [vmem:[%s17732_s25 + $0x83] sm:$0xff] }
  0x1d   : > { %15214 = vmatmul.mubr.msk.f32.gmra.mrb[4].mxu1 %vm21515_vm1, %v862_v16  ;;  %15438 = vmatmul.mubr.msk.f32.gmra.mrb[4].mxu0 %vm21515_vm1, %v2474_v17  ;;  %v872_v36 = vld [vmem:[%s17732_s25 + $0x79] sm:$0xff]  ;;  %v2484_v37 = vld [vmem:[%s17732_s25 + $0x8b] sm:$0xff]  ;;  %v873_v38 = vld [vmem:[%s17732_s25 + $0x81] sm:$0xff] }
  0x1e   : > { %15216 = vmatprep.mubr.msk.f32.mxu1 %vm21515_vm1, %v863_v18  ;;  %15440 = vmatprep.mubr.msk.f32.mxu0 %vm21515_vm1, %v2475_v19  ;;  %v2485_v39 = vld [vmem:[%s17732_s25 + $0x93] sm:$0xff]  ;;  %v874_v40 = vld [vmem:[%s17732_s25 + $0x89] sm:$0xff]  ;;  %v2486_v41 = vld [vmem:[%s17732_s25 + $0x9b] sm:$0xff] }
  0x1f   : > { %v875_v42 = vld [vmem:[%s17732_s25 + $0x91] sm:$0xff]  ;;  %v876_v44 = vld [vmem:[%s17732_s25 + $0x99] sm:$0xff]  ;;  %v877_v46 = vld [vmem:[%s17732_s25 + $0xa1] sm:$0xff] }
  0x20   : > { %v2899_v43 = vld [vmem:[%s17732_s25 + $0x14] sm:$0xff]  ;;  %v2900_v45 = vld [vmem:[%s17732_s25 + $0x1c] sm:$0xff]  ;;  %v17830_v47 = vld [vmem:[%s17732_s25 + $0x24] sm:$0xff] }
  0x21   : > { %15217 = vmatmul.mubr.msk.f32.gmra.mrb[6].mxu1 %vm21515_vm1, %v864_v20  ;;  %15441 = vmatmul.mubr.msk.f32.gmra.mrb[6].mxu0 %vm21515_vm1, %v2476_v21  ;;  %v878_v49 = vld [vmem:[%s17732_s25 + $0xa9] sm:$0xff]  ;;  %v879_v51 = vld [vmem:[%s17732_s25 + $0xb1] sm:$0xff]  ;;  %v880_v53 = vld [vmem:[%s17732_s25 + $0xb9] sm:$0xff] }
  0x22   : > { %15219 = vmatprep.mubr.msk.f32.mxu1 %vm21515_vm1, %v865_v22  ;;  %15443 = vmatprep.mubr.msk.f32.mxu0 %vm21515_vm1, %v2477_v23  ;;  %v17844_v50 = vld [vmem:[%s17732_s25 + $0x2c] sm:$0xff]  ;;  %v17850_v52 = vld [vmem:[%s17732_s25 + $0x34] sm:$0xff]  ;;  %v17862_v54 = vld [vmem:[%s17732_s25 + $0x3c] sm:$0xff] }
  0x23   : > { %v881_v55 = vld [vmem:[%s17732_s25 + $0xc1] sm:$0xff]  ;;  %v882_v57 = vld [vmem:[%s17732_s25 + $0xc9] sm:$0xff]  ;;  %v883_v59 = vld [vmem:[%s17732_s25 + $0xd1] sm:$0xff] }
  0x24   : > { %v17866_v56 = vld [vmem:[%s17732_s25 + $0x44] sm:$0xff]  ;;  %v17876_v58 = vld [vmem:[%s17732_s25 + $0x4c] sm:$0xff]  ;;  %v17880_v60 = vld [vmem:[%s17732_s25 + $0x54] sm:$0xff] }
  0x25   : > { %15220 = vmatmul.mubr.msk.f32.gmra.mrb[8].mxu1 %vm21515_vm1, %v866_v24  ;;  %15444 = vmatmul.mubr.msk.f32.gmra.mrb[8].mxu0 %vm21515_vm1, %v2478_v25  ;;  %v884_v61 = vld [vmem:[%s17732_s25 + $0xd9] sm:$0xff]  ;;  %v885_v63 = vld [vmem:[%s17732_s25 + $0xe1] sm:$0xff]  ;;  %v886_v2 = vld [vmem:[%s17732_s25 + $0xe9] sm:$0xff] }
  0x26   : > { %15222 = vmatprep.mubr.msk.f32.mxu1 %vm21515_vm1, %v867_v26  ;;  %15446 = vmatprep.mubr.msk.f32.mxu0 %vm21515_vm1, %v2479_v27  ;;  %v17890_v62 = vld [vmem:[%s17732_s25 + $0x5c] sm:$0xff]  ;;  %v17894_v0 = vld [vmem:[%s17732_s25 + $0x64] sm:$0xff]  ;;  %v17904_v3 = vld [vmem:[%s17732_s25 + $0x6c] sm:$0xff] }
  0x27   : > { %v887_v4 = vld [vmem:[%s17732_s25 + $0xf1] sm:$0xff]  ;;  %v888_v6 = vld [vmem:[%s17732_s25 + $0xf9] sm:$0xff]  ;;  %v889_v8 = vld [vmem:[%s17732_s25 + $0x101] sm:$0xff] }
  0x28   : > { %v17908_v5 = vld [vmem:[%s17732_s25 + $0x74] sm:$0xff]  ;;  %v17918_v7 = vld [vmem:[%s17732_s25 + $0x7c] sm:$0xff]  ;;  %v17922_v9 = vld [vmem:[%s17732_s25 + $0x84] sm:$0xff] }
  0x29   : > { %15223 = vmatmul.mubr.msk.f32.gmra.mrb[10].mxu1 %vm21515_vm1, %v868_v28  ;;  %15447 = vmatmul.mubr.msk.f32.gmra.mrb[10].mxu0 %vm21515_vm1, %v2480_v29  ;;  %v17932_v12 = vld [vmem:[%s17732_s25 + $0x8c] sm:$0xff]  ;;  %v17936_v14 = vld [vmem:[%s17732_s25 + $0x94] sm:$0xff]  ;;  %v17946_v16 = vld [vmem:[%s17732_s25 + $0x9c] sm:$0xff] }
  0x2a   : > { %15225 = vmatprep.mubr.msk.f32.mxu1 %vm21515_vm1, %v869_v30  ;;  %15449 = vmatprep.mubr.msk.f32.mxu0 %vm21515_vm1, %v2481_v31  ;;  %v891_v13 = vld [vmem:[%s17732_s25 + $0x111] sm:$0xff]  ;;  %v892_v15 = vld [vmem:[%s17732_s25 + $0x119] sm:$0xff]  ;;  %v17950_v18 = vld [vmem:[%s17732_s25 + $0xa4] sm:$0xff] }
  0x2b   : > { %v820_v17 = vld [vmem:[%s17732_s25] sm:$0xff]  ;;  %v821_v19 = vld [vmem:[%s17732_s25 + $0x8] sm:$0xff]  ;;  %v822_v21 = vld [vmem:[%s17732_s25 + $0x10] sm:$0xff] }
  0x2c   : > { %v17960_v20 = vld [vmem:[%s17732_s25 + $0xac] sm:$0xff]  ;;  %v17964_v22 = vld [vmem:[%s17732_s25 + $0xb4] sm:$0xff]  ;;  %v17979_v25 = vld [vmem:[%s17732_s25 + $0xbc] sm:$0xff] }
  0x2d   : > { %15226 = vmatmul.mubr.msk.f32.gmra.mrb[12].mxu1 %vm21515_vm1, %v870_v32  ;;  %15450 = vmatmul.mubr.msk.f32.gmra.mrb[12].mxu0 %vm21515_vm1, %v2482_v33  ;;  %v17969_v23 = vld [vmem:[%s21512_s1 + $0xc] sm:$0xf]  ;;  %v823_v24 = vld [vmem:[%s17732_s25 + $0x18] sm:$0xff]  ;;  %v824_v26 = vld [vmem:[%s17732_s25 + $0x20] sm:$0xff] }
  0x2e   : > { %15228 = vmatprep.mubr.msk.f32.mxu1 %vm21515_vm1, %v871_v34  ;;  %15452 = vmatprep.mubr.msk.f32.mxu0 %vm21515_vm1, %v2483_v35  ;;  %v17985_v27 = vld [vmem:[%s17732_s25 + $0xc4] sm:$0xff]  ;;  %v17997_v28 = vld [vmem:[%s17732_s25 + $0xcc] sm:$0xff]  ;;  %v18001_v30 = vld [vmem:[%s17732_s25 + $0xd4] sm:$0xff] }
  0x2f   : > { %v826_v29 = vld [vmem:[%s17732_s25 + $0x30] sm:$0xff]  ;;  %v827_v31 = vld [vmem:[%s17732_s25 + $0x38] sm:$0xff]  ;;  %v828_v33 = vld [vmem:[%s17732_s25 + $0x40] sm:$0xff] }
  0x30   : > { %v18011_v32 = vld [vmem:[%s17732_s25 + $0xdc] sm:$0xff]  ;;  %v18015_v34 = vld [vmem:[%s17732_s25 + $0xe4] sm:$0xff] }
  0x31   : > { %15229 = vmatmul.mubr.msk.f32.gmra.mrb[14].mxu1 %vm21515_vm1, %v872_v36  ;;  %15453 = vmatmul.mubr.msk.f32.gmra.mrb[14].mxu0 %vm21515_vm1, %v2484_v37  ;;  %v829_v35 = vld [vmem:[%s17732_s25 + $0x48] sm:$0xff]  ;;  %v830_v37 = vld [vmem:[%s17732_s25 + $0x50] sm:$0xff] }
  0x32   : > { %15231 = vmatprep.mubr.msk.f32.mxu1 %vm21515_vm1, %v873_v38  ;;  %15455 = vmatprep.mubr.msk.f32.mxu0 %vm21515_vm1, %v2485_v39  ;;  %v18025_v36 = vld [vmem:[%s17732_s25 + $0xec] sm:$0xff]  ;;  %v18029_v38 = vld [vmem:[%s17732_s25 + $0xf4] sm:$0xff] }
  0x33   : > { %v831_v39 = vld [vmem:[%s17732_s25 + $0x58] sm:$0xff] }
  0x35   : > { %15232 = vmatmul.mubr.msk.f32.gmra.mrb[16].mxu1 %vm21515_vm1, %v874_v40  ;;  %15456 = vmatmul.mubr.msk.f32.gmra.mrb[16].mxu0 %vm21515_vm1, %v2486_v41  ;;  %v18039_v40 = vld [vmem:[%s17732_s25 + $0xfc] sm:$0xff] }
  0x36   : > { %15234 = vmatprep.mubr.msk.f32.mxu1 %vm21515_vm1, %v875_v42  ;;  %15487 = vmatprep.mubr.msk.f32.mxu0 %vm21515_vm1, %v2899_v43  ;;  %v832_v41 = vld [vmem:[%s17732_s25 + $0x60] sm:$0xff]  ;;  %v833_v43 = vld [vmem:[%s17732_s25 + $0x68] sm:$0xff] }
  0x37   : > { %v18043_v42 = vld [vmem:[%s17732_s25 + $0x104] sm:$0xff] }
  0x39   : > { %15235 = vmatmul.mubr.msk.f32.gmra.mrb[18].mxu1 %vm21515_vm1, %v876_v44  ;;  %15488 = vmatmul.mubr.msk.f32.vlgmr.msra.gmra.mrb[0].mxu0 %vm21515_vm1, %v2900_v45  ;;  %v18053_v44 = vld [vmem:[%s17732_s25 + $0x10c] sm:$0xff] }
  0x3a   : > { %15542 = vmatpush3.msk.msra.mxu0 %vm21516_vm0, %v17747_v10  ;;  %15237 = vmatprep.mubr.msk.f32.mxu1 %vm21515_vm1, %v877_v46  ;;  %v890_v10 = vld [vmem:[%s17732_s25 + $0x109] sm:$0xff]  ;;  %v18057_v46 = vld [vmem:[%s17732_s25 + $0x114] sm:$0xff] }
  0x3b   : > { %15490 = vmatprep.mubr.msk.f32.mxu0 %vm21515_vm1, %v17830_v47  ;;  %15597 = vmatprep.subr.msk.mxu0 %vm21516_vm0, %v17835_v48  ;;  %v834_v45 = vld [vmem:[%s17732_s25 + $0x70] sm:$0xff] }
  0x3d   : > { %15238 = vmatmul.mubr.msk.f32.gmra.mrb[20].mxu1 %vm21515_vm1, %v878_v49  ;;  %15491 = vmatmul.mubr.msk.f32.gmra.mrb[2].mxu0 %vm21515_vm1, %v17844_v50  ;;  %v835_v49 = vld [vmem:[%s17732_s25 + $0x78] sm:$0xff] }
  0x3e   : > { %15240 = vmatprep.mubr.msk.f32.mxu1 %vm21515_vm1, %v879_v51  ;;  %15493 = vmatprep.mubr.msk.f32.mxu0 %vm21515_vm1, %v17850_v52  ;;  %v18067_v51 = vld [vmem:[%s17732_s25 + $0x11c] sm:$0xff] }
  0x41   : > { %15241 = vmatmul.mubr.msk.f32.gmra.mrb[22].mxu1 %vm21515_vm1, %v880_v53  ;;  %15494 = vmatmul.mubr.msk.f32.gmra.mrb[4].mxu0 %vm21515_vm1, %v17862_v54  ;;  %v836_v53 = vld [vmem:[%s17732_s25 + $0x80] sm:$0xff] }
  0x42   : > { %15243 = vmatprep.mubr.msk.f32.mxu1 %vm21515_vm1, %v881_v55  ;;  %15496 = vmatprep.mubr.msk.f32.mxu0 %vm21515_vm1, %v17866_v56  ;;  %v18071_v55 = vld [vmem:[%s17732_s25 + $0x124] sm:$0xff] }
  0x45   : > { %15244 = vmatmul.mubr.msk.f32.gmra.mrb[24].mxu1 %vm21515_vm1, %v882_v57  ;;  %15497 = vmatmul.mubr.msk.f32.gmra.mrb[6].mxu0 %vm21515_vm1, %v17876_v58  ;;  %v837_v57 = vld [vmem:[%s17732_s25 + $0x88] sm:$0xff] }
  0x46   : > { %15246 = vmatprep.mubr.msk.f32.mxu1 %vm21515_vm1, %v883_v59  ;;  %15499 = vmatprep.mubr.msk.f32.mxu0 %vm21515_vm1, %v17880_v60  ;;  %v18081_v59 = vld [vmem:[%s17732_s25 + $0x12c] sm:$0xff] }
  0x49   : > { %15247 = vmatmul.mubr.msk.f32.gmra.mrb[26].mxu1 %vm21515_vm1, %v884_v61  ;;  %15500 = vmatmul.mubr.msk.f32.gmra.mrb[8].mxu0 %vm21515_vm1, %v17890_v62  ;;  %v838_v61 = vld [vmem:[%s17732_s25 + $0x90] sm:$0xff] }
  0x4a   : > { %15249 = vmatprep.mubr.msk.f32.mxu1 %vm21515_vm1, %v885_v63  ;;  %15502 = vmatprep.mubr.msk.f32.mxu0 %vm21515_vm1, %v17894_v0  ;;  %v839_v63 = vld [vmem:[%s17732_s25 + $0x98] sm:$0xff] }
  0x4d   : > { %15250 = vmatmul.mubr.msk.f32.gmra.mrb[28].mxu1 %vm21515_vm1, %v886_v2  ;;  %15503 = vmatmul.mubr.msk.f32.gmra.mrb[10].mxu0 %vm21515_vm1, %v17904_v3  ;;  %v840_v2 = vld [vmem:[%s17732_s25 + $0xa0] sm:$0xff] }
  0x4e   : > { %15252 = vmatprep.mubr.msk.f32.mxu1 %vm21515_vm1, %v887_v4  ;;  %15505 = vmatprep.mubr.msk.f32.mxu0 %vm21515_vm1, %v17908_v5  ;;  %v18095_v4 = vld [vmem:[%s21512_s1 + $0x20] sm:$0xf] }
  0x51   : > { %15253 = vmatmul.mubr.msk.f32.gmra.mrb[30].mxu1 %vm21515_vm1, %v888_v6  ;;  %15506 = vmatmul.mubr.msk.f32.gmra.mrb[12].mxu0 %vm21515_vm1, %v17918_v7  ;;  %v842_v6 = vld [vmem:[%s17732_s25 + $0xb0] sm:$0xff] }
  0x52   : > { %15255 = vmatprep.mubr.msk.f32.mxu1 %vm21515_vm1, %v889_v8  ;;  %15508 = vmatprep.mubr.msk.f32.mxu0 %vm21515_vm1, %v17922_v9  ;;  %v855_v8 = vld [vmem:[%s17732_s25 + $0x118] sm:$0xff] }
  0x55   : > { %15256 = vmatmul.mubr.msk.f32.gmra.mrb[32].mxu1 %vm21515_vm1, %v890_v10  ;;  %15509 = vmatmul.mubr.msk.f32.gmra.mrb[14].mxu0 %vm21515_vm1, %v17932_v12  ;;  %v1610_v10 = vld [vmem:[%s17732_s25 + $0xa] sm:$0xff] }
  0x56   : > { %15258 = vmatprep.mubr.msk.f32.mxu1 %vm21515_vm1, %v891_v13  ;;  %15511 = vmatprep.mubr.msk.f32.mxu0 %vm21515_vm1, %v17936_v14  ;;  %v18183_v13 = vld [vmem:[%s17732_s25 + $0x1a] sm:$0xff] }
  0x59   : > { %15259 = vmatmul.mubr.msk.f32.gmra.mrb[34].mxu1 %vm21515_vm1, %v892_v15  ;;  %15512 = vmatmul.mubr.msk.f32.gmra.mrb[16].mxu0 %vm21515_vm1, %v17946_v16  ;;  %v18201_v15 = vld [vmem:[%s17732_s25 + $0x2a] sm:$0xff] }
  0x5a   : > { %15263 = vmatprep.mubr.msk.f32.mxu1 %vm21515_vm1, %v820_v17  ;;  %15514 = vmatprep.mubr.msk.f32.mxu0 %vm21515_vm1, %v17950_v18  ;;  %v18215_v17 = vld [vmem:[%s17732_s25 + $0x3a] sm:$0xff] }
  0x5d   : > { %15264 = vmatmul.mubr.msk.f32.vlgmr.msra.gmra.mrb[0].mxu1 %vm21515_vm1, %v821_v19  ;;  %15515 = vmatmul.mubr.msk.f32.gmra.mrb[18].mxu0 %vm21515_vm1, %v17960_v20  ;;  %v18229_v19 = vld [vmem:[%s17732_s25 + $0x4a] sm:$0xff] }
  0x5e   : > { %15318 = vmatpush3.msk.msra.mxu1 %vm21516_vm0, %v17752_v11  ;;  %15266 = vmatprep.mubr.msk.f32.mxu1 %vm21515_vm1, %v822_v21  ;;  %v825_v11 = vld [vmem:[%s17732_s25 + $0x28] sm:$0xff]  ;;  %v18243_v21 = vld [vmem:[%s17732_s25 + $0x5a] sm:$0xff] }
  0x5f   : > { %15517 = vmatprep.mubr.msk.f32.mxu0 %vm21515_vm1, %v17964_v22  ;;  %15373 = vmatprep.subr.msk.mxu1 %vm21516_vm0, %v17969_v23 }
  0x61   : > { %15267 = vmatmul.mubr.msk.f32.gmra.mrb[2].mxu1 %vm21515_vm1, %v823_v24  ;;  %15518 = vmatmul.mubr.msk.f32.gmra.mrb[20].mxu0 %vm21515_vm1, %v17979_v25  ;;  %v18260_v24 = vld [vmem:[%s17732_s25 + $0x72] sm:$0xff] }
  0x62   : > { %15269 = vmatprep.mubr.msk.f32.mxu1 %vm21515_vm1, %v824_v26  ;;  %15520 = vmatprep.mubr.msk.f32.mxu0 %vm21515_vm1, %v17985_v27  ;;  %v18274_v26 = vld [vmem:[%s17732_s25 + $0x82] sm:$0xff] }
  0x65   : > { %15270 = vmatmul.mubr.msk.f32.gmra.mrb[4].mxu1 %vm21515_vm1, %v825_v11  ;;  %15521 = vmatmul.mubr.msk.f32.gmra.mrb[22].mxu0 %vm21515_vm1, %v17997_v28  ;;  %v18285_v11 = vld [vmem:[%s17732_s25 + $0x8a] sm:$0xff] }
  0x66   : > { %15272 = vmatprep.mubr.msk.f32.mxu1 %vm21515_vm1, %v826_v29  ;;  %15523 = vmatprep.mubr.msk.f32.mxu0 %vm21515_vm1, %v18001_v30  ;;  %v18289_v29 = vld [vmem:[%s17732_s25 + $0x92] sm:$0xff] }
  0x69   : > { %15273 = vmatmul.mubr.msk.f32.gmra.mrb[6].mxu1 %vm21515_vm1, %v827_v31  ;;  %15524 = vmatmul.mubr.msk.f32.gmra.mrb[24].mxu0 %vm21515_vm1, %v18011_v32  ;;  %v18299_v31 = vld [vmem:[%s17732_s25 + $0x9a] sm:$0xff] }
  0x6a   : > { %15275 = vmatprep.mubr.msk.f32.mxu1 %vm21515_vm1, %v828_v33  ;;  %15526 = vmatprep.mubr.msk.f32.mxu0 %vm21515_vm1, %v18015_v34  ;;  %v18303_v33 = vld [vmem:[%s17732_s25 + $0xa2] sm:$0xff] }
  0x6d   : > { %15276 = vmatmul.mubr.msk.f32.gmra.mrb[8].mxu1 %vm21515_vm1, %v829_v35  ;;  %15527 = vmatmul.mubr.msk.f32.gmra.mrb[26].mxu0 %vm21515_vm1, %v18025_v36  ;;  %v18314_v35 = vld [vmem:[%s17732_s25 + $0xaa] sm:$0xff] }
  0x6e   : > { %15278 = vmatprep.mubr.msk.f32.mxu1 %vm21515_vm1, %v830_v37  ;;  %15529 = vmatprep.mubr.msk.f32.mxu0 %vm21515_vm1, %v18029_v38  ;;  %v18319_v37 = vld [vmem:[%s17732_s25 + $0xb2] sm:$0xff] }
  0x71   : > { %15279 = vmatmul.mubr.msk.f32.gmra.mrb[10].mxu1 %vm21515_vm1, %v831_v39  ;;  %15530 = vmatmul.mubr.msk.f32.gmra.mrb[28].mxu0 %vm21515_vm1, %v18039_v40  ;;  %v18329_v39 = vld [vmem:[%s17732_s25 + $0xba] sm:$0xff] }
  0x72   : > { %15281 = vmatprep.mubr.msk.f32.mxu1 %vm21515_vm1, %v832_v41  ;;  %15532 = vmatprep.mubr.msk.f32.mxu0 %vm21515_vm1, %v18043_v42  ;;  %v18333_v41 = vld [vmem:[%s17732_s25 + $0xc2] sm:$0xff] }
  0x75   : > { %15282 = vmatmul.mubr.msk.f32.gmra.mrb[12].mxu1 %vm21515_vm1, %v833_v43  ;;  %15533 = vmatmul.mubr.msk.f32.gmra.mrb[30].mxu0 %vm21515_vm1, %v18053_v44  ;;  %v18343_v43 = vld [vmem:[%s17732_s25 + $0xca] sm:$0xff] }
  0x76   : > { %15284 = vmatprep.mubr.msk.f32.mxu1 %vm21515_vm1, %v834_v45  ;;  %15535 = vmatprep.mubr.msk.f32.mxu0 %vm21515_vm1, %v18057_v46  ;;  %v18347_v45 = vld [vmem:[%s17732_s25 + $0xd2] sm:$0xff] }
  0x79   : > { %15285 = vmatmul.mubr.msk.f32.gmra.mrb[14].mxu1 %vm21515_vm1, %v835_v49  ;;  %15536 = vmatmul.mubr.msk.f32.gmra.mrb[32].mxu0 %vm21515_vm1, %v18067_v51  ;;  %v18357_v49 = vld [vmem:[%s17732_s25 + $0xda] sm:$0xff] }
  0x7a   : > { %15287 = vmatprep.mubr.msk.f32.mxu1 %vm21515_vm1, %v836_v53  ;;  %15538 = vmatprep.mubr.msk.f32.mxu0 %vm21515_vm1, %v18071_v55  ;;  %v18361_v53 = vld [vmem:[%s17732_s25 + $0xe2] sm:$0xff] }
  0x7d   : > { %15288 = vmatmul.mubr.msk.f32.gmra.mrb[16].mxu1 %vm21515_vm1, %v837_v57  ;;  %15539 = vmatmul.mubr.msk.f32.gmra.mrb[34].mxu0 %vm21515_vm1, %v18081_v59  ;;  %v18371_v57 = vld [vmem:[%s17732_s25 + $0xea] sm:$0xff] }
  0x7e   : > { %15290 = vmatprep.mubr.msk.f32.mxu1 %vm21515_vm1, %v838_v61  ;;  %15543 = vmatprep.mubr.msk.f32.mxu0 %vm21515_vm1, %v17830_v47  ;;  %v841_v47 = vld [vmem:[%s17732_s25 + $0xa8] sm:$0xff]  ;;  %v18375_v61 = vld [vmem:[%s17732_s25 + $0xf2] sm:$0xff] }
  0x81   : > { %15291 = vmatmul.mubr.msk.f32.gmra.mrb[18].mxu1 %vm21515_vm1, %v839_v63  ;;  %15544 = vmatmul.mubr.msk.f32.vlgmr.msra.gmra.mrb[0].mxu0 %vm21515_vm1, %v17844_v50  ;;  %v844_v50 = vld [vmem:[%s17732_s25 + $0xc0] sm:$0xff] }
  0x82   : > { %15598 = vmatpush3.msk.msra.mxu0 %vm21516_vm0, %v17835_v48  ;;  %15293 = vmatprep.mubr.msk.f32.mxu1 %vm21515_vm1, %v840_v2  ;;  %v843_v48 = vld [vmem:[%s17732_s25 + $0xb8] sm:$0xff]  ;;  %v3771_v63 = vld [vmem:[%s17732_s25 + $0x85] sm:$0xff] }
  0x83   : > { %15546 = vmatprep.mubr.msk.f32.mxu0 %vm21515_vm1, %v17850_v52  ;;  %15653 = vmatprep.subr.msk.mxu0 %vm21516_vm0, %v18095_v4  ;;  %v845_v52 = vld [vmem:[%s17732_s25 + $0xc8] sm:$0xff]  ;;  %v18385_v2 = vld [vmem:[%s17732_s25 + $0xfa] sm:$0xff] }
  0x85   : > { %15294 = vmatmul.mubr.msk.f32.gmra.mrb[20].mxu1 %vm21515_vm1, %v841_v47  ;;  %15547 = vmatmul.mubr.msk.f32.gmra.mrb[2].mxu0 %vm21515_vm1, %v17862_v54  ;;  %v846_v54 = vld [vmem:[%s17732_s25 + $0xd0] sm:$0xff]  ;;  %v18389_v47 = vld [vmem:[%s17732_s25 + $0x102] sm:$0xff] }
  0x86   : > { %15296 = vmatprep.mubr.msk.f32.mxu1 %vm21515_vm1, %v842_v6  ;;  %15549 = vmatprep.mubr.msk.f32.mxu0 %vm21515_vm1, %v17866_v56  ;;  %v847_v56 = vld [vmem:[%s17732_s25 + $0xd8] sm:$0xff] }
  0x87   : > { %v3773_v6 = vld [vmem:[%s17732_s25 + $0x95] sm:$0xff] }
  0x89   : > { %15297 = vmatmul.mubr.msk.f32.gmra.mrb[22].mxu1 %vm21515_vm1, %v843_v48  ;;  %15550 = vmatmul.mubr.msk.f32.gmra.mrb[4].mxu0 %vm21515_vm1, %v17876_v58  ;;  %v848_v58 = vld [vmem:[%s17732_s25 + $0xe0] sm:$0xff]  ;;  %v18399_v48 = vld [vmem:[%s17732_s25 + $0x10a] sm:$0xff] }
  0x8a   : > { %15299 = vmatprep.mubr.msk.f32.mxu1 %vm21515_vm1, %v844_v50  ;;  %15552 = vmatprep.mubr.msk.f32.mxu0 %vm21515_vm1, %v17880_v60  ;;  %v849_v60 = vld [vmem:[%s17732_s25 + $0xe8] sm:$0xff]  ;;  %v3774_v50 = vld [vmem:[%s17732_s25 + $0x9d] sm:$0xff] }
  0x8d   : > { %15300 = vmatmul.mubr.msk.f32.gmra.mrb[24].mxu1 %vm21515_vm1, %v845_v52  ;;  %15553 = vmatmul.mubr.msk.f32.gmra.mrb[6].mxu0 %vm21515_vm1, %v17890_v62  ;;  %v850_v62 = vld [vmem:[%s17732_s25 + $0xf0] sm:$0xff] }
  0x8e   : > { %15302 = vmatprep.mubr.msk.f32.mxu1 %vm21515_vm1, %v846_v54  ;;  %15555 = vmatprep.mubr.msk.f32.mxu0 %vm21515_vm1, %v17894_v0  ;;  %v851_v0 = vld [vmem:[%s17732_s25 + $0xf8] sm:$0xff]  ;;  %v3775_v54 = vld [vmem:[%s17732_s25 + $0xa5] sm:$0xff] }
  0x8f   : > { %v18403_v52 = vld [vmem:[%s17732_s25 + $0x112] sm:$0xff] }
  0x91   : > { %15303 = vmatmul.mubr.msk.f32.gmra.mrb[26].mxu1 %vm21515_vm1, %v847_v56  ;;  %15556 = vmatmul.mubr.msk.f32.gmra.mrb[8].mxu0 %vm21515_vm1, %v17904_v3  ;;  %v852_v3 = vld [vmem:[%s17732_s25 + $0x100] sm:$0xff] }
  0x92   : > { %15305 = vmatprep.mubr.msk.f32.mxu1 %vm21515_vm1, %v848_v58  ;;  %15558 = vmatprep.mubr.msk.f32.mxu0 %vm21515_vm1, %v17908_v5  ;;  %v853_v5 = vld [vmem:[%s17732_s25 + $0x108] sm:$0xff]  ;;  %v18413_v56 = vld [vmem:[%s17732_s25 + $0x11a] sm:$0xff] }
  0x93   : > { %v3776_v58 = vld [vmem:[%s17732_s25 + $0xad] sm:$0xff] }
  0x95   : > { %15306 = vmatmul.mubr.msk.f32.gmra.mrb[28].mxu1 %vm21515_vm1, %v849_v60  ;;  %15559 = vmatmul.mubr.msk.f32.gmra.mrb[10].mxu0 %vm21515_vm1, %v17918_v7  ;;  %v854_v7 = vld [vmem:[%s17732_s25 + $0x110] sm:$0xff] }
  0x96   : > { %15308 = vmatprep.mubr.msk.f32.mxu1 %vm21515_vm1, %v850_v62  ;;  %15561 = vmatprep.mubr.msk.f32.mxu0 %vm21515_vm1, %v17922_v9  ;;  %v1609_v9 = vld [vmem:[%s17732_s25 + $0x2] sm:$0xff]  ;;  %v3777_v60 = vld [vmem:[%s17732_s25 + $0xb5] sm:$0xff] }
  0x97   : > { %v3778_v62 = vld [vmem:[%s17732_s25 + $0xbd] sm:$0xff] }
  0x99   : > { %15309 = vmatmul.mubr.msk.f32.gmra.mrb[30].mxu1 %vm21515_vm1, %v851_v0  ;;  %15562 = vmatmul.mubr.msk.f32.gmra.mrb[12].mxu0 %vm21515_vm1, %v17932_v12  ;;  %v18173_v12 = vld [vmem:[%s17732_s25 + $0x12] sm:$0xff]  ;;  %v3779_v0 = vld [vmem:[%s17732_s25 + $0xc5] sm:$0xff] }
  0x9a   : > { %15311 = vmatprep.mubr.msk.f32.mxu1 %vm21515_vm1, %v852_v3  ;;  %15564 = vmatprep.mubr.msk.f32.mxu0 %vm21515_vm1, %v17936_v14  ;;  %v18188_v14 = vld [vmem:[%s17732_s25 + $0x22] sm:$0xff]  ;;  %v3780_v3 = vld [vmem:[%s17732_s25 + $0xcd] sm:$0xff] }
  0x9d   : > { %15312 = vmatmul.mubr.msk.f32.gmra.mrb[32].mxu1 %vm21515_vm1, %v853_v5  ;;  %15565 = vmatmul.mubr.msk.f32.gmra.mrb[14].mxu0 %vm21515_vm1, %v17946_v16  ;;  %v18204_v16 = vld [vmem:[%s17732_s25 + $0x32] sm:$0xff] }
  0x9e   : > { %15314 = vmatprep.mubr.msk.f32.mxu1 %vm21515_vm1, %v854_v7  ;;  %15567 = vmatprep.mubr.msk.f32.mxu0 %vm21515_vm1, %v17950_v18  ;;  %v18218_v18 = vld [vmem:[%s17732_s25 + $0x42] sm:$0xff]  ;;  %v3781_v5 = vld [vmem:[%s17732_s25 + $0xd5] sm:$0xff] }
  0x9f   : > { %v3783_v7 = vld [vmem:[%s17732_s25 + $0xe5] sm:$0xff] }
  0xa1   : > { %15315 = vmatmul.mubr.msk.f32.gmra.mrb[34].mxu1 %vm21515_vm1, %v855_v8  ;;  %15568 = vmatmul.mubr.msk.f32.gmra.mrb[16].mxu0 %vm21515_vm1, %v17960_v20  ;;  %v18232_v20 = vld [vmem:[%s17732_s25 + $0x52] sm:$0xff] }
  0xa2   : > { %15319 = vmatprep.mubr.msk.f32.mxu1 %vm21515_vm1, %v1609_v9  ;;  %15570 = vmatprep.mubr.msk.f32.mxu0 %vm21515_vm1, %v17964_v22  ;;  %v18246_v22 = vld [vmem:[%s17732_s25 + $0x62] sm:$0xff]  ;;  %v3784_v8 = vld [vmem:[%s17732_s25 + $0xed] sm:$0xff]  ;;  %v3785_v9 = vld [vmem:[%s17732_s25 + $0xf5] sm:$0xff] }
  0xa5   : > { %15320 = vmatmul.mubr.msk.f32.vlgmr.msra.gmra.mrb[0].mxu1 %vm21515_vm1, %v1610_v10  ;;  %15571 = vmatmul.mubr.msk.f32.gmra.mrb[18].mxu0 %vm21515_vm1, %v17979_v25  ;;  %v18271_v25 = vld [vmem:[%s17732_s25 + $0x7a] sm:$0xff] }
  0xa6   : > { %15374 = vmatpush3.msk.msra.mxu1 %vm21516_vm0, %v17969_v23  ;;  %15322 = vmatprep.mubr.msk.f32.mxu1 %vm21515_vm1, %v18173_v12  ;;  %v18257_v23 = vld [vmem:[%s17732_s25 + $0x6a] sm:$0xff]  ;;  %v3786_v10 = vld [vmem:[%s17732_s25 + $0xfd] sm:$0xff] }
  0xa7   : > { %15573 = vmatprep.mubr.msk.f32.mxu0 %vm21515_vm1, %v17985_v27  ;;  %16717 = vmatprep.subr.msk.mxu1 %vm21516_vm0, %v17710_v1  ;;  %v3363_v27 = vld [vmem:[%s17732_s25 + $0x134] sm:$0xff] }
  0xa9   : > { %15323 = vmatmul.mubr.msk.f32.gmra.mrb[2].mxu1 %vm21515_vm1, %v18183_v13  ;;  %15574 = vmatmul.mubr.msk.f32.gmra.mrb[20].mxu0 %vm21515_vm1, %v17997_v28  ;;  %v3364_v28 = vld [vmem:[%s17732_s25 + $0x13c] sm:$0xff] }
  0xaa   : > { %15325 = vmatprep.mubr.msk.f32.mxu1 %vm21515_vm1, %v18188_v14  ;;  %15576 = vmatprep.mubr.msk.f32.mxu0 %vm21515_vm1, %v18001_v30  ;;  %v3759_v30 = vld [vmem:[%s17732_s25 + $0x25] sm:$0xff] }
  0xad   : > { %15326 = vmatmul.mubr.msk.f32.gmra.mrb[4].mxu1 %vm21515_vm1, %v18201_v15  ;;  %15577 = vmatmul.mubr.msk.f32.gmra.mrb[22].mxu0 %vm21515_vm1, %v18011_v32  ;;  %v3760_v32 = vld [vmem:[%s17732_s25 + $0x2d] sm:$0xff] }
  0xae   : > { %15328 = vmatprep.mubr.msk.f32.mxu1 %vm21515_vm1, %v18204_v16  ;;  %15579 = vmatprep.mubr.msk.f32.mxu0 %vm21515_vm1, %v18015_v34  ;;  %v3761_v34 = vld [vmem:[%s17732_s25 + $0x35] sm:$0xff] }
  0xb1   : > { %15329 = vmatmul.mubr.msk.f32.gmra.mrb[6].mxu1 %vm21515_vm1, %v18215_v17  ;;  %15580 = vmatmul.mubr.msk.f32.gmra.mrb[24].mxu0 %vm21515_vm1, %v18025_v36  ;;  %v3762_v36 = vld [vmem:[%s17732_s25 + $0x3d] sm:$0xff] }
  0xb2   : > { %15331 = vmatprep.mubr.msk.f32.mxu1 %vm21515_vm1, %v18218_v18  ;;  %15582 = vmatprep.mubr.msk.f32.mxu0 %vm21515_vm1, %v18029_v38  ;;  %v3763_v38 = vld [vmem:[%s17732_s25 + $0x45] sm:$0xff] }
  0xb5   : > { %15332 = vmatmul.mubr.msk.f32.gmra.mrb[8].mxu1 %vm21515_vm1, %v18229_v19  ;;  %15583 = vmatmul.mubr.msk.f32.gmra.mrb[26].mxu0 %vm21515_vm1, %v18039_v40  ;;  %v3764_v40 = vld [vmem:[%s17732_s25 + $0x4d] sm:$0xff] }
  0xb6   : > { %15334 = vmatprep.mubr.msk.f32.mxu1 %vm21515_vm1, %v18232_v20  ;;  %15585 = vmatprep.mubr.msk.f32.mxu0 %vm21515_vm1, %v18043_v42  ;;  %v3765_v42 = vld [vmem:[%s17732_s25 + $0x55] sm:$0xff] }
  0xb9   : > { %15335 = vmatmul.mubr.msk.f32.gmra.mrb[10].mxu1 %vm21515_vm1, %v18243_v21  ;;  %15586 = vmatmul.mubr.msk.f32.gmra.mrb[28].mxu0 %vm21515_vm1, %v18053_v44  ;;  %v3766_v44 = vld [vmem:[%s17732_s25 + $0x5d] sm:$0xff] }
  0xba   : > { %15337 = vmatprep.mubr.msk.f32.mxu1 %vm21515_vm1, %v18246_v22  ;;  %15588 = vmatprep.mubr.msk.f32.mxu0 %vm21515_vm1, %v18057_v46  ;;  %v3767_v46 = vld [vmem:[%s17732_s25 + $0x65] sm:$0xff] }
  0xbd   : > { %15338 = vmatmul.mubr.msk.f32.gmra.mrb[12].mxu1 %vm21515_vm1, %v18257_v23  ;;  %15589 = vmatmul.mubr.msk.f32.gmra.mrb[30].mxu0 %vm21515_vm1, %v18067_v51  ;;  %v3768_v51 = vld [vmem:[%s17732_s25 + $0x6d] sm:$0xff] }
  0xbe   : > { %15340 = vmatprep.mubr.msk.f32.mxu1 %vm21515_vm1, %v18260_v24  ;;  %15591 = vmatprep.mubr.msk.f32.mxu0 %vm21515_vm1, %v18071_v55  ;;  %v3769_v55 = vld [vmem:[%s17732_s25 + $0x75] sm:$0xff] }
  0xc1   : > { %15341 = vmatmul.mubr.msk.f32.gmra.mrb[14].mxu1 %vm21515_vm1, %v18271_v25  ;;  %15592 = vmatmul.mubr.msk.f32.gmra.mrb[32].mxu0 %vm21515_vm1, %v18081_v59  ;;  %v3770_v59 = vld [vmem:[%s17732_s25 + $0x7d] sm:$0xff] }
  0xc2   : > { %15343 = vmatprep.mubr.msk.f32.mxu1 %vm21515_vm1, %v18274_v26  ;;  %15594 = vmatprep.mubr.msk.f32.mxu0 %vm21515_vm1, %v3363_v27  ;;  %v4196_v27 = vld [vmem:[%s17732_s25 + $0x5e] sm:$0xff] }
  0xc5   : > { %15344 = vmatmul.mubr.msk.f32.gmra.mrb[16].mxu1 %vm21515_vm1, %v18285_v11  ;;  %15595 = vmatmul.mubr.msk.f32.gmra.mrb[34].mxu0 %vm21515_vm1, %v3364_v28  ;;  %v4198_v28 = vld [vmem:[%s17732_s25 + $0x6e] sm:$0xff] }
  0xc6   : > { %15346 = vmatprep.mubr.msk.f32.mxu1 %vm21515_vm1, %v18289_v29  ;;  %15599 = vmatprep.mubr.msk.f32.mxu0 %vm21515_vm1, %v3759_v30  ;;  %v4200_v30 = vld [vmem:[%s17732_s25 + $0x7e] sm:$0xff] }
  0xc9   : > { %15347 = vmatmul.mubr.msk.f32.gmra.mrb[18].mxu1 %vm21515_vm1, %v18299_v31  ;;  %15600 = vmatmul.mubr.msk.f32.vlgmr.msra.gmra.mrb[0].mxu0 %vm21515_vm1, %v3760_v32  ;;  %v4202_v32 = vld [vmem:[%s17732_s25 + $0x8e] sm:$0xff] }
  0xca   : > { %15654 = vmatpush3.msk.msra.mxu0 %vm21516_vm0, %v18095_v4  ;;  %15349 = vmatprep.mubr.msk.f32.mxu1 %vm21515_vm1, %v18303_v33  ;;  %v3772_v4 = vld [vmem:[%s17732_s25 + $0x8d] sm:$0xff] }
  0xcb   : > { %15602 = vmatprep.mubr.msk.f32.mxu0 %vm21515_vm1, %v3761_v34  ;;  %v4204_v34 = vld [vmem:[%s17732_s25 + $0x9e] sm:$0xff] }
  0xcd   : > { %15350 = vmatmul.mubr.msk.f32.gmra.mrb[20].mxu1 %vm21515_vm1, %v18314_v35  ;;  %15603 = vmatmul.mubr.msk.f32.gmra.mrb[2].mxu0 %vm21515_vm1, %v3762_v36  ;;  %v4205_v36 = vld [vmem:[%s17732_s25 + $0xa6] sm:$0xff] }
  0xce   : > { %15352 = vmatprep.mubr.msk.f32.mxu1 %vm21515_vm1, %v18319_v37  ;;  %15605 = vmatprep.mubr.msk.f32.mxu0 %vm21515_vm1, %v3763_v38  ;;  %v4206_v38 = vld [vmem:[%s17732_s25 + $0xae] sm:$0xff] }
  0xd1   : > { %15353 = vmatmul.mubr.msk.f32.gmra.mrb[22].mxu1 %vm21515_vm1, %v18329_v39  ;;  %15606 = vmatmul.mubr.msk.f32.gmra.mrb[4].mxu0 %vm21515_vm1, %v3764_v40  ;;  %v4207_v40 = vld [vmem:[%s17732_s25 + $0xb6] sm:$0xff] }
  0xd2   : > { %15355 = vmatprep.mubr.msk.f32.mxu1 %vm21515_vm1, %v18333_v41  ;;  %15608 = vmatprep.mubr.msk.f32.mxu0 %vm21515_vm1, %v3765_v42  ;;  %v4208_v42 = vld [vmem:[%s17732_s25 + $0xbe] sm:$0xff] }
  0xd5   : > { %15356 = vmatmul.mubr.msk.f32.gmra.mrb[24].mxu1 %vm21515_vm1, %v18343_v43  ;;  %15609 = vmatmul.mubr.msk.f32.gmra.mrb[6].mxu0 %vm21515_vm1, %v3766_v44  ;;  %v4209_v44 = vld [vmem:[%s17732_s25 + $0xc6] sm:$0xff] }
  0xd6   : > { %15358 = vmatprep.mubr.msk.f32.mxu1 %vm21515_vm1, %v18347_v45  ;;  %15611 = vmatprep.mubr.msk.f32.mxu0 %vm21515_vm1, %v3767_v46  ;;  %v4210_v46 = vld [vmem:[%s17732_s25 + $0xce] sm:$0xff] }
  0xd9   : > { %15359 = vmatmul.mubr.msk.f32.gmra.mrb[26].mxu1 %vm21515_vm1, %v18357_v49  ;;  %15612 = vmatmul.mubr.msk.f32.gmra.mrb[8].mxu0 %vm21515_vm1, %v3768_v51  ;;  %v4211_v51 = vld [vmem:[%s17732_s25 + $0xd6] sm:$0xff] }
  0xda   : > { %15361 = vmatprep.mubr.msk.f32.mxu1 %vm21515_vm1, %v18361_v53  ;;  %15614 = vmatprep.mubr.msk.f32.mxu0 %vm21515_vm1, %v3769_v55  ;;  %v4212_v55 = vld [vmem:[%s17732_s25 + $0xde] sm:$0xff] }
  0xdd   : > { %15362 = vmatmul.mubr.msk.f32.gmra.mrb[28].mxu1 %vm21515_vm1, %v18371_v57  ;;  %15615 = vmatmul.mubr.msk.f32.gmra.mrb[10].mxu0 %vm21515_vm1, %v3770_v59  ;;  %v4213_v59 = vld [vmem:[%s17732_s25 + $0xe6] sm:$0xff] }
  0xde   : > { %15364 = vmatprep.mubr.msk.f32.mxu1 %vm21515_vm1, %v18375_v61  ;;  %15617 = vmatprep.mubr.msk.f32.mxu0 %vm21515_vm1, %v3771_v63  ;;  %v4214_v63 = vld [vmem:[%s17732_s25 + $0xee] sm:$0xff] }
  0xe1   : > { %15365 = vmatmul.mubr.msk.f32.gmra.mrb[30].mxu1 %vm21515_vm1, %v18385_v2  ;;  %15618 = vmatmul.mubr.msk.f32.gmra.mrb[12].mxu0 %vm21515_vm1, %v3772_v4  ;;  %v4215_v4 = vld [vmem:[%s17732_s25 + $0xf6] sm:$0xff] }
  0xe2   : > { %15367 = vmatprep.mubr.msk.f32.mxu1 %vm21515_vm1, %v18389_v47  ;;  %15620 = vmatprep.mubr.msk.f32.mxu0 %vm21515_vm1, %v3773_v6  ;;  %v4216_v6 = vld [vmem:[%s17732_s25 + $0xfe] sm:$0xff] }
  0xe5   : > { %15368 = vmatmul.mubr.msk.f32.gmra.mrb[32].mxu1 %vm21515_vm1, %v18399_v48  ;;  %15621 = vmatmul.mubr.msk.f32.gmra.mrb[14].mxu0 %vm21515_vm1, %v3774_v50  ;;  %v4217_v50 = vld [vmem:[%s17732_s25 + $0x106] sm:$0xff] }
  0xe6   : > { %15370 = vmatprep.mubr.msk.f32.mxu1 %vm21515_vm1, %v18403_v52  ;;  %15623 = vmatprep.mubr.msk.f32.mxu0 %vm21515_vm1, %v3775_v54  ;;  %v4218_v54 = vld [vmem:[%s17732_s25 + $0x10e] sm:$0xff] }
  0xe9   : > { %15371 = vmatmul.mubr.msk.f32.gmra.mrb[34].mxu1 %vm21515_vm1, %v18413_v56  ;;  %15624 = vmatmul.mubr.msk.f32.gmra.mrb[16].mxu0 %vm21515_vm1, %v3776_v58  ;;  %v4219_v58 = vld [vmem:[%s17732_s25 + $0x116] sm:$0xff] }
  0xea   : > { %15375 = vmatprep.mubr.msk.f32.mxu1 %vm21515_vm1, %v18173_v12  ;;  %15626 = vmatprep.mubr.msk.f32.mxu0 %vm21515_vm1, %v3777_v60  ;;  %v3787_v12 = vld [vmem:[%s17732_s25 + $0x105] sm:$0xff] }
  0xeb   : > { %v2500_v60 = vld [vmem:[%s17732_s25 + $0x10b] sm:$0xff] }
  0xed   : > { %15376 = vmatmul.mubr.msk.f32.vlgmr.msra.gmra.mrb[0].mxu1 %vm21515_vm1, %v18183_v13  ;;  %15627 = vmatmul.mubr.msk.f32.gmra.mrb[18].mxu0 %vm21515_vm1, %v3778_v62  ;;  %v3788_v13 = vld [vmem:[%s17732_s25 + $0x10d] sm:$0xff]  ;;  %v4220_v62 = vld [vmem:[%s17732_s25 + $0x11e] sm:$0xff] }
  0xee   : > { %16718 = vmatpush3.msk.msra.mxu1 %vm21516_vm0, %v17710_v1  ;;  %15378 = vmatprep.mubr.msk.f32.mxu1 %vm21515_vm1, %v18188_v14  ;;  %v3782_v1 = vld [vmem:[%s17732_s25 + $0xdd] sm:$0xff]  ;;  %v3789_v14 = vld [vmem:[%s17732_s25 + $0x115] sm:$0xff] }
  0xef   : > { %15629 = vmatprep.mubr.msk.f32.mxu0 %vm21515_vm1, %v3779_v0  ;;  %v2501_v0 = vld [vmem:[%s17732_s25 + $0x113] sm:$0xff] }
  0xf1   : > { %15379 = vmatmul.mubr.msk.f32.gmra.mrb[2].mxu1 %vm21515_vm1, %v18201_v15  ;;  %15630 = vmatmul.mubr.msk.f32.gmra.mrb[20].mxu0 %vm21515_vm1, %v3780_v3  ;;  %v3790_v15 = vld [vmem:[%s17732_s25 + $0x11d] sm:$0xff]  ;;  %v4221_v3 = vld [vmem:[%s17732_s25 + $0x126] sm:$0xff] }
  0xf2   : > { %15381 = vmatprep.mubr.msk.f32.mxu1 %vm21515_vm1, %v18204_v16  ;;  %15632 = vmatprep.mubr.msk.f32.mxu0 %vm21515_vm1, %v3781_v5  ;;  %v3791_v16 = vld [vmem:[%s17732_s25 + $0x125] sm:$0xff] }
  0xf3   : > { %v13517_v5 = vld [vmem:[%s21512_s1 + $0x28] sm:$0xf] }
  0xf4   : > { %15709 = vmatprep.subr.msk.mxu1 %vm21516_vm0, %v13517_v5 }
  0xf5   : > { %15382 = vmatmul.mubr.msk.f32.gmra.mrb[4].mxu1 %vm21515_vm1, %v18215_v17  ;;  %15633 = vmatmul.mubr.msk.f32.gmra.mrb[22].mxu0 %vm21515_vm1, %v3782_v1  ;;  %v3792_v17 = vld [vmem:[%s17732_s25 + $0x12d] sm:$0xff]  ;;  %v2502_v1 = vld [vmem:[%s17732_s25 + $0x11b] sm:$0xff] }
  0xf6   : > { %15384 = vmatprep.mubr.msk.f32.mxu1 %vm21515_vm1, %v18218_v18  ;;  %15635 = vmatprep.mubr.msk.f32.mxu0 %vm21515_vm1, %v3783_v7  ;;  %v3793_v18 = vld [vmem:[%s17732_s25 + $0x135] sm:$0xff] }
  0xf7   : > { %v4222_v7 = vld [vmem:[%s17732_s25 + $0x12e] sm:$0xff] }
  0xf9   : > { %15385 = vmatmul.mubr.msk.f32.gmra.mrb[6].mxu1 %vm21515_vm1, %v18229_v19  ;;  %15636 = vmatmul.mubr.msk.f32.gmra.mrb[24].mxu0 %vm21515_vm1, %v3784_v8  ;;  %v3794_v19 = vld [vmem:[%s17732_s25 + $0x13d] sm:$0xff] }
  0xfa   : > { %15387 = vmatprep.mubr.msk.f32.mxu1 %vm21515_vm1, %v18232_v20  ;;  %15638 = vmatprep.mubr.msk.f32.mxu0 %vm21515_vm1, %v3785_v9  ;;  %v4189_v20 = vld [vmem:[%s17732_s25 + $0x26] sm:$0xff]  ;;  %v4223_v9 = vld [vmem:[%s17732_s25 + $0x136] sm:$0xff] }
  0xfb   : > { %v2503_v8 = vld [vmem:[%s17732_s25 + $0x123] sm:$0xff] }
  0xfd   : > { %15388 = vmatmul.mubr.msk.f32.gmra.mrb[8].mxu1 %vm21515_vm1, %v18243_v21  ;;  %15639 = vmatmul.mubr.msk.f32.gmra.mrb[26].mxu0 %vm21515_vm1, %v3786_v10  ;;  %v4190_v21 = vld [vmem:[%s17732_s25 + $0x2e] sm:$0xff] }
  0xfe   : > { %15390 = vmatprep.mubr.msk.f32.mxu1 %vm21515_vm1, %v18246_v22  ;;  %15641 = vmatprep.mubr.msk.f32.mxu0 %vm21515_vm1, %v3787_v12  ;;  %v4191_v22 = vld [vmem:[%s17732_s25 + $0x36] sm:$0xff]  ;;  %v2504_v10 = vld [vmem:[%s17732_s25 + $0x12b] sm:$0xff]  ;;  %v4224_v12 = vld [vmem:[%s17732_s25 + $0x13e] sm:$0xff] }
 0x101   : > { %15391 = vmatmul.mubr.msk.f32.gmra.mrb[10].mxu1 %vm21515_vm1, %v18257_v23  ;;  %15642 = vmatmul.mubr.msk.f32.gmra.mrb[28].mxu0 %vm21515_vm1, %v3788_v13  ;;  %v4192_v23 = vld [vmem:[%s17732_s25 + $0x3e] sm:$0xff]  ;;  %v17675_v13 = vmov 0.0  }
 0x102   : > { %15393 = vmatprep.mubr.msk.f32.mxu1 %vm21515_vm1, %v18260_v24  ;;  %15644 = vmatprep.mubr.msk.f32.mxu0 %vm21515_vm1, %v3789_v14  ;;  %v4193_v24 = vld [vmem:[%s17732_s25 + $0x46] sm:$0xff]  ;;  %4773 = vst.msk [vmem:[#allocation2 + $0x18] sm:$0xff] %vm21515_vm1, %v17675_v13  ;;  %4774 = vst.msk [vmem:[#allocation2 + $0x20] sm:$0xff] %vm21515_vm1, %v17675_v13 }
 0x103   : > { %4770 = vst.msk [vmem:[#allocation2] sm:$0xff] %vm21515_vm1, %v17675_v13  ;;  %4771 = vst.msk [vmem:[#allocation2 + $0x8] sm:$0xff] %vm21515_vm1, %v17675_v13 }
 0x104   : > { %4772 = vst.msk [vmem:[#allocation2 + $0x10] sm:$0xff] %vm21515_vm1, %v17675_v13  ;;  %4775 = vst.msk [vmem:[#allocation2 + $0x28] sm:$0xff] %vm21515_vm1, %v17675_v13 }
 0x105   : > { %15394 = vmatmul.mubr.msk.f32.gmra.mrb[12].mxu1 %vm21515_vm1, %v18271_v25  ;;  %15645 = vmatmul.mubr.msk.f32.gmra.mrb[30].mxu0 %vm21515_vm1, %v3790_v15  ;;  %v4194_v25 = vld [vmem:[%s17732_s25 + $0x4e] sm:$0xff]  ;;  %4776 = vst.msk [vmem:[#allocation2 + $0x30] sm:$0xff] %vm21515_vm1, %v17675_v13  ;;  %4777 = vst.msk [vmem:[#allocation2 + $0x38] sm:$0xff] %vm21515_vm1, %v17675_v13 }
 0x106   : > { %15396 = vmatprep.mubr.msk.f32.mxu1 %vm21515_vm1, %v18274_v26  ;;  %15647 = vmatprep.mubr.msk.f32.mxu0 %vm21515_vm1, %v3791_v16  ;;  %v4195_v26 = vld [vmem:[%s17732_s25 + $0x56] sm:$0xff]  ;;  %4778 = vst.msk [vmem:[#allocation2 + $0x40] sm:$0xff] %vm21515_vm1, %v17675_v13  ;;  %4779 = vst.msk [vmem:[#allocation2 + $0x48] sm:$0xff] %vm21515_vm1, %v17675_v13  ;;  %v13516_v16 = vld [vmem:[%s21512_s1 + $0x24] sm:$0xf] }
 0x107   : > { %4780 = vst.msk [vmem:[#allocation2 + $0x50] sm:$0xff] %vm21515_vm1, %v17675_v13  ;;  %4781 = vst.msk [vmem:[#allocation2 + $0x58] sm:$0xff] %vm21515_vm1, %v17675_v13 }
 0x108   : > { %4782 = vst.msk [vmem:[#allocation2 + $0x60] sm:$0xff] %vm21515_vm1, %v17675_v13  ;;  %4783 = vst.msk [vmem:[#allocation2 + $0x68] sm:$0xff] %vm21515_vm1, %v17675_v13 }
 0x109   : > { %15397 = vmatmul.mubr.msk.f32.gmra.mrb[14].mxu1 %vm21515_vm1, %v18285_v11  ;;  %15648 = vmatmul.mubr.msk.f32.gmra.mrb[32].mxu0 %vm21515_vm1, %v3792_v17  ;;  %v4197_v11 = vld [vmem:[%s17732_s25 + $0x66] sm:$0xff]  ;;  %4784 = vst.msk [vmem:[#allocation2 + $0x70] sm:$0xff] %vm21515_vm1, %v17675_v13  ;;  %4785 = vst.msk [vmem:[#allocation2 + $0x78] sm:$0xff] %vm21515_vm1, %v17675_v13  ;;  %v171_v17 = vlaneseq }
 0x10a   : > { %15399 = vmatprep.mubr.msk.f32.mxu1 %vm21515_vm1, %v18289_v29  ;;  %15650 = vmatprep.mubr.msk.f32.mxu0 %vm21515_vm1, %v3793_v18  ;;  %v4199_v29 = vld [vmem:[%s17732_s25 + $0x76] sm:$0xff]  ;;  %4786 = vst.msk [vmem:[#allocation2 + $0x80] sm:$0xff] %vm21515_vm1, %v17675_v13  ;;  %4787 = vst.msk [vmem:[#allocation2 + $0x88] sm:$0xff] %vm21515_vm1, %v17675_v13  ;;  %v4993_v14 = vld [vmem:[#allocation2 + $0x1] sm:$0xff] }
 0x10b   : > { %4788 = vst.msk [vmem:[#allocation2 + $0x90] sm:$0xff] %vm21515_vm1, %v17675_v13  ;;  %4789 = vst.msk [vmem:[#allocation2 + $0x98] sm:$0xff] %vm21515_vm1, %v17675_v13  ;;  %v4994_v15 = vld [vmem:[#allocation2 + $0x9] sm:$0xff]  ;;  %v18813_v18 = vshrl.u32 %v171_v17, 7 }
 0x10c   : > { %4790 = vst.msk [vmem:[#allocation2 + $0xa0] sm:$0xff] %vm21515_vm1, %v17675_v13  ;;  %4791 = vst.msk [vmem:[#allocation2 + $0xa8] sm:$0xff] %vm21515_vm1, %v17675_v13 }
 0x10d   : > { %15400 = vmatmul.mubr.msk.f32.gmra.mrb[16].mxu1 %vm21515_vm1, %v18299_v31  ;;  %15651 = vmatmul.mubr.msk.f32.gmra.mrb[34].mxu0 %vm21515_vm1, %v3794_v19  ;;  %v4201_v31 = vld [vmem:[%s17732_s25 + $0x86] sm:$0xff]  ;;  %4792 = vst.msk [vmem:[#allocation2 + $0xb0] sm:$0xff] %vm21515_vm1, %v17675_v13  ;;  %4793 = vst.msk [vmem:[#allocation2 + $0xb8] sm:$0xff] %vm21515_vm1, %v17675_v13  ;;  %v173_v19 = vadd.s32 8, %v18813_v18 }
 0x10e   : > { %15402 = vmatprep.mubr.msk.f32.mxu1 %vm21515_vm1, %v18303_v33  ;;  %15655 = vmatprep.mubr.msk.f32.mxu0 %vm21515_vm1, %v4189_v20  ;;  %v4203_v33 = vld [vmem:[%s17732_s25 + $0x96] sm:$0xff]  ;;  %4794 = vst.msk [vmem:[#allocation2 + $0xc0] sm:$0xff] %vm21515_vm1, %v17675_v13  ;;  %4795 = vst.msk [vmem:[#allocation2 + $0xc8] sm:$0xff] %vm21515_vm1, %v17675_v13 }
 0x10f   : > { %4796 = vst.msk [vmem:[#allocation2 + $0xd0] sm:$0xff] %vm21515_vm1, %v17675_v13  ;;  %4797 = vst.msk [vmem:[#allocation2 + $0xd8] sm:$0xff] %vm21515_vm1, %v17675_v13 }
 0x110   : > { %4798 = vst.msk [vmem:[#allocation2 + $0xe0] sm:$0xff] %vm21515_vm1, %v17675_v13  ;;  %4799 = vst.msk [vmem:[#allocation2 + $0xe8] sm:$0xff] %vm21515_vm1, %v17675_v13 }
 0x111   : > { %15403 = vmatmul.mubr.msk.f32.gmra.mrb[18].mxu1 %vm21515_vm1, %v18314_v35  ;;  %15656 = vmatmul.mubr.msk.f32.vlgmr.msra.gmra.mrb[0].mxu0 %vm21515_vm1, %v4190_v21  ;;  %v2073_v35 = vld [vmem:[%s17732_s25 + $0x122] sm:$0xff]  ;;  %4800 = vst.msk [vmem:[#allocation2 + $0xf0] sm:$0xff] %vm21515_vm1, %v17675_v13  ;;  %4801 = vst.msk [vmem:[#allocation2 + $0xf8] sm:$0xff] %vm21515_vm1, %v17675_v13  ;;  %v18816_v20 = vmul.u32.u64.low 3817748708, %v173_v19  ;;  %v18817_v21 = vmul.u32.u64.high 3817748708, %v173_v19, %v18816_v20 }
 0x112   : > { %15405 = vmatprep.mubr.msk.f32.mxu1 %vm21515_vm1, %v18319_v37  ;;  %15658 = vmatprep.mubr.msk.f32.mxu0 %vm21515_vm1, %v4191_v22  ;;  %v2074_v37 = vld [vmem:[%s17732_s25 + $0x12a] sm:$0xff]  ;;  %4802 = vst.msk [vmem:[#allocation2 + $0x100] sm:$0xff] %vm21515_vm1, %v17675_v13  ;;  %4803 = vst.msk [vmem:[#allocation2 + $0x108] sm:$0xff] %vm21515_vm1, %v17675_v13  ;;  %v175_v22 = vadd.s32 24, %v18813_v18 }
 0x113   : > { %4804 = vst.msk [vmem:[#allocation2 + $0x110] sm:$0xff] %vm21515_vm1, %v17675_v13  ;;  %4805 = vst.msk [vmem:[#allocation2 + $0x118] sm:$0xff] %vm21515_vm1, %v17675_v13 }
 0x114   : > { %4806 = vst.msk [vmem:[#allocation2 + $0x120] sm:$0xff] %vm21515_vm1, %v17675_v13  ;;  %4807 = vst.msk [vmem:[#allocation2 + $0x128] sm:$0xff] %vm21515_vm1, %v17675_v13 }
 0x115   : > { %15406 = vmatmul.mubr.msk.f32.gmra.mrb[20].mxu1 %vm21515_vm1, %v18329_v39  ;;  %15659 = vmatmul.mubr.msk.f32.gmra.mrb[2].mxu0 %vm21515_vm1, %v4192_v23  ;;  %v2487_v39 = vld [vmem:[%s17732_s25 + $0xa3] sm:$0xff]  ;;  %4808 = vst.msk [vmem:[#allocation2 + $0x130] sm:$0xff] %vm21515_vm1, %v17675_v13  ;;  %4809 = vst.msk [vmem:[#allocation2 + $0x138] sm:$0xff] %vm21515_vm1, %v17675_v13 }
 0x116   : > { %15408 = vmatprep.mubr.msk.f32.mxu1 %vm21515_vm1, %v18333_v41  ;;  %15661 = vmatprep.mubr.msk.f32.mxu0 %vm21515_vm1, %v4193_v24  ;;  %v2488_v41 = vld [vmem:[%s17732_s25 + $0xab] sm:$0xff]  ;;  %4810 = vst.msk [vmem:[#allocation2 + $0x140] sm:$0xff] %vm21515_vm1, %v17675_v13  ;;  %8905 = vst.msk [vmem:[#allocation3] sm:$0xff] %vm21515_vm1, %v17675_v13  ;;  %v18821_v23 = vmul.u32.u64.low 3817748708, %v18813_v18  ;;  %v18822_v24 = vmul.u32.u64.high 3817748708, %v18813_v18, %v18821_v23 }
 0x117   : > { %8906 = vst.msk [vmem:[#allocation3 + $0x8] sm:$0xff] %vm21515_vm1, %v17675_v13  ;;  %8907 = vst.msk [vmem:[#allocation3 + $0x10] sm:$0xff] %vm21515_vm1, %v17675_v13 }
 0x118   : > { %8908 = vst.msk [vmem:[#allocation3 + $0x18] sm:$0xff] %vm21515_vm1, %v17675_v13  ;;  %8909 = vst.msk [vmem:[#allocation3 + $0x20] sm:$0xff] %vm21515_vm1, %v17675_v13 }
 0x119   : > { %15409 = vmatmul.mubr.msk.f32.gmra.mrb[22].mxu1 %vm21515_vm1, %v18343_v43  ;;  %15662 = vmatmul.mubr.msk.f32.gmra.mrb[4].mxu0 %vm21515_vm1, %v4194_v25  ;;  %v2489_v43 = vld [vmem:[%s17732_s25 + $0xb3] sm:$0xff]  ;;  %8910 = vst.msk [vmem:[#allocation3 + $0x28] sm:$0xff] %vm21515_vm1, %v17675_v13  ;;  %8911 = vst.msk [vmem:[#allocation3 + $0x30] sm:$0xff] %vm21515_vm1, %v17675_v13  ;;  %v174_v25 = vadd.s32 16, %v18813_v18 }
 0x11a   : > { %15411 = vmatprep.mubr.msk.f32.mxu1 %vm21515_vm1, %v18347_v45  ;;  %15664 = vmatprep.mubr.msk.f32.mxu0 %vm21515_vm1, %v4195_v26  ;;  %v2490_v45 = vld [vmem:[%s17732_s25 + $0xbb] sm:$0xff]  ;;  %8912 = vst.msk [vmem:[#allocation3 + $0x38] sm:$0xff] %vm21515_vm1, %v17675_v13  ;;  %8913 = vst.msk [vmem:[#allocation3 + $0x40] sm:$0xff] %vm21515_vm1, %v17675_v13 }
 0x11b   : > { %8914 = vst.msk [vmem:[#allocation3 + $0x48] sm:$0xff] %vm21515_vm1, %v17675_v13  ;;  %8915 = vst.msk [vmem:[#allocation3 + $0x50] sm:$0xff] %vm21515_vm1, %v17675_v13 }
 0x11c   : > { %8916 = vst.msk [vmem:[#allocation3 + $0x58] sm:$0xff] %vm21515_vm1, %v17675_v13  ;;  %8917 = vst.msk [vmem:[#allocation3 + $0x60] sm:$0xff] %vm21515_vm1, %v17675_v13 }
 0x11d   : > { %15412 = vmatmul.mubr.msk.f32.gmra.mrb[24].mxu1 %vm21515_vm1, %v18357_v49  ;;  %15665 = vmatmul.mubr.msk.f32.gmra.mrb[6].mxu0 %vm21515_vm1, %v4196_v27  ;;  %v2491_v49 = vld [vmem:[%s17732_s25 + $0xc3] sm:$0xff]  ;;  %8918 = vst.msk [vmem:[#allocation3 + $0x68] sm:$0xff] %vm21515_vm1, %v17675_v13  ;;  %8919 = vst.msk [vmem:[#allocation3 + $0x70] sm:$0xff] %vm21515_vm1, %v17675_v13  ;;  %v18825_v26 = vmul.u32.u64.low 3817748708, %v175_v22  ;;  %v18826_v27 = vmul.u32.u64.high 3817748708, %v175_v22, %v18825_v26 }
 0x11e   : > { %15414 = vmatprep.mubr.msk.f32.mxu1 %vm21515_vm1, %v18361_v53  ;;  %15667 = vmatprep.mubr.msk.f32.mxu0 %vm21515_vm1, %v4197_v11  ;;  %v2492_v53 = vld [vmem:[%s17732_s25 + $0xcb] sm:$0xff]  ;;  %8920 = vst.msk [vmem:[#allocation3 + $0x78] sm:$0xff] %vm21515_vm1, %v17675_v13  ;;  %8921 = vst.msk [vmem:[#allocation3 + $0x80] sm:$0xff] %vm21515_vm1, %v17675_v13  ;;  %v177_v11 = vadd.s32 40, %v18813_v18 }
 0x11f   : > { %8922 = vst.msk [vmem:[#allocation3 + $0x88] sm:$0xff] %vm21515_vm1, %v17675_v13  ;;  %8923 = vst.msk [vmem:[#allocation3 + $0x90] sm:$0xff] %vm21515_vm1, %v17675_v13 }
 0x120   : > { %8924 = vst.msk [vmem:[#allocation3 + $0x98] sm:$0xff] %vm21515_vm1, %v17675_v13  ;;  %8925 = vst.msk [vmem:[#allocation3 + $0xa0] sm:$0xff] %vm21515_vm1, %v17675_v13 }
 0x121   : > { %15415 = vmatmul.mubr.msk.f32.gmra.mrb[26].mxu1 %vm21515_vm1, %v18371_v57  ;;  %15668 = vmatmul.mubr.msk.f32.gmra.mrb[8].mxu0 %vm21515_vm1, %v4198_v28  ;;  %v2493_v57 = vld [vmem:[%s17732_s25 + $0xd3] sm:$0xff]  ;;  %8926 = vst.msk [vmem:[#allocation3 + $0xa8] sm:$0xff] %vm21515_vm1, %v17675_v13  ;;  %8927 = vst.msk [vmem:[#allocation3 + $0xb0] sm:$0xff] %vm21515_vm1, %v17675_v13  ;;  %v225_v28 = vshrl.u32 %v18817_v21, 4 }
 0x122   : > { %15417 = vmatprep.mubr.msk.f32.mxu1 %vm21515_vm1, %v18375_v61  ;;  %15670 = vmatprep.mubr.msk.f32.mxu0 %vm21515_vm1, %v4199_v29  ;;  %v2494_v61 = vld [vmem:[%s17732_s25 + $0xdb] sm:$0xff]  ;;  %8928 = vst.msk [vmem:[#allocation3 + $0xb8] sm:$0xff] %vm21515_vm1, %v17675_v13  ;;  %8929 = vst.msk [vmem:[#allocation3 + $0xc0] sm:$0xff] %vm21515_vm1, %v17675_v13 }
 0x123   : > { %8930 = vst.msk [vmem:[#allocation3 + $0xc8] sm:$0xff] %vm21515_vm1, %v17675_v13  ;;  %8931 = vst.msk [vmem:[#allocation3 + $0xd0] sm:$0xff] %vm21515_vm1, %v17675_v13 }
 0x124   : > { %8932 = vst.msk [vmem:[#allocation3 + $0xd8] sm:$0xff] %vm21515_vm1, %v17675_v13  ;;  %8933 = vst.msk [vmem:[#allocation3 + $0xe0] sm:$0xff] %vm21515_vm1, %v17675_v13 }
 0x125   : > { %15418 = vmatmul.mubr.msk.f32.gmra.mrb[28].mxu1 %vm21515_vm1, %v18385_v2  ;;  %15671 = vmatmul.mubr.msk.f32.gmra.mrb[10].mxu0 %vm21515_vm1, %v4200_v30  ;;  %v2495_v2 = vld [vmem:[%s17732_s25 + $0xe3] sm:$0xff]  ;;  %8934 = vst.msk [vmem:[#allocation3 + $0xe8] sm:$0xff] %vm21515_vm1, %v17675_v13  ;;  %8935 = vst.msk [vmem:[#allocation3 + $0xf0] sm:$0xff] %vm21515_vm1, %v17675_v13  ;;  %v18830_v29 = vmul.u32.u64.low 3817748708, %v174_v25  ;;  %v18831_v30 = vmul.u32.u64.high 3817748708, %v174_v25, %v18830_v29 }
 0x126   : > { %15420 = vmatprep.mubr.msk.f32.mxu1 %vm21515_vm1, %v18389_v47  ;;  %15673 = vmatprep.mubr.msk.f32.mxu0 %vm21515_vm1, %v4201_v31  ;;  %v2496_v47 = vld [vmem:[%s17732_s25 + $0xeb] sm:$0xff]  ;;  %8936 = vst.msk [vmem:[#allocation3 + $0xf8] sm:$0xff] %vm21515_vm1, %v17675_v13  ;;  %8937 = vst.msk [vmem:[#allocation3 + $0x100] sm:$0xff] %vm21515_vm1, %v17675_v13  ;;  %v176_v31 = vadd.s32 32, %v18813_v18  ;;  %v18949_v29 = vadd.s32 120, %v18813_v18 }
 0x127   : > { %8938 = vst.msk [vmem:[#allocation3 + $0x108] sm:$0xff] %vm21515_vm1, %v17675_v13  ;;  %8939 = vst.msk [vmem:[#allocation3 + $0x110] sm:$0xff] %vm21515_vm1, %v17675_v13 }
 0x128   : > { %8940 = vst.msk [vmem:[#allocation3 + $0x118] sm:$0xff] %vm21515_vm1, %v17675_v13  ;;  %8941 = vst.msk [vmem:[#allocation3 + $0x120] sm:$0xff] %vm21515_vm1, %v17675_v13 }
 0x129   : > { %15421 = vmatmul.mubr.msk.f32.gmra.mrb[30].mxu1 %vm21515_vm1, %v18399_v48  ;;  %15674 = vmatmul.mubr.msk.f32.gmra.mrb[12].mxu0 %vm21515_vm1, %v4202_v32  ;;  %v2497_v48 = vld [vmem:[%s17732_s25 + $0xf3] sm:$0xff]  ;;  %8942 = vst.msk [vmem:[#allocation3 + $0x128] sm:$0xff] %vm21515_vm1, %v17675_v13  ;;  %8943 = vst.msk [vmem:[#allocation3 + $0x130] sm:$0xff] %vm21515_vm1, %v17675_v13  ;;  %v179_v32 = vadd.s32 56, %v18813_v18 }
 0x12a   : > { %15423 = vmatprep.mubr.msk.f32.mxu1 %vm21515_vm1, %v18403_v52  ;;  %15676 = vmatprep.mubr.msk.f32.mxu0 %vm21515_vm1, %v4203_v33  ;;  %v2498_v52 = vld [vmem:[%s17732_s25 + $0xfb] sm:$0xff]  ;;  %8944 = vst.msk [vmem:[#allocation3 + $0x138] sm:$0xff] %vm21515_vm1, %v17675_v13  ;;  %8945 = vst.msk [vmem:[#allocation3 + $0x140] sm:$0xff] %vm21515_vm1, %v17675_v13  ;;  %v178_v33 = vadd.s32 48, %v18813_v18  ;;  %v18904_v13 = vadd.s32 96, %v18813_v18 }
 0x12d   : > { %15424 = vmatmul.mubr.msk.f32.gmra.mrb[32].mxu1 %vm21515_vm1, %v18413_v56  ;;  %15677 = vmatmul.mubr.msk.f32.gmra.mrb[14].mxu0 %vm21515_vm1, %v4204_v34  ;;  %v2499_v56 = vld [vmem:[%s17732_s25 + $0x103] sm:$0xff] }
 0x12e   : > { %15426 = vmatprep.mubr.msk.f32.mxu1 %vm21515_vm1, %v2073_v35  ;;  %15679 = vmatprep.mubr.msk.f32.mxu0 %vm21515_vm1, %v4205_v36  ;;  %v18836_v34 = vmul.u32.u64.low 3817748708, %v177_v11  ;;  %v18837_v35 = vmul.u32.u64.high 3817748708, %v177_v11, %v18836_v34  ;;  %v18840_v36 = vadd.s32 72, %v18813_v18 }
 0x131   : > { %15427 = vmatmul.mubr.msk.f32.gmra.mrb[34].mxu1 %vm21515_vm1, %v2074_v37  ;;  %15680 = vmatmul.mubr.msk.f32.gmra.mrb[16].mxu0 %vm21515_vm1, %v4206_v38  ;;  %v226_v37 = vmul.u32 18, %v225_v28  ;;  %v214_v38 = vshrl.u32 %v18822_v24, 4 }
 0x132   : > { %15458 = vmatprep.mubr.msk.f32.mxu1 %vm21515_vm1, %v2487_v39  ;;  %15682 = vmatprep.mubr.msk.f32.mxu0 %vm21515_vm1, %v4207_v40  ;;  %v18843_v39 = vmul.u32.u64.low 3817748708, %v176_v31  ;;  %v18844_v40 = vmul.u32.u64.high 3817748708, %v176_v31, %v18843_v39 }
 0x135   : > { %15459 = vmatmul.mubr.msk.f32.vlgmr.msra.gmra.mrb[18].mxu1 %vm21515_vm1, %v2488_v41  ;;  %15683 = vmatmul.mubr.msk.f32.gmra.mrb[18].mxu0 %vm21515_vm1, %v4208_v42  ;;  %v18846_v41 = vmul.u32.u64.low 3817748708, %v179_v32  ;;  %v18847_v42 = vmul.u32.u64.high 3817748708, %v179_v32, %v18846_v41 }
 0x136   : > { %15461 = vmatprep.mubr.msk.f32.mxu1 %vm21515_vm1, %v2489_v43  ;;  %15685 = vmatprep.mubr.msk.f32.mxu0 %vm21515_vm1, %v4209_v44  ;;  %v18849_v43 = vmul.u32.u64.low 3817748708, %v178_v33  ;;  %v18850_v44 = vmul.u32.u64.high 3817748708, %v178_v33, %v18849_v43 }
 0x137   : > { %15710 = vmatpush3.msk.msra.mxu1 %vm21516_vm0, %v13517_v5 }
 0x138   : > { %15765 = vmatprep.subr.msk.mxu1 %vm21516_vm0, %v13516_v16 }
 0x139   : > { %15462 = vmatmul.mubr.msk.f32.gmra.mrb[20].mxu1 %vm21515_vm1, %v2490_v45  ;;  %15686 = vmatmul.mubr.msk.f32.gmra.mrb[20].mxu0 %vm21515_vm1, %v4210_v46  ;;  %v247_v45 = vshrl.u32 %v18826_v27, 4  ;;  %v21754_v27 = vmov 0 }
 0x13a   : > { %15464 = vmatprep.mubr.msk.f32.mxu1 %vm21515_vm1, %v2491_v49  ;;  %15688 = vmatprep.mubr.msk.f32.mxu0 %vm21515_vm1, %v4211_v51  ;;  %v18854_v46 = vmul.u32.u64.low 3817748708, %v18840_v36  ;;  %v18855_v49 = vmul.u32.u64.high 3817748708, %v18840_v36, %v18854_v46  ;;  %v236_v51 = vshrl.u32 %v18831_v30, 4  ;;  %v19579_v30 = vadd.s32 248, %v18813_v18 }
 0x13b   : > { %v21642_v46 = vmov 0 }
 0x13d   : > { %15465 = vmatmul.mubr.msk.f32.gmra.mrb[22].mxu1 %vm21515_vm1, %v2492_v53  ;;  %15689 = vmatmul.mubr.msk.f32.gmra.mrb[22].mxu0 %vm21515_vm1, %v4212_v55  ;;  %v18858_v53 = vsub.s32 %v173_v19, %v226_v37  ;;  %v215_v55 = vmul.u32 18, %v214_v38  ;;  %v21637_v38 = vmov 0 }
 0x13e   : > { %15467 = vmatprep.mubr.msk.f32.mxu1 %vm21515_vm1, %v2493_v57  ;;  %15691 = vmatprep.mubr.msk.f32.mxu0 %vm21515_vm1, %v4213_v59  ;;  %v248_v57 = vmul.u32 18, %v247_v45  ;;  %v269_v59 = vshrl.u32 %v18837_v35, 4 }
 0x13f   : > { %vm605_vm2 = vcmp.ne.s32.totalorder %v18858_v53, 0  ;;  %vm641_vm3 = vcmp.lt.s32.totalorder %v18858_v53, 0 }
 0x140   : > { %vm18939_vm10 = vmand %vm641_vm3, %vm605_vm2 }
 0x141   : > { %15468 = vmatmul.mubr.msk.f32.gmra.mrb[24].mxu1 %vm21515_vm1, %v2494_v61  ;;  %15692 = vmatmul.mubr.msk.f32.gmra.mrb[24].mxu0 %vm21515_vm1, %v4214_v63  ;;  %v18862_v61 = vadd.s32 64, %v18813_v18  ;;  %v237_v63 = vmul.u32 18, %v236_v51 }
 0x142   : > { %15470 = vmatprep.mubr.msk.f32.mxu1 %vm21515_vm1, %v2495_v2  ;;  %15694 = vmatprep.mubr.msk.f32.mxu0 %vm21515_vm1, %v4215_v4  ;;  %v258_v2 = vshrl.u32 %v18844_v40, 4  ;;  %v18866_v4 = vadd.s32 88, %v18813_v18  ;;  %v19003_v40 = vmul.u32.u64.low 3817748708, %v18949_v29  ;;  %v19004_v41 = vmul.u32.u64.high 3817748708, %v18949_v29, %v19003_v40 }
 0x145   : > { %15471 = vmatmul.mubr.msk.f32.gmra.mrb[26].mxu1 %vm21515_vm1, %v2496_v47  ;;  %15695 = vmatmul.mubr.msk.f32.gmra.mrb[26].mxu0 %vm21515_vm1, %v4216_v6  ;;  %v18870_v47 = vsub.s32 %v18813_v18, %v215_v55  ;;  %v291_v6 = vshrl.u32 %v18847_v42, 4  ;;  %v21639_v42 = vmov 0  ;;  %v19030_v55 = vadd.s32 136, %v18813_v18 }
 0x146   : > { %15473 = vmatprep.mubr.msk.f32.mxu1 %vm21515_vm1, %v2497_v48  ;;  %15697 = vmatprep.mubr.msk.f32.mxu0 %vm21515_vm1, %v4217_v50  ;;  %v280_v48 = vshrl.u32 %v18850_v44, 4  ;;  %v18876_v50 = vadd.s32 18, %v18858_v53 }
 0x147   : > { %vm604_vm4 = vcmp.ne.s32.totalorder %v18870_v47, 0  ;;  %vm640_vm5 = vcmp.lt.s32.totalorder %v18870_v47, 0 }
 0x148   : > { %vm18955_vm12 = vmand %vm640_vm5, %vm604_vm4 }
 0x149   : > { %15474 = vmatmul.mubr.msk.f32.gmra.mrb[28].mxu1 %vm21515_vm1, %v2498_v52  ;;  %15698 = vmatmul.mubr.msk.f32.gmra.mrb[28].mxu0 %vm21515_vm1, %v4218_v54  ;;  %v18878_v52 = vsub.s32 %v175_v22, %v248_v57  ;;  %v18881_v54 = vadd.s32 80, %v18813_v18  ;;  %v21647_v57 = vmov 0 }
 0x14a   : > { %15476 = vmatprep.mubr.msk.f32.mxu1 %vm21515_vm1, %v2499_v56  ;;  %15700 = vmatprep.mubr.msk.f32.mxu0 %vm21515_vm1, %v4219_v58  ;;  %v270_v56 = vmul.u32 18, %v269_v59  ;;  %v313_v58 = vshrl.u32 %v18855_v49, 4 }
 0x14b   : > { %vm607_vm6 = vcmp.ne.s32.totalorder %v18878_v52, 0  ;;  %vm643_vm7 = vcmp.lt.s32.totalorder %v18878_v52, 0  ;;  %v18914_v17 = vadd.s32 18, %v18878_v52 }
 0x14c   : > { %vm18971_vm14 = vmand %vm643_vm7, %vm607_vm6 }
 0x14d   : > { %15477 = vmatmul.mubr.msk.f32.gmra.mrb[30].mxu1 %vm21515_vm1, %v2500_v60  ;;  %15701 = vmatmul.mubr.msk.f32.gmra.mrb[30].mxu0 %vm21515_vm1, %v4220_v62  ;;  %v18885_v60 = vmul.u32.u64.low 3817748708, %v18862_v61  ;;  %v18886_v62 = vmul.u32.u64.high 3817748708, %v18862_v61, %v18885_v60 }
 0x14e   : > { %15479 = vmatprep.mubr.msk.f32.mxu1 %vm21515_vm1, %v2501_v0  ;;  %15703 = vmatprep.mubr.msk.f32.mxu0 %vm21515_vm1, %v4221_v3  ;;  %v18888_v0 = vsub.s32 %v174_v25, %v237_v63  ;;  %v259_v3 = vmul.u32 18, %v258_v2  ;;  %v18932_v25 = vmul.u32.u64.low 3817748708, %v18904_v13  ;;  %v18933_v26 = vmul.u32.u64.high 3817748708, %v18904_v13, %v18932_v25 }
 0x14f   : > { %v302_v28 = vshrl.u32 %v18886_v62, 4  ;;  %v21651_v62 = vmov 0 }
 0x150   : > { %vm606_vm8 = vcmp.ne.s32.totalorder %v18888_v0, 0  ;;  %vm642_vm9 = vcmp.lt.s32.totalorder %v18888_v0, 0  ;;  %v18919_v19 = vadd.s32 18, %v18888_v0  ;;  %v18921_v20 = vsub.s32 %v176_v31, %v259_v3 }
 0x151   : > { %15480 = vmatmul.mubr.msk.f32.gmra.mrb[32].mxu1 %vm21515_vm1, %v2502_v1  ;;  %15704 = vmatmul.mubr.msk.f32.gmra.mrb[32].mxu0 %vm21515_vm1, %v4222_v7  ;;  %v18891_v5 = vmul.u32.u64.low 3817748708, %v18866_v4  ;;  %v18892_v1 = vmul.u32.u64.high 3817748708, %v18866_v4, %v18891_v5  ;;  %v292_v7 = vmul.u32 18, %v291_v6  ;;  %vm18985_vm4 = vmand %vm642_vm9, %vm606_vm8  ;;  %v346_v6 = vshrl.u32 %v18933_v26, 4 }
 0x152   : > { %15482 = vmatprep.mubr.msk.f32.mxu1 %vm21515_vm1, %v2503_v8  ;;  %15706 = vmatprep.mubr.msk.f32.mxu0 %vm21515_vm1, %v4223_v9  ;;  %v281_v8 = vmul.u32 18, %v280_v48  ;;  %21624 = vst [vmem:[#allocation5_spill] sm:$0xff] %v18921_v20  ;;  %vm608_vm15 = vcmp.ne.s32.totalorder %v18921_v20, 0  ;;  %vm644_vm2 = vcmp.lt.s32.totalorder %v18921_v20, 0  ;;  %v18978_v35 = vadd.s32 18, %v18921_v20 }
 0x153   : > { %v18923_v21 = vsub.s32 %v179_v32, %v292_v7  ;;  %v335_v32 = vshrl.u32 %v18892_v1, 4  ;;  %v303_v39 = vmul.u32 18, %v302_v28  ;;  %vm19008_vm9 = vmand %vm644_vm2, %vm608_vm15  ;;  %v13592_v48 = vld [vmem:[%s21512_s1 + $0x2c] sm:$0xf]  ;;  %vm21655_vm2 = vcmask 1043456  }
 0x154   : > { %v18925_v22 = vsub.s32 %v178_v33, %v281_v8  ;;  %v18965_v33 = vadd.s32 112, %v18813_v18  ;;  %21634 = vst [vmem:[#allocation9_spill] sm:$0xff] %v18978_v35  ;;  %v21640_v42 = vsel %vm19008_vm9, 4294967295, %v21639_v42  ;;  %v347_v25 = vmul.u32 18, %v346_v6 }
 0x155   : > { %15483 = vmatmul.mubr.msk.f32.gmra.mrb[34].mxu1 %vm21515_vm1, %v2504_v10  ;;  %15707 = vmatmul.mubr.msk.f32.gmra.mrb[34].mxu0 %vm21515_vm1, %v4224_v12  ;;  %v18897_v9 = vmul.u32.u64.low 3817748708, %v18881_v54  ;;  %v18898_v10 = vmul.u32.u64.high 3817748708, %v18881_v54, %v18897_v9  ;;  %v18901_v12 = vadd.s32 104, %v18813_v18  ;;  %21625 = vst [vmem:[#allocation6_spill] sm:$0xff] %v18923_v21  ;;  %vm611_vm3 = vcmp.ne.s32.totalorder %v18923_v21, 0  ;;  %21641 = vst [vmem:[#allocation10_spill] sm:$0xff] %v21640_v42 }
 0x156   : > { %15711 = vmatprep.mubr.msk.f32.mxu1 %vm21515_vm1, %v4993_v14  ;;  %v18907_v14 = vadd.s32 18, %v18870_v47  ;;  %21626 = vst [vmem:[#allocation7_spill] sm:$0xff] %v18925_v22  ;;  %vm647_vm5 = vcmp.lt.s32.totalorder %v18923_v21, 0  ;;  %vm610_vm6 = vcmp.ne.s32.totalorder %v18925_v22, 0  ;;  %vm646_vm7 = vcmp.lt.s32.totalorder %v18925_v22, 0 }
 0x157   : > { %v18928_v23 = vmul.u32.u64.low 3817748708, %v18901_v12  ;;  %v18929_v24 = vmul.u32.u64.high 3817748708, %v18901_v12, %v18928_v23  ;;  %v324_v37 = vshrl.u32 %v18898_v10, 4  ;;  %v336_v43 = vmul.u32 18, %v335_v32 }
 0x158   : > { %v19014_v44 = vmul.u32.u64.low 3817748708, %v18965_v33  ;;  %v19015_v45 = vmul.u32.u64.high 3817748708, %v18965_v33, %v19014_v44  ;;  %v19024_v49 = vadd.s32 18, %v18923_v21  ;;  %v19027_v51 = vadd.s32 18, %v18925_v22 }
 0x159   : > { %15712 = vmatmul.mubr.msk.f32.vlgmr.msra.gmra.mrb[36].mxu1 %vm21515_vm1, %v4994_v15  ;;  %v18910_v15 = vsub.s32 %v177_v11, %v270_v56  ;;  %v325_v63 = vmul.u32 18, %v324_v37  ;;  %v357_v2 = vshrl.u32 %v18929_v24, 4  ;;  %v19069_v3 = vsub.s32 %v18862_v61, %v303_v39 }
 0x15a   : > { %15766 = vmatpush3.msk.msra.mxu1 %vm21516_vm0, %v13516_v16  ;;  %v314_v16 = vmul.u32 18, %v313_v58  ;;  %21645 = vst [vmem:[#allocation12_spill] sm:$0xff] %v19024_v49  ;;  %21646 = vst [vmem:[#allocation13_spill] sm:$0xff] %v19027_v51  ;;  %v19085_v61 = vsub.s32 %v18866_v4, %v336_v43  ;;  %v379_v26 = vshrl.u32 %v19004_v41, 4  ;;  %v19110_v28 = vadd.s32 128, %v18813_v18 }
 0x15b   : > { %21623 = vst [vmem:[#allocation4_spill] sm:$0xff] %v18910_v15  ;;  %vm609_vm11 = vcmp.ne.s32.totalorder %v18910_v15, 0  ;;  %vm645_vm13 = vcmp.lt.s32.totalorder %v18910_v15, 0  ;;  %v18961_v31 = vadd.s32 18, %v18910_v15  ;;  %21654 = vst [vmem:[#allocation17_spill] sm:$0xff] %v19069_v3  ;;  %15821 = vmatprep.subr.msk.mxu1 %vm21655_vm2, %v13592_v48  ;;  %v19104_v23 = vsub.s32 %v18881_v54, %v325_v63 }
 0x15c   : > { %v18945_v11 = vsub.s32 %v18840_v36, %v314_v16  ;;  %vm18997_vm1 = vmand %vm645_vm13, %vm609_vm11  ;;  %v19096_v10 = vmul.u32.u64.low 3817748708, %v19030_v55  ;;  %v19097_v16 = vmul.u32.u64.high 3817748708, %v19030_v55, %v19096_v10  ;;  %v358_v24 = vmul.u32 18, %v357_v2 }
 0x15d   : > { %v21638_v38 = vsel %vm18997_vm1, 4294967295, %v21637_v38  ;;  %vm19019_vm11 = vmand %vm647_vm5, %vm611_vm3  ;;  %21656 = vst [vmem:[#allocation18_spill] sm:$0xff] %v19104_v23  ;;  %vm648_vm3 = vcmp.lt.s32.totalorder %v19069_v3, 0  ;;  %v19113_v32 = vadd.s32 18, %v19069_v3  ;;  %vm615_vm5 = vcmp.ne.s32.totalorder %v19085_v61, 0 }
 0x15e   : > { %21629 = vst [vmem:[#allocation8_spill] sm:$0xff] %v18945_v11  ;;  %vm613_vm8 = vcmp.ne.s32.totalorder %v18945_v11, 0  ;;  %vm649_vm0 = vcmp.lt.s32.totalorder %v18945_v11, 0  ;;  %v21643_v46 = vsel %vm19019_vm11, 4294967295, %v21642_v46  ;;  %vm19036_vm13 = vmand %vm646_vm7, %vm610_vm6  ;;  %v19041_v59 = vadd.s32 18, %v18945_v11 }
 0x15f   : > { %21644 = vst [vmem:[#allocation11_spill] sm:$0xff] %v21643_v46  ;;  %v21648_v57 = vsel %vm19036_vm13, 4294967295, %v21647_v57  ;;  %vm19064_vm15 = vmand %vm649_vm0, %vm613_vm8  ;;  %vm612_vm0 = vcmp.ne.s32.totalorder %v19069_v3, 0  ;;  %v368_v37 = vshrl.u32 %v19015_v45, 4  ;;  %v19118_v54 = vadd.s32 152, %v18813_v18 }
 0x160   : > { %21649 = vst [vmem:[#allocation14_spill] sm:$0xff] %v21648_v57  ;;  %21650 = vst [vmem:[#allocation15_spill] sm:$0xff] %v19041_v59  ;;  %v21652_v62 = vsel %vm19064_vm15, 4294967295, %v21651_v62  ;;  %vm651_vm6 = vcmp.lt.s32.totalorder %v19085_v61, 0  ;;  %v19124_v40 = vadd.s32 18, %v19085_v61  ;;  %v19127_v41 = vadd.s32 144, %v18813_v18 }
 0x161   : > { %21653 = vst [vmem:[#allocation16_spill] sm:$0xff] %v21652_v62  ;;  %21657 = vst [vmem:[#allocation19_spill] sm:$0xff] %v19113_v32  ;;  %v19130_v43 = vadd.s32 168, %v18813_v18  ;;  %v19137_v45 = vsub.s32 %v18901_v12, %v358_v24  ;;  %v19140_v63 = vsub.s32 %v18904_v13, %v347_v25  ;;  %v380_v2 = vmul.u32 18, %v379_v26 }
 0x162   : > { %v19143_v6 = vmul.u32.u64.low 3817748708, %v19110_v28  ;;  %v19144_v48 = vmul.u32.u64.high 3817748708, %v19110_v28, %v19143_v6  ;;  %v19147_v10 = vadd.s32 160, %v18813_v18  ;;  %v369_v4 = vmul.u32 18, %v368_v37  ;;  %vm19210_vm2 = vmand %vm648_vm3, %vm612_vm0 }
 0x163   : > { %21658 = vst [vmem:[#allocation20_spill] sm:$0xff] %v19140_v63  ;;  %v19150_v9 = vmul.u32.u64.low 3817748708, %v19118_v54  ;;  %v19151_v8 = vmul.u32.u64.high 3817748708, %v19118_v54, %v19150_v9  ;;  %v19154_v7 = vadd.s32 184, %v18813_v18  ;;  %v19169_v37 = vadd.s32 18, %v19104_v23  ;;  %vm19225_vm7 = vmand %vm651_vm6, %vm615_vm5 }
 0x164   : > { %v19159_v13 = vmul.u32.u64.low 3817748708, %v19127_v41  ;;  %v19160_v24 = vmul.u32.u64.high 3817748708, %v19127_v41, %v19159_v13  ;;  %v19163_v25 = vmul.u32.u64.low 3817748708, %v19130_v43  ;;  %v19164_v26 = vmul.u32.u64.high 3817748708, %v19130_v43, %v19163_v25 }
 0x165   : > { %21660 = vst [vmem:[#allocation22_spill] sm:$0xff] %v19169_v37  ;;  %v401_v9 = vshrl.u32 %v19097_v16, 4  ;;  %v19174_v1 = vadd.s32 176, %v18813_v18  ;;  %v19177_v5 = vsub.s32 %v18949_v29, %v380_v2  ;;  %v19184_v25 = vadd.s32 200, %v18813_v18 }
 0x166   : > { %v19180_v13 = vmul.u32.u64.low 3817748708, %v19147_v10  ;;  %v19181_v60 = vmul.u32.u64.high 3817748708, %v19147_v10, %v19180_v13  ;;  %v19188_v58 = vadd.s32 18, %v19137_v45  ;;  %v19192_v16 = vadd.s32 192, %v18813_v18 }
 0x167   : > { %21661 = vst [vmem:[#allocation23_spill] sm:$0xff] %v19177_v5  ;;  %v19198_v29 = vsub.s32 %v18965_v33, %v369_v4  ;;  %v19201_v2 = vmul.u32.u64.low 3817748708, %v19154_v7  ;;  %v19202_v13 = vmul.u32.u64.high 3817748708, %v19154_v7, %v19201_v2  ;;  %v21665_v59 = vmov 0 }
 0x168   : > { %v21666_v59 = vsel %vm19210_vm2, 4294967295, %v21665_v59  ;;  %v402_v62 = vmul.u32 18, %v401_v9  ;;  %v19215_v22 = vmul.u32.u64.low 3817748708, %v19174_v1  ;;  %v19216_v51 = vmul.u32.u64.high 3817748708, %v19174_v1, %v19215_v22 }
 0x169   : > { %21663 = vst [vmem:[#allocation25_spill] sm:$0xff] %v19198_v29  ;;  %v19219_v33 = vadd.s32 216, %v18813_v18  ;;  %v21667_v4 = vmov 0  ;;  %v390_v2 = vshrl.u32 %v19144_v48, 4  ;;  %vm21669_vm3 = vcmp.ne.s32.totalorder %v19104_v23, 0 }
 0x16a   : > { %v21668_v4 = vsel %vm19225_vm7, 4294967295, %v21667_v4  ;;  %v19232_v9 = vmul.u32.u64.low 3817748708, %v19184_v25  ;;  %v19233_v57 = vmul.u32.u64.high 3817748708, %v19184_v25, %v19232_v9  ;;  %vm21670_vm8 = vcmp.lt.s32.totalorder %v19104_v23, 0 }
 0x16b   : > { %vm19239_vm15 = vmand %vm21670_vm8, %vm21669_vm3  ;;  %v21671_v22 = vmov 0  ;;  %v19246_v21 = vmul.u32.u64.low 3817748708, %v19192_v16  ;;  %v19247_v49 = vmul.u32.u64.high 3817748708, %v19192_v16, %v19246_v21  ;;  %vm21675_vm6 = vcmp.ne.s32.totalorder %v19137_v45, 0 }
 0x16c   : > { %v21672_v22 = vsel %vm19239_vm15, 4294967295, %v21671_v22  ;;  %vm21676_vm0 = vcmp.lt.s32.totalorder %v19137_v45, 0  ;;  %v21677_v9 = vmov 0  ;;  %vm618_vm8 = vcmp.ne.s32.totalorder %v19198_v29, 0 }
 0x16d   : > { %21673 = vst [vmem:[#allocation27_spill] sm:$0xff] %v21672_v22  ;;  %vm19255_vm13 = vmand %vm21676_vm0, %vm21675_vm6  ;;  %vm654_vm3 = vcmp.lt.s32.totalorder %v19198_v29, 0  ;;  %v445_v46 = vshrl.u32 %v19164_v26, 4  ;;  %vm21680_vm5 = vcmp.ne.s32.totalorder %v19140_v63, 0  ;;  %vm21681_vm11 = vcmp.lt.s32.totalorder %v19140_v63, 0 }
 0x16e   : > { %v21678_v9 = vsel %vm19255_vm13, 4294967295, %v21677_v9  ;;  %vm19269_vm9 = vmand %vm21681_vm11, %vm21680_vm5  ;;  %v21682_v21 = vmov 0  ;;  %v19277_v20 = vadd.s32 18, %v19177_v5  ;;  %vm21685_vm11 = vcmp.ne.s32.totalorder %v19177_v5, 0 }
 0x16f   : > { %v21683_v21 = vsel %vm19269_vm9, 4294967295, %v21682_v21  ;;  %vm21686_vm0 = vcmp.lt.s32.totalorder %v19177_v5, 0  ;;  %v19296_v42 = vadd.s32 18, %v19198_v29  ;;  %v434_v15 = vshrl.u32 %v19181_v60, 4  ;;  %vm19311_vm6 = vmand %vm654_vm3, %vm618_vm8 }
 0x170   : > { %21684 = vst [vmem:[#allocation30_spill] sm:$0xff] %v19277_v20  ;;  %vm19291_vm5 = vmand %vm21686_vm0, %vm21685_vm11  ;;  %v21691_v3 = vmov 0  ;;  %v19316_v60 = vsub.s32 %v19030_v55, %v402_v62  ;;  %v446_v23 = vmul.u32 18, %v445_v46  ;;  %v467_v37 = vshrl.u32 %v19202_v13, 4 }
 0x171   : > { %21690 = vst [vmem:[#allocation32_spill] sm:$0xff] %v19296_v42  ;;  %v21692_v3 = vsel %vm19311_vm6, 4294967295, %v21691_v3  ;;  %v456_v62 = vshrl.u32 %v19216_v51, 4  ;;  %v489_v55 = vshrl.u32 %v19233_v57, 4 }
 0x172   : > { %21693 = vst [vmem:[#allocation33_spill] sm:$0xff] %v21692_v3  ;;  %21694 = vst [vmem:[#allocation34_spill] sm:$0xff] %v19316_v60  ;;  %v19356_v3 = vadd.s32 18, %v19316_v60  ;;  %v468_v57 = vmul.u32 18, %v467_v37  ;;  %vm21702_vm0 = vcmp.ne.s32.totalorder %v19316_v60, 0  ;;  %vm21703_vm3 = vcmp.lt.s32.totalorder %v19316_v60, 0 }
 0x173   : > { %v457_v46 = vmul.u32 18, %v456_v62 }
 0x174   : > { %21696 = vst [vmem:[#allocation36_spill] sm:$0xff] %v19356_v3 }
 0x1c0   : > { %v19120_v39 = vpop.f32.mrb[0].mxu1 }
 0x1c1   : > { %v19132_v44 = vpop.f32.mrb[1].mxu1 }
 0x1c4   : > { %v19156_v12 = vpop.f32.mrb[2].mxu1 }
 0x1c5   : > { %v19166_v6 = vpop.f32.mrb[3].mxu1 }
 0x1c6   : > { %21659 = vst [vmem:[#allocation21_spill] sm:$0xff] %v19166_v6  ;;  %v391_v6 = vmul.u32 18, %v390_v2 }
 0x1c8   : > { %v19194_v56 = vpop.f32.mrb[4].mxu1  ;;  %v19344_v13 = vsub.s32 %v19110_v28, %v391_v6 }
 0x1c9   : > { %21662 = vst [vmem:[#allocation24_spill] sm:$0xff] %v19194_v56  ;;  %v19204_v11 = vpop.f32.mrb[5].mxu1 }
 0x1ca   : > { %21664 = vst [vmem:[#allocation26_spill] sm:$0xff] %v19204_v11  ;;  %v423_v11 = vshrl.u32 %v19151_v8, 4  ;;  %v412_v8 = vshrl.u32 %v19160_v24, 4  ;;  %v19280_v24 = vmul.u32.u64.low 3817748708, %v19219_v33  ;;  %v19281_v35 = vmul.u32.u64.high 3817748708, %v19219_v33, %v19280_v24  ;;  %21695 = vst [vmem:[#allocation35_spill] sm:$0xff] %v19344_v13 }
 0x1cb   : > { %v19337_v24 = vadd.s32 208, %v18813_v18  ;;  %vm21707_vm6 = vcmp.ne.s32.totalorder %v19344_v13, 0  ;;  %vm21708_vm11 = vcmp.lt.s32.totalorder %v19344_v13, 0  ;;  %v19445_v42 = vadd.s32 18, %v19344_v13 }
 0x1cc   : > { %v19249_v48 = vpop.f32.mrb[6].mxu1  ;;  %v424_v2 = vmul.u32 18, %v423_v11  ;;  %v413_v26 = vmul.u32 18, %v412_v8  ;;  %v478_v11 = vshrl.u32 %v19247_v49, 4  ;;  %vm19410_vm13 = vmand %vm21708_vm11, %vm21707_vm6  ;;  %v21745_v13 = vmov 0 }
 0x1cd   : > { %21674 = vst [vmem:[#allocation28_spill] sm:$0xff] %v19249_v48  ;;  %v19263_v56 = vpop.f32.mrb[7].mxu1  ;;  %v19274_v48 = vadd.s32 18, %v19140_v63  ;;  %v435_v8 = vmul.u32 18, %v434_v15  ;;  %v19362_v15 = vsub.s32 %v19130_v43, %v446_v23  ;;  %21719 = vst [vmem:[#allocation47_spill] sm:$0xff] %v19445_v42  ;;  %v21749_v42 = vmov 0 }
 0x1ce   : > { %21679 = vst [vmem:[#allocation29_spill] sm:$0xff] %v19263_v56  ;;  %v21687_v56 = vmov 0  ;;  %v19350_v51 = vsub.s32 %v19118_v54, %v424_v2  ;;  %v19359_v28 = vsub.s32 %v19127_v41, %v413_v26  ;;  %v511_v54 = vshrl.u32 %v19281_v35, 4 }
 0x1cf   : > { %v21688_v56 = vsel %vm19291_vm5, 4294967295, %v21687_v56  ;;  %v19368_v2 = vmul.u32.u64.low 3817748708, %v19337_v24  ;;  %v19369_v49 = vmul.u32.u64.high 3817748708, %v19337_v24, %v19368_v2  ;;  %v19373_v29 = vsub.s32 %v19147_v10, %v435_v8  ;;  %vm19397_vm5 = vmand %vm21703_vm3, %vm21702_vm0 }
 0x1d0   : > { %21689 = vst [vmem:[#allocation31_spill] sm:$0xff] %v21688_v56  ;;  %v19318_v32 = vpop.f32.mrb[8].mxu1  ;;  %21697 = vst [vmem:[#allocation37_spill] sm:$0xff] %v19359_v28  ;;  %v490_v41 = vmul.u32 18, %v489_v55  ;;  %v19376_v26 = vadd.s32 232, %v18813_v18  ;;  %v479_v23 = vmul.u32 18, %v478_v11  ;;  %v19389_v10 = vsub.s32 %v19154_v7, %v468_v57 }
 0x1d1   : > { %v19325_v22 = vpop.f32.mrb[9].mxu1  ;;  %21698 = vst [vmem:[#allocation38_spill] sm:$0xff] %v19373_v29  ;;  %v19381_v35 = vadd.s32 224, %v18813_v18  ;;  %v21704_v55 = vmov 0  ;;  %v19404_v11 = vsub.s32 %v19174_v1, %v457_v46  ;;  %v512_v62 = vmul.u32 18, %v511_v54 }
 0x1d2   : > { %21700 = vst [vmem:[#allocation40_spill] sm:$0xff] %v19389_v10  ;;  %v21705_v55 = vsel %vm19397_vm5, 4294967295, %v21704_v55  ;;  %v21709_v7 = vmov 0  ;;  %v19416_v8 = vsub.s32 %v19184_v25, %v490_v41  ;;  %vm21713_vm0 = vcmp.ne.s32.totalorder %v19350_v51, 0 }
 0x1d3   : > { %21706 = vst [vmem:[#allocation42_spill] sm:$0xff] %v21705_v55  ;;  %v21710_v7 = vsel %vm19410_vm13, 4294967295, %v21709_v7  ;;  %v19419_v57 = vmul.u32.u64.low 3817748708, %v19376_v26  ;;  %v19420_v2 = vmul.u32.u64.high 3817748708, %v19376_v26, %v19419_v57  ;;  %vm21714_vm8 = vcmp.lt.s32.totalorder %v19350_v51, 0 }
 0x1d4   : > { %v19353_v5 = vpop.f32.mrb[10].mxu1  ;;  %21711 = vst [vmem:[#allocation43_spill] sm:$0xff] %v21710_v7  ;;  %21712 = vst [vmem:[#allocation44_spill] sm:$0xff] %v19416_v8  ;;  %v19432_v46 = vsub.s32 %v19192_v16, %v479_v23  ;;  %v19435_v25 = vmul.u32.u64.low 3817748708, %v19381_v35  ;;  %v19436_v54 = vmul.u32.u64.high 3817748708, %v19381_v35, %v19435_v25  ;;  %vm21721_vm11 = vcmp.lt.s32.totalorder %v19359_v28, 0 }
 0x1d5   : > { %v19364_v6 = vpop.f32.mrb[11].mxu1  ;;  %vm19426_vm9 = vmand %vm21714_vm8, %vm21713_vm0  ;;  %vm21720_vm8 = vcmp.ne.s32.totalorder %v19359_v28, 0  ;;  %vm627_vm6 = vcmp.ne.s32.totalorder %v19389_v10, 0  ;;  %vm663_vm3 = vcmp.lt.s32.totalorder %v19389_v10, 0  ;;  %vm21725_vm15 = vcmp.ne.s32.totalorder %v19362_v15, 0 }
 0x1d6   : > { %21717 = vst [vmem:[#allocation45_spill] sm:$0xff] %v19432_v46  ;;  %vm19451_vm0 = vmand %vm21721_vm11, %vm21720_vm8  ;;  %vm21726_vm5 = vcmp.lt.s32.totalorder %v19362_v15, 0  ;;  %v21727_v25 = vmov 0  ;;  %v19470_v57 = vsub.s32 %v19219_v33, %v512_v62  ;;  %v500_v60 = vshrl.u32 %v19369_v49, 4 }
 0x1d7   : > { %vm19463_vm7 = vmand %vm21726_vm5, %vm21725_vm15  ;;  %v19474_v3 = vadd.s32 18, %v19350_v51  ;;  %vm21730_vm15 = vcmp.ne.s32.totalorder %v19373_v29, 0  ;;  %vm21731_vm5 = vcmp.lt.s32.totalorder %v19373_v29, 0  ;;  %v21732_v55 = vmov 0  ;;  %v21909_v1 = vld [vmem:[#allocation37_spill] sm:$0xff] }
 0x1d8   : > { %v19383_v43 = vpop.f32.mrb[12].mxu1  ;;  %v21728_v25 = vsel %vm19463_vm7, 4294967295, %v21727_v25  ;;  %21729 = vst [vmem:[#allocation49_spill] sm:$0xff] %v19470_v57  ;;  %vm19483_vm11 = vmand %vm21731_vm5, %vm21730_vm15  ;;  %vm629_vm8 = vcmp.ne.s32.totalorder %v19416_v8, 0  ;;  %v19490_v33 = vadd.s32 18, %v19362_v15  ;;  %v19493_v49 = vadd.s32 18, %v19373_v29 }
 0x1d9   : > { %21699 = vst [vmem:[#allocation39_spill] sm:$0xff] %v19383_v43  ;;  %v19391_v37 = vpop.f32.mrb[13].mxu1  ;;  %v21733_v55 = vsel %vm19483_vm11, 4294967295, %v21732_v55  ;;  %vm19499_vm1 = vmand %vm663_vm3, %vm627_vm6  ;;  %v21734_v62 = vmov 0  ;;  %v19512_v20 = vadd.s32 18, %v19389_v10  ;;  %vm21737_vm2 = vcmp.ne.s32.totalorder %v19404_v11, 0 }
 0x1da   : > { %21701 = vst [vmem:[#allocation41_spill] sm:$0xff] %v19391_v37  ;;  %v21735_v62 = vsel %vm19499_vm1, 4294967295, %v21734_v62  ;;  %vm21738_vm3 = vcmp.lt.s32.totalorder %v19404_v11, 0  ;;  %v21739_v56 = vmov 0  ;;  %v19523_v43 = vadd.s32 18, %v19404_v11 }
 0x1db   : > { %vm19518_vm6 = vmand %vm21738_vm3, %vm21737_vm2  ;;  %v21744_v37 = vsel %vm18939_vm10, %v18876_v50, %v18858_v53  ;;  %vm21748_vm2 = vcmp.lt.s32.totalorder %v19416_v8, 0  ;;  %v19548_v7 = vadd.s32 18, %v19432_v46  ;;  %vm631_vm15 = vcmp.ne.s32.totalorder %v19470_v57, 0 }
 0x1dc   : > { %v19438_v41 = vpop.f32.mrb[14].mxu1  ;;  %v21740_v56 = vsel %vm19518_vm6, 4294967295, %v21739_v56  ;;  %vm19535_vm5 = vcmp.lt.s32.totalorder %v21744_v37, 16  ;;  %vm19543_vm3 = vmand %vm21748_vm2, %vm629_vm8  ;;  %v501_v53 = vmul.u32 18, %v500_v60  ;;  %v21753_v50 = vsel %vm18955_vm12, %v18907_v14, %v18870_v47 }
 0x1dd   : > { %21718 = vst [vmem:[#allocation46_spill] sm:$0xff] %v19438_v41  ;;  %v19457_v23 = vpop.f32.mrb[15].mxu1  ;;  %21741 = vst [vmem:[#allocation51_spill] sm:$0xff] %v21740_v56  ;;  %v21746_v13 = vsel %vm19535_vm5, 4294967295, %v21745_v13  ;;  %v21750_v42 = vsel %vm19543_vm3, 4294967295, %v21749_v42  ;;  %vm19557_vm10 = vcmp.lt.s32.totalorder %v21753_v50, 16  ;;  %v21767_v50 = vsel %vm18971_vm14, %v18914_v17, %v18878_v52 }
 0x1de   : > { %21724 = vst [vmem:[#allocation48_spill] sm:$0xff] %v19457_v23  ;;  %v19477_v23 = vadd.s32 18, %v19359_v28  ;;  %21747 = vst [vmem:[#allocation54_spill] sm:$0xff] %v21746_v13  ;;  %v21755_v27 = vsel %vm19557_vm10, 4294967295, %v21754_v27  ;;  %vm21757_vm8 = vcmp.ne.s32.totalorder %v19432_v46, 0  ;;  %vm21758_vm2 = vcmp.lt.s32.totalorder %v19432_v46, 0 }
 0x1df   : > { %21751 = vst [vmem:[#allocation55_spill] sm:$0xff] %v21750_v42  ;;  %21752 = vst [vmem:[#allocation56_spill] sm:$0xff] %v19548_v7  ;;  %v21759_v47 = vmov 0  ;;  %v533_v14 = vshrl.u32 %v19420_v2, 4  ;;  %v522_v37 = vshrl.u32 %v19436_v54, 4  ;;  %vm21763_vm12 = vcmp.lt.s32.totalorder %v19470_v57, 0 }
 0x1e0   : > { %v19505_v41 = vpop.f32.mrb[16].mxu1  ;;  %21756 = vst [vmem:[#allocation57_spill] sm:$0xff] %v21755_v27  ;;  %vm19573_vm13 = vmand %vm21758_vm2, %vm21757_vm8  ;;  %v19596_v2 = vld [vmem:[%s21513_s2] ss:$0 sm:$0xff]  ;;  %v21764_v29 = vmov 0  ;;  %v19619_v60 = vadd.s32 240, %v18813_v18  ;;  %v21770_v52 = vsel %vm18985_vm4, %v18919_v19, %v18888_v0 }
 0x1e1   : > { %21736 = vst [vmem:[#allocation50_spill] sm:$0xff] %v19505_v41  ;;  %v19526_v41 = vadd.s32 18, %v19416_v8  ;;  %v19528_v63 = vpop.f32.mrb[17].mxu1  ;;  %v21760_v47 = vsel %vm19573_vm13, 4294967295, %v21759_v47  ;;  %vm19614_vm8 = vmand %vm21763_vm12, %vm631_vm15  ;;  %vm19627_vm2 = vcmp.lt.s32.totalorder %v21767_v50, 16  ;;  %v21768_v54 = vmov 0 }
 0x1e2   : > { %21743 = vst [vmem:[#allocation53_spill] sm:$0xff] %v19528_v63  ;;  %21761 = vst [vmem:[#allocation58_spill] sm:$0xff] %v21760_v47  ;;  %v19590_v63 = vadd.s32 18, %v19470_v57  ;;  %v21765_v29 = vsel %vm19614_vm8, 4294967295, %v21764_v29  ;;  %v21769_v54 = vsel %vm19627_vm2, 4294967295, %v21768_v54  ;;  %vm19647_vm14 = vcmp.lt.s32.totalorder %v21770_v52, 16 }
 0x1e3   : > { %21742 = vst [vmem:[#allocation52_spill] sm:$0xff] %v19526_v41  ;;  %21766 = vst [vmem:[#allocation60_spill] sm:$0xff] %v21765_v29  ;;  %v19636_v41 = vsub.s32 %v19337_v24, %v501_v53  ;;  %v21771_v17 = vmov 0  ;;  %v19652_v50 = vmul.u32.u64.low 3817748708, %v19579_v30  ;;  %v19653_v8 = vmul.u32.u64.high 3817748708, %v19579_v30, %v19652_v50  ;;  %v21780_v46 = vld [vmem:[#allocation10_spill] sm:$0xff] }
 0x1e4   : > { %21762 = vst [vmem:[#allocation59_spill] sm:$0xff] %v19590_v63  ;;  %v15657_v28 = vpop.f32.mrb[0].mxu0  ;;  %v21772_v17 = vsel %vm19647_vm14, 4294967295, %v21771_v17  ;;  %v523_v36 = vmul.u32 18, %v522_v37  ;;  %v19670_v52 = vadd.s32 280, %v18813_v18  ;;  %vm21774_vm15 = vnez %v21638_v38  ;;  %v21775_v37 = vld [vmem:[#allocation4_spill] sm:$0xff] }
 0x1e5   : > { %v16719_v10 = vadd.f32 %v15657_v28, %v19120_v39  ;;  %v4404_v56 = vpop.f32.mrb[1].mxu0  ;;  %v19639_v39 = vadd.s32 264, %v18813_v18  ;;  %21773 = vst [vmem:[#allocation61_spill] sm:$0xff] %v21772_v17  ;;  %v534_v28 = vmul.u32 18, %v533_v14  ;;  %v21776_v57 = vsel %vm21774_vm15, %v18961_v31, %v21775_v37  ;;  %v21779_v63 = vld [vmem:[#allocation21_spill] sm:$0xff]  ;;  %v21811_v42 = vld [vmem:[#allocation16_spill] sm:$0xff] }
 0x1e6   : > { %v16720_v34 = vadd.f32 %v4404_v56, %v19132_v44  ;;  %v19661_v44 = vadd.s32 256, %v18813_v18  ;;  %v19665_v53 = vmul.u32.u64.low 3817748708, %v19619_v60  ;;  %v19666_v14 = vmul.u32.u64.high 3817748708, %v19619_v60, %v19665_v53  ;;  %v21782_v7 = vld [vmem:[#allocation9_spill] sm:$0xff]  ;;  %v21821_v17 = vld [vmem:[#allocation19_spill] sm:$0xff] }
 0x1e7   : > { %v4627_v24 = vadd.f32 %v16719_v10, %v19596_v2  ;;  %vm19678_vm12 = vcmp.lt.s32.totalorder %v21776_v57, 16  ;;  %vm21781_vm3 = vnez %v21780_v46  ;;  %v21785_v38 = vmov 0  ;;  %v21800_v27 = vld [vmem:[#allocation13_spill] sm:$0xff] }
 0x1e8   : > { %v4626_v0 = vadd.f32 %v16720_v34, %v19596_v2  ;;  %v15660_v19 = vpop.f32.mrb[2].mxu0  ;;  %v21777_v34 = vmov 0  ;;  %v19696_v37 = vadd.s32 18, %v19636_v41  ;;  %v19699_v47 = vsub.s32 %v19376_v26, %v534_v28 }
 0x1e9   : > { %vm4663_vm4 = vcmp.ge.f32.partialorder %v4627_v24, 0.0  ;;  %v4699_v10 = vmul.f32 0.2, %v4627_v24  ;;  %v16721_v50 = vadd.f32 %v15660_v19, %v19156_v12  ;;  %v4414_v56 = vpop.f32.mrb[3].mxu0  ;;  %v21778_v34 = vsel %vm19678_vm12, 4294967295, %v21777_v34  ;;  %v21783_v12 = vld [vmem:[#allocation5_spill] sm:$0xff] }
 0x1ea   : > { %vm4662_vm13 = vcmp.ge.f32.partialorder %v4626_v0, 0.0  ;;  %v4698_v53 = vmul.f32 0.2, %v4626_v0  ;;  %v16722_v29 = vadd.f32 %v4414_v56, %v21779_v63  ;;  %v21784_v19 = vsel %vm21781_vm3, %v21782_v7, %v21783_v12 }
 0x1eb   : > { %vm19689_vm6 = vcmp.lt.s32.totalorder %v21784_v19, 16  ;;  %v4735_v31 = vsel %vm4663_vm4, %v4627_v24, %v4699_v10  ;;  %v4629_v57 = vadd.f32 %v16721_v50, %v19596_v2  ;;  %v19705_v12 = vsub.s32 %v19381_v35, %v523_v36  ;;  %v21788_v50 = vld [vmem:[#allocation24_spill] sm:$0xff]  ;;  %v21789_v19 = vld [vmem:[#allocation11_spill] sm:$0xff]  ;;  %v21797_v36 = vld [vmem:[#allocation26_spill] sm:$0xff] }
 0x1ec   : > { %v21786_v38 = vsel %vm19689_vm6, 4294967295, %v21785_v38  ;;  %v4884_v63 = vsel %vm19535_vm5, %v4735_v31, 0.0  ;;  %v4734_v46 = vsel %vm4662_vm13, %v4626_v0, %v4698_v53  ;;  %v4628_v7 = vadd.f32 %v16722_v29, %v19596_v2  ;;  %v15663_v56 = vpop.f32.mrb[4].mxu0  ;;  %v21791_v31 = vld [vmem:[#allocation12_spill] sm:$0xff]  ;;  %v21792_v0 = vld [vmem:[#allocation6_spill] sm:$0xff] }
 0x1ed   : > { %vm21787_vm3 = vcmask 31744   ;;  %v4883_v24 = vsel %vm19557_vm10, %v4734_v46, 0.0  ;;  %vm4665_vm4 = vcmp.ge.f32.partialorder %v4629_v57, 0.0  ;;  %v4701_v10 = vmul.f32 0.2, %v4629_v57  ;;  %v4424_v28 = vpop.f32.mrb[5].mxu0 }
 0x1ee   : > { %4920 = vst.msk [vmem:[#allocation2 + $0x1b] sm:$0xff] %vm21787_vm3, %v4884_v63  ;;  %v16723_v26 = vadd.f32 %v15663_v56, %v21788_v50  ;;  %vm21790_vm15 = vnez %v21789_v19  ;;  %v21794_v29 = vmov 0  ;;  %vm21796_vm8 = vmmov %vm21787_vm3  ;;  %vm4664_vm3 = vcmp.ge.f32.partialorder %v4628_v7, 0.0  ;;  %v21798_v46 = vld [vmem:[#allocation14_spill] sm:$0xff]  ;;  %v21801_v56 = vld [vmem:[#allocation7_spill] sm:$0xff] }
 0x1ef   : > { %v21793_v53 = vsel %vm21790_vm15, %v21791_v31, %v21792_v0  ;;  %4919 = vst.msk [vmem:[#allocation2 + $0x13] sm:$0xff] %vm21796_vm8, %v4883_v24  ;;  %v4700_v35 = vmul.f32 0.2, %v4628_v7  ;;  %v16724_v63 = vadd.f32 %v4424_v28, %v21797_v36  ;;  %vm21799_vm10 = vnez %v21798_v46 }
 0x1f0   : > { %vm19716_vm13 = vcmp.lt.s32.totalorder %v21793_v53, 16  ;;  %v21802_v50 = vsel %vm21799_vm10, %v21800_v27, %v21801_v56  ;;  %v21803_v19 = vmov 0  ;;  %v555_v31 = vshrl.u32 %v19653_v8, 4 }
 0x1f1   : > { %v21795_v29 = vsel %vm19716_vm13, 4294967295, %v21794_v29  ;;  %vm19727_vm5 = vcmp.lt.s32.totalorder %v21802_v50, 16  ;;  %v4737_v0 = vsel %vm4665_vm4, %v4629_v57, %v4701_v10  ;;  %v4631_v53 = vadd.f32 %v16723_v26, %v19596_v2  ;;  %v15666_v10 = vpop.f32.mrb[6].mxu0  ;;  %v21810_v50 = vld [vmem:[#allocation28_spill] sm:$0xff] }
 0x1f2   : > { %v21804_v19 = vsel %vm19727_vm5, 4294967295, %v21803_v19  ;;  %vm21805_vm8 = vcmp.ne.s32.totalorder %v19636_v41, 0  ;;  %vm21806_vm15 = vcmp.lt.s32.totalorder %v19636_v41, 0  ;;  %v21807_v24 = vmov 0 }
 0x1f3   : > { %vm19737_vm1 = vmand %vm21806_vm15, %vm21805_vm8  ;;  %v19742_v28 = vmul.u32.u64.low 3817748708, %v19639_v39  ;;  %v19743_v27 = vmul.u32.u64.high 3817748708, %v19639_v39, %v19742_v28  ;;  %v4886_v36 = vsel %vm19627_vm2, %v4737_v0, 0.0  ;;  %v4736_v8 = vsel %vm4664_vm3, %v4628_v7, %v4700_v35  ;;  %v21813_v0 = vld [vmem:[#allocation15_spill] sm:$0xff]  ;;  %v21814_v7 = vld [vmem:[#allocation8_spill] sm:$0xff] }
 0x1f4   : > { %v21808_v24 = vsel %vm19737_vm1, 4294967295, %v21807_v24  ;;  %v4630_v57 = vadd.f32 %v16724_v63, %v19596_v2  ;;  %v19750_v26 = vadd.s32 272, %v18813_v18  ;;  %vm21809_vm10 = vcmask 31744   ;;  %v4434_v28 = vpop.f32.mrb[7].mxu0 }
 0x1f5   : > { %4922 = vst.msk [vmem:[#allocation2 + $0x2b] sm:$0xff] %vm21809_vm10, %v4886_v36  ;;  %v4885_v46 = vsel %vm19647_vm14, %v4736_v8, 0.0  ;;  %vm4667_vm4 = vcmp.ge.f32.partialorder %v4631_v53, 0.0  ;;  %v4703_v56 = vmul.f32 0.2, %v4631_v53  ;;  %v16725_v13 = vadd.f32 %v15666_v10, %v21810_v50  ;;  %vm21818_vm15 = vmmov %vm21809_vm10  ;;  %v21819_v36 = vld [vmem:[#allocation29_spill] sm:$0xff] }
 0x1f6   : > { %vm21812_vm8 = vnez %v21811_v42  ;;  %v21816_v63 = vmov 0  ;;  %4921 = vst.msk [vmem:[#allocation2 + $0x23] sm:$0xff] %vm21818_vm15, %v4885_v46  ;;  %vm4666_vm10 = vcmp.ge.f32.partialorder %v4630_v57, 0.0  ;;  %v4702_v18 = vmul.f32 0.2, %v4630_v57  ;;  %v21822_v10 = vld [vmem:[#allocation17_spill] sm:$0xff] }
 0x1f7   : > { %v21815_v35 = vsel %vm21812_vm8, %v21813_v0, %v21814_v7  ;;  %v16726_v8 = vadd.f32 %v4434_v28, %v21819_v36  ;;  %vm21820_vm14 = vnez %v21666_v59  ;;  %v21824_v42 = vmov 0 }
 0x1f8   : > { %vm19761_vm3 = vcmp.lt.s32.totalorder %v21815_v35, 16  ;;  %v21823_v50 = vsel %vm21820_vm14, %v21821_v17, %v21822_v10  ;;  %v4739_v7 = vsel %vm4667_vm4, %v4631_v53, %v4703_v56  ;;  %v4633_v46 = vadd.f32 %v16725_v13, %v19596_v2  ;;  %v15669_v35 = vpop.f32.mrb[8].mxu0  ;;  %vm21826_vm14 = vmmov %vm21818_vm15 }
 0x1f9   : > { %v21817_v63 = vsel %vm19761_vm3, 4294967295, %v21816_v63  ;;  %vm19772_vm2 = vcmp.lt.s32.totalorder %v21823_v50, 16  ;;  %v4888_v59 = vsel %vm19678_vm12, %v4739_v7, 0.0  ;;  %v4738_v17 = vsel %vm4666_vm10, %v4630_v57, %v4702_v18  ;;  %v4444_v10 = vpop.f32.mrb[9].mxu0  ;;  %v4995_v50 = vld [vmem:[#allocation2 + $0x11] sm:$0xff]  ;;  %vm21832_vm8 = vmmov %vm21826_vm14 }
 0x1fa   : > { %v21825_v42 = vsel %vm19772_vm2, 4294967295, %v21824_v42  ;;  %v4632_v28 = vadd.f32 %v16726_v8, %v19596_v2  ;;  %v19787_v36 = vadd.s32 18, %v19699_v47  ;;  %4924 = vst.msk [vmem:[#allocation2 + $0x3b] sm:$0xff] %vm21826_vm14, %v4888_v59  ;;  %v4887_v53 = vsel %vm19689_vm6, %v4738_v17, 0.0  ;;  %vm21833_vm6 = vmmov %vm21832_vm8  ;;  %v21834_v59 = vld [vmem:[#allocation27_spill] sm:$0xff]  ;;  %v21836_v17 = vld [vmem:[#allocation22_spill] sm:$0xff] }
 0x1fb   : > { %vm4669_vm4 = vcmp.ge.f32.partialorder %v4633_v46, 0.0  ;;  %v4705_v13 = vmul.f32 0.2, %v4633_v46  ;;  %v16727_v56 = vadd.f32 %v15669_v35, %v19318_v32  ;;  %vm21827_vm15 = vnez %v21668_v4  ;;  %4923 = vst.msk [vmem:[#allocation2 + $0x33] sm:$0xff] %vm21832_vm8, %v4887_v53  ;;  %15714 = vmatprep.mubr.msk.f32.mxu1 %vm21833_vm6, %v4995_v50  ;;  %v4996_v32 = vld [vmem:[#allocation2 + $0x19] sm:$0xff]  ;;  %vm21842_vm8 = vmmov %vm21833_vm6  ;;  %v15672_v50 = vpop.f32.mrb[10].mxu0 }
 0x1fc   : > { %v21828_v57 = vsel %vm21827_vm15, %v19124_v40, %v19085_v61  ;;  %v21829_v18 = vmov 0  ;;  %vm4668_vm14 = vcmp.ge.f32.partialorder %v4632_v28, 0.0  ;;  %v4704_v8 = vmul.f32 0.2, %v4632_v28  ;;  %v21837_v4 = vld [vmem:[#allocation18_spill] sm:$0xff]  ;;  %15715 = vmatmul.mubr.msk.f32.gmra.mrb[38].mxu1 %vm21842_vm8, %v4996_v32 }
 0x1fd   : > { %vm19798_vm10 = vcmp.lt.s32.totalorder %v21828_v57, 16  ;;  %v16728_v7 = vadd.f32 %v4444_v10, %v19325_v22  ;;  %vm21835_vm12 = vnez %v21834_v59  ;;  %v21839_v61 = vmov 0 }
 0x1fe   : > { %v21830_v18 = vsel %vm19798_vm10, 4294967295, %v21829_v18  ;;  %v21838_v35 = vsel %vm21835_vm12, %v21836_v17, %v21837_v4  ;;  %v4741_v40 = vsel %vm4669_vm4, %v4633_v46, %v4705_v13  ;;  %v4635_v53 = vadd.f32 %v16727_v56, %v19596_v2  ;;  %vm21847_vm4 = vmmov %vm21842_vm8  ;;  %v4454_v4 = vpop.f32.mrb[11].mxu0 }
 0x1ff   : > { %21831 = vst [vmem:[#allocation4_spill] sm:$0xff] %v21830_v18  ;;  %vm19810_vm1 = vcmp.lt.s32.totalorder %v21838_v35, 16  ;;  %vm21843_vm11 = vcmp.ne.s32.totalorder %v19699_v47, 0  ;;  %vm21844_vm6 = vcmp.lt.s32.totalorder %v19699_v47, 0  ;;  %v19827_v10 = vadd.s32 18, %v19705_v12  ;;  %v4997_v35 = vld [vmem:[#allocation2 + $0x21] sm:$0xff] }
 0x200   : > { %v21840_v61 = vsel %vm19810_vm1, 4294967295, %v21839_v61  ;;  %vm19821_vm7 = vmand %vm21844_vm6, %vm21843_vm11  ;;  %v4890_v46 = vsel %vm19716_vm13, %v4741_v40, 0.0  ;;  %v4740_v13 = vsel %vm4668_vm14, %v4632_v28, %v4704_v8  ;;  %v4634_v56 = vadd.f32 %v16728_v7, %v19596_v2 }
 0x201   : > { %21841 = vst [vmem:[#allocation21_spill] sm:$0xff] %v21840_v61  ;;  %v556_v57 = vmul.u32 18, %v555_v31  ;;  %4926 = vst.msk [vmem:[#allocation2 + $0x4b] sm:$0xff] %vm21847_vm4, %v4890_v46  ;;  %v4889_v32 = vsel %vm19727_vm5, %v4740_v13, 0.0  ;;  %vm4671_vm11 = vcmp.ge.f32.partialorder %v4635_v53, 0.0  ;;  %v16729_v17 = vadd.f32 %v15672_v50, %v19353_v5  ;;  %v4998_v5 = vld [vmem:[#allocation2 + $0x29] sm:$0xff] }
 0x202   : > { %v4707_v59 = vmul.f32 0.2, %v4635_v53  ;;  %vm21848_vm8 = vnez %v21678_v9  ;;  %v21850_v8 = vmov 0  ;;  %vm21852_vm6 = vmmov %vm21847_vm4  ;;  %vm4670_vm4 = vcmp.ge.f32.partialorder %v4634_v56, 0.0  ;;  %v21855_v9 = vld [vmem:[#allocation20_spill] sm:$0xff]  ;;  %v21896_v61 = vld [vmem:[#allocation47_spill] sm:$0xff] }
 0x203   : > { %v21849_v28 = vsel %vm21848_vm8, %v19188_v58, %v19137_v45  ;;  %4925 = vst.msk [vmem:[#allocation2 + $0x43] sm:$0xff] %vm21852_vm6, %v4889_v32  ;;  %v4706_v31 = vmul.f32 0.2, %v4634_v56  ;;  %v16730_v7 = vadd.f32 %v4454_v4, %v19364_v6  ;;  %vm21853_vm12 = vmmov %vm21852_vm6  ;;  %vm21854_vm15 = vnez %v21683_v21  ;;  %v15675_v4 = vpop.f32.mrb[12].mxu0 }
 0x204   : > { %vm19841_vm14 = vcmp.lt.s32.totalorder %v21849_v28, 16  ;;  %15717 = vmatprep.mubr.msk.f32.mxu1 %vm21853_vm12, %v4997_v35  ;;  %v21856_v40 = vsel %vm21854_vm15, %v19274_v48, %v21855_v9  ;;  %v21857_v58 = vmov 0  ;;  %v4743_v46 = vsel %vm4671_vm11, %v4635_v53, %v4707_v59  ;;  %vm21859_vm8 = vmmov %vm21852_vm6  ;;  %v4999_v9 = vld [vmem:[#allocation2 + $0x31] sm:$0xff] }
 0x205   : > { %v21851_v8 = vsel %vm19841_vm14, 4294967295, %v21850_v8  ;;  %vm19853_vm5 = vcmp.lt.s32.totalorder %v21856_v40, 16  ;;  %v4637_v6 = vadd.f32 %v16729_v17, %v19596_v2  ;;  %15718 = vmatmul.mubr.msk.f32.gmra.mrb[40].mxu1 %vm21859_vm8, %v4998_v5  ;;  %v4892_v48 = vsel %vm19761_vm3, %v4743_v46, 0.0  ;;  %vm21860_vm15 = vmmov %vm21852_vm6  ;;  %v21861_v17 = vld [vmem:[#allocation39_spill] sm:$0xff]  ;;  %v4464_v5 = vpop.f32.mrb[13].mxu0  ;;  %v21864_v46 = vld [vmem:[#allocation30_spill] sm:$0xff] }
 0x206   : > { %v21858_v58 = vsel %vm19853_vm5, 4294967295, %v21857_v58  ;;  %v19864_v13 = vmul.u32.u64.low 3817748708, %v19661_v44  ;;  %v19865_v21 = vmul.u32.u64.high 3817748708, %v19661_v44, %v19864_v13  ;;  %v4742_v50 = vsel %vm4670_vm4, %v4634_v56, %v4706_v31  ;;  %4928 = vst.msk [vmem:[#allocation2 + $0x5b] sm:$0xff] %vm21860_vm15, %v4892_v48  ;;  %v21862_v40 = vld [vmem:[#allocation31_spill] sm:$0xff]  ;;  %v21873_v48 = vld [vmem:[#allocation41_spill] sm:$0xff]  ;;  %vm21874_vm3 = vmmov %vm21853_vm12 }
 0x207   : > { %v4636_v32 = vadd.f32 %v16730_v7, %v19596_v2  ;;  %v544_v35 = vshrl.u32 %v19666_v14, 4  ;;  %v4891_v53 = vsel %vm19772_vm2, %v4742_v50, 0.0  ;;  %v4709_v59 = vmul.f32 0.2, %v4637_v6  ;;  %v21865_v56 = vld [vmem:[#allocation23_spill] sm:$0xff]  ;;  %15720 = vmatprep.mubr.msk.f32.mxu1 %vm21874_vm3, %v4999_v9 }
 0x208   : > { %v16731_v28 = vadd.f32 %v15675_v4, %v21861_v17  ;;  %vm21863_vm11 = vnez %v21862_v40  ;;  %v21867_v7 = vmov 0  ;;  %vm21869_vm4 = vcmp.ne.s32.totalorder %v19705_v12, 0  ;;  %4927 = vst.msk [vmem:[#allocation2 + $0x53] sm:$0xff] %vm21853_vm12, %v4891_v53  ;;  %v5000_v4 = vld [vmem:[#allocation2 + $0x39] sm:$0xff]  ;;  %v21877_v40 = vld [vmem:[#allocation32_spill] sm:$0xff] }
 0x209   : > { %v21866_v31 = vsel %vm21863_vm11, %v21864_v46, %v21865_v56  ;;  %vm21870_vm8 = vcmp.lt.s32.totalorder %v19705_v12, 0  ;;  %vm4672_vm2 = vcmp.ge.f32.partialorder %v4636_v32, 0.0  ;;  %v4708_v13 = vmul.f32 0.2, %v4636_v32  ;;  %v21875_v17 = vld [vmem:[#allocation33_spill] sm:$0xff] }
 0x20a   : > { %vm19881_vm6 = vcmp.lt.s32.totalorder %v21866_v31, 16  ;;  %vm19889_vm15 = vmand %vm21870_vm8, %vm21869_vm4  ;;  %v16732_v50 = vadd.f32 %v4464_v5, %v21873_v48  ;;  %vm21876_vm11 = vnez %v21875_v17  ;;  %v21878_v46 = vld [vmem:[#allocation25_spill] sm:$0xff]  ;;  %v21880_v31 = vmov 0 }
 0x20b   : > { %v21868_v7 = vsel %vm19881_vm6, 4294967295, %v21867_v7  ;;  %v21879_v56 = vsel %vm21876_vm11, %v21877_v40, %v21878_v46  ;;  %v19906_v45 = vsub.s32 %v19579_v30, %v556_v57  ;;  %vm21882_vm12 = vcmp.ge.f32.partialorder %v4637_v6, 0.0  ;;  %vm21883_vm4 = vmmov %vm21874_vm3  ;;  %v15678_v46 = vpop.f32.mrb[14].mxu0 }
 0x20c   : > { %vm19901_vm13 = vcmp.lt.s32.totalorder %v21879_v56, 16  ;;  %v4745_v53 = vsel %vm21882_vm12, %v4637_v6, %v4709_v59  ;;  %v4639_v0 = vadd.f32 %v16731_v28, %v19596_v2  ;;  %15721 = vmatmul.mubr.msk.f32.gmra.mrb[42].mxu1 %vm21883_vm4, %v5000_v4  ;;  %v4744_v17 = vsel %vm4672_vm2, %v4636_v32, %v4708_v13  ;;  %v21884_v59 = vld [vmem:[#allocation46_spill] sm:$0xff]  ;;  %v4474_v4 = vpop.f32.mrb[15].mxu0  ;;  %v21887_v13 = vld [vmem:[#allocation36_spill] sm:$0xff]  ;;  %vm21892_vm12 = vmmov %vm21874_vm3 }
 0x20d   : > { %v21881_v31 = vsel %vm19901_vm13, 4294967295, %v21880_v31  ;;  %v19912_v5 = vmul.u32.u64.low 3817748708, %v19670_v52  ;;  %v19913_v9 = vmul.u32.u64.high 3817748708, %v19670_v52, %v19912_v5  ;;  %v4894_v48 = vsel %vm19798_vm10, %v4745_v53, 0.0  ;;  %v5001_v56 = vld [vmem:[#allocation2 + $0x41] sm:$0xff] }
 0x20e   : > { %v4638_v40 = vadd.f32 %v16732_v50, %v19596_v2  ;;  %4930 = vst.msk [vmem:[#allocation2 + $0x6b] sm:$0xff] %vm21874_vm3, %v4894_v48  ;;  %v4893_v57 = vsel %vm19810_vm1, %v4744_v17, 0.0  ;;  %vm4675_vm8 = vcmp.ge.f32.partialorder %v4639_v0, 0.0  ;;  %v4711_v6 = vmul.f32 0.2, %v4639_v0  ;;  %v21885_v32 = vld [vmem:[#allocation42_spill] sm:$0xff]  ;;  %15723 = vmatprep.mubr.msk.f32.mxu1 %vm21874_vm3, %v5001_v56 }
 0x20f   : > { %v16733_v28 = vadd.f32 %v15678_v46, %v21884_v59  ;;  %vm21886_vm2 = vnez %v21885_v32  ;;  %v21888_v50 = vld [vmem:[#allocation34_spill] sm:$0xff]  ;;  %v21890_v5 = vmov 0  ;;  %4929 = vst.msk [vmem:[#allocation2 + $0x63] sm:$0xff] %vm21892_vm12, %v4893_v57  ;;  %v21893_v17 = vld [vmem:[#allocation48_spill] sm:$0xff]  ;;  %v21894_v59 = vld [vmem:[#allocation43_spill] sm:$0xff] }
 0x210   : > { %v21889_v53 = vsel %vm21886_vm2, %v21887_v13, %v21888_v50  ;;  %vm4674_vm4 = vcmp.ge.f32.partialorder %v4638_v40, 0.0  ;;  %v4710_v48 = vmul.f32 0.2, %v4638_v40  ;;  %v16734_v30 = vadd.f32 %v4474_v4, %v21893_v17  ;;  %v5002_v46 = vld [vmem:[#allocation2 + $0x49] sm:$0xff]  ;;  %vm21901_vm2 = vmmov %vm21874_vm3 }
 0x211   : > { %vm19932_vm11 = vcmp.lt.s32.totalorder %v21889_v53, 16  ;;  %vm21895_vm1 = vnez %v21894_v59  ;;  %v21897_v32 = vld [vmem:[#allocation35_spill] sm:$0xff]  ;;  %v21899_v13 = vmov 0  ;;  %v577_v50 = vshrl.u32 %v19743_v27, 4  ;;  %15724 = vmatmul.mubr.msk.f32.gmra.mrb[44].mxu1 %vm21901_vm2, %v5002_v46  ;;  %vm21902_vm3 = vmmov %vm21901_vm2  ;;  %v21907_v59 = vld [vmem:[#allocation53_spill] sm:$0xff] }
 0x212   : > { %v21891_v5 = vsel %vm19932_vm11, 4294967295, %v21890_v5  ;;  %v21898_v18 = vsel %vm21895_vm1, %v21896_v61, %v21897_v32  ;;  %v4747_v53 = vsel %vm4675_vm8, %v4639_v0, %v4711_v6  ;;  %v4641_v57 = vadd.f32 %v16733_v28, %v19596_v2  ;;  %v21903_v6 = vld [vmem:[#allocation50_spill] sm:$0xff]  ;;  %vm21908_vm1 = vmmov %vm21901_vm2 }
 0x213   : > { %vm19944_vm10 = vcmp.lt.s32.totalorder %v21898_v18, 16  ;;  %v545_v4 = vmul.u32 18, %v544_v35  ;;  %v4896_v56 = vsel %vm19841_vm14, %v4747_v53, 0.0  ;;  %v4746_v17 = vsel %vm4674_vm4, %v4638_v40, %v4710_v48  ;;  %v15681_v18 = vpop.f32.mrb[16].mxu0  ;;  %v5003_v35 = vld [vmem:[#allocation2 + $0x51] sm:$0xff]  ;;  %v5004_v53 = vld [vmem:[#allocation2 + $0x59] sm:$0xff] }
 0x214   : > { %v21900_v13 = vsel %vm19944_vm10, 4294967295, %v21899_v13  ;;  %v4640_v61 = vadd.f32 %v16734_v30, %v19596_v2  ;;  %4932 = vst.msk [vmem:[#allocation2 + $0x7b] sm:$0xff] %vm21902_vm3, %v4896_v56  ;;  %v4895_v27 = vsel %vm19853_vm5, %v4746_v17, 0.0  ;;  %vm4677_vm8 = vcmp.ge.f32.partialorder %v4641_v57, 0.0  ;;  %v4484_v46 = vpop.f32.mrb[17].mxu0  ;;  %15726 = vmatprep.mubr.msk.f32.mxu1 %vm21908_vm1, %v5003_v35  ;;  %v15460_v35 = vpop.f32.mrb[18].mxu1 }
 0x215   : > { %v4713_v0 = vmul.f32 0.2, %v4641_v57  ;;  %v16735_v28 = vadd.f32 %v15681_v18, %v21903_v6  ;;  %v21904_v40 = vsel %vm19426_vm9, %v19474_v3, %v19350_v51  ;;  %v21905_v30 = vmov 0  ;;  %4931 = vst.msk [vmem:[#allocation2 + $0x73] sm:$0xff] %vm21901_vm2, %v4895_v27  ;;  %vm21913_vm9 = vmmov %vm21908_vm1 }
 0x216   : > { %vm19965_vm4 = vcmp.lt.s32.totalorder %v21904_v40, 16  ;;  %vm4676_vm3 = vcmp.ge.f32.partialorder %v4640_v61, 0.0  ;;  %v4712_v48 = vmul.f32 0.2, %v4640_v61  ;;  %v16736_v32 = vadd.f32 %v4484_v46, %v21907_v59  ;;  %15727 = vmatmul.mubr.msk.f32.gmra.mrb[46].mxu1 %vm21913_vm9, %v5004_v53  ;;  %v15684_v40 = vpop.f32.mrb[18].mxu0  ;;  %v2774_v59 = vpop.f32.mrb[19].mxu1 }
 0x217   : > { %v21906_v30 = vsel %vm19965_vm4, 4294967295, %v21905_v30  ;;  %v21910_v56 = vsel %vm19451_vm0, %v19477_v23, %v21909_v1  ;;  %v21911_v3 = vmov 0  ;;  %v19982_v51 = vadd.s32 18, %v19906_v45 }
 0x218   : > { %vm19977_vm12 = vcmp.lt.s32.totalorder %v21910_v56, 16  ;;  %v4749_v17 = vsel %vm4677_vm8, %v4641_v57, %v4713_v0  ;;  %v4643_v18 = vadd.f32 %v16735_v28, %v19596_v2  ;;  %v4748_v23 = vsel %vm4676_vm3, %v4640_v61, %v4712_v48 }
 0x219   : > { %v21912_v3 = vsel %vm19977_vm12, 4294967295, %v21911_v3  ;;  %v19987_v27 = vmul.u32.u64.low 3817748708, %v19750_v26  ;;  %v19988_v6 = vmul.u32.u64.high 3817748708, %v19750_v26, %v19987_v27  ;;  %v4898_v16 = vsel %vm19881_vm6, %v4749_v17, 0.0  ;;  %v5005_v17 = vld [vmem:[#allocation2 + $0x61] sm:$0xff] }
 0x21a   : > { %v4642_v46 = vadd.f32 %v16736_v32, %v19596_v2  ;;  %vm21914_vm0 = vcmp.ne.s32.totalorder %v19906_v45, 0  ;;  %vm21915_vm1 = vcmp.lt.s32.totalorder %v19906_v45, 0  ;;  %v578_v0 = vmul.u32 18, %v577_v50  ;;  %4934 = vst.msk [vmem:[#allocation2 + $0x8b] sm:$0xff] %vm21901_vm2, %v4898_v16  ;;  %v4494_v32 = vpop.f32.mrb[19].mxu0  ;;  %v5006_v27 = vld [vmem:[#allocation2 + $0x69] sm:$0xff] }
 0x21b   : > { %vm19998_vm8 = vmand %vm21915_vm1, %vm21914_vm0  ;;  %v4897_v28 = vsel %vm19901_vm13, %v4748_v23, 0.0  ;;  %vm4679_vm9 = vcmp.ge.f32.partialorder %v4643_v18, 0.0  ;;  %v4715_v61 = vmul.f32 0.2, %v4643_v18  ;;  %v16737_v48 = vadd.f32 %v15684_v40, %v15460_v35  ;;  %v21924_v16 = vld [vmem:[#allocation38_spill] sm:$0xff] }
 0x21c   : > { %vm21918_vm3 = vnez %v21728_v25  ;;  %v21920_v1 = vmov 0  ;;  %vm21922_vm1 = vmmov %vm21901_vm2  ;;  %vm4678_vm2 = vcmp.ge.f32.partialorder %v4642_v46, 0.0  ;;  %v4714_v50 = vmul.f32 0.2, %v4642_v46 }
 0x21d   : > { %v21919_v53 = vsel %vm21918_vm3, %v19490_v33, %v19362_v15  ;;  %4933 = vst.msk [vmem:[#allocation2 + $0x83] sm:$0xff] %vm21922_vm1, %v4897_v28  ;;  %v16738_v56 = vadd.f32 %v4494_v32, %v2774_v59  ;;  %vm21923_vm13 = vnez %v21733_v55  ;;  %v21926_v25 = vmov 0  ;;  %vm21928_vm3 = vmmov %vm21922_vm1 }
 0x21e   : > { %vm20010_vm0 = vcmp.lt.s32.totalorder %v21919_v53, 16  ;;  %v21925_v23 = vsel %vm21923_vm13, %v19493_v49, %v21924_v16  ;;  %v20025_v15 = vsub.s32 %v19619_v60, %v545_v4  ;;  %v4751_v33 = vsel %vm4679_vm9, %v4643_v18, %v4715_v61  ;;  %15729 = vmatprep.mubr.msk.f32.mxu1 %vm21928_vm3, %v5005_v17  ;;  %vm21929_vm13 = vmmov %vm21922_vm1  ;;  %v15463_v60 = vpop.f32.mrb[20].mxu1  ;;  %v15687_v4 = vpop.f32.mrb[20].mxu0  ;;  %v5007_v17 = vld [vmem:[#allocation2 + $0x71] sm:$0xff]  ;;  %v21937_v16 = vld [vmem:[#allocation51_spill] sm:$0xff] }
 0x21f   : > { %v21921_v1 = vsel %vm20010_vm0, 4294967295, %v21920_v1  ;;  %vm20020_vm6 = vcmp.lt.s32.totalorder %v21925_v23, 16  ;;  %v4645_v35 = vadd.f32 %v16737_v48, %v19596_v2  ;;  %v779_v55 = vsel %vm19998_vm8, %v19982_v51, %v19906_v45  ;;  %15730 = vmatmul.mubr.msk.f32.gmra.mrb[48].mxu1 %vm21929_vm13, %v5006_v27  ;;  %vm21930_vm9 = vmmov %vm21922_vm1  ;;  %v2784_v32 = vpop.f32.mrb[21].mxu1  ;;  %v4504_v53 = vpop.f32.mrb[21].mxu0  ;;  %v5008_v27 = vld [vmem:[#allocation2 + $0x79] sm:$0xff] }
 0x220   : > { %v21927_v25 = vsel %vm20020_vm6, 4294967295, %v21926_v25  ;;  %v566_v40 = vshrl.u32 %v19865_v21, 4  ;;  %v4900_v49 = vsel %vm19932_vm11, %v4751_v33, 0.0  ;;  %v4750_v28 = vsel %vm4678_vm2, %v4642_v46, %v4714_v50  ;;  %v21932_v46 = vld [vmem:[#allocation40_spill] sm:$0xff]  ;;  %vm21936_vm13 = vmmov %vm21930_vm9 }
 0x221   : > { %v4644_v59 = vadd.f32 %v16738_v56, %v19596_v2  ;;  %v20039_v18 = vsub.s32 %v19639_v39, %v578_v0  ;;  %4936 = vst.msk [vmem:[#allocation2 + $0x9b] sm:$0xff] %vm21930_vm9, %v4900_v49  ;;  %v4899_v61 = vsel %vm19944_vm10, %v4750_v28, 0.0  ;;  %vm4681_vm1 = vcmp.ge.f32.partialorder %v4645_v35, 0.0  ;;  %15732 = vmatprep.mubr.msk.f32.mxu1 %vm21936_vm13, %v5007_v17 }
 0x222   : > { %v4717_v21 = vmul.f32 0.2, %v4645_v35  ;;  %v16739_v48 = vadd.f32 %v15687_v4, %v15463_v60  ;;  %vm21931_vm2 = vnez %v21735_v62  ;;  %4935 = vst.msk [vmem:[#allocation2 + $0x93] sm:$0xff] %vm21936_vm13, %v4899_v61  ;;  %v16740_v0 = vadd.f32 %v4504_v53, %v2784_v32  ;;  %v15466_v60 = vpop.f32.mrb[22].mxu1  ;;  %v15690_v4 = vpop.f32.mrb[22].mxu0  ;;  %v21944_v53 = vld [vmem:[#allocation55_spill] sm:$0xff] }
 0x223   : > { %v21933_v50 = vsel %vm21931_vm2, %v19512_v20, %v21932_v46  ;;  %vm4680_vm9 = vcmp.ge.f32.partialorder %v4644_v59, 0.0  ;;  %v4716_v39 = vmul.f32 0.2, %v4644_v59  ;;  %vm21938_vm10 = vnez %v21937_v16  ;;  %v4514_v32 = vpop.f32.mrb[23].mxu0  ;;  %v21947_v46 = vld [vmem:[#allocation44_spill] sm:$0xff] }
 0x224   : > { %vm20049_vm3 = vcmp.lt.s32.totalorder %v21933_v50, 16  ;;  %v21939_v23 = vsel %vm21938_vm10, %v19523_v43, %v19404_v11  ;;  %v4753_v20 = vsel %vm4681_vm1, %v4645_v35, %v4717_v21  ;;  %v4647_v33 = vadd.f32 %v16739_v48, %v19596_v2  ;;  %vm21942_vm10 = vmmov %vm21936_vm13  ;;  %v2794_v48 = vpop.f32.mrb[23].mxu1  ;;  %v5010_v16 = vld [vmem:[#allocation2 + $0x89] sm:$0xff] }
 0x225   : > { %vm20059_vm11 = vcmp.lt.s32.totalorder %v21939_v23, 16  ;;  %v20068_v49 = vadd.s32 18, %v20025_v15  ;;  %v4902_v28 = vsel %vm19965_vm4, %v4753_v20, 0.0  ;;  %v4752_v43 = vsel %vm4680_vm9, %v4644_v59, %v4716_v39  ;;  %15733 = vmatmul.mubr.msk.f32.gmra.mrb[50].mxu1 %vm21942_vm10, %v5008_v27  ;;  %vm21943_vm2 = vmmov %vm21942_vm10  ;;  %v21946_v59 = vld [vmem:[#allocation52_spill] sm:$0xff]  ;;  %v5009_v27 = vld [vmem:[#allocation2 + $0x81] sm:$0xff] }
 0x226   : > { %v4646_v11 = vadd.f32 %v16740_v0, %v19596_v2  ;;  %4938 = vst.msk [vmem:[#allocation2 + $0xab] sm:$0xff] %vm21943_vm2, %v4902_v28  ;;  %v4901_v35 = vsel %vm19977_vm12, %v4752_v43, 0.0  ;;  %vm4683_vm13 = vcmp.ge.f32.partialorder %v4647_v33, 0.0  ;;  %v4719_v61 = vmul.f32 0.2, %v4647_v33  ;;  %vm21951_vm1 = vmmov %vm21943_vm2  ;;  %v21952_v23 = vld [vmem:[#allocation58_spill] sm:$0xff] }
 0x227   : > { %v16741_v21 = vadd.f32 %v15690_v4, %v15466_v60  ;;  %vm21945_vm9 = vnez %v21944_v53  ;;  %4937 = vst.msk [vmem:[#allocation2 + $0xa3] sm:$0xff] %vm21951_vm1, %v4901_v35  ;;  %v16742_v17 = vadd.f32 %v4514_v32, %v2794_v48  ;;  %vm21953_vm5 = vnez %v21952_v23  ;;  %v21954_v20 = vld [vmem:[#allocation56_spill] sm:$0xff]  ;;  %v21955_v28 = vld [vmem:[#allocation45_spill] sm:$0xff]  ;;  %15735 = vmatprep.mubr.msk.f32.mxu1 %vm21951_vm1, %v5009_v27 }
 0x228   : > { %v21948_v50 = vsel %vm21945_vm9, %v21946_v59, %v21947_v46  ;;  %vm4682_vm2 = vcmp.ge.f32.partialorder %v4646_v11, 0.0  ;;  %v4718_v0 = vmul.f32 0.2, %v4646_v11  ;;  %v21956_v43 = vsel %vm21953_vm5, %v21954_v20, %v21955_v28  ;;  %vm21963_vm5 = vmmov %vm21951_vm1  ;;  %v15693_v46 = vpop.f32.mrb[24].mxu0 }
 0x229   : > { %vm20083_vm10 = vcmp.lt.s32.totalorder %v21948_v50, 16  ;;  %vm20093_vm12 = vcmp.lt.s32.totalorder %v21956_v43, 16  ;;  %v4755_v4 = vsel %vm4683_vm13, %v4647_v33, %v4719_v61  ;;  %v4649_v53 = vadd.f32 %v16741_v21, %v19596_v2  ;;  %15736 = vmatmul.mubr.msk.f32.gmra.mrb[52].mxu1 %vm21963_vm5, %v5010_v16  ;;  %v15469_v21 = vpop.f32.mrb[24].mxu1  ;;  %v4524_v28 = vpop.f32.mrb[25].mxu0  ;;  %v21965_v43 = vld [vmem:[#allocation60_spill] sm:$0xff] }
 0x22a   : > { %vm21959_vm4 = vcmp.ne.s32.totalorder %v20025_v15, 0  ;;  %vm21960_vm14 = vcmp.lt.s32.totalorder %v20025_v15, 0  ;;  %v20109_v48 = vadd.s32 18, %v20039_v18  ;;  %v567_v32 = vmul.u32 18, %v566_v40  ;;  %v2804_v20 = vpop.f32.mrb[25].mxu1 }
 0x22b   : > { %vm20104_vm8 = vmand %vm21960_vm14, %vm21959_vm4  ;;  %v4904_v59 = vsel %vm20010_vm0, %v4755_v4, 0.0  ;;  %v4754_v33 = vsel %vm4682_vm2, %v4646_v11, %v4718_v0  ;;  %v4648_v61 = vadd.f32 %v16742_v17, %v19596_v2  ;;  %v599_v50 = vshrl.u32 %v19913_v9, 4  ;;  %v21967_v11 = vld [vmem:[#allocation59_spill] sm:$0xff]  ;;  %v21968_v0 = vld [vmem:[#allocation49_spill] sm:$0xff]  ;;  %v15472_v35 = vpop.f32.mrb[26].mxu1 }
 0x22c   : > { %vm21964_vm14 = vmmov %vm21951_vm1  ;;  %v4903_v27 = vsel %vm20020_vm6, %v4754_v33, 0.0  ;;  %vm4685_vm4 = vcmp.ge.f32.partialorder %v4649_v53, 0.0  ;;  %v4721_v23 = vmul.f32 0.2, %v4649_v53  ;;  %v16743_v40 = vadd.f32 %v15693_v46, %v15469_v21  ;;  %v5012_v33 = vld [vmem:[#allocation2 + $0x99] sm:$0xff] }
 0x22d   : > { %4940 = vst.msk [vmem:[#allocation2 + $0xbb] sm:$0xff] %vm21964_vm14, %v4904_v59  ;;  %vm21966_vm13 = vnez %v21965_v43  ;;  %v21970_v16 = vmov 0  ;;  %vm4684_vm5 = vcmp.ge.f32.partialorder %v4648_v61, 0.0  ;;  %v4720_v9 = vmul.f32 0.2, %v4648_v61  ;;  %v5011_v59 = vld [vmem:[#allocation2 + $0x91] sm:$0xff] }
 0x22e   : > { %v21969_v17 = vsel %vm21966_vm13, %v21967_v11, %v21968_v0  ;;  %4939 = vst.msk [vmem:[#allocation2 + $0xb3] sm:$0xff] %vm21951_vm1, %v4903_v27  ;;  %v16744_v4 = vadd.f32 %v4524_v28, %v2804_v20  ;;  %vm21972_vm14 = vnez %v21808_v24  ;;  %v21974_v46 = vmov 0  ;;  %vm21976_vm13 = vmmov %vm21951_vm1 }
 0x22f   : > { %vm20124_vm2 = vcmp.lt.s32.totalorder %v21969_v17, 16  ;;  %v21973_v21 = vsel %vm21972_vm14, %v19696_v37, %v19636_v41  ;;  %v778_v43 = vsel %vm20104_vm8, %v20068_v49, %v20025_v15  ;;  %v4757_v27 = vsel %vm4685_vm4, %v4649_v53, %v4721_v23  ;;  %15738 = vmatprep.mubr.msk.f32.mxu1 %vm21976_vm13, %v5011_v59  ;;  %vm21981_vm8 = vmmov %vm21976_vm13  ;;  %v15696_v23 = vpop.f32.mrb[26].mxu0 }
 0x230   : > { %v21971_v16 = vsel %vm20124_vm2, 4294967295, %v21970_v16  ;;  %vm20134_vm9 = vcmp.lt.s32.totalorder %v21973_v21, 16  ;;  %v4651_v11 = vadd.f32 %v16743_v40, %v19596_v2  ;;  %vm21977_vm1 = vcmp.ne.s32.totalorder %v20039_v18, 0  ;;  %15739 = vmatmul.mubr.msk.f32.gmra.mrb[54].mxu1 %vm21981_vm8, %v5012_v33  ;;  %v4534_v28 = vpop.f32.mrb[27].mxu0 }
 0x231   : > { %v21975_v46 = vsel %vm20134_vm9, 4294967295, %v21974_v46  ;;  %vm21978_vm6 = vcmp.lt.s32.totalorder %v20039_v18, 0  ;;  %v20153_v37 = vsub.s32 %v19661_v44, %v567_v32  ;;  %v588_v24 = vshrl.u32 %v19988_v6, 4  ;;  %v2814_v6 = vpop.f32.mrb[27].mxu1 }
 0x232   : > { %vm20148_vm0 = vmand %vm21978_vm6, %vm21977_vm1  ;;  %v4906_v15 = vsel %vm20049_vm3, %v4757_v27, 0.0  ;;  %v4756_v49 = vsel %vm4684_vm5, %v4648_v61, %v4720_v9  ;;  %v4650_v53 = vadd.f32 %v16744_v4, %v19596_v2  ;;  %v600_v40 = vmul.u32 18, %v599_v50  ;;  %v5013_v9 = vld [vmem:[#allocation2 + $0xa1] sm:$0xff]  ;;  %v5014_v4 = vld [vmem:[#allocation2 + $0xa9] sm:$0xff]  ;;  %v15475_v27 = vpop.f32.mrb[28].mxu1 }
 0x233   : > { %vm21982_vm6 = vmmov %vm21981_vm8  ;;  %v4905_v20 = vsel %vm20059_vm11, %v4756_v49, 0.0  ;;  %vm4687_vm4 = vcmp.ge.f32.partialorder %v4651_v11, 0.0  ;;  %v4723_v44 = vmul.f32 0.2, %v4651_v11  ;;  %v16745_v32 = vadd.f32 %v15696_v23, %v15472_v35  ;;  %v2824_v23 = vpop.f32.mrb[29].mxu1 }
 0x234   : > { %4942 = vst.msk [vmem:[#allocation2 + $0xcb] sm:$0xff] %vm21982_vm6, %v4906_v15  ;;  %v21983_v61 = vsel %vm19821_vm7, %v19787_v36, %v19699_v47  ;;  %v21984_v0 = vmov 0  ;;  %vm21986_vm14 = vmmov %vm21982_vm6  ;;  %vm4686_vm13 = vcmp.ge.f32.partialorder %v4650_v53, 0.0  ;;  %v4722_v50 = vmul.f32 0.2, %v4650_v53  ;;  %v15699_v15 = vpop.f32.mrb[28].mxu0 }
 0x235   : > { %vm20168_vm5 = vcmp.lt.s32.totalorder %v21983_v61, 16  ;;  %4941 = vst.msk [vmem:[#allocation2 + $0xc3] sm:$0xff] %vm21986_vm14, %v4905_v20  ;;  %v16746_v17 = vadd.f32 %v4534_v28, %v2814_v6  ;;  %v21987_v59 = vsel %vm19889_vm15, %v19827_v10, %v19705_v12  ;;  %v781_v47 = vsel %vm20148_vm0, %v20109_v48, %v20039_v18  ;;  %vm21990_vm7 = vmmov %vm21982_vm6  ;;  %v4544_v20 = vpop.f32.mrb[29].mxu0 }
 0x236   : > { %v21985_v0 = vsel %vm20168_vm5, 4294967295, %v21984_v0  ;;  %vm20178_vm1 = vcmp.lt.s32.totalorder %v21987_v59, 16  ;;  %v4759_v36 = vsel %vm4687_vm4, %v4651_v11, %v4723_v44  ;;  %v4653_v33 = vadd.f32 %v16745_v32, %v19596_v2  ;;  %15741 = vmatprep.mubr.msk.f32.mxu1 %vm21990_vm7, %v5013_v9  ;;  %vm21991_vm15 = vmmov %vm21982_vm6  ;;  %v5015_v44 = vld [vmem:[#allocation2 + $0xb1] sm:$0xff]  ;;  %v5016_v32 = vld [vmem:[#allocation2 + $0xb9] sm:$0xff] }
 0x237   : > { %v589_v14 = vmul.u32 18, %v588_v24  ;;  %v4908_v12 = vsel %vm20083_vm10, %v4759_v36, 0.0  ;;  %v4758_v10 = vsel %vm4686_vm13, %v4650_v53, %v4722_v50  ;;  %v4652_v21 = vadd.f32 %v16746_v17, %v19596_v2  ;;  %15742 = vmatmul.mubr.msk.f32.gmra.mrb[56].mxu1 %vm21991_vm15, %v5014_v4  ;;  %vm21995_vm7 = vmmov %vm21982_vm6  ;;  %v15478_v50 = vpop.f32.mrb[30].mxu1  ;;  %v15702_v17 = vpop.f32.mrb[30].mxu0 }
 0x238   : > { %v20194_v49 = vsub.s32 %v19670_v52, %v600_v40  ;;  %4944 = vst.msk [vmem:[#allocation2 + $0xdb] sm:$0xff] %vm21982_vm6, %v4908_v12  ;;  %v4907_v11 = vsel %vm20093_vm12, %v4758_v10, 0.0  ;;  %vm4689_vm4 = vcmp.ge.f32.partialorder %v4653_v33, 0.0  ;;  %v4725_v24 = vmul.f32 0.2, %v4653_v33  ;;  %vm21998_vm14 = vmmov %vm21995_vm7  ;;  %v2834_v59 = vpop.f32.mrb[31].mxu1 }
 0x239   : > { %v16747_v35 = vadd.f32 %v15699_v15, %v15475_v27  ;;  %vm20204_vm13 = vcmp.lt.s32.totalorder %v779_v55, 16  ;;  %v21993_v53 = vmov 0  ;;  %4943 = vst.msk [vmem:[#allocation2 + $0xd3] sm:$0xff] %vm21995_vm7, %v4907_v11  ;;  %vm4688_vm15 = vcmp.ge.f32.partialorder %v4652_v21, 0.0  ;;  %15744 = vmatprep.mubr.msk.f32.mxu1 %vm21998_vm14, %v5015_v44  ;;  %vm21999_vm8 = vmmov %vm21995_vm7  ;;  %v4554_v36 = vpop.f32.mrb[31].mxu0 }
 0x23a   : > { %v21994_v53 = vsel %vm20204_vm13, 4294967295, %v21993_v53  ;;  %v4724_v52 = vmul.f32 0.2, %v4652_v21  ;;  %v16748_v40 = vadd.f32 %v4544_v20, %v2824_v23  ;;  %vm20209_vm6 = vcmp.lt.s32.totalorder %v778_v43, 16  ;;  %v15481_v23 = vpop.f32.mrb[32].mxu1  ;;  %v15705_v20 = vpop.f32.mrb[32].mxu0 }
 0x23b   : > { %v21996_v6 = vmov 0  ;;  %v4761_v57 = vsel %vm4689_vm4, %v4653_v33, %v4725_v24  ;;  %v4655_v45 = vadd.f32 %v16747_v35, %v19596_v2  ;;  %v20217_v51 = vadd.s32 18, %v20153_v37  ;;  %15745 = vmatmul.mubr.msk.f32.gmra.mrb[58].mxu1 %vm21995_vm7, %v5016_v32 }
 0x23c   : > { %v21997_v6 = vsel %vm20209_vm6, 4294967295, %v21996_v6  ;;  %v20220_v55 = vsub.s32 %v19750_v26, %v589_v14  ;;  %v4910_v28 = vsel %vm20124_vm2, %v4761_v57, 0.0  ;;  %v4760_v43 = vsel %vm4688_vm15, %v4652_v21, %v4724_v52  ;;  %vm22000_vm2 = vmmov %vm21995_vm7  ;;  %v5017_v12 = vld [vmem:[#allocation2 + $0xc1] sm:$0xff]  ;;  %v5018_v10 = vld [vmem:[#allocation2 + $0xc9] sm:$0xff]  ;;  %v2844_v57 = vpop.f32.mrb[33].mxu1 }
 0x23d   : > { %v4654_v61 = vadd.f32 %v16748_v40, %v19596_v2  ;;  %4946 = vst.msk [vmem:[#allocation2 + $0xeb] sm:$0xff] %vm21999_vm8, %v4910_v28  ;;  %v4909_v9 = vsel %vm20134_vm9, %v4760_v43, 0.0  ;;  %vm4691_vm14 = vcmp.ge.f32.partialorder %v4655_v45, 0.0  ;;  %v4727_v26 = vmul.f32 0.2, %v4655_v45  ;;  %vm22001_vm8 = vmmov %vm22000_vm2 }
 0x23e   : > { %v16749_v4 = vadd.f32 %v15702_v17, %v15478_v50  ;;  %4945 = vst.msk [vmem:[#allocation2 + $0xe3] sm:$0xff] %vm22000_vm2, %v4909_v9  ;;  %v16750_v14 = vadd.f32 %v4554_v36, %v2834_v59  ;;  %15747 = vmatprep.mubr.msk.f32.mxu1 %vm22001_vm8, %v5017_v12  ;;  %v747_v15 = vadd.s32 18, %v20194_v49  ;;  %vm22003_vm7 = vcmp.lt.s32.totalorder %v20153_v37, 0  ;;  %vm22006_vm4 = vmmov %vm22000_vm2  ;;  %v15484_v36 = vpop.f32.mrb[34].mxu1 }
 0x23f   : > { %vm4690_vm15 = vcmp.ge.f32.partialorder %v4654_v61, 0.0  ;;  %v4726_v33 = vmul.f32 0.2, %v4654_v61  ;;  %v4763_v21 = vsel %vm4691_vm14, %v4655_v45, %v4727_v26  ;;  %15748 = vmatmul.mubr.msk.f32.gmra.mrb[60].mxu1 %vm22000_vm2, %v5018_v10  ;;  %vm22002_vm14 = vcmp.ne.s32.totalorder %v20153_v37, 0  ;;  %v4564_v45 = vpop.f32.mrb[33].mxu0 }
 0x240   : > { %v4657_v27 = vadd.f32 %v16749_v4, %v19596_v2  ;;  %v4912_v11 = vsel %vm20168_vm5, %v4763_v21, 0.0  ;;  %v4656_v35 = vadd.f32 %v16750_v14, %v19596_v2  ;;  %vm20244_vm9 = vmand %vm22003_vm7, %vm22002_vm14  ;;  %v16751_v32 = vadd.f32 %v15705_v20, %v15481_v23  ;;  %v5019_v17 = vld [vmem:[#allocation2 + $0xd1] sm:$0xff]  ;;  %v5020_v9 = vld [vmem:[#allocation2 + $0xd9] sm:$0xff]  ;;  %v15708_v14 = vpop.f32.mrb[34].mxu0  ;;  %v2854_v21 = vpop.f32.mrb[35].mxu1 }
 0x241   : > { %v4762_v24 = vsel %vm4690_vm15, %v4654_v61, %v4726_v33  ;;  %4948 = vst.msk [vmem:[#allocation2 + $0xfb] sm:$0xff] %vm22006_vm4, %v4912_v11  ;;  %vm22007_vm2 = vcmp.ne.s32.totalorder %v20194_v49, 0  ;;  %vm22008_vm5 = vcmp.lt.s32.totalorder %v20194_v49, 0  ;;  %vm22011_vm14 = vmmov %vm22006_vm4  ;;  %vm20266_vm4 = vcmp.lt.s32.totalorder %v781_v47, 16 }
 0x242   : > { %v4911_v40 = vsel %vm20178_vm1, %v4762_v24, 0.0  ;;  %vm4693_vm15 = vcmp.ge.f32.partialorder %v4657_v27, 0.0  ;;  %v4729_v44 = vmul.f32 0.2, %v4657_v27  ;;  %vm20256_vm7 = vmand %vm22008_vm5, %vm22007_vm2  ;;  %vm4692_vm8 = vcmp.ge.f32.partialorder %v4656_v35, 0.0 }
 0x243   : > { %4947 = vst.msk [vmem:[#allocation2 + $0xf3] sm:$0xff] %vm22011_vm14, %v4911_v40  ;;  %v4728_v43 = vmul.f32 0.2, %v4656_v35  ;;  %v22012_v61 = vmov 0  ;;  %v16752_v50 = vadd.f32 %v4564_v45, %v2844_v57  ;;  %v4659_v4 = vadd.f32 %v16751_v32, %v19596_v2  ;;  %vm22014_vm5 = vmmov %vm22011_vm14 }
 0x244   : > { %v22013_v61 = vsel %vm20266_vm4, 4294967295, %v22012_v61  ;;  %v4765_v26 = vsel %vm4693_vm15, %v4657_v27, %v4729_v44  ;;  %v780_v59 = vsel %vm20244_vm9, %v20217_v51, %v20153_v37  ;;  %15750 = vmatprep.mubr.msk.f32.mxu1 %vm22014_vm5, %v5019_v17  ;;  %v746_v41 = vadd.s32 18, %v20220_v55  ;;  %vm22015_vm0 = vmmov %vm22014_vm5  ;;  %v4574_v27 = vpop.f32.mrb[35].mxu0  ;;  %v17666_v37 = vld [vmem:[%s21512_s1 + $0x2c] sm:$0xf] }
 0x245   : > { %v4914_v18 = vsel %vm20204_vm13, %v4765_v26, 0.0  ;;  %v4764_v48 = vsel %vm4692_vm8, %v4656_v35, %v4728_v43  ;;  %v4658_v47 = vadd.f32 %v16752_v50, %v19596_v2  ;;  %15751 = vmatmul.mubr.msk.f32.gmra.mrb[62].mxu1 %vm22015_vm0, %v5020_v9  ;;  %v783_v33 = vsel %vm20256_vm7, %v747_v15, %v20194_v49  ;;  %vm22020_vm14 = vmmov %vm22015_vm0  ;;  %v5021_v24 = vld [vmem:[#allocation2 + $0xe1] sm:$0xff]  ;;  %v5022_v35 = vld [vmem:[#allocation2 + $0xe9] sm:$0xff] }
 0x246   : > { %vm22016_vm9 = vcmp.ne.s32.totalorder %v20220_v55, 0  ;;  %vm22017_vm15 = vcmp.lt.s32.totalorder %v20220_v55, 0  ;;  %4950 = vst.msk [vmem:[#allocation2 + $0x10b] sm:$0xff] %vm22020_vm14, %v4914_v18  ;;  %v4913_v51 = vsel %vm20209_vm6, %v4764_v48, 0.0  ;;  %vm4695_vm8 = vcmp.ge.f32.partialorder %v4659_v4, 0.0  ;;  %vm22021_vm7 = vmmov %vm22015_vm0 }
 0x247   : > { %vm20288_vm2 = vmand %vm22017_vm15, %vm22016_vm9  ;;  %v4731_v12 = vmul.f32 0.2, %v4659_v4  ;;  %v16753_v10 = vadd.f32 %v15708_v14, %v15484_v36  ;;  %4949 = vst.msk [vmem:[#allocation2 + $0x103] sm:$0xff] %vm22021_vm7, %v4913_v51  ;;  %vm20296_vm5 = vcmp.lt.s32.totalorder %v780_v59, 16  ;;  %v22022_v49 = vmov 0  ;;  %v4956_v36 = vld [vmem:[#allocation2 + $0x8] sm:$0xff] }
 0x248   : > { %v22023_v49 = vsel %vm20296_vm5, 4294967295, %v22022_v49  ;;  %vm4694_vm0 = vcmp.ge.f32.partialorder %v4658_v47, 0.0  ;;  %v4730_v15 = vmul.f32 0.2, %v4658_v47  ;;  %v16754_v11 = vadd.f32 %v4574_v27, %v2854_v21  ;;  %vm22025_vm9 = vmmov %vm22021_vm7  ;;  %v4957_v14 = vld [vmem:[#allocation2 + $0x10] sm:$0xff]  ;;  %v4958_v51 = vld [vmem:[#allocation2 + $0x18] sm:$0xff] }
 0x249   : > { %22024 = vst [vmem:[#allocation10_spill] sm:$0xff] %v22023_v49  ;;  %v4767_v23 = vsel %vm4695_vm8, %v4659_v4, %v4731_v12  ;;  %v4661_v20 = vadd.f32 %v16753_v10, %v19596_v2  ;;  %v782_v52 = vsel %vm20288_vm2, %v746_v41, %v20220_v55  ;;  %15753 = vmatprep.mubr.msk.f32.mxu1 %vm22025_vm9, %v5021_v24  ;;  %vm20307_vm15 = vcmp.lt.s32.totalorder %v783_v33, 16  ;;  %vm22029_vm14 = vmmov %vm22021_vm7  ;;  %v20337_v33 = vld [vmem:[%s21512_s1 + $0x30] sm:$0xf]  ;;  %v4959_v12 = vld [vmem:[#allocation2 + $0x20] sm:$0xff] }
 0x24a   : > { %v4916_v40 = vsel %vm20266_vm4, %v4767_v23, 0.0  ;;  %v4766_v44 = vsel %vm4694_vm0, %v4658_v47, %v4730_v15  ;;  %v22026_v32 = vmov 0  ;;  %v4660_v57 = vadd.f32 %v16754_v11, %v19596_v2  ;;  %15754 = vmatmul.mubr.msk.f32.gmra.mrb[64].mxu1 %vm22029_vm14, %v5022_v35  ;;  %vm22030_vm8 = vmmov %vm22021_vm7  ;;  %v5023_v28 = vld [vmem:[#allocation2 + $0xf1] sm:$0xff]  ;;  %v5024_v43 = vld [vmem:[#allocation2 + $0xf9] sm:$0xff] }
 0x24b   : > { %v22027_v32 = vsel %vm20307_vm15, 4294967295, %v22026_v32  ;;  %4952 = vst.msk [vmem:[#allocation2 + $0x11b] sm:$0xff] %vm22030_vm8, %v4916_v40  ;;  %v4915_v45 = vsel %vm20296_vm5, %v4766_v44, 0.0  ;;  %vm4697_vm2 = vcmp.ge.f32.partialorder %v4661_v20, 0.0  ;;  %v4733_v55 = vmul.f32 0.2, %v4661_v20  ;;  %vm22034_vm4 = vmmov %vm22021_vm7 }
 0x24c   : > { %22028 = vst [vmem:[#allocation9_spill] sm:$0xff] %v22027_v32  ;;  %4951 = vst.msk [vmem:[#allocation2 + $0x113] sm:$0xff] %vm22021_vm7, %v4915_v45  ;;  %vm20317_vm0 = vcmp.lt.s32.totalorder %v782_v52, 16  ;;  %v22031_v50 = vmov 0  ;;  %vm4696_vm9 = vcmp.ge.f32.partialorder %v4660_v57, 0.0  ;;  %15756 = vmatprep.mubr.msk.f32.mxu1 %vm22034_vm4, %v5023_v28  ;;  %v4955_v47 = vld [vmem:[#allocation2] sm:$0xff] }
 0x24d   : > { %v22032_v50 = vsel %vm20317_vm0, 4294967295, %v22031_v50  ;;  %v4732_v17 = vmul.f32 0.2, %v4660_v57  ;;  %v4769_v2 = vsel %vm4697_vm2, %v4661_v20, %v4733_v55  ;;  %vm22035_vm14 = vmmov %vm22034_vm4  ;;  %v4960_v10 = vld [vmem:[#allocation2 + $0x28] sm:$0xff]  ;;  %v4961_v21 = vld [vmem:[#allocation2 + $0x30] sm:$0xff] }
 0x24e   : > { %22033 = vst [vmem:[#allocation5_spill] sm:$0xff] %v22032_v50  ;;  %v4918_v9 = vsel %vm20307_vm15, %v4769_v2, 0.0  ;;  %15757 = vmatmul.mubr.msk.f32.gmra.mrb[66].mxu1 %vm22035_vm14, %v5024_v43  ;;  %vm22036_vm8 = vmmov %vm22034_vm4  ;;  %v5025_v59 = vld [vmem:[#allocation2 + $0x101] sm:$0xff]  ;;  %v5026_v41 = vld [vmem:[#allocation2 + $0x109] sm:$0xff] }
 0x24f   : > { %v4768_v26 = vsel %vm4696_vm9, %v4660_v57, %v4732_v17  ;;  %4954 = vst.msk [vmem:[#allocation2 + $0x12b] sm:$0xff] %vm22036_vm8, %v4918_v9  ;;  %vm22037_vm7 = vmmov %vm22034_vm4  ;;  %v4962_v27 = vld [vmem:[#allocation2 + $0x38] sm:$0xff]  ;;  %v4963_v15 = vld [vmem:[#allocation2 + $0x40] sm:$0xff] }
 0x250   : > { %v4917_v4 = vsel %vm20317_vm0, %v4768_v26, 0.0  ;;  %vm22038_vm5 = vmmov %vm22034_vm4  ;;  %v4964_v11 = vld [vmem:[#allocation2 + $0x48] sm:$0xff]  ;;  %v4965_v24 = vld [vmem:[#allocation2 + $0x50] sm:$0xff] }
 0x251   : > { %4953 = vst.msk [vmem:[#allocation2 + $0x123] sm:$0xff] %vm22037_vm7, %v4917_v4  ;;  %15759 = vmatprep.mubr.msk.f32.mxu1 %vm22038_vm5, %v5025_v59  ;;  %vm22039_vm6 = vmmov %vm22034_vm4  ;;  %v4966_v35 = vld [vmem:[#allocation2 + $0x58] sm:$0xff]  ;;  %v4967_v23 = vld [vmem:[#allocation2 + $0x60] sm:$0xff] }
 0x252   : > { %15760 = vmatmul.mubr.msk.f32.gmra.mrb[68].mxu1 %vm22039_vm6, %v5026_v41  ;;  %vm22040_vm2 = vmmov %vm22034_vm4  ;;  %vm22043_vm6 = vcmask 1043456   ;;  %v4968_v20 = vld [vmem:[#allocation2 + $0x68] sm:$0xff]  ;;  %v4969_v52 = vld [vmem:[#allocation2 + $0x70] sm:$0xff] }
 0x253   : > { %v5027_v18 = vld [vmem:[#allocation2 + $0x111] sm:$0xff]  ;;  %v5028_v48 = vld [vmem:[#allocation2 + $0x119] sm:$0xff]  ;;  %vm22041_vm9 = vmmov %vm22040_vm2 }
 0x254   : > { %15762 = vmatprep.mubr.msk.f32.mxu1 %vm22034_vm4, %v5027_v18  ;;  %vm22042_vm14 = vmmov %vm22040_vm2  ;;  %v4970_v40 = vld [vmem:[#allocation2 + $0x78] sm:$0xff]  ;;  %v4971_v44 = vld [vmem:[#allocation2 + $0x80] sm:$0xff] }
 0x255   : > { %vm22044_vm5 = vmmov %vm22040_vm2  ;;  %v4972_v57 = vld [vmem:[#allocation2 + $0x88] sm:$0xff]  ;;  %v4973_v45 = vld [vmem:[#allocation2 + $0x90] sm:$0xff] }
 0x256   : > { %15763 = vmatmul.mubr.msk.f32.gmra.mrb[70].mxu1 %vm22040_vm2, %v5028_v48  ;;  %vm22045_vm8 = vmmov %vm22043_vm6  ;;  %v4974_v55 = vld [vmem:[#allocation2 + $0x98] sm:$0xff]  ;;  %v4975_v28 = vld [vmem:[#allocation2 + $0xa0] sm:$0xff] }
 0x257   : > { %15767 = vmatprep.mubr.msk.f32.mxu1 %vm22041_vm9, %v4955_v47  ;;  %vm22046_vm7 = vmmov %vm22040_vm2  ;;  %v4976_v43 = vld [vmem:[#allocation2 + $0xa8] sm:$0xff]  ;;  %v4977_v17 = vld [vmem:[#allocation2 + $0xb0] sm:$0xff] }
 0x258   : > { %vm22047_vm4 = vmmov %vm22040_vm2  ;;  %v4978_v2 = vld [vmem:[#allocation2 + $0xb8] sm:$0xff]  ;;  %v4979_v9 = vld [vmem:[#allocation2 + $0xc0] sm:$0xff] }
 0x259   : > { %vm22048_vm9 = vmmov %vm22040_vm2  ;;  %v4980_v26 = vld [vmem:[#allocation2 + $0xc8] sm:$0xff]  ;;  %v4981_v4 = vld [vmem:[#allocation2 + $0xd0] sm:$0xff] }
 0x25a   : > { %15768 = vmatmul.mubr.msk.f32.vlgmr.msra.gmra.mrb[36].mxu1 %vm22042_vm14, %v4956_v36  ;;  %vm22049_vm14 = vmmov %vm22040_vm2  ;;  %v4982_v59 = vld [vmem:[#allocation2 + $0xd8] sm:$0xff]  ;;  %v4983_v41 = vld [vmem:[#allocation2 + $0xe0] sm:$0xff] }
 0x25b   : > { %15822 = vmatpush3.msk.msra.mxu1 %vm22043_vm6, %v17666_v37  ;;  %15770 = vmatprep.mubr.msk.f32.mxu1 %vm22044_vm5, %v4957_v14  ;;  %vm22050_vm6 = vmmov %vm22040_vm2  ;;  %v4984_v18 = vld [vmem:[#allocation2 + $0xe8] sm:$0xff]  ;;  %v4985_v48 = vld [vmem:[#allocation2 + $0xf0] sm:$0xff] }
 0x25c   : > { %15877 = vmatprep.subr.msk.mxu1 %vm22045_vm8, %v20337_v33  ;;  %vm22051_vm5 = vmmov %vm22040_vm2  ;;  %v4986_v47 = vld [vmem:[#allocation2 + $0xf8] sm:$0xff]  ;;  %v4987_v36 = vld [vmem:[#allocation2 + $0x100] sm:$0xff] }
 0x25d   : > { %vm22052_vm8 = vmmov %vm22040_vm2  ;;  %v4988_v14 = vld [vmem:[#allocation2 + $0x108] sm:$0xff]  ;;  %v4989_v37 = vld [vmem:[#allocation2 + $0x110] sm:$0xff] }
 0x25e   : > { %15771 = vmatmul.mubr.msk.f32.gmra.mrb[38].mxu1 %vm22046_vm7, %v4958_v51  ;;  %vm22053_vm7 = vmmov %vm22040_vm2  ;;  %v5743_v51 = vld [vmem:[#allocation2 + $0x2] sm:$0xff]  ;;  %v5777_v50 = vld [vmem:[#allocation2 + $0x112] sm:$0xff] }
 0x25f   : > { %15773 = vmatprep.mubr.msk.f32.mxu1 %vm22047_vm4, %v4959_v12  ;;  %vm22054_vm4 = vmmov %vm22040_vm2  ;;  %v4990_v12 = vld [vmem:[#allocation2 + $0x118] sm:$0xff] }
 0x260   : > { %v5778_v32 = vld [vmem:[#allocation2 + $0x11a] sm:$0xff]  ;;  %vm22120_vm0 = vmmov %vm22040_vm2 }
 0x261   : > { %v13706_v49 = vld [vmem:[%s21512_s1 + $0x38] sm:$0xf]  ;;  %vm22123_vm15 = vmmov %vm22120_vm0 }
 0x262   : > { %15774 = vmatmul.mubr.msk.f32.gmra.mrb[40].mxu1 %vm22040_vm2, %v4960_v10  ;;  %v5744_v10 = vld [vmem:[#allocation2 + $0xa] sm:$0xff]  ;;  %vm22126_vm13 = vmmov %vm22120_vm0 }
 0x263   : > { %15776 = vmatprep.mubr.msk.f32.mxu1 %vm22048_vm9, %v4961_v21  ;;  %vm22055_vm9 = vmmov %vm22040_vm2  ;;  %v20384_v21 = vld [vmem:[%s21512_s1 + $0x34] sm:$0xf] }
 0x266   : > { %15777 = vmatmul.mubr.msk.f32.gmra.mrb[42].mxu1 %vm22049_vm14, %v4962_v27  ;;  %vm22056_vm14 = vmmov %vm22040_vm2  ;;  %v20387_v27 = vld [vmem:[#allocation2 + $0x12] sm:$0xff] }
 0x267   : > { %15779 = vmatprep.mubr.msk.f32.mxu1 %vm22050_vm6, %v4963_v15  ;;  %vm22057_vm6 = vmmov %vm22040_vm2  ;;  %v20395_v15 = vld [vmem:[#allocation2 + $0x1a] sm:$0xff] }
 0x26a   : > { %15780 = vmatmul.mubr.msk.f32.gmra.mrb[44].mxu1 %vm22051_vm5, %v4964_v11  ;;  %vm22058_vm5 = vmmov %vm22040_vm2  ;;  %v20399_v11 = vld [vmem:[#allocation2 + $0x22] sm:$0xff] }
 0x26b   : > { %15782 = vmatprep.mubr.msk.f32.mxu1 %vm22052_vm8, %v4965_v24  ;;  %vm22059_vm8 = vmmov %vm22040_vm2  ;;  %v20403_v24 = vld [vmem:[#allocation2 + $0x2a] sm:$0xff] }
 0x26e   : > { %15783 = vmatmul.mubr.msk.f32.gmra.mrb[46].mxu1 %vm22053_vm7, %v4966_v35  ;;  %vm22060_vm7 = vmmov %vm22040_vm2  ;;  %v20411_v35 = vld [vmem:[#allocation2 + $0x3a] sm:$0xff] }
 0x26f   : > { %15785 = vmatprep.mubr.msk.f32.mxu1 %vm22054_vm4, %v4967_v23  ;;  %vm22061_vm4 = vmmov %vm22040_vm2  ;;  %v20415_v23 = vld [vmem:[#allocation2 + $0x42] sm:$0xff] }
 0x272   : > { %15786 = vmatmul.mubr.msk.f32.gmra.mrb[48].mxu1 %vm22040_vm2, %v4968_v20  ;;  %v20419_v20 = vld [vmem:[#allocation2 + $0x4a] sm:$0xff] }
 0x273   : > { %15788 = vmatprep.mubr.msk.f32.mxu1 %vm22055_vm9, %v4969_v52  ;;  %vm22062_vm9 = vmmov %vm22040_vm2  ;;  %v20423_v52 = vld [vmem:[#allocation2 + $0x52] sm:$0xff] }
 0x276   : > { %15789 = vmatmul.mubr.msk.f32.gmra.mrb[50].mxu1 %vm22056_vm14, %v4970_v40  ;;  %vm22063_vm14 = vmmov %vm22040_vm2  ;;  %v5754_v40 = vld [vmem:[#allocation2 + $0x5a] sm:$0xff] }
 0x277   : > { %15791 = vmatprep.mubr.msk.f32.mxu1 %vm22057_vm6, %v4971_v44  ;;  %vm22064_vm6 = vmmov %vm22040_vm2  ;;  %v5755_v44 = vld [vmem:[#allocation2 + $0x62] sm:$0xff] }
 0x27a   : > { %15792 = vmatmul.mubr.msk.f32.gmra.mrb[52].mxu1 %vm22058_vm5, %v4972_v57  ;;  %vm22065_vm5 = vmmov %vm22040_vm2  ;;  %v5756_v57 = vld [vmem:[#allocation2 + $0x6a] sm:$0xff] }
 0x27b   : > { %15794 = vmatprep.mubr.msk.f32.mxu1 %vm22059_vm8, %v4973_v45  ;;  %vm22066_vm8 = vmmov %vm22040_vm2  ;;  %v5757_v45 = vld [vmem:[#allocation2 + $0x72] sm:$0xff] }
 0x27e   : > { %15795 = vmatmul.mubr.msk.f32.gmra.mrb[54].mxu1 %vm22060_vm7, %v4974_v55  ;;  %vm22067_vm7 = vmmov %vm22040_vm2  ;;  %v5758_v55 = vld [vmem:[#allocation2 + $0x7a] sm:$0xff] }
 0x27f   : > { %15797 = vmatprep.mubr.msk.f32.mxu1 %vm22061_vm4, %v4975_v28  ;;  %vm22068_vm4 = vmmov %vm22040_vm2  ;;  %v5759_v28 = vld [vmem:[#allocation2 + $0x82] sm:$0xff] }
 0x282   : > { %15798 = vmatmul.mubr.msk.f32.gmra.mrb[56].mxu1 %vm22040_vm2, %v4976_v43  ;;  %v5760_v43 = vld [vmem:[#allocation2 + $0x8a] sm:$0xff] }
 0x283   : > { %15800 = vmatprep.mubr.msk.f32.mxu1 %vm22062_vm9, %v4977_v17  ;;  %vm22069_vm9 = vmmov %vm22040_vm2  ;;  %v5761_v17 = vld [vmem:[#allocation2 + $0x92] sm:$0xff] }
 0x286   : > { %15801 = vmatmul.mubr.msk.f32.gmra.mrb[58].mxu1 %vm22063_vm14, %v4978_v2  ;;  %vm22070_vm14 = vmmov %vm22040_vm2  ;;  %v5762_v2 = vld [vmem:[#allocation2 + $0x9a] sm:$0xff] }
 0x287   : > { %15803 = vmatprep.mubr.msk.f32.mxu1 %vm22064_vm6, %v4979_v9  ;;  %vm22071_vm6 = vmmov %vm22040_vm2  ;;  %v5763_v9 = vld [vmem:[#allocation2 + $0xa2] sm:$0xff] }
 0x28a   : > { %15804 = vmatmul.mubr.msk.f32.gmra.mrb[60].mxu1 %vm22065_vm5, %v4980_v26  ;;  %vm22072_vm5 = vmmov %vm22040_vm2  ;;  %v5764_v26 = vld [vmem:[#allocation2 + $0xaa] sm:$0xff] }
 0x28b   : > { %15806 = vmatprep.mubr.msk.f32.mxu1 %vm22066_vm8, %v4981_v4  ;;  %vm22073_vm8 = vmmov %vm22040_vm2  ;;  %v5765_v4 = vld [vmem:[#allocation2 + $0xb2] sm:$0xff] }
 0x28e   : > { %15807 = vmatmul.mubr.msk.f32.gmra.mrb[62].mxu1 %vm22067_vm7, %v4982_v59  ;;  %vm22074_vm7 = vmmov %vm22040_vm2  ;;  %v5766_v59 = vld [vmem:[#allocation2 + $0xba] sm:$0xff] }
 0x28f   : > { %15809 = vmatprep.mubr.msk.f32.mxu1 %vm22068_vm4, %v4983_v41  ;;  %vm22075_vm4 = vmmov %vm22040_vm2  ;;  %v5767_v41 = vld [vmem:[#allocation2 + $0xc2] sm:$0xff] }
 0x292   : > { %15810 = vmatmul.mubr.msk.f32.gmra.mrb[64].mxu1 %vm22040_vm2, %v4984_v18  ;;  %v5768_v18 = vld [vmem:[#allocation2 + $0xca] sm:$0xff] }
 0x293   : > { %15812 = vmatprep.mubr.msk.f32.mxu1 %vm22069_vm9, %v4985_v48  ;;  %vm22076_vm9 = vcmask 1043456   ;;  %v5769_v48 = vld [vmem:[#allocation2 + $0xd2] sm:$0xff] }
 0x296   : > { %15813 = vmatmul.mubr.msk.f32.gmra.mrb[66].mxu1 %vm22070_vm14, %v4986_v47  ;;  %vm22077_vm14 = vmmov %vm22040_vm2  ;;  %v5770_v47 = vld [vmem:[#allocation2 + $0xda] sm:$0xff] }
 0x297   : > { %15815 = vmatprep.mubr.msk.f32.mxu1 %vm22071_vm6, %v4987_v36  ;;  %vm22078_vm6 = vmmov %vm22076_vm9  ;;  %v5771_v36 = vld [vmem:[#allocation2 + $0xe2] sm:$0xff] }
 0x29a   : > { %15816 = vmatmul.mubr.msk.f32.gmra.mrb[68].mxu1 %vm22072_vm5, %v4988_v14  ;;  %vm22079_vm5 = vmmov %vm22040_vm2  ;;  %v5772_v14 = vld [vmem:[#allocation2 + $0xea] sm:$0xff] }
 0x29b   : > { %15818 = vmatprep.mubr.msk.f32.mxu1 %vm22073_vm8, %v4989_v37  ;;  %vm22080_vm8 = vmmov %vm22040_vm2  ;;  %v5773_v37 = vld [vmem:[#allocation2 + $0xf2] sm:$0xff] }
 0x29e   : > { %15819 = vmatmul.mubr.msk.f32.gmra.mrb[70].mxu1 %vm22074_vm7, %v4990_v12  ;;  %vm22081_vm7 = vmmov %vm22040_vm2  ;;  %v5775_v12 = vld [vmem:[#allocation2 + $0x102] sm:$0xff] }
 0x29f   : > { %15823 = vmatprep.mubr.msk.f32.mxu1 %vm22075_vm4, %v5743_v51  ;;  %vm22082_vm4 = vmmov %vm22040_vm2  ;;  %v5774_v51 = vld [vmem:[#allocation2 + $0xfa] sm:$0xff] }
 0x2a2   : > { %15824 = vmatmul.mubr.msk.f32.vlgmr.msra.gmra.mrb[36].mxu1 %vm22040_vm2, %v5744_v10  ;;  %v5776_v10 = vld [vmem:[#allocation2 + $0x10a] sm:$0xff] }
 0x2a3   : > { %15878 = vmatpush3.msk.msra.mxu1 %vm22076_vm9, %v20337_v33  ;;  %15826 = vmatprep.mubr.msk.f32.mxu1 %vm22077_vm14, %v20387_v27  ;;  %v20407_v33 = vld [vmem:[#allocation2 + $0x32] sm:$0xff]  ;;  %vm22083_vm9 = vmmov %vm22040_vm2 }
 0x2a4   : > { %15933 = vmatprep.subr.msk.mxu1 %vm22078_vm6, %v20384_v21  ;;  %vm22084_vm14 = vmmov %vm22040_vm2 }
 0x2a5   : > { %vm22085_vm6 = vmmov %vm22040_vm2 }
 0x2a6   : > { %15827 = vmatmul.mubr.msk.f32.gmra.mrb[38].mxu1 %vm22079_vm5, %v20395_v15  ;;  %vm22086_vm5 = vmmov %vm22040_vm2 }
 0x2a7   : > { %15829 = vmatprep.mubr.msk.f32.mxu1 %vm22080_vm8, %v20399_v11  ;;  %vm22087_vm8 = vmmov %vm22040_vm2 }
 0x2aa   : > { %15830 = vmatmul.mubr.msk.f32.gmra.mrb[40].mxu1 %vm22081_vm7, %v20403_v24  ;;  %vm22088_vm7 = vmmov %vm22040_vm2 }
 0x2ab   : > { %15832 = vmatprep.mubr.msk.f32.mxu1 %vm22082_vm4, %v20407_v33  ;;  %vm22089_vm4 = vmmov %vm22040_vm2 }
 0x2ae   : > { %15833 = vmatmul.mubr.msk.f32.gmra.mrb[42].mxu1 %vm22040_vm2, %v20411_v35 }
 0x2af   : > { %15835 = vmatprep.mubr.msk.f32.mxu1 %vm22083_vm9, %v20415_v23  ;;  %vm22090_vm9 = vmmov %vm22040_vm2 }
 0x2b2   : > { %15836 = vmatmul.mubr.msk.f32.gmra.mrb[44].mxu1 %vm22084_vm14, %v20419_v20  ;;  %vm22091_vm14 = vmmov %vm22040_vm2 }
 0x2b3   : > { %15838 = vmatprep.mubr.msk.f32.mxu1 %vm22085_vm6, %v20423_v52  ;;  %vm22092_vm6 = vmmov %vm22040_vm2 }
 0x2b6   : > { %15839 = vmatmul.mubr.msk.f32.gmra.mrb[46].mxu1 %vm22086_vm5, %v5754_v40  ;;  %vm22093_vm5 = vmmov %vm22040_vm2 }
 0x2b7   : > { %15841 = vmatprep.mubr.msk.f32.mxu1 %vm22087_vm8, %v5755_v44  ;;  %vm22094_vm8 = vmmov %vm22040_vm2 }
 0x2ba   : > { %15842 = vmatmul.mubr.msk.f32.gmra.mrb[48].mxu1 %vm22088_vm7, %v5756_v57  ;;  %vm22095_vm7 = vmmov %vm22040_vm2 }
 0x2bb   : > { %15844 = vmatprep.mubr.msk.f32.mxu1 %vm22089_vm4, %v5757_v45  ;;  %vm22096_vm4 = vmmov %vm22040_vm2 }
 0x2be   : > { %15845 = vmatmul.mubr.msk.f32.gmra.mrb[50].mxu1 %vm22040_vm2, %v5758_v55 }
 0x2bf   : > { %15847 = vmatprep.mubr.msk.f32.mxu1 %vm22090_vm9, %v5759_v28  ;;  %vm22097_vm9 = vmmov %vm22040_vm2 }
 0x2c2   : > { %15848 = vmatmul.mubr.msk.f32.gmra.mrb[52].mxu1 %vm22091_vm14, %v5760_v43  ;;  %vm22098_vm14 = vmmov %vm22040_vm2 }
 0x2c3   : > { %15850 = vmatprep.mubr.msk.f32.mxu1 %vm22092_vm6, %v5761_v17  ;;  %vm22099_vm6 = vmmov %vm22040_vm2 }
 0x2c6   : > { %15851 = vmatmul.mubr.msk.f32.gmra.mrb[54].mxu1 %vm22093_vm5, %v5762_v2  ;;  %vm22100_vm5 = vmmov %vm22040_vm2 }
 0x2c7   : > { %15853 = vmatprep.mubr.msk.f32.mxu1 %vm22094_vm8, %v5763_v9  ;;  %vm22101_vm8 = vmmov %vm22040_vm2 }
 0x2ca   : > { %15854 = vmatmul.mubr.msk.f32.gmra.mrb[56].mxu1 %vm22095_vm7, %v5764_v26  ;;  %vm22102_vm7 = vmmov %vm22040_vm2 }
 0x2cb   : > { %15856 = vmatprep.mubr.msk.f32.mxu1 %vm22096_vm4, %v5765_v4  ;;  %vm22103_vm4 = vmmov %vm22040_vm2 }
 0x2ce   : > { %15857 = vmatmul.mubr.msk.f32.gmra.mrb[58].mxu1 %vm22040_vm2, %v5766_v59 }
 0x2cf   : > { %15859 = vmatprep.mubr.msk.f32.mxu1 %vm22097_vm9, %v5767_v41  ;;  %vm22104_vm9 = vmmov %vm22040_vm2 }
 0x2d2   : > { %15860 = vmatmul.mubr.msk.f32.gmra.mrb[60].mxu1 %vm22098_vm14, %v5768_v18  ;;  %vm22105_vm14 = vmmov %vm22040_vm2 }
 0x2d3   : > { %15862 = vmatprep.mubr.msk.f32.mxu1 %vm22099_vm6, %v5769_v48  ;;  %vm22106_vm6 = vmmov %vm22040_vm2 }
 0x2d6   : > { %15863 = vmatmul.mubr.msk.f32.gmra.mrb[62].mxu1 %vm22100_vm5, %v5770_v47  ;;  %vm22107_vm5 = vmmov %vm22040_vm2 }
 0x2d7   : > { %15865 = vmatprep.mubr.msk.f32.mxu1 %vm22101_vm8, %v5771_v36  ;;  %vm22108_vm8 = vmmov %vm22040_vm2 }
 0x2da   : > { %15866 = vmatmul.mubr.msk.f32.gmra.mrb[64].mxu1 %vm22102_vm7, %v5772_v14  ;;  %vm22109_vm7 = vmmov %vm22040_vm2 }
 0x2db   : > { %15868 = vmatprep.mubr.msk.f32.mxu1 %vm22103_vm4, %v5773_v37  ;;  %vm22110_vm4 = vcmask 1043456  }
 0x2de   : > { %15869 = vmatmul.mubr.msk.f32.gmra.mrb[66].mxu1 %vm22040_vm2, %v5774_v51 }
 0x2df   : > { %15871 = vmatprep.mubr.msk.f32.mxu1 %vm22104_vm9, %v5775_v12  ;;  %vm22111_vm9 = vmmov %vm22110_vm4 }
 0x2e2   : > { %15872 = vmatmul.mubr.msk.f32.gmra.mrb[68].mxu1 %vm22105_vm14, %v5776_v10  ;;  %vm22112_vm14 = vmmov %vm22040_vm2 }
 0x2e3   : > { %15874 = vmatprep.mubr.msk.f32.mxu1 %vm22106_vm6, %v5777_v50  ;;  %vm22113_vm6 = vmmov %vm22040_vm2 }
 0x2e6   : > { %15875 = vmatmul.mubr.msk.f32.gmra.mrb[70].mxu1 %vm22107_vm5, %v5778_v32  ;;  %vm22114_vm5 = vmmov %vm22040_vm2 }
 0x2e7   : > { %15879 = vmatprep.mubr.msk.f32.mxu1 %vm22108_vm8, %v20387_v27  ;;  %vm22115_vm8 = vmmov %vm22040_vm2  ;;  %v6208_v27 = vld [vmem:[#allocation2 + $0x12a] sm:$0xff] }
 0x2ea   : > { %15880 = vmatmul.mubr.msk.f32.vlgmr.msra.gmra.mrb[36].mxu1 %vm22109_vm7, %v20395_v15  ;;  %vm22116_vm7 = vmmov %vm22040_vm2  ;;  %v6603_v15 = vld [vmem:[#allocation2 + $0x13] sm:$0xff] }
 0x2eb   : > { %15934 = vmatpush3.msk.msra.mxu1 %vm22110_vm4, %v20384_v21  ;;  %15882 = vmatprep.mubr.msk.f32.mxu1 %vm22040_vm2, %v20399_v11  ;;  %vm22117_vm4 = vmmov %vm22040_vm2  ;;  %v6207_v21 = vld [vmem:[#allocation2 + $0x122] sm:$0xff] }
 0x2ec   : > { %15989 = vmatprep.subr.msk.mxu1 %vm22111_vm9, %v13706_v49  ;;  %vm22118_vm9 = vmmov %vm22040_vm2  ;;  %v6604_v11 = vld [vmem:[#allocation2 + $0x1b] sm:$0xff] }
 0x2ee   : > { %15883 = vmatmul.mubr.msk.f32.gmra.mrb[38].mxu1 %vm22112_vm14, %v20403_v24  ;;  %vm22119_vm14 = vmmov %vm22040_vm2  ;;  %v20507_v24 = vld [vmem:[%s21512_s1 + $0x3c] sm:$0xf] }
 0x2ef   : > { %15885 = vmatprep.mubr.msk.f32.mxu1 %vm22113_vm6, %v20407_v33  ;;  %vm22121_vm6 = vmmov %vm22120_vm0  ;;  %v6607_v33 = vld [vmem:[#allocation2 + $0x33] sm:$0xff] }
 0x2f2   : > { %15886 = vmatmul.mubr.msk.f32.gmra.mrb[40].mxu1 %vm22114_vm5, %v20411_v35  ;;  %vm22122_vm5 = vmmov %vm22120_vm0  ;;  %v6608_v35 = vld [vmem:[#allocation2 + $0x3b] sm:$0xff] }
 0x2f3   : > { %15888 = vmatprep.mubr.msk.f32.mxu1 %vm22115_vm8, %v20415_v23  ;;  %vm22124_vm8 = vmmov %vm22120_vm0  ;;  %v6609_v23 = vld [vmem:[#allocation2 + $0x43] sm:$0xff] }
 0x2f6   : > { %15889 = vmatmul.mubr.msk.f32.gmra.mrb[42].mxu1 %vm22116_vm7, %v20419_v20  ;;  %vm22125_vm7 = vmmov %vm22120_vm0  ;;  %v6610_v20 = vld [vmem:[#allocation2 + $0x4b] sm:$0xff] }
 0x2f7   : > { %15891 = vmatprep.mubr.msk.f32.mxu1 %vm22117_vm4, %v20423_v52  ;;  %vm22127_vm4 = vmmov %vm22120_vm0  ;;  %v6612_v52 = vld [vmem:[#allocation2 + $0x5b] sm:$0xff] }
 0x2fa   : > { %15892 = vmatmul.mubr.msk.f32.gmra.mrb[44].mxu1 %vm22040_vm2, %v5754_v40  ;;  %vm22128_vm2 = vmmov %vm22120_vm0  ;;  %v6613_v40 = vld [vmem:[#allocation2 + $0x63] sm:$0xff] }
 0x2fb   : > { %15894 = vmatprep.mubr.msk.f32.mxu1 %vm22118_vm9, %v5755_v44  ;;  %vm22129_vm9 = vmmov %vm22120_vm0  ;;  %v6614_v44 = vld [vmem:[#allocation2 + $0x6b] sm:$0xff] }
 0x2fe   : > { %15895 = vmatmul.mubr.msk.f32.gmra.mrb[46].mxu1 %vm22119_vm14, %v5756_v57  ;;  %vm22130_vm14 = vmmov %vm22120_vm0  ;;  %v6615_v57 = vld [vmem:[#allocation2 + $0x73] sm:$0xff] }
 0x2ff   : > { %15897 = vmatprep.mubr.msk.f32.mxu1 %vm22120_vm0, %v5757_v45  ;;  %v6616_v45 = vld [vmem:[#allocation2 + $0x7b] sm:$0xff] }
 0x302   : > { %15898 = vmatmul.mubr.msk.f32.gmra.mrb[48].mxu1 %vm22121_vm6, %v5758_v55  ;;  %vm22131_vm6 = vmmov %vm22120_vm0  ;;  %v6617_v55 = vld [vmem:[#allocation2 + $0x83] sm:$0xff] }
 0x303   : > { %15900 = vmatprep.mubr.msk.f32.mxu1 %vm22122_vm5, %v5759_v28  ;;  %vm22132_vm5 = vmmov %vm22120_vm0  ;;  %v6618_v28 = vld [vmem:[#allocation2 + $0x8b] sm:$0xff] }
 0x306   : > { %15901 = vmatmul.mubr.msk.f32.gmra.mrb[50].mxu1 %vm22123_vm15, %v5760_v43  ;;  %vm22133_vm15 = vmmov %vm22120_vm0  ;;  %v6619_v43 = vld [vmem:[#allocation2 + $0x93] sm:$0xff] }
 0x307   : > { %15903 = vmatprep.mubr.msk.f32.mxu1 %vm22124_vm8, %v5761_v17  ;;  %vm22134_vm8 = vmmov %vm22120_vm0  ;;  %v6620_v17 = vld [vmem:[#allocation2 + $0x9b] sm:$0xff] }
 0x30a   : > { %15904 = vmatmul.mubr.msk.f32.gmra.mrb[52].mxu1 %vm22125_vm7, %v5762_v2  ;;  %vm22135_vm7 = vmmov %vm22120_vm0  ;;  %v6621_v2 = vld [vmem:[#allocation2 + $0xa3] sm:$0xff] }
 0x30b   : > { %15906 = vmatprep.mubr.msk.f32.mxu1 %vm22126_vm13, %v5763_v9  ;;  %vm22136_vm13 = vmmov %vm22120_vm0  ;;  %v6622_v9 = vld [vmem:[#allocation2 + $0xab] sm:$0xff] }
 0x30e   : > { %15907 = vmatmul.mubr.msk.f32.gmra.mrb[54].mxu1 %vm22127_vm4, %v5764_v26  ;;  %vm22137_vm4 = vmmov %vm22120_vm0  ;;  %v6623_v26 = vld [vmem:[#allocation2 + $0xb3] sm:$0xff] }
 0x30f   : > { %15909 = vmatprep.mubr.msk.f32.mxu1 %vm22128_vm2, %v5765_v4  ;;  %vm22138_vm2 = vmmov %vm22120_vm0  ;;  %v6624_v4 = vld [vmem:[#allocation2 + $0xbb] sm:$0xff] }
 0x312   : > { %15910 = vmatmul.mubr.msk.f32.gmra.mrb[56].mxu1 %vm22129_vm9, %v5766_v59  ;;  %vm22139_vm9 = vmmov %vm22120_vm0  ;;  %v6625_v59 = vld [vmem:[#allocation2 + $0xc3] sm:$0xff] }
 0x313   : > { %15912 = vmatprep.mubr.msk.f32.mxu1 %vm22130_vm14, %v5767_v41  ;;  %vm22140_vm14 = vmmov %vm22120_vm0  ;;  %v6626_v41 = vld [vmem:[#allocation2 + $0xcb] sm:$0xff] }
 0x316   : > { %15913 = vmatmul.mubr.msk.f32.gmra.mrb[58].mxu1 %vm22120_vm0, %v5768_v18  ;;  %v6627_v18 = vld [vmem:[#allocation2 + $0xd3] sm:$0xff] }
 0x317   : > { %15915 = vmatprep.mubr.msk.f32.mxu1 %vm22131_vm6, %v5769_v48  ;;  %vm22141_vm6 = vmmov %vm22120_vm0  ;;  %v6628_v48 = vld [vmem:[#allocation2 + $0xdb] sm:$0xff] }
 0x31a   : > { %15916 = vmatmul.mubr.msk.f32.gmra.mrb[60].mxu1 %vm22132_vm5, %v5770_v47  ;;  %vm22142_vm5 = vmmov %vm22120_vm0  ;;  %v6629_v47 = vld [vmem:[#allocation2 + $0xe3] sm:$0xff] }
 0x31b   : > { %15918 = vmatprep.mubr.msk.f32.mxu1 %vm22133_vm15, %v5771_v36  ;;  %vm22143_vm15 = vmmov %vm22120_vm0  ;;  %v6630_v36 = vld [vmem:[#allocation2 + $0xeb] sm:$0xff] }
 0x31e   : > { %15919 = vmatmul.mubr.msk.f32.gmra.mrb[62].mxu1 %vm22134_vm8, %v5772_v14  ;;  %vm22144_vm8 = vcmask 1043456   ;;  %v6631_v14 = vld [vmem:[#allocation2 + $0xf3] sm:$0xff] }
 0x31f   : > { %15921 = vmatprep.mubr.msk.f32.mxu1 %vm22135_vm7, %v5773_v37  ;;  %vm22145_vm7 = vmmov %vm22120_vm0  ;;  %v6632_v37 = vld [vmem:[#allocation2 + $0xfb] sm:$0xff] }
 0x322   : > { %15922 = vmatmul.mubr.msk.f32.gmra.mrb[64].mxu1 %vm22136_vm13, %v5774_v51  ;;  %vm22146_vm13 = vmmov %vm22144_vm8  ;;  %v6633_v51 = vld [vmem:[#allocation2 + $0x103] sm:$0xff] }
 0x323   : > { %15924 = vmatprep.mubr.msk.f32.mxu1 %vm22137_vm4, %v5775_v12  ;;  %vm22147_vm4 = vmmov %vm22120_vm0  ;;  %v6634_v12 = vld [vmem:[#allocation2 + $0x10b] sm:$0xff] }
 0x326   : > { %15925 = vmatmul.mubr.msk.f32.gmra.mrb[66].mxu1 %vm22138_vm2, %v5776_v10  ;;  %vm22148_vm2 = vmmov %vm22120_vm0  ;;  %v6635_v10 = vld [vmem:[#allocation2 + $0x113] sm:$0xff] }
 0x327   : > { %15927 = vmatprep.mubr.msk.f32.mxu1 %vm22139_vm9, %v5777_v50  ;;  %v6605_v50 = vld [vmem:[#allocation2 + $0x23] sm:$0xff]  ;;  %vm22149_vm9 = vmmov %vm22120_vm0 }
 0x32a   : > { %15928 = vmatmul.mubr.msk.f32.gmra.mrb[68].mxu1 %vm22140_vm14, %v5778_v32  ;;  %v6606_v32 = vld [vmem:[#allocation2 + $0x2b] sm:$0xff]  ;;  %vm22150_vm14 = vmmov %vm22120_vm0 }
 0x32b   : > { %15930 = vmatprep.mubr.msk.f32.mxu1 %vm22120_vm0, %v6207_v21  ;;  %v6636_v21 = vld [vmem:[#allocation2 + $0x11b] sm:$0xff] }
 0x32e   : > { %15931 = vmatmul.mubr.msk.f32.gmra.mrb[70].mxu1 %vm22141_vm6, %v6208_v27  ;;  %vm22151_vm6 = vmmov %vm22120_vm0  ;;  %v6637_v27 = vld [vmem:[#allocation2 + $0x123] sm:$0xff] }
 0x32f   : > { %15935 = vmatprep.mubr.msk.f32.mxu1 %vm22142_vm5, %v6603_v15  ;;  %vm22152_vm5 = vmmov %vm22120_vm0  ;;  %v6638_v15 = vld [vmem:[#allocation2 + $0x12b] sm:$0xff] }
 0x332   : > { %15936 = vmatmul.mubr.msk.f32.vlgmr.msra.gmra.mrb[36].mxu1 %vm22143_vm15, %v6604_v11  ;;  %vm22153_vm15 = vmmov %vm22120_vm0  ;;  %v7033_v11 = vld [vmem:[#allocation2 + $0x14] sm:$0xff] }
 0x333   : > { %15990 = vmatpush3.msk.msra.mxu1 %vm22144_vm8, %v13706_v49  ;;  %15938 = vmatprep.mubr.msk.f32.mxu1 %vm22145_vm7, %v6605_v50  ;;  %v6611_v49 = vld [vmem:[#allocation2 + $0x53] sm:$0xff]  ;;  %vm22154_vm8 = vmmov %vm22120_vm0  ;;  %v7034_v50 = vld [vmem:[#allocation2 + $0x1c] sm:$0xff] }
 0x334   : > { %16045 = vmatprep.subr.msk.mxu1 %vm22146_vm13, %v20507_v24  ;;  %vm22155_vm7 = vmmov %vm22120_vm0 }
 0x335   : > { %vm22156_vm13 = vmmov %vm22120_vm0 }
 0x336   : > { %15939 = vmatmul.mubr.msk.f32.gmra.mrb[38].mxu1 %vm22147_vm4, %v6606_v32  ;;  %vm22157_vm4 = vmmov %vm22120_vm0  ;;  %v20551_v32 = vld [vmem:[%s21512_s1 + $0x40] sm:$0xf] }
 0x337   : > { %15941 = vmatprep.mubr.msk.f32.mxu1 %vm22148_vm2, %v6607_v33  ;;  %vm22158_vm2 = vmmov %vm22120_vm0  ;;  %v20554_v33 = vld [vmem:[#allocation2 + $0x24] sm:$0xff] }
 0x33a   : > { %15942 = vmatmul.mubr.msk.f32.gmra.mrb[40].mxu1 %vm22149_vm9, %v6608_v35  ;;  %vm22159_vm9 = vmmov %vm22120_vm0  ;;  %v20562_v35 = vld [vmem:[#allocation2 + $0x2c] sm:$0xff] }
 0x33b   : > { %15944 = vmatprep.mubr.msk.f32.mxu1 %vm22150_vm14, %v6609_v23  ;;  %vm22160_vm14 = vmmov %vm22120_vm0  ;;  %v20566_v23 = vld [vmem:[#allocation2 + $0x34] sm:$0xff] }
 0x33e   : > { %15945 = vmatmul.mubr.msk.f32.gmra.mrb[42].mxu1 %vm22120_vm0, %v6610_v20  ;;  %v20570_v20 = vld [vmem:[#allocation2 + $0x3c] sm:$0xff] }
 0x33f   : > { %15947 = vmatprep.mubr.msk.f32.mxu1 %vm22151_vm6, %v6611_v49  ;;  %vm22161_vm6 = vmmov %vm22120_vm0  ;;  %v20578_v49 = vld [vmem:[#allocation2 + $0x4c] sm:$0xff] }
 0x342   : > { %15948 = vmatmul.mubr.msk.f32.gmra.mrb[44].mxu1 %vm22152_vm5, %v6612_v52  ;;  %vm22162_vm5 = vmmov %vm22120_vm0  ;;  %v20582_v52 = vld [vmem:[#allocation2 + $0x54] sm:$0xff] }
 0x343   : > { %15950 = vmatprep.mubr.msk.f32.mxu1 %vm22153_vm15, %v6613_v40  ;;  %vm22163_vm15 = vmmov %vm22120_vm0  ;;  %v20586_v40 = vld [vmem:[#allocation2 + $0x5c] sm:$0xff] }
 0x346   : > { %15951 = vmatmul.mubr.msk.f32.gmra.mrb[46].mxu1 %vm22154_vm8, %v6614_v44  ;;  %vm22164_vm8 = vmmov %vm22120_vm0  ;;  %v20590_v44 = vld [vmem:[#allocation2 + $0x64] sm:$0xff] }
 0x347   : > { %15953 = vmatprep.mubr.msk.f32.mxu1 %vm22155_vm7, %v6615_v57  ;;  %vm22165_vm7 = vmmov %vm22120_vm0  ;;  %v7044_v57 = vld [vmem:[#allocation2 + $0x6c] sm:$0xff] }
 0x34a   : > { %15954 = vmatmul.mubr.msk.f32.gmra.mrb[48].mxu1 %vm22156_vm13, %v6616_v45  ;;  %vm22166_vm13 = vmmov %vm22120_vm0  ;;  %v7045_v45 = vld [vmem:[#allocation2 + $0x74] sm:$0xff] }
 0x34b   : > { %15956 = vmatprep.mubr.msk.f32.mxu1 %vm22157_vm4, %v6617_v55  ;;  %vm22167_vm4 = vmmov %vm22120_vm0  ;;  %v7046_v55 = vld [vmem:[#allocation2 + $0x7c] sm:$0xff] }
 0x34e   : > { %15957 = vmatmul.mubr.msk.f32.gmra.mrb[50].mxu1 %vm22158_vm2, %v6618_v28  ;;  %vm22168_vm2 = vmmov %vm22120_vm0  ;;  %v7047_v28 = vld [vmem:[#allocation2 + $0x84] sm:$0xff] }
 0x34f   : > { %15959 = vmatprep.mubr.msk.f32.mxu1 %vm22159_vm9, %v6619_v43  ;;  %vm22169_vm9 = vmmov %vm22120_vm0  ;;  %v7048_v43 = vld [vmem:[#allocation2 + $0x8c] sm:$0xff] }
 0x352   : > { %15960 = vmatmul.mubr.msk.f32.gmra.mrb[52].mxu1 %vm22160_vm14, %v6620_v17  ;;  %vm22170_vm14 = vmmov %vm22120_vm0  ;;  %v7049_v17 = vld [vmem:[#allocation2 + $0x94] sm:$0xff] }
 0x353   : > { %15962 = vmatprep.mubr.msk.f32.mxu1 %vm22120_vm0, %v6621_v2  ;;  %v7050_v2 = vld [vmem:[#allocation2 + $0x9c] sm:$0xff] }
 0x356   : > { %15963 = vmatmul.mubr.msk.f32.gmra.mrb[54].mxu1 %vm22161_vm6, %v6622_v9  ;;  %vm22171_vm6 = vmmov %vm22120_vm0  ;;  %v7051_v9 = vld [vmem:[#allocation2 + $0xa4] sm:$0xff] }
 0x357   : > { %15965 = vmatprep.mubr.msk.f32.mxu1 %vm22162_vm5, %v6623_v26  ;;  %vm22172_vm5 = vmmov %vm22120_vm0  ;;  %v7052_v26 = vld [vmem:[#allocation2 + $0xac] sm:$0xff] }
 0x35a   : > { %15966 = vmatmul.mubr.msk.f32.gmra.mrb[56].mxu1 %vm22163_vm15, %v6624_v4  ;;  %vm22173_vm15 = vmmov %vm22120_vm0  ;;  %v7053_v4 = vld [vmem:[#allocation2 + $0xb4] sm:$0xff] }
 0x35b   : > { %15968 = vmatprep.mubr.msk.f32.mxu1 %vm22164_vm8, %v6625_v59  ;;  %vm22174_vm8 = vmmov %vm22120_vm0  ;;  %v7054_v59 = vld [vmem:[#allocation2 + $0xbc] sm:$0xff] }
 0x35e   : > { %15969 = vmatmul.mubr.msk.f32.gmra.mrb[58].mxu1 %vm22165_vm7, %v6626_v41  ;;  %vm22175_vm7 = vmmov %vm22120_vm0  ;;  %v7055_v41 = vld [vmem:[#allocation2 + $0xc4] sm:$0xff] }
 0x35f   : > { %15971 = vmatprep.mubr.msk.f32.mxu1 %vm22166_vm13, %v6627_v18  ;;  %vm22176_vm13 = vmmov %vm22120_vm0  ;;  %v7056_v18 = vld [vmem:[#allocation2 + $0xcc] sm:$0xff] }
 0x362   : > { %15972 = vmatmul.mubr.msk.f32.gmra.mrb[60].mxu1 %vm22167_vm4, %v6628_v48  ;;  %vm22177_vm4 = vmmov %vm22120_vm0  ;;  %v7057_v48 = vld [vmem:[#allocation2 + $0xd4] sm:$0xff] }
 0x363   : > { %15974 = vmatprep.mubr.msk.f32.mxu1 %vm22168_vm2, %v6629_v47  ;;  %vm22178_vm2 = vmmov %vm22120_vm0  ;;  %v7058_v47 = vld [vmem:[#allocation2 + $0xdc] sm:$0xff] }
 0x366   : > { %15975 = vmatmul.mubr.msk.f32.gmra.mrb[62].mxu1 %vm22169_vm9, %v6630_v36  ;;  %vm22179_vm9 = vcmask 1043456   ;;  %v7059_v36 = vld [vmem:[#allocation2 + $0xe4] sm:$0xff] }
 0x367   : > { %15977 = vmatprep.mubr.msk.f32.mxu1 %vm22170_vm14, %v6631_v14  ;;  %vm22180_vm14 = vmmov %vm22120_vm0  ;;  %v7060_v14 = vld [vmem:[#allocation2 + $0xec] sm:$0xff] }
 0x36a   : > { %15978 = vmatmul.mubr.msk.f32.gmra.mrb[64].mxu1 %vm22120_vm0, %v6632_v37  ;;  %vm22181_vm0 = vmmov %vm22179_vm9  ;;  %v7061_v37 = vld [vmem:[#allocation2 + $0xf4] sm:$0xff] }
 0x36b   : > { %15980 = vmatprep.mubr.msk.f32.mxu1 %vm22171_vm6, %v6633_v51  ;;  %vm22182_vm6 = vmmov %vm22178_vm2  ;;  %v7062_v51 = vld [vmem:[#allocation2 + $0xfc] sm:$0xff] }
 0x36e   : > { %15981 = vmatmul.mubr.msk.f32.gmra.mrb[66].mxu1 %vm22172_vm5, %v6634_v12  ;;  %vm22183_vm5 = vmmov %vm22178_vm2  ;;  %v7063_v12 = vld [vmem:[#allocation2 + $0x104] sm:$0xff] }
 0x36f   : > { %15983 = vmatprep.mubr.msk.f32.mxu1 %vm22173_vm15, %v6635_v10  ;;  %vm22184_vm15 = vmmov %vm22178_vm2  ;;  %v7064_v10 = vld [vmem:[#allocation2 + $0x10c] sm:$0xff] }
 0x372   : > { %15984 = vmatmul.mubr.msk.f32.gmra.mrb[68].mxu1 %vm22174_vm8, %v6636_v21  ;;  %vm22185_vm8 = vmmov %vm22178_vm2  ;;  %v7065_v21 = vld [vmem:[#allocation2 + $0x114] sm:$0xff] }
 0x373   : > { %15986 = vmatprep.mubr.msk.f32.mxu1 %vm22175_vm7, %v6637_v27  ;;  %vm22186_vm7 = vmmov %vm22178_vm2  ;;  %v7066_v27 = vld [vmem:[#allocation2 + $0x11c] sm:$0xff] }
 0x376   : > { %15987 = vmatmul.mubr.msk.f32.gmra.mrb[70].mxu1 %vm22176_vm13, %v6638_v15  ;;  %vm22187_vm13 = vmmov %vm22178_vm2  ;;  %v7067_v15 = vld [vmem:[#allocation2 + $0x124] sm:$0xff] }
 0x377   : > { %15991 = vmatprep.mubr.msk.f32.mxu1 %vm22177_vm4, %v7033_v11  ;;  %vm22188_vm4 = vmmov %vm22178_vm2  ;;  %v7068_v11 = vld [vmem:[#allocation2 + $0x12c] sm:$0xff] }
 0x37a   : > { %15992 = vmatmul.mubr.msk.f32.vlgmr.msra.gmra.mrb[36].mxu1 %vm22178_vm2, %v7034_v50  ;;  %v13820_v50 = vld [vmem:[%s21512_s1 + $0x44] sm:$0xf] }
 0x37b   : > { %16046 = vmatpush3.msk.msra.mxu1 %vm22179_vm9, %v20507_v24  ;;  %15994 = vmatprep.mubr.msk.f32.mxu1 %vm22180_vm14, %v20554_v33  ;;  %v20574_v24 = vld [vmem:[#allocation2 + $0x44] sm:$0xff]  ;;  %vm22189_vm9 = vmmov %vm22178_vm2 }
 0x37c   : > { %16101 = vmatprep.subr.msk.mxu1 %vm22181_vm0, %v20551_v32  ;;  %vm22190_vm14 = vmmov %vm22178_vm2 }
 0x37d   : > { %vm22191_vm0 = vmmov %vm22178_vm2 }
 0x37e   : > { %15995 = vmatmul.mubr.msk.f32.gmra.mrb[38].mxu1 %vm22182_vm6, %v20562_v35  ;;  %vm22192_vm6 = vmmov %vm22191_vm0 }
 0x37f   : > { %15997 = vmatprep.mubr.msk.f32.mxu1 %vm22183_vm5, %v20566_v23  ;;  %vm22193_vm5 = vmmov %vm22191_vm0 }
 0x382   : > { %15998 = vmatmul.mubr.msk.f32.gmra.mrb[40].mxu1 %vm22184_vm15, %v20570_v20  ;;  %vm22194_vm15 = vmmov %vm22191_vm0 }
 0x383   : > { %16000 = vmatprep.mubr.msk.f32.mxu1 %vm22185_vm8, %v20574_v24  ;;  %vm22195_vm8 = vmmov %vm22191_vm0 }
 0x386   : > { %16001 = vmatmul.mubr.msk.f32.gmra.mrb[42].mxu1 %vm22186_vm7, %v20578_v49  ;;  %vm22196_vm7 = vmmov %vm22191_vm0 }
 0x387   : > { %16003 = vmatprep.mubr.msk.f32.mxu1 %vm22187_vm13, %v20582_v52  ;;  %vm22197_vm13 = vmmov %vm22191_vm0 }
 0x38a   : > { %16004 = vmatmul.mubr.msk.f32.gmra.mrb[44].mxu1 %vm22188_vm4, %v20586_v40  ;;  %vm22198_vm4 = vmmov %vm22191_vm0 }
 0x38b   : > { %16006 = vmatprep.mubr.msk.f32.mxu1 %vm22178_vm2, %v20590_v44  ;;  %vm22199_vm2 = vmmov %vm22191_vm0 }
 0x38e   : > { %16007 = vmatmul.mubr.msk.f32.gmra.mrb[46].mxu1 %vm22189_vm9, %v7044_v57  ;;  %vm22200_vm9 = vmmov %vm22191_vm0 }
 0x38f   : > { %16009 = vmatprep.mubr.msk.f32.mxu1 %vm22190_vm14, %v7045_v45  ;;  %vm22201_vm14 = vmmov %vm22191_vm0 }
 0x392   : > { %16010 = vmatmul.mubr.msk.f32.gmra.mrb[48].mxu1 %vm22191_vm0, %v7046_v55 }
 0x393   : > { %16012 = vmatprep.mubr.msk.f32.mxu1 %vm22192_vm6, %v7047_v28  ;;  %vm22202_vm6 = vmmov %vm22191_vm0 }
 0x396   : > { %16013 = vmatmul.mubr.msk.f32.gmra.mrb[50].mxu1 %vm22193_vm5, %v7048_v43  ;;  %vm22203_vm5 = vmmov %vm22191_vm0 }
 0x397   : > { %16015 = vmatprep.mubr.msk.f32.mxu1 %vm22194_vm15, %v7049_v17  ;;  %vm22204_vm15 = vmmov %vm22191_vm0 }
 0x39a   : > { %16016 = vmatmul.mubr.msk.f32.gmra.mrb[52].mxu1 %vm22195_vm8, %v7050_v2  ;;  %vm22205_vm8 = vmmov %vm22191_vm0 }
 0x39b   : > { %16018 = vmatprep.mubr.msk.f32.mxu1 %vm22196_vm7, %v7051_v9  ;;  %vm22206_vm7 = vmmov %vm22191_vm0 }
 0x39e   : > { %16019 = vmatmul.mubr.msk.f32.gmra.mrb[54].mxu1 %vm22197_vm13, %v7052_v26  ;;  %vm22207_vm13 = vmmov %vm22191_vm0 }
 0x39f   : > { %16021 = vmatprep.mubr.msk.f32.mxu1 %vm22198_vm4, %v7053_v4  ;;  %vm22208_vm4 = vmmov %vm22191_vm0 }
 0x3a2   : > { %16022 = vmatmul.mubr.msk.f32.gmra.mrb[56].mxu1 %vm22199_vm2, %v7054_v59  ;;  %vm22209_vm2 = vmmov %vm22191_vm0 }
 0x3a3   : > { %16024 = vmatprep.mubr.msk.f32.mxu1 %vm22200_vm9, %v7055_v41  ;;  %vm22210_vm9 = vmmov %vm22191_vm0 }
 0x3a6   : > { %16025 = vmatmul.mubr.msk.f32.gmra.mrb[58].mxu1 %vm22201_vm14, %v7056_v18  ;;  %vm22211_vm14 = vmmov %vm22191_vm0 }
 0x3a7   : > { %16027 = vmatprep.mubr.msk.f32.mxu1 %vm22191_vm0, %v7057_v48 }
 0x3aa   : > { %16028 = vmatmul.mubr.msk.f32.gmra.mrb[60].mxu1 %vm22202_vm6, %v7058_v47  ;;  %vm22212_vm6 = vmmov %vm22191_vm0 }
 0x3ab   : > { %16030 = vmatprep.mubr.msk.f32.mxu1 %vm22203_vm5, %v7059_v36  ;;  %vm22213_vm5 = vmmov %vm22191_vm0 }
 0x3ae   : > { %16031 = vmatmul.mubr.msk.f32.gmra.mrb[62].mxu1 %vm22204_vm15, %v7060_v14  ;;  %vm22214_vm15 = vcmask 1043456  }
 0x3af   : > { %16033 = vmatprep.mubr.msk.f32.mxu1 %vm22205_vm8, %v7061_v37  ;;  %vm22215_vm8 = vmmov %vm22191_vm0 }
 0x3b2   : > { %16034 = vmatmul.mubr.msk.f32.gmra.mrb[64].mxu1 %vm22206_vm7, %v7062_v51  ;;  %vm22216_vm7 = vmmov %vm22214_vm15 }
 0x3b3   : > { %16036 = vmatprep.mubr.msk.f32.mxu1 %vm22207_vm13, %v7063_v12  ;;  %vm22217_vm13 = vmmov %vm22191_vm0 }
 0x3b6   : > { %16037 = vmatmul.mubr.msk.f32.gmra.mrb[66].mxu1 %vm22208_vm4, %v7064_v10  ;;  %vm22218_vm4 = vmmov %vm22191_vm0 }
 0x3b7   : > { %16039 = vmatprep.mubr.msk.f32.mxu1 %vm22209_vm2, %v7065_v21  ;;  %vm22219_vm2 = vmmov %vm22191_vm0 }
 0x3ba   : > { %16040 = vmatmul.mubr.msk.f32.gmra.mrb[68].mxu1 %vm22210_vm9, %v7066_v27  ;;  %vm22220_vm9 = vmmov %vm22191_vm0 }
 0x3bb   : > { %16042 = vmatprep.mubr.msk.f32.mxu1 %vm22211_vm14, %v7067_v15  ;;  %vm22221_vm14 = vmmov %vm22191_vm0 }
 0x3be   : > { %16043 = vmatmul.mubr.msk.f32.gmra.mrb[70].mxu1 %vm22191_vm0, %v7068_v11 }
 0x3bf   : > { %16047 = vmatprep.mubr.msk.f32.mxu1 %vm22212_vm6, %v20554_v33  ;;  %vm22222_vm6 = vmmov %vm22191_vm0  ;;  %v7498_v33 = vld [vmem:[#allocation2 + $0x13c] sm:$0xff] }
 0x3c2   : > { %16048 = vmatmul.mubr.msk.f32.vlgmr.msra.gmra.mrb[36].mxu1 %vm22213_vm5, %v20562_v35  ;;  %vm22223_vm5 = vmmov %vm22191_vm0  ;;  %v7893_v35 = vld [vmem:[#allocation2 + $0x25] sm:$0xff] }
 0x3c3   : > { %16102 = vmatpush3.msk.msra.mxu1 %vm22214_vm15, %v20551_v32  ;;  %16050 = vmatprep.mubr.msk.f32.mxu1 %vm22215_vm8, %v20566_v23  ;;  %vm22224_vm15 = vmmov %vm22191_vm0  ;;  %v7497_v32 = vld [vmem:[#allocation2 + $0x134] sm:$0xff] }
 0x3c4   : > { %16157 = vmatprep.subr.msk.mxu1 %vm22216_vm7, %v13820_v50  ;;  %vm22225_vm8 = vmmov %vm22191_vm0  ;;  %v7894_v23 = vld [vmem:[#allocation2 + $0x2d] sm:$0xff] }
 0x3c5   : > { %vm22226_vm7 = vmmov %vm22191_vm0 }
 0x3c6   : > { %16051 = vmatmul.mubr.msk.f32.gmra.mrb[38].mxu1 %vm22217_vm13, %v20570_v20  ;;  %vm22227_vm13 = vmmov %vm22191_vm0  ;;  %v7895_v20 = vld [vmem:[#allocation2 + $0x35] sm:$0xff] }
 0x3c7   : > { %16053 = vmatprep.mubr.msk.f32.mxu1 %vm22218_vm4, %v20574_v24  ;;  %vm22228_vm4 = vmmov %vm22191_vm0  ;;  %v7896_v24 = vld [vmem:[#allocation2 + $0x3d] sm:$0xff] }
 0x3ca   : > { %16054 = vmatmul.mubr.msk.f32.gmra.mrb[40].mxu1 %vm22219_vm2, %v20578_v49  ;;  %vm22229_vm2 = vmmov %vm22191_vm0  ;;  %v7897_v49 = vld [vmem:[#allocation2 + $0x45] sm:$0xff] }
 0x3cb   : > { %16056 = vmatprep.mubr.msk.f32.mxu1 %vm22220_vm9, %v20582_v52  ;;  %vm22230_vm9 = vmmov %vm22191_vm0  ;;  %v7898_v52 = vld [vmem:[#allocation2 + $0x4d] sm:$0xff] }
 0x3ce   : > { %16057 = vmatmul.mubr.msk.f32.gmra.mrb[42].mxu1 %vm22221_vm14, %v20586_v40  ;;  %vm22231_vm14 = vmmov %vm22191_vm0  ;;  %v7899_v40 = vld [vmem:[#allocation2 + $0x55] sm:$0xff] }
 0x3cf   : > { %16059 = vmatprep.mubr.msk.f32.mxu1 %vm22191_vm0, %v20590_v44  ;;  %v7900_v44 = vld [vmem:[#allocation2 + $0x5d] sm:$0xff] }
 0x3d2   : > { %16060 = vmatmul.mubr.msk.f32.gmra.mrb[44].mxu1 %vm22222_vm6, %v7044_v57  ;;  %vm22232_vm6 = vmmov %vm22191_vm0  ;;  %v7901_v57 = vld [vmem:[#allocation2 + $0x65] sm:$0xff] }
 0x3d3   : > { %16062 = vmatprep.mubr.msk.f32.mxu1 %vm22223_vm5, %v7045_v45  ;;  %vm22233_vm5 = vmmov %vm22191_vm0  ;;  %v13861_v45 = vld [vmem:[%s21512_s1 + $0x4c] sm:$0xf] }
 0x3d6   : > { %16063 = vmatmul.mubr.msk.f32.gmra.mrb[46].mxu1 %vm22224_vm15, %v7046_v55  ;;  %vm22234_vm15 = vmmov %vm22191_vm0  ;;  %v7902_v55 = vld [vmem:[#allocation2 + $0x6d] sm:$0xff] }
 0x3d7   : > { %16065 = vmatprep.mubr.msk.f32.mxu1 %vm22225_vm8, %v7047_v28  ;;  %vm22235_vm8 = vmmov %vm22191_vm0  ;;  %v7903_v28 = vld [vmem:[#allocation2 + $0x75] sm:$0xff] }
 0x3da   : > { %16066 = vmatmul.mubr.msk.f32.gmra.mrb[48].mxu1 %vm22226_vm7, %v7048_v43  ;;  %vm22236_vm7 = vmmov %vm22191_vm0  ;;  %v7904_v43 = vld [vmem:[#allocation2 + $0x7d] sm:$0xff] }
 0x3db   : > { %16068 = vmatprep.mubr.msk.f32.mxu1 %vm22227_vm13, %v7049_v17  ;;  %vm22237_vm13 = vmmov %vm22191_vm0  ;;  %v7905_v17 = vld [vmem:[#allocation2 + $0x85] sm:$0xff] }
 0x3de   : > { %16069 = vmatmul.mubr.msk.f32.gmra.mrb[50].mxu1 %vm22228_vm4, %v7050_v2  ;;  %vm22238_vm4 = vmmov %vm22191_vm0  ;;  %v7906_v2 = vld [vmem:[#allocation2 + $0x8d] sm:$0xff] }
 0x3df   : > { %16071 = vmatprep.mubr.msk.f32.mxu1 %vm22229_vm2, %v7051_v9  ;;  %vm22239_vm2 = vmmov %vm22191_vm0  ;;  %v7907_v9 = vld [vmem:[#allocation2 + $0x95] sm:$0xff] }
 0x3e2   : > { %16072 = vmatmul.mubr.msk.f32.gmra.mrb[52].mxu1 %vm22230_vm9, %v7052_v26  ;;  %vm22240_vm9 = vmmov %vm22191_vm0  ;;  %v7908_v26 = vld [vmem:[#allocation2 + $0x9d] sm:$0xff] }
 0x3e3   : > { %16074 = vmatprep.mubr.msk.f32.mxu1 %vm22231_vm14, %v7053_v4  ;;  %vm22241_vm14 = vmmov %vm22191_vm0  ;;  %v7909_v4 = vld [vmem:[#allocation2 + $0xa5] sm:$0xff] }
 0x3e6   : > { %16075 = vmatmul.mubr.msk.f32.gmra.mrb[54].mxu1 %vm22191_vm0, %v7054_v59  ;;  %v7910_v59 = vld [vmem:[#allocation2 + $0xad] sm:$0xff] }
 0x3e7   : > { %16077 = vmatprep.mubr.msk.f32.mxu1 %vm22232_vm6, %v7055_v41  ;;  %vm22242_vm6 = vmmov %vm22191_vm0  ;;  %v7911_v41 = vld [vmem:[#allocation2 + $0xb5] sm:$0xff] }
 0x3ea   : > { %16078 = vmatmul.mubr.msk.f32.gmra.mrb[56].mxu1 %vm22233_vm5, %v7056_v18  ;;  %vm22243_vm5 = vmmov %vm22191_vm0  ;;  %v7912_v18 = vld [vmem:[#allocation2 + $0xbd] sm:$0xff] }
 0x3eb   : > { %16080 = vmatprep.mubr.msk.f32.mxu1 %vm22234_vm15, %v7057_v48  ;;  %vm22244_vm15 = vmmov %vm22191_vm0  ;;  %v7913_v48 = vld [vmem:[#allocation2 + $0xc5] sm:$0xff] }
 0x3ee   : > { %16081 = vmatmul.mubr.msk.f32.gmra.mrb[58].mxu1 %vm22235_vm8, %v7058_v47  ;;  %vm22245_vm8 = vmmov %vm22191_vm0  ;;  %v7914_v47 = vld [vmem:[#allocation2 + $0xcd] sm:$0xff] }
 0x3ef   : > { %16083 = vmatprep.mubr.msk.f32.mxu1 %vm22236_vm7, %v7059_v36  ;;  %vm22246_vm7 = vmmov %vm22191_vm0  ;;  %v7915_v36 = vld [vmem:[#allocation2 + $0xd5] sm:$0xff] }
 0x3f2   : > { %16084 = vmatmul.mubr.msk.f32.gmra.mrb[60].mxu1 %vm22237_vm13, %v7060_v14  ;;  %vm22247_vm13 = vmmov %vm22191_vm0  ;;  %v7916_v14 = vld [vmem:[#allocation2 + $0xdd] sm:$0xff] }
 0x3f3   : > { %16086 = vmatprep.mubr.msk.f32.mxu1 %vm22238_vm4, %v7061_v37  ;;  %vm22248_vm4 = vmmov %vm22191_vm0  ;;  %v7917_v37 = vld [vmem:[#allocation2 + $0xe5] sm:$0xff] }
 0x3f6   : > { %16087 = vmatmul.mubr.msk.f32.gmra.mrb[62].mxu1 %vm22239_vm2, %v7062_v51  ;;  %vm22249_vm2 = vcmask 1043456   ;;  %v7918_v51 = vld [vmem:[#allocation2 + $0xed] sm:$0xff] }
 0x3f7   : > { %16089 = vmatprep.mubr.msk.f32.mxu1 %vm22240_vm9, %v7063_v12  ;;  %vm22250_vm9 = vmmov %vm22191_vm0  ;;  %v7919_v12 = vld [vmem:[#allocation2 + $0xf5] sm:$0xff] }
 0x3fa   : > { %16090 = vmatmul.mubr.msk.f32.gmra.mrb[64].mxu1 %vm22241_vm14, %v7064_v10  ;;  %vm22251_vm14 = vmmov %vm22191_vm0  ;;  %v7920_v10 = vld [vmem:[#allocation2 + $0xfd] sm:$0xff] }
 0x3fb   : > { %16092 = vmatprep.mubr.msk.f32.mxu1 %vm22191_vm0, %v7065_v21  ;;  %v7921_v21 = vld [vmem:[#allocation2 + $0x105] sm:$0xff] }
 0x3fe   : > { %16093 = vmatmul.mubr.msk.f32.gmra.mrb[66].mxu1 %vm22242_vm6, %v7066_v27  ;;  %vm22252_vm6 = vmmov %vm22191_vm0  ;;  %v7922_v27 = vld [vmem:[#allocation2 + $0x10d] sm:$0xff] }
 0x3ff   : > { %16095 = vmatprep.mubr.msk.f32.mxu1 %vm22243_vm5, %v7067_v15  ;;  %vm22253_vm5 = vmmov %vm22191_vm0  ;;  %v7923_v15 = vld [vmem:[#allocation2 + $0x115] sm:$0xff] }
 0x402   : > { %16096 = vmatmul.mubr.msk.f32.gmra.mrb[68].mxu1 %vm22244_vm15, %v7068_v11  ;;  %vm22254_vm15 = vmmov %vm22191_vm0  ;;  %v7924_v11 = vld [vmem:[#allocation2 + $0x11d] sm:$0xff] }
 0x403   : > { %16098 = vmatprep.mubr.msk.f32.mxu1 %vm22245_vm8, %v7497_v32  ;;  %vm22255_vm8 = vmmov %vm22191_vm0  ;;  %v7927_v32 = vld [vmem:[#allocation2 + $0x135] sm:$0xff] }
 0x406   : > { %16099 = vmatmul.mubr.msk.f32.gmra.mrb[70].mxu1 %vm22246_vm7, %v7498_v33  ;;  %vm22256_vm7 = vmmov %vm22249_vm2  ;;  %v7926_v33 = vld [vmem:[#allocation2 + $0x12d] sm:$0xff] }
 0x407   : > { %16103 = vmatprep.mubr.msk.f32.mxu1 %vm22247_vm13, %v7893_v35  ;;  %16213 = vmatprep.subr.msk.mxu0 %vm22256_vm7, %v13861_v45  ;;  %vm22257_vm13 = vmmov %vm22249_vm2  ;;  %v7928_v35 = vld [vmem:[#allocation2 + $0x13d] sm:$0xff] }
 0x408   : > { %16214 = vmatpush3.msk.msra.mxu0 %vm22257_vm13, %v13861_v45  ;;  %vm22266_vm7 = vmmov %vm22191_vm0  ;;  %v8331_v45 = vld [vmem:[#allocation2 + $0x66] sm:$0xff] }
 0x409   : > { %vm22267_vm13 = vmmov %vm22191_vm0 }
 0x40a   : > { %16104 = vmatmul.mubr.msk.f32.vlgmr.msra.gmra.mrb[36].mxu1 %vm22248_vm4, %v7894_v23  ;;  %vm22258_vm4 = vmmov %vm22191_vm0  ;;  %v8323_v23 = vld [vmem:[#allocation2 + $0x26] sm:$0xff] }
 0x40b   : > { %16158 = vmatpush3.msk.msra.mxu1 %vm22249_vm2, %v13820_v50  ;;  %16106 = vmatprep.mubr.msk.f32.mxu1 %vm22250_vm9, %v7895_v20  ;;  %vm22259_vm2 = vmmov %vm22191_vm0  ;;  %v7925_v50 = vld [vmem:[#allocation2 + $0x125] sm:$0xff]  ;;  %v8324_v20 = vld [vmem:[#allocation2 + $0x2e] sm:$0xff] }
 0x40c   : > { %vm22260_vm9 = vmmov %vm22191_vm0 }
 0x40e   : > { %16107 = vmatmul.mubr.msk.f32.gmra.mrb[38].mxu1 %vm22251_vm14, %v7896_v24  ;;  %vm22261_vm14 = vmmov %vm22191_vm0  ;;  %v8325_v24 = vld [vmem:[#allocation2 + $0x36] sm:$0xff] }
 0x40f   : > { %16109 = vmatprep.mubr.msk.f32.mxu1 %vm22191_vm0, %v7897_v49  ;;  %v8326_v49 = vld [vmem:[#allocation2 + $0x3e] sm:$0xff] }
 0x412   : > { %16110 = vmatmul.mubr.msk.f32.gmra.mrb[40].mxu1 %vm22252_vm6, %v7898_v52  ;;  %vm22262_vm6 = vmmov %vm22191_vm0  ;;  %v8327_v52 = vld [vmem:[#allocation2 + $0x46] sm:$0xff] }
 0x413   : > { %16112 = vmatprep.mubr.msk.f32.mxu1 %vm22253_vm5, %v7899_v40  ;;  %vm22263_vm5 = vmmov %vm22191_vm0  ;;  %v8328_v40 = vld [vmem:[#allocation2 + $0x4e] sm:$0xff] }
 0x416   : > { %16113 = vmatmul.mubr.msk.f32.gmra.mrb[42].mxu1 %vm22254_vm15, %v7900_v44  ;;  %vm22264_vm15 = vmmov %vm22191_vm0  ;;  %v8329_v44 = vld [vmem:[#allocation2 + $0x56] sm:$0xff] }
 0x417   : > { %16115 = vmatprep.mubr.msk.f32.mxu1 %vm22255_vm8, %v7901_v57  ;;  %vm22265_vm8 = vmmov %vm22191_vm0  ;;  %v8330_v57 = vld [vmem:[#allocation2 + $0x5e] sm:$0xff] }
 0x41a   : > { %16116 = vmatmul.mubr.msk.f32.gmra.mrb[44].mxu1 %vm22258_vm4, %v7902_v55  ;;  %vm22268_vm4 = vmmov %vm22191_vm0  ;;  %v8332_v55 = vld [vmem:[#allocation2 + $0x6e] sm:$0xff] }
 0x41b   : > { %16118 = vmatprep.mubr.msk.f32.mxu1 %vm22259_vm2, %v7903_v28  ;;  %vm22269_vm2 = vmmov %vm22191_vm0  ;;  %v8333_v28 = vld [vmem:[#allocation2 + $0x76] sm:$0xff] }
 0x41e   : > { %16119 = vmatmul.mubr.msk.f32.gmra.mrb[46].mxu1 %vm22260_vm9, %v7904_v43  ;;  %vm22270_vm9 = vmmov %vm22191_vm0  ;;  %v8334_v43 = vld [vmem:[#allocation2 + $0x7e] sm:$0xff] }
 0x41f   : > { %16121 = vmatprep.mubr.msk.f32.mxu1 %vm22261_vm14, %v7905_v17  ;;  %vm22271_vm14 = vmmov %vm22191_vm0  ;;  %v8335_v17 = vld [vmem:[#allocation2 + $0x86] sm:$0xff] }
 0x422   : > { %16122 = vmatmul.mubr.msk.f32.gmra.mrb[48].mxu1 %vm22191_vm0, %v7906_v2  ;;  %v8336_v2 = vld [vmem:[#allocation2 + $0x8e] sm:$0xff] }
 0x423   : > { %16124 = vmatprep.mubr.msk.f32.mxu1 %vm22262_vm6, %v7907_v9  ;;  %vm22272_vm6 = vmmov %vm22191_vm0  ;;  %v8337_v9 = vld [vmem:[#allocation2 + $0x96] sm:$0xff] }
 0x426   : > { %16125 = vmatmul.mubr.msk.f32.gmra.mrb[50].mxu1 %vm22263_vm5, %v7908_v26  ;;  %vm22273_vm5 = vmmov %vm22191_vm0  ;;  %v8338_v26 = vld [vmem:[#allocation2 + $0x9e] sm:$0xff] }
 0x427   : > { %16127 = vmatprep.mubr.msk.f32.mxu1 %vm22264_vm15, %v7909_v4  ;;  %vm22274_vm15 = vmmov %vm22191_vm0  ;;  %v8339_v4 = vld [vmem:[#allocation2 + $0xa6] sm:$0xff] }
 0x42a   : > { %16128 = vmatmul.mubr.msk.f32.gmra.mrb[52].mxu1 %vm22265_vm8, %v7910_v59  ;;  %vm22275_vm8 = vmmov %vm22191_vm0  ;;  %v8340_v59 = vld [vmem:[#allocation2 + $0xae] sm:$0xff] }
 0x42b   : > { %16130 = vmatprep.mubr.msk.f32.mxu1 %vm22266_vm7, %v7911_v41  ;;  %vm22276_vm7 = vmmov %vm22191_vm0  ;;  %v8341_v41 = vld [vmem:[#allocation2 + $0xb6] sm:$0xff] }
 0x42e   : > { %16131 = vmatmul.mubr.msk.f32.gmra.mrb[54].mxu1 %vm22267_vm13, %v7912_v18  ;;  %vm22277_vm13 = vmmov %vm22191_vm0  ;;  %v8342_v18 = vld [vmem:[#allocation2 + $0xbe] sm:$0xff] }
 0x42f   : > { %16133 = vmatprep.mubr.msk.f32.mxu1 %vm22268_vm4, %v7913_v48  ;;  %vm22278_vm4 = vmmov %vm22191_vm0  ;;  %v8343_v48 = vld [vmem:[#allocation2 + $0xc6] sm:$0xff] }
 0x432   : > { %16134 = vmatmul.mubr.msk.f32.gmra.mrb[56].mxu1 %vm22269_vm2, %v7914_v47  ;;  %vm22279_vm2 = vmmov %vm22191_vm0  ;;  %v8344_v47 = vld [vmem:[#allocation2 + $0xce] sm:$0xff] }
 0x433   : > { %16136 = vmatprep.mubr.msk.f32.mxu1 %vm22270_vm9, %v7915_v36  ;;  %vm22280_vm9 = vmmov %vm22191_vm0  ;;  %v8345_v36 = vld [vmem:[#allocation2 + $0xd6] sm:$0xff] }
 0x436   : > { %16137 = vmatmul.mubr.msk.f32.gmra.mrb[58].mxu1 %vm22271_vm14, %v7916_v14  ;;  %vm22281_vm14 = vmmov %vm22191_vm0  ;;  %v8346_v14 = vld [vmem:[#allocation2 + $0xde] sm:$0xff] }
 0x437   : > { %16139 = vmatprep.mubr.msk.f32.mxu1 %vm22191_vm0, %v7917_v37  ;;  %v8347_v37 = vld [vmem:[#allocation2 + $0xe6] sm:$0xff] }
 0x43a   : > { %16140 = vmatmul.mubr.msk.f32.gmra.mrb[60].mxu1 %vm22272_vm6, %v7918_v51  ;;  %vm22282_vm6 = vmmov %vm22191_vm0  ;;  %v8348_v51 = vld [vmem:[#allocation2 + $0xee] sm:$0xff] }
 0x43b   : > { %16142 = vmatprep.mubr.msk.f32.mxu1 %vm22273_vm5, %v7919_v12  ;;  %vm22283_vm5 = vmmov %vm22191_vm0  ;;  %v8349_v12 = vld [vmem:[#allocation2 + $0xf6] sm:$0xff] }
 0x43e   : > { %16143 = vmatmul.mubr.msk.f32.gmra.mrb[62].mxu1 %vm22274_vm15, %v7920_v10  ;;  %vm22284_vm15 = vmmov %vm22191_vm0  ;;  %v8350_v10 = vld [vmem:[#allocation2 + $0xfe] sm:$0xff] }
 0x43f   : > { %16145 = vmatprep.mubr.msk.f32.mxu1 %vm22275_vm8, %v7921_v21  ;;  %vm22285_vm8 = vmmov %vm22191_vm0  ;;  %v8351_v21 = vld [vmem:[#allocation2 + $0x106] sm:$0xff] }
 0x442   : > { %16146 = vmatmul.mubr.msk.f32.gmra.mrb[64].mxu1 %vm22276_vm7, %v7922_v27  ;;  %vm22286_vm7 = vmmov %vm22191_vm0  ;;  %v8352_v27 = vld [vmem:[#allocation2 + $0x10e] sm:$0xff] }
 0x443   : > { %16148 = vmatprep.mubr.msk.f32.mxu1 %vm22277_vm13, %v7923_v15  ;;  %vm22287_vm13 = vmmov %vm22191_vm0  ;;  %v8353_v15 = vld [vmem:[#allocation2 + $0x116] sm:$0xff] }
 0x446   : > { %16149 = vmatmul.mubr.msk.f32.gmra.mrb[66].mxu1 %vm22278_vm4, %v7924_v11  ;;  %vm22288_vm4 = vmmov %vm22191_vm0  ;;  %v8354_v11 = vld [vmem:[#allocation2 + $0x11e] sm:$0xff] }
 0x447   : > { %16151 = vmatprep.mubr.msk.f32.mxu1 %vm22279_vm2, %v7925_v50  ;;  %vm22289_vm2 = vmmov %vm22191_vm0  ;;  %v8355_v50 = vld [vmem:[#allocation2 + $0x126] sm:$0xff] }
 0x44a   : > { %16152 = vmatmul.mubr.msk.f32.gmra.mrb[68].mxu1 %vm22280_vm9, %v7926_v33  ;;  %vm22290_vm9 = vmmov %vm22191_vm0  ;;  %v8356_v33 = vld [vmem:[#allocation2 + $0x12e] sm:$0xff] }
 0x44b   : > { %16154 = vmatprep.mubr.msk.f32.mxu1 %vm22281_vm14, %v7927_v32  ;;  %vm22291_vm14 = vmmov %vm22191_vm0  ;;  %v8357_v32 = vld [vmem:[#allocation2 + $0x136] sm:$0xff] }
 0x44e   : > { %16155 = vmatmul.mubr.msk.f32.gmra.mrb[70].mxu1 %vm22191_vm0, %v7928_v35  ;;  %v8358_v35 = vld [vmem:[#allocation2 + $0x13e] sm:$0xff] }
 0x44f   : > { %16159 = vmatprep.mubr.msk.f32.mxu1 %vm22282_vm6, %v8323_v23  ;;  %vm22292_vm6 = vmmov %vm22191_vm0  ;;  %v9056_v23 = vld [vmem:[#allocation3 + $0x1] sm:$0xff] }
 0x452   : > { %16160 = vmatmul.mubr.msk.f32.vlgmr.msra.gmra.mrb[36].mxu1 %vm22283_vm5, %v8324_v20  ;;  %vm22293_vm5 = vmmov %vm22191_vm0  ;;  %v13860_v20 = vld [vmem:[%s21512_s1 + $0x48] sm:$0xf] }
 0x453   : > { %16162 = vmatprep.mubr.msk.f32.mxu1 %vm22284_vm15, %v8325_v24  ;;  %vm22294_vm15 = vmmov %vm22191_vm0  ;;  %v9057_v24 = vld [vmem:[#allocation3 + $0x9] sm:$0xff] }
 0x456   : > { %16163 = vmatmul.mubr.msk.f32.gmra.mrb[38].mxu1 %vm22285_vm8, %v8326_v49  ;;  %vm22295_vm8 = vmmov %vm22191_vm0  ;;  %v20758_v49 = vld [vmem:[%s21512_s1 + $0x50] sm:$0xf] }
 0x457   : > { %16165 = vmatprep.mubr.msk.f32.mxu1 %vm22286_vm7, %v8327_v52  ;;  %vm22296_vm7 = vmmov %vm22191_vm0  ;;  %v20765_v52 = vld [vmem:[%s21513_s2 + $0x1] ss:$0 sm:$0xff] }
 0x45a   : > { %16166 = vmatmul.mubr.msk.f32.gmra.mrb[40].mxu1 %vm22287_vm13, %v8328_v40  ;;  %vm22297_vm13 = vmmov %vm22191_vm0 }
 0x45b   : > { %16168 = vmatprep.mubr.msk.f32.mxu1 %vm22288_vm4, %v8329_v44  ;;  %vm22298_vm4 = vmmov %vm22191_vm0 }
 0x45e   : > { %16169 = vmatmul.mubr.msk.f32.gmra.mrb[42].mxu1 %vm22289_vm2, %v8330_v57  ;;  %vm22299_vm2 = vmmov %vm22191_vm0 }
 0x45f   : > { %16171 = vmatprep.mubr.msk.f32.mxu1 %vm22290_vm9, %v8331_v45  ;;  %vm22300_vm9 = vmmov %vm22191_vm0 }
 0x462   : > { %16172 = vmatmul.mubr.msk.f32.gmra.mrb[44].mxu1 %vm22291_vm14, %v8332_v55  ;;  %vm22301_vm14 = vmmov %vm22191_vm0 }
 0x463   : > { %16174 = vmatprep.mubr.msk.f32.mxu1 %vm22191_vm0, %v8333_v28 }
 0x466   : > { %16175 = vmatmul.mubr.msk.f32.gmra.mrb[46].mxu1 %vm22292_vm6, %v8334_v43  ;;  %vm22302_vm6 = vmmov %vm22191_vm0 }
 0x467   : > { %16177 = vmatprep.mubr.msk.f32.mxu1 %vm22293_vm5, %v8335_v17  ;;  %vm22303_vm5 = vmmov %vm22191_vm0 }
 0x46a   : > { %16178 = vmatmul.mubr.msk.f32.gmra.mrb[48].mxu1 %vm22294_vm15, %v8336_v2  ;;  %vm22304_vm15 = vmmov %vm22191_vm0 }
 0x46b   : > { %16180 = vmatprep.mubr.msk.f32.mxu1 %vm22295_vm8, %v8337_v9  ;;  %vm22305_vm8 = vmmov %vm22191_vm0 }
 0x46e   : > { %16181 = vmatmul.mubr.msk.f32.gmra.mrb[50].mxu1 %vm22296_vm7, %v8338_v26  ;;  %vm22306_vm7 = vmmov %vm22191_vm0  ;;  %v22320_v26 = vld [vmem:[#allocation54_spill] sm:$0xff] }
 0x46f   : > { %16183 = vmatprep.mubr.msk.f32.mxu1 %vm22297_vm13, %v8339_v4  ;;  %vm22307_vm13 = vmmov %vm22191_vm0 }
 0x472   : > { %16184 = vmatmul.mubr.msk.f32.gmra.mrb[52].mxu1 %vm22298_vm4, %v8340_v59  ;;  %vm22308_vm4 = vmmov %vm22191_vm0 }
 0x473   : > { %16186 = vmatprep.mubr.msk.f32.mxu1 %vm22299_vm2, %v8341_v41  ;;  %vm22309_vm2 = vmmov %vm22191_vm0 }
 0x476   : > { %16187 = vmatmul.mubr.msk.f32.gmra.mrb[54].mxu1 %vm22300_vm9, %v8342_v18  ;;  %vm22310_vm9 = vmmov %vm22191_vm0  ;;  %v22323_v18 = vld [vmem:[#allocation57_spill] sm:$0xff] }
 0x477   : > { %16189 = vmatprep.mubr.msk.f32.mxu1 %vm22301_vm14, %v8343_v48  ;;  %vm22311_vm14 = vmmov %vm22191_vm0 }
 0x47a   : > { %16190 = vmatmul.mubr.msk.f32.gmra.mrb[56].mxu1 %vm22191_vm0, %v8344_v47 }
 0x47b   : > { %16192 = vmatprep.mubr.msk.f32.mxu1 %vm22302_vm6, %v8345_v36  ;;  %vm22312_vm6 = vmmov %vm22191_vm0 }
 0x47e   : > { %16193 = vmatmul.mubr.msk.f32.gmra.mrb[58].mxu1 %vm22303_vm5, %v8346_v14  ;;  %vm22313_vm5 = vmmov %vm22191_vm0 }
 0x47f   : > { %16195 = vmatprep.mubr.msk.f32.mxu1 %vm22304_vm15, %v8347_v37  ;;  %vm22314_vm15 = vmmov %vm22191_vm0 }
 0x482   : > { %16196 = vmatmul.mubr.msk.f32.gmra.mrb[60].mxu1 %vm22305_vm8, %v8348_v51  ;;  %vm22315_vm8 = vmmov %vm22191_vm0 }
 0x483   : > { %16198 = vmatprep.mubr.msk.f32.mxu1 %vm22306_vm7, %v8349_v12  ;;  %16215 = vmatprep.mubr.msk.f32.mxu0 %vm22315_vm8, %v9056_v23  ;;  %vm22316_vm7 = vcmask 1043456  }
 0x484   : > { %16269 = vmatprep.subr.msk.mxu0 %vm22316_vm7, %v13860_v20 }
 0x486   : > { %16199 = vmatmul.mubr.msk.f32.gmra.mrb[62].mxu1 %vm22307_vm13, %v8350_v10  ;;  %vm22317_vm13 = vmmov %vm22191_vm0 }
 0x487   : > { %16201 = vmatprep.mubr.msk.f32.mxu1 %vm22308_vm4, %v8351_v21  ;;  %16216 = vmatmul.mubr.msk.f32.vlgmr.msra.gmra.mrb[36].mxu0 %vm22317_vm13, %v9057_v24  ;;  %vm22318_vm4 = vmmov %vm22316_vm7  ;;  %vm22326_vm13 = vnez %v21769_v54 }
 0x488   : > { %16270 = vmatpush3.msk.msra.mxu0 %vm22318_vm4, %v13860_v20 }
 0x48a   : > { %16202 = vmatmul.mubr.msk.f32.gmra.mrb[64].mxu1 %vm22309_vm2, %v8352_v27  ;;  %vm22319_vm2 = vmmov %vm22318_vm4 }
 0x48b   : > { %16204 = vmatprep.mubr.msk.f32.mxu1 %vm22310_vm9, %v8353_v15  ;;  %16325 = vmatprep.subr.msk.mxu0 %vm22319_vm2, %v20758_v49  ;;  %v22328_v15 = vld [vmem:[#allocation61_spill] sm:$0xff] }
 0x48c   : > { %vm22329_vm2 = vnez %v22328_v15 }
 0x48e   : > { %16205 = vmatmul.mubr.msk.f32.gmra.mrb[66].mxu1 %vm22311_vm14, %v8354_v11 }
 0x48f   : > { %16207 = vmatprep.mubr.msk.f32.mxu1 %vm22191_vm0, %v8355_v50  ;;  %vm22321_vm0 = vnez %v22320_v26 }
 0x492   : > { %16208 = vmatmul.mubr.msk.f32.gmra.mrb[68].mxu1 %vm22312_vm6, %v8356_v33  ;;  %vm22322_vm6 = vmmov %vm22313_vm5 }
 0x493   : > { %16210 = vmatprep.mubr.msk.f32.mxu1 %vm22313_vm5, %v8357_v32  ;;  %vm22324_vm5 = vnez %v22323_v18  ;;  %vm22325_vm8 = vmmov %vm22322_vm6 }
 0x494   : > { %vm22327_vm4 = vmmov %vm22322_vm6 }
 0x496   : > { %16211 = vmatmul.mubr.msk.f32.gmra.mrb[70].mxu1 %vm22314_vm15, %v8358_v35 }
 0x525   : > { %v16161_v40 = vpop.f32.mrb[36].mxu1 }
 0x526   : > { %v8762_v44 = vadd.f32 %v16161_v40, %v20765_v52  ;;  %v8538_v57 = vpop.f32.mrb[37].mxu1 }
 0x527   : > { %v8761_v45 = vadd.f32 %v20765_v52, %v8538_v57 }
 0x528   : > { %vm8798_vm9 = vcmp.ge.f32.partialorder %v8762_v44, 0.0  ;;  %v8834_v55 = vmul.f32 0.2, %v8762_v44 }
 0x529   : > { %vm8797_vm14 = vcmp.ge.f32.partialorder %v8761_v45, 0.0  ;;  %v8833_v28 = vmul.f32 0.2, %v8761_v45  ;;  %v16164_v43 = vpop.f32.mrb[38].mxu1 }
 0x52a   : > { %v8870_v17 = vsel %vm8798_vm9, %v8762_v44, %v8834_v55  ;;  %v8764_v2 = vadd.f32 %v16164_v43, %v20765_v52  ;;  %v8548_v9 = vpop.f32.mrb[39].mxu1 }
 0x52b   : > { %v8947_v4 = vsel %vm22321_vm0, %v8870_v17, 0.0  ;;  %v8869_v59 = vsel %vm8797_vm14, %v8761_v45, %v8833_v28  ;;  %v8763_v41 = vadd.f32 %v20765_v52, %v8548_v9  ;;  %vm22330_vm14 = vmmov %vm22327_vm4 }
 0x52c   : > { %8983 = vst.msk [vmem:[#allocation3 + $0x1b] sm:$0xff] %vm22322_vm6, %v8947_v4  ;;  %v8946_v48 = vsel %vm22324_vm5, %v8869_v59, 0.0  ;;  %vm8800_vm15 = vcmp.ge.f32.partialorder %v8764_v2, 0.0  ;;  %v8836_v47 = vmul.f32 0.2, %v8764_v2  ;;  %vm22331_vm6 = vnez %v21778_v34  ;;  %vm22332_vm5 = vmmov %vm22327_vm4 }
 0x52d   : > { %8982 = vst.msk [vmem:[#allocation3 + $0x13] sm:$0xff] %vm22325_vm8, %v8946_v48  ;;  %vm8799_vm7 = vcmp.ge.f32.partialorder %v8763_v41, 0.0  ;;  %v8835_v36 = vmul.f32 0.2, %v8763_v41  ;;  %v16167_v14 = vpop.f32.mrb[40].mxu1 }
 0x52e   : > { %v8872_v37 = vsel %vm8800_vm15, %v8764_v2, %v8836_v47  ;;  %v8766_v51 = vadd.f32 %v16167_v14, %v20765_v52  ;;  %v8558_v12 = vpop.f32.mrb[41].mxu1  ;;  %vm22333_vm15 = vnez %v21786_v38 }
 0x52f   : > { %v8949_v10 = vsel %vm22326_vm13, %v8872_v37, 0.0  ;;  %v8871_v21 = vsel %vm8799_vm7, %v8763_v41, %v8835_v36  ;;  %v8765_v27 = vadd.f32 %v20765_v52, %v8558_v12  ;;  %vm22334_vm7 = vmmov %vm22327_vm4 }
 0x530   : > { %8985 = vst.msk [vmem:[#allocation3 + $0x2b] sm:$0xff] %vm22327_vm4, %v8949_v10  ;;  %v8948_v11 = vsel %vm22329_vm2, %v8871_v21, 0.0  ;;  %vm8802_vm9 = vcmp.ge.f32.partialorder %v8766_v51, 0.0  ;;  %v8838_v50 = vmul.f32 0.2, %v8766_v51  ;;  %vm22335_vm2 = vmmov %vm22327_vm4 }
 0x531   : > { %8984 = vst.msk [vmem:[#allocation3 + $0x23] sm:$0xff] %vm22330_vm14, %v8948_v11  ;;  %vm8801_vm0 = vcmp.ge.f32.partialorder %v8765_v27, 0.0  ;;  %v8837_v32 = vmul.f32 0.2, %v8765_v27  ;;  %v16170_v33 = vpop.f32.mrb[42].mxu1  ;;  %vm22337_vm14 = vmmov %vm22335_vm2 }
 0x532   : > { %v8874_v35 = vsel %vm8802_vm9, %v8766_v51, %v8838_v50  ;;  %v8768_v23 = vadd.f32 %v16170_v33, %v20765_v52  ;;  %v8568_v54 = vpop.f32.mrb[43].mxu1  ;;  %vm22336_vm9 = vnez %v21795_v29  ;;  %v22348_v33 = vld [vmem:[#allocation4_spill] sm:$0xff] }
 0x533   : > { %v8951_v20 = vsel %vm22331_vm6, %v8874_v35, 0.0  ;;  %v8873_v24 = vsel %vm8801_vm0, %v8765_v27, %v8837_v32  ;;  %v8767_v40 = vadd.f32 %v20765_v52, %v8568_v54  ;;  %vm22338_vm0 = vnez %v21804_v19  ;;  %v22351_v54 = vld [vmem:[#allocation21_spill] sm:$0xff] }
 0x534   : > { %8987 = vst.msk [vmem:[#allocation3 + $0x3b] sm:$0xff] %vm22332_vm5, %v8951_v20  ;;  %v8950_v44 = vsel %vm22333_vm15, %v8873_v24, 0.0  ;;  %vm8804_vm8 = vcmp.ge.f32.partialorder %v8768_v23, 0.0  ;;  %v8840_v57 = vmul.f32 0.2, %v8768_v23  ;;  %v9058_v45 = vld [vmem:[#allocation3 + $0x11] sm:$0xff]  ;;  %vm22339_vm5 = vmmov %vm22335_vm2 }
 0x535   : > { %v9059_v55 = vld [vmem:[#allocation3 + $0x19] sm:$0xff]  ;;  %8986 = vst.msk [vmem:[#allocation3 + $0x33] sm:$0xff] %vm22334_vm7, %v8950_v44  ;;  %vm8803_vm13 = vcmp.ge.f32.partialorder %v8767_v40, 0.0  ;;  %v8839_v28 = vmul.f32 0.2, %v8767_v40  ;;  %v16173_v43 = vpop.f32.mrb[44].mxu1  ;;  %16218 = vmatprep.mubr.msk.f32.mxu0 %vm22327_vm4, %v9058_v45  ;;  %vm22341_vm7 = vmmov %vm22335_vm2 }
 0x536   : > { %v8876_v34 = vsel %vm8804_vm8, %v8768_v23, %v8840_v57  ;;  %v8770_v17 = vadd.f32 %v16173_v43, %v20765_v52  ;;  %v8578_v2 = vpop.f32.mrb[45].mxu1  ;;  %16219 = vmatmul.mubr.msk.f32.gmra.mrb[38].mxu0 %vm22335_vm2, %v9059_v55  ;;  %vm22340_vm8 = vmmov %vm22335_vm2 }
 0x537   : > { %v8953_v38 = vsel %vm22336_vm9, %v8876_v34, 0.0  ;;  %v8875_v9 = vsel %vm8803_vm13, %v8767_v40, %v8839_v28  ;;  %v8769_v26 = vadd.f32 %v20765_v52, %v8578_v2  ;;  %vm22342_vm13 = vnez %v21817_v63  ;;  %vm22343_vm4 = vmmov %vm22335_vm2 }
 0x538   : > { %8989 = vst.msk [vmem:[#allocation3 + $0x4b] sm:$0xff] %vm22337_vm14, %v8953_v38  ;;  %v8952_v4 = vsel %vm22338_vm0, %v8875_v9, 0.0  ;;  %vm8806_vm6 = vcmp.ge.f32.partialorder %v8770_v17, 0.0  ;;  %v8842_v59 = vmul.f32 0.2, %v8770_v17  ;;  %v9060_v41 = vld [vmem:[#allocation3 + $0x21] sm:$0xff]  ;;  %vm22344_vm2 = vnez %v21825_v42  ;;  %vm22345_vm14 = vmmov %vm22343_vm4 }
 0x539   : > { %v9061_v18 = vld [vmem:[#allocation3 + $0x29] sm:$0xff]  ;;  %8988 = vst.msk [vmem:[#allocation3 + $0x43] sm:$0xff] %vm22339_vm5, %v8952_v4  ;;  %vm8805_vm15 = vcmp.ge.f32.partialorder %v8769_v26, 0.0  ;;  %v8841_v48 = vmul.f32 0.2, %v8769_v26  ;;  %v16176_v47 = vpop.f32.mrb[46].mxu1  ;;  %16221 = vmatprep.mubr.msk.f32.mxu0 %vm22340_vm8, %v9060_v41  ;;  %vm22347_vm5 = vmmov %vm22343_vm4 }
 0x53a   : > { %v8878_v29 = vsel %vm8806_vm6, %v8770_v17, %v8842_v59  ;;  %v8772_v36 = vadd.f32 %v16176_v47, %v20765_v52  ;;  %v8588_v14 = vpop.f32.mrb[47].mxu1  ;;  %16222 = vmatmul.mubr.msk.f32.gmra.mrb[40].mxu0 %vm22341_vm7, %v9061_v18  ;;  %vm22346_vm6 = vmmov %vm22343_vm4  ;;  %vm22352_vm7 = vnez %v22351_v54 }
 0x53b   : > { %v8955_v19 = vsel %vm22342_vm13, %v8878_v29, 0.0  ;;  %v8877_v37 = vsel %vm8805_vm15, %v8769_v26, %v8841_v48  ;;  %v8771_v51 = vadd.f32 %v20765_v52, %v8588_v14  ;;  %vm22349_vm15 = vnez %v22348_v33  ;;  %vm22350_vm8 = vmmov %vm22343_vm4 }
 0x53c   : > { %8991 = vst.msk [vmem:[#allocation3 + $0x5b] sm:$0xff] %vm22343_vm4, %v8955_v19  ;;  %v8954_v12 = vsel %vm22344_vm2, %v8877_v37, 0.0  ;;  %vm8808_vm9 = vcmp.ge.f32.partialorder %v8772_v36, 0.0  ;;  %v8844_v10 = vmul.f32 0.2, %v8772_v36  ;;  %v9062_v21 = vld [vmem:[#allocation3 + $0x31] sm:$0xff] }
 0x53d   : > { %v9063_v27 = vld [vmem:[#allocation3 + $0x39] sm:$0xff]  ;;  %8990 = vst.msk [vmem:[#allocation3 + $0x53] sm:$0xff] %vm22345_vm14, %v8954_v12  ;;  %vm8807_vm0 = vcmp.ge.f32.partialorder %v8771_v51, 0.0  ;;  %v8843_v15 = vmul.f32 0.2, %v8771_v51  ;;  %v16179_v11 = vpop.f32.mrb[48].mxu1  ;;  %16224 = vmatprep.mubr.msk.f32.mxu0 %vm22346_vm6, %v9062_v21  ;;  %vm22354_vm14 = vmmov %vm22343_vm4 }
 0x53e   : > { %v8880_v63 = vsel %vm8808_vm9, %v8772_v36, %v8844_v10  ;;  %v8774_v50 = vadd.f32 %v16179_v11, %v20765_v52  ;;  %v8598_v32 = vpop.f32.mrb[49].mxu1  ;;  %16225 = vmatmul.mubr.msk.f32.gmra.mrb[42].mxu0 %vm22347_vm5, %v9063_v27  ;;  %vm22353_vm9 = vmmov %vm22343_vm4  ;;  %vm22357_vm5 = vnez %v21858_v58 }
 0x53f   : > { %v8957_v42 = vsel %vm22349_vm15, %v8880_v63, 0.0  ;;  %v8879_v35 = vsel %vm8807_vm0, %v8771_v51, %v8843_v15  ;;  %v8773_v23 = vadd.f32 %v20765_v52, %v8598_v32  ;;  %vm22355_vm0 = vnez %v21851_v8  ;;  %vm22356_vm6 = vmmov %vm22343_vm4 }
 0x540   : > { %8993 = vst.msk [vmem:[#allocation3 + $0x6b] sm:$0xff] %vm22350_vm8, %v8957_v42  ;;  %v8956_v20 = vsel %vm22352_vm7, %v8879_v35, 0.0  ;;  %vm8810_vm13 = vcmp.ge.f32.partialorder %v8774_v50, 0.0  ;;  %v8846_v24 = vmul.f32 0.2, %v8774_v50  ;;  %v9064_v40 = vld [vmem:[#allocation3 + $0x41] sm:$0xff]  ;;  %vm22358_vm8 = vmmov %vm22343_vm4 }
 0x541   : > { %v9065_v44 = vld [vmem:[#allocation3 + $0x49] sm:$0xff]  ;;  %8992 = vst.msk [vmem:[#allocation3 + $0x63] sm:$0xff] %vm22343_vm4, %v8956_v20  ;;  %vm8809_vm2 = vcmp.ge.f32.partialorder %v8773_v23, 0.0  ;;  %v8845_v57 = vmul.f32 0.2, %v8773_v23  ;;  %v16182_v45 = vpop.f32.mrb[50].mxu1  ;;  %16227 = vmatprep.mubr.msk.f32.mxu0 %vm22353_vm9, %v9064_v40  ;;  %vm22361_vm9 = vmmov %vm22343_vm4 }
 0x542   : > { %v8882_v55 = vsel %vm8810_vm13, %v8774_v50, %v8846_v24  ;;  %v8776_v28 = vadd.f32 %v16182_v45, %v20765_v52  ;;  %v8608_v43 = vpop.f32.mrb[51].mxu1  ;;  %16228 = vmatmul.mubr.msk.f32.gmra.mrb[44].mxu0 %vm22354_vm14, %v9065_v44  ;;  %vm22359_vm13 = vmmov %vm22343_vm4  ;;  %vm22362_vm14 = vnez %v21881_v31 }
 0x543   : > { %v8959_v34 = vsel %vm22355_vm0, %v8882_v55, 0.0  ;;  %v8881_v17 = vsel %vm8809_vm2, %v8773_v23, %v8845_v57  ;;  %v8775_v2 = vadd.f32 %v20765_v52, %v8608_v43  ;;  %vm22360_vm2 = vnez %v21868_v7 }
 0x544   : > { %8995 = vst.msk [vmem:[#allocation3 + $0x7b] sm:$0xff] %vm22356_vm6, %v8959_v34  ;;  %v8958_v38 = vsel %vm22357_vm5, %v8881_v17, 0.0  ;;  %vm8812_vm15 = vcmp.ge.f32.partialorder %v8776_v28, 0.0  ;;  %v8848_v9 = vmul.f32 0.2, %v8776_v28  ;;  %v9066_v26 = vld [vmem:[#allocation3 + $0x51] sm:$0xff]  ;;  %vm22363_vm6 = vmmov %vm22343_vm4 }
 0x545   : > { %v9067_v4 = vld [vmem:[#allocation3 + $0x59] sm:$0xff]  ;;  %8994 = vst.msk [vmem:[#allocation3 + $0x73] sm:$0xff] %vm22358_vm8, %v8958_v38  ;;  %vm8811_vm7 = vcmp.ge.f32.partialorder %v8775_v2, 0.0  ;;  %v8847_v59 = vmul.f32 0.2, %v8775_v2  ;;  %v16185_v41 = vpop.f32.mrb[52].mxu1  ;;  %16230 = vmatprep.mubr.msk.f32.mxu0 %vm22359_vm13, %v9066_v26  ;;  %vm22365_vm8 = vmmov %vm22343_vm4 }
 0x546   : > { %v8884_v8 = vsel %vm8812_vm15, %v8776_v28, %v8848_v9  ;;  %v8778_v18 = vadd.f32 %v16185_v41, %v20765_v52  ;;  %v8618_v48 = vpop.f32.mrb[53].mxu1  ;;  %16231 = vmatmul.mubr.msk.f32.gmra.mrb[46].mxu0 %vm22343_vm4, %v9067_v4  ;;  %vm22364_vm15 = vmmov %vm22343_vm4 }
 0x547   : > { %v8961_v58 = vsel %vm22360_vm2, %v8884_v8, 0.0  ;;  %v8883_v47 = vsel %vm8811_vm7, %v8775_v2, %v8847_v59  ;;  %v8777_v29 = vadd.f32 %v20765_v52, %v8618_v48  ;;  %vm22366_vm7 = vnez %v21891_v5  ;;  %vm22367_vm13 = vmmov %vm22343_vm4 }
 0x548   : > { %8997 = vst.msk [vmem:[#allocation3 + $0x8b] sm:$0xff] %vm22361_vm9, %v8961_v58  ;;  %v8960_v36 = vsel %vm22362_vm14, %v8883_v47, 0.0  ;;  %vm8814_vm0 = vcmp.ge.f32.partialorder %v8778_v18, 0.0  ;;  %v8850_v14 = vmul.f32 0.2, %v8778_v18  ;;  %v9068_v19 = vld [vmem:[#allocation3 + $0x61] sm:$0xff]  ;;  %vm22368_vm4 = vnez %v21900_v13  ;;  %vm22369_vm9 = vmmov %vm22363_vm6 }
 0x549   : > { %v9069_v37 = vld [vmem:[#allocation3 + $0x69] sm:$0xff]  ;;  %8996 = vst.msk [vmem:[#allocation3 + $0x83] sm:$0xff] %vm22363_vm6, %v8960_v36  ;;  %vm8813_vm5 = vcmp.ge.f32.partialorder %v8777_v29, 0.0  ;;  %v8849_v51 = vmul.f32 0.2, %v8777_v29  ;;  %v16188_v12 = vpop.f32.mrb[54].mxu1  ;;  %16233 = vmatprep.mubr.msk.f32.mxu0 %vm22364_vm15, %v9068_v19 }
 0x54a   : > { %v8886_v7 = vsel %vm8814_vm0, %v8778_v18, %v8850_v14  ;;  %v8780_v10 = vadd.f32 %v16188_v12, %v20765_v52  ;;  %v8628_v21 = vpop.f32.mrb[55].mxu1  ;;  %16234 = vmatmul.mubr.msk.f32.gmra.mrb[48].mxu0 %vm22365_vm8, %v9069_v37  ;;  %vm22370_vm0 = vmmov %vm22363_vm6  ;;  %vm22374_vm8 = vnez %v21912_v3 }
 0x54b   : > { %v8963_v31 = vsel %vm22366_vm7, %v8886_v7, 0.0  ;;  %v8885_v27 = vsel %vm8813_vm5, %v8777_v29, %v8849_v51  ;;  %v8779_v15 = vadd.f32 %v20765_v52, %v8628_v21  ;;  %vm22371_vm6 = vmmov %vm22370_vm0  ;;  %vm22372_vm5 = vnez %v21906_v30 }
 0x54c   : > { %8999 = vst.msk [vmem:[#allocation3 + $0x9b] sm:$0xff] %vm22367_vm13, %v8963_v31  ;;  %v8962_v11 = vsel %vm22368_vm4, %v8885_v27, 0.0  ;;  %vm8816_vm2 = vcmp.ge.f32.partialorder %v8780_v10, 0.0  ;;  %v8852_v63 = vmul.f32 0.2, %v8780_v10  ;;  %v9070_v50 = vld [vmem:[#allocation3 + $0x71] sm:$0xff]  ;;  %vm22373_vm15 = vmmov %vm22370_vm0 }
 0x54d   : > { %v9071_v32 = vld [vmem:[#allocation3 + $0x79] sm:$0xff]  ;;  %8998 = vst.msk [vmem:[#allocation3 + $0x93] sm:$0xff] %vm22369_vm9, %v8962_v11  ;;  %vm8815_vm14 = vcmp.ge.f32.partialorder %v8779_v15, 0.0  ;;  %v8851_v33 = vmul.f32 0.2, %v8779_v15  ;;  %v16191_v42 = vpop.f32.mrb[56].mxu1  ;;  %16236 = vmatprep.mubr.msk.f32.mxu0 %vm22370_vm0, %v9070_v50  ;;  %vm22375_vm13 = vmmov %vm22370_vm0 }
 0x54e   : > { %v8888_v5 = vsel %vm8816_vm2, %v8780_v10, %v8852_v63  ;;  %v8782_v35 = vadd.f32 %v16191_v42, %v20765_v52  ;;  %v8638_v23 = vpop.f32.mrb[57].mxu1  ;;  %16237 = vmatmul.mubr.msk.f32.gmra.mrb[50].mxu0 %vm22371_vm6, %v9071_v32  ;;  %vm22376_vm2 = vmmov %vm22370_vm0  ;;  %vm22379_vm6 = vnez %v21927_v25 }
 0x54f   : > { %v8965_v13 = vsel %vm22372_vm5, %v8888_v5, 0.0  ;;  %v8887_v54 = vsel %vm8815_vm14, %v8779_v15, %v8851_v33  ;;  %v8781_v20 = vadd.f32 %v20765_v52, %v8638_v23  ;;  %vm22377_vm9 = vmmov %vm22370_vm0  ;;  %vm22378_vm14 = vnez %v21921_v1 }
 0x550   : > { %9001 = vst.msk [vmem:[#allocation3 + $0xab] sm:$0xff] %vm22373_vm15, %v8965_v13  ;;  %v8964_v24 = vsel %vm22374_vm8, %v8887_v54, 0.0  ;;  %vm8818_vm7 = vcmp.ge.f32.partialorder %v8782_v35, 0.0  ;;  %v8854_v40 = vmul.f32 0.2, %v8782_v35  ;;  %v9072_v44 = vld [vmem:[#allocation3 + $0x81] sm:$0xff]  ;;  %vm22380_vm15 = vmmov %vm22370_vm0 }
 0x551   : > { %v9073_v57 = vld [vmem:[#allocation3 + $0x89] sm:$0xff]  ;;  %9000 = vst.msk [vmem:[#allocation3 + $0xa3] sm:$0xff] %vm22375_vm13, %v8964_v24  ;;  %vm8817_vm4 = vcmp.ge.f32.partialorder %v8781_v20, 0.0  ;;  %v8853_v45 = vmul.f32 0.2, %v8781_v20  ;;  %v16194_v55 = vpop.f32.mrb[58].mxu1  ;;  %16239 = vmatprep.mubr.msk.f32.mxu0 %vm22376_vm2, %v9072_v44  ;;  %vm22382_vm13 = vmmov %vm22370_vm0 }
 0x552   : > { %v8890_v30 = vsel %vm8818_vm7, %v8782_v35, %v8854_v40  ;;  %v8784_v28 = vadd.f32 %v16194_v55, %v20765_v52  ;;  %v8648_v43 = vpop.f32.mrb[59].mxu1  ;;  %16240 = vmatmul.mubr.msk.f32.gmra.mrb[52].mxu0 %vm22377_vm9, %v9073_v57  ;;  %vm22381_vm7 = vmmov %vm22370_vm0 }
 0x553   : > { %v8967_v3 = vsel %vm22378_vm14, %v8890_v30, 0.0  ;;  %v8889_v34 = vsel %vm8817_vm4, %v8781_v20, %v8853_v45  ;;  %v8783_v17 = vadd.f32 %v20765_v52, %v8648_v43  ;;  %vm22383_vm4 = vmmov %vm22370_vm0 }
 0x554   : > { %9003 = vst.msk [vmem:[#allocation3 + $0xbb] sm:$0xff] %vm22370_vm0, %v8967_v3  ;;  %v8966_v2 = vsel %vm22379_vm6, %v8889_v34, 0.0  ;;  %vm8820_vm5 = vcmp.ge.f32.partialorder %v8784_v28, 0.0  ;;  %v8856_v38 = vmul.f32 0.2, %v8784_v28  ;;  %v9074_v9 = vld [vmem:[#allocation3 + $0x91] sm:$0xff]  ;;  %vm22384_vm9 = vmmov %vm22370_vm0 }
 0x555   : > { %v9075_v26 = vld [vmem:[#allocation3 + $0x99] sm:$0xff]  ;;  %9002 = vst.msk [vmem:[#allocation3 + $0xb3] sm:$0xff] %vm22380_vm15, %v8966_v2  ;;  %vm8819_vm8 = vcmp.ge.f32.partialorder %v8783_v17, 0.0  ;;  %v8855_v4 = vmul.f32 0.2, %v8783_v17  ;;  %v16197_v59 = vpop.f32.mrb[60].mxu1  ;;  %16242 = vmatprep.mubr.msk.f32.mxu0 %vm22381_vm7, %v9074_v9  ;;  %vm22390_vm7 = vnez %v21971_v16 }
 0x556   : > { %v8892_v1 = vsel %vm8820_vm5, %v8784_v28, %v8856_v38  ;;  %v8786_v41 = vadd.f32 %v16197_v59, %v20765_v52  ;;  %v8658_v8 = vpop.f32.mrb[61].mxu1  ;;  %16243 = vmatmul.mubr.msk.f32.gmra.mrb[54].mxu0 %vm22382_vm13, %v9075_v26  ;;  %vm22387_vm5 = vmmov %vm22370_vm0  ;;  %vm22392_vm13 = vnez %v21975_v46 }
 0x557   : > { %v8969_v25 = vsel %vm20049_vm3, %v8892_v1, 0.0  ;;  %v8891_v18 = vsel %vm8819_vm8, %v8783_v17, %v8855_v4  ;;  %v8785_v48 = vadd.f32 %v20765_v52, %v8658_v8  ;;  %vm22385_vm3 = vmmov %vm22370_vm0 }
 0x558   : > { %9005 = vst.msk [vmem:[#allocation3 + $0xcb] sm:$0xff] %vm22383_vm4, %v8969_v25  ;;  %v8968_v58 = vsel %vm20059_vm11, %v8891_v18, 0.0  ;;  %vm8822_vm2 = vcmp.ge.f32.partialorder %v8786_v41, 0.0  ;;  %v8858_v47 = vmul.f32 0.2, %v8786_v41  ;;  %v9076_v29 = vld [vmem:[#allocation3 + $0xa1] sm:$0xff]  ;;  %vm22386_vm11 = vmmov %vm22370_vm0 }
 0x559   : > { %v9077_v36 = vld [vmem:[#allocation3 + $0xa9] sm:$0xff]  ;;  %9004 = vst.msk [vmem:[#allocation3 + $0xc3] sm:$0xff] %vm22384_vm9, %v8968_v58  ;;  %vm8821_vm14 = vcmp.ge.f32.partialorder %v8785_v48, 0.0  ;;  %v8857_v14 = vmul.f32 0.2, %v8785_v48  ;;  %v16200_v19 = vpop.f32.mrb[62].mxu1  ;;  %16245 = vmatprep.mubr.msk.f32.mxu0 %vm22370_vm0, %v9076_v29  ;;  %vm22388_vm8 = vmmov %vm22370_vm0 }
 0x55a   : > { %v8894_v56 = vsel %vm8822_vm2, %v8786_v41, %v8858_v47  ;;  %v8788_v37 = vadd.f32 %v16200_v19, %v20765_v52  ;;  %v8668_v51 = vpop.f32.mrb[63].mxu1  ;;  %16246 = vmatmul.mubr.msk.f32.gmra.mrb[56].mxu0 %vm22385_vm3, %v9077_v36  ;;  %vm22393_vm2 = vmmov %vm22370_vm0  ;;  %vm22395_vm3 = vnez %v21985_v0  ;;  %v22413_v19 = vld [vmem:[#allocation9_spill] sm:$0xff] }
 0x55b   : > { %v8971_v62 = vsel %vm20083_vm10, %v8894_v56, 0.0  ;;  %v8893_v12 = vsel %vm8821_vm14, %v8785_v48, %v8857_v14  ;;  %v8787_v7 = vadd.f32 %v20765_v52, %v8668_v51  ;;  %vm22389_vm10 = vmmov %vm22370_vm0  ;;  %v22408_v48 = vld [vmem:[#allocation10_spill] sm:$0xff] }
 0x55c   : > { %9007 = vst.msk [vmem:[#allocation3 + $0xdb] sm:$0xff] %vm22386_vm11, %v8971_v62  ;;  %v8970_v10 = vsel %vm20093_vm12, %v8893_v12, 0.0  ;;  %vm8824_vm6 = vcmp.ge.f32.partialorder %v8788_v37, 0.0  ;;  %v8860_v21 = vmul.f32 0.2, %v8788_v37  ;;  %v9078_v31 = vld [vmem:[#allocation3 + $0xb1] sm:$0xff]  ;;  %vm22391_vm12 = vmmov %vm22370_vm0 }
 0x55d   : > { %v9079_v27 = vld [vmem:[#allocation3 + $0xb9] sm:$0xff]  ;;  %9006 = vst.msk [vmem:[#allocation3 + $0xd3] sm:$0xff] %vm22387_vm5, %v8970_v10  ;;  %vm8823_vm15 = vcmp.ge.f32.partialorder %v8787_v7, 0.0  ;;  %v8859_v15 = vmul.f32 0.2, %v8787_v7  ;;  %v16203_v11 = vpop.f32.mrb[64].mxu1  ;;  %16248 = vmatprep.mubr.msk.f32.mxu0 %vm22388_vm8, %v9078_v31  ;;  %vm22394_vm14 = vmmov %vm22370_vm0 }
 0x55e   : > { %v8896_v39 = vsel %vm8824_vm6, %v8788_v37, %v8860_v21  ;;  %v8790_v63 = vadd.f32 %v16203_v11, %v20765_v52  ;;  %v8678_v50 = vpop.f32.mrb[65].mxu1  ;;  %16249 = vmatmul.mubr.msk.f32.gmra.mrb[58].mxu0 %vm22389_vm10, %v9079_v27  ;;  %vm22396_vm11 = vmmov %vm22370_vm0  ;;  %v22415_v37 = vld [vmem:[#allocation5_spill] sm:$0xff]  ;;  %v9018_v21 = vld [vmem:[#allocation3] sm:$0xff] }
 0x55f   : > { %v8973_v60 = vsel %vm22390_vm7, %v8896_v39, 0.0  ;;  %v8895_v32 = vsel %vm8823_vm15, %v8787_v7, %v8859_v15  ;;  %v8789_v33 = vadd.f32 %v20765_v52, %v8678_v50  ;;  %vm22397_vm5 = vmmov %vm22370_vm0  ;;  %vm22400_vm7 = vnez %v21994_v53  ;;  %v9019_v31 = vld [vmem:[#allocation3 + $0x8] sm:$0xff]  ;;  %v9020_v15 = vld [vmem:[#allocation3 + $0x10] sm:$0xff] }
 0x560   : > { %9009 = vst.msk [vmem:[#allocation3 + $0xeb] sm:$0xff] %vm22391_vm12, %v8973_v60  ;;  %v8972_v42 = vsel %vm22392_vm13, %v8895_v32, 0.0  ;;  %vm8826_vm4 = vcmp.ge.f32.partialorder %v8790_v63, 0.0  ;;  %v8862_v5 = vmul.f32 0.2, %v8790_v63  ;;  %v9080_v35 = vld [vmem:[#allocation3 + $0xc1] sm:$0xff]  ;;  %vm22398_vm8 = vmmov %vm22370_vm0  ;;  %vm22402_vm12 = vnez %v21997_v6 }
 0x561   : > { %v9081_v23 = vld [vmem:[#allocation3 + $0xc9] sm:$0xff]  ;;  %9008 = vst.msk [vmem:[#allocation3 + $0xe3] sm:$0xff] %vm22393_vm2, %v8972_v42  ;;  %vm8825_vm9 = vcmp.ge.f32.partialorder %v8789_v33, 0.0  ;;  %v8861_v13 = vmul.f32 0.2, %v8789_v33  ;;  %v16206_v54 = vpop.f32.mrb[66].mxu1  ;;  %16251 = vmatprep.mubr.msk.f32.mxu0 %vm22394_vm14, %v9080_v35  ;;  %vm22399_vm10 = vmmov %vm22370_vm0 }
 0x562   : > { %v8898_v16 = vsel %vm8826_vm4, %v8790_v63, %v8862_v5  ;;  %v8792_v20 = vadd.f32 %v16206_v54, %v20765_v52  ;;  %v8688_v24 = vpop.f32.mrb[67].mxu1  ;;  %16252 = vmatmul.mubr.msk.f32.gmra.mrb[60].mxu0 %vm22370_vm0, %v9081_v23  ;;  %vm22403_vm4 = vmmov %vm22370_vm0  ;;  %v20949_v27 = vld [vmem:[%s21512_s1 + $0x54] sm:$0xf]  ;;  %v9021_v11 = vld [vmem:[#allocation3 + $0x18] sm:$0xff] }
 0x563   : > { %v8975_v46 = vsel %vm22395_vm3, %v8898_v16, 0.0  ;;  %v8897_v40 = vsel %vm8825_vm9, %v8789_v33, %v8861_v13  ;;  %v8791_v44 = vadd.f32 %v20765_v52, %v8688_v24  ;;  %vm22404_vm9 = vmmov %vm22370_vm0  ;;  %v9022_v39 = vld [vmem:[#allocation3 + $0x20] sm:$0xff]  ;;  %v9023_v63 = vld [vmem:[#allocation3 + $0x28] sm:$0xff] }
 0x564   : > { %9011 = vst.msk [vmem:[#allocation3 + $0xfb] sm:$0xff] %vm22396_vm11, %v8975_v46  ;;  %v8974_v57 = vsel %vm20178_vm1, %v8897_v40, 0.0  ;;  %vm8828_vm6 = vcmp.ge.f32.partialorder %v8792_v20, 0.0  ;;  %v8864_v45 = vmul.f32 0.2, %v8792_v20  ;;  %v9082_v55 = vld [vmem:[#allocation3 + $0xd1] sm:$0xff]  ;;  %vm22401_vm1 = vmmov %vm22370_vm0  ;;  %vm22409_vm11 = vnez %v22408_v48 }
 0x565   : > { %v9083_v30 = vld [vmem:[#allocation3 + $0xd9] sm:$0xff]  ;;  %9010 = vst.msk [vmem:[#allocation3 + $0xf3] sm:$0xff] %vm22397_vm5, %v8974_v57  ;;  %vm8827_vm15 = vcmp.ge.f32.partialorder %v8791_v44, 0.0  ;;  %v8863_v28 = vmul.f32 0.2, %v8791_v44  ;;  %v16209_v43 = vpop.f32.mrb[68].mxu1  ;;  %16254 = vmatprep.mubr.msk.f32.mxu0 %vm22398_vm8, %v9082_v55  ;;  %vm22405_vm14 = vmmov %vm22370_vm0  ;;  %vm22406_vm0 = vnez %v22013_v61 }
 0x566   : > { %v8900_v0 = vsel %vm8828_vm6, %v8792_v20, %v8864_v45  ;;  %v8794_v3 = vadd.f32 %v16209_v43, %v20765_v52  ;;  %v8698_v34 = vpop.f32.mrb[69].mxu1  ;;  %16255 = vmatmul.mubr.msk.f32.gmra.mrb[62].mxu0 %vm22399_vm10, %v9083_v30  ;;  %vm22407_vm3 = vmmov %vm22401_vm1  ;;  %v9024_v50 = vld [vmem:[#allocation3 + $0x30] sm:$0xff]  ;;  %v9025_v60 = vld [vmem:[#allocation3 + $0x38] sm:$0xff] }
 0x567   : > { %v8977_v22 = vsel %vm22400_vm7, %v8900_v0, 0.0  ;;  %v8899_v17 = vsel %vm8827_vm15, %v8791_v44, %v8863_v28  ;;  %v8793_v2 = vadd.f32 %v20765_v52, %v8698_v34  ;;  %vm22410_vm5 = vmmov %vm22401_vm1  ;;  %vm22414_vm7 = vnez %v22413_v19  ;;  %v9027_v32 = vld [vmem:[#allocation3 + $0x48] sm:$0xff]  ;;  %v9028_v33 = vld [vmem:[#allocation3 + $0x50] sm:$0xff] }
 0x568   : > { %9013 = vst.msk [vmem:[#allocation3 + $0x10b] sm:$0xff] %vm22401_vm1, %v8977_v22  ;;  %v8976_v38 = vsel %vm22402_vm12, %v8899_v17, 0.0  ;;  %vm8830_vm13 = vcmp.ge.f32.partialorder %v8794_v3, 0.0  ;;  %v8866_v9 = vmul.f32 0.2, %v8794_v3  ;;  %v9084_v26 = vld [vmem:[#allocation3 + $0xe1] sm:$0xff]  ;;  %vm22411_vm8 = vmmov %vm22401_vm1  ;;  %vm22416_vm12 = vnez %v22415_v37 }
 0x569   : > { %v9085_v4 = vld [vmem:[#allocation3 + $0xe9] sm:$0xff]  ;;  %9012 = vst.msk [vmem:[#allocation3 + $0x103] sm:$0xff] %vm22403_vm4, %v8976_v38  ;;  %vm8829_vm2 = vcmp.ge.f32.partialorder %v8793_v2, 0.0  ;;  %v8865_v59 = vmul.f32 0.2, %v8793_v2  ;;  %v16212_v1 = vpop.f32.mrb[70].mxu1  ;;  %16257 = vmatprep.mubr.msk.f32.mxu0 %vm22404_vm9, %v9084_v26  ;;  %vm22412_vm10 = vmmov %vm22401_vm1 }
 0x56a   : > { %v8902_v53 = vsel %vm8830_vm13, %v8794_v3, %v8866_v9  ;;  %v8796_v41 = vadd.f32 %v16212_v1, %v20765_v52  ;;  %v8708_v8 = vpop.f32.mrb[71].mxu1  ;;  %16258 = vmatmul.mubr.msk.f32.gmra.mrb[64].mxu0 %vm22405_vm14, %v9085_v4  ;;  %vm22417_vm13 = vmmov %vm22401_vm1  ;;  %v9029_v42 = vld [vmem:[#allocation3 + $0x58] sm:$0xff]  ;;  %v9030_v5 = vld [vmem:[#allocation3 + $0x60] sm:$0xff] }
 0x56b   : > { %v8979_v6 = vsel %vm22406_vm0, %v8902_v53, 0.0  ;;  %v8901_v25 = vsel %vm8829_vm2, %v8793_v2, %v8865_v59  ;;  %v8795_v18 = vadd.f32 %v20765_v52, %v8708_v8  ;;  %vm22418_vm4 = vmmov %vm22401_vm1  ;;  %v9031_v35 = vld [vmem:[#allocation3 + $0x68] sm:$0xff]  ;;  %v9032_v23 = vld [vmem:[#allocation3 + $0x70] sm:$0xff] }
 0x56c   : > { %9015 = vst.msk [vmem:[#allocation3 + $0x11b] sm:$0xff] %vm22407_vm3, %v8979_v6  ;;  %v8978_v58 = vsel %vm22409_vm11, %v8901_v25, 0.0  ;;  %vm8832_vm6 = vcmp.ge.f32.partialorder %v8796_v41, 0.0  ;;  %v8868_v47 = vmul.f32 0.2, %v8796_v41  ;;  %v9086_v29 = vld [vmem:[#allocation3 + $0xf1] sm:$0xff]  ;;  %vm22419_vm2 = vmmov %vm22401_vm1 }
 0x56d   : > { %v9087_v36 = vld [vmem:[#allocation3 + $0xf9] sm:$0xff]  ;;  %9014 = vst.msk [vmem:[#allocation3 + $0x113] sm:$0xff] %vm22410_vm5, %v8978_v58  ;;  %vm8831_vm15 = vcmp.ge.f32.partialorder %v8795_v18, 0.0  ;;  %v8867_v14 = vmul.f32 0.2, %v8795_v18  ;;  %16260 = vmatprep.mubr.msk.f32.mxu0 %vm22411_vm8, %v9086_v29  ;;  %vm22420_vm9 = vmmov %vm22401_vm1  ;;  %vm22424_vm11 = vcmask 1043456  }
 0x56e   : > { %v8904_v61 = vsel %vm8832_vm6, %v8796_v41, %v8868_v47  ;;  %16261 = vmatmul.mubr.msk.f32.gmra.mrb[66].mxu0 %vm22412_vm10, %v9087_v36  ;;  %vm22421_vm14 = vmmov %vm22401_vm1  ;;  %v9033_v13 = vld [vmem:[#allocation3 + $0x78] sm:$0xff]  ;;  %v9034_v54 = vld [vmem:[#allocation3 + $0x80] sm:$0xff] }
 0x56f   : > { %v8981_v52 = vsel %vm22414_vm7, %v8904_v61, 0.0  ;;  %v8903_v56 = vsel %vm8831_vm15, %v8795_v18, %v8867_v14  ;;  %vm22422_vm0 = vmmov %vm22401_vm1  ;;  %v9035_v16 = vld [vmem:[#allocation3 + $0x88] sm:$0xff]  ;;  %v9036_v20 = vld [vmem:[#allocation3 + $0x90] sm:$0xff] }
 0x570   : > { %9017 = vst.msk [vmem:[#allocation3 + $0x12b] sm:$0xff] %vm22401_vm1, %v8981_v52  ;;  %v8980_v51 = vsel %vm22416_vm12, %v8903_v56, 0.0  ;;  %v9088_v62 = vld [vmem:[#allocation3 + $0x101] sm:$0xff]  ;;  %v9089_v12 = vld [vmem:[#allocation3 + $0x109] sm:$0xff]  ;;  %vm22423_vm3 = vmmov %vm22422_vm0 }
 0x571   : > { %9016 = vst.msk [vmem:[#allocation3 + $0x123] sm:$0xff] %vm22417_vm13, %v8980_v51  ;;  %16263 = vmatprep.mubr.msk.f32.mxu0 %vm22418_vm4, %v9088_v62  ;;  %vm22425_vm6 = vmmov %vm22422_vm0  ;;  %v9037_v24 = vld [vmem:[#allocation3 + $0x98] sm:$0xff]  ;;  %v9038_v46 = vld [vmem:[#allocation3 + $0xa0] sm:$0xff] }
 0x572   : > { %16264 = vmatmul.mubr.msk.f32.gmra.mrb[68].mxu0 %vm22419_vm2, %v9089_v12  ;;  %vm22426_vm5 = vmmov %vm22424_vm11  ;;  %v9039_v40 = vld [vmem:[#allocation3 + $0xa8] sm:$0xff]  ;;  %v9040_v44 = vld [vmem:[#allocation3 + $0xb0] sm:$0xff] }
 0x573   : > { %vm22427_vm15 = vmmov %vm22422_vm0  ;;  %v9041_v57 = vld [vmem:[#allocation3 + $0xb8] sm:$0xff]  ;;  %v9042_v45 = vld [vmem:[#allocation3 + $0xc0] sm:$0xff] }
 0x574   : > { %v9090_v7 = vld [vmem:[#allocation3 + $0x111] sm:$0xff]  ;;  %v9091_v10 = vld [vmem:[#allocation3 + $0x119] sm:$0xff]  ;;  %vm22428_vm8 = vmmov %vm22422_vm0 }
 0x575   : > { %16266 = vmatprep.mubr.msk.f32.mxu0 %vm22420_vm9, %v9090_v7  ;;  %vm22429_vm10 = vmmov %vm22422_vm0  ;;  %v9043_v55 = vld [vmem:[#allocation3 + $0xc8] sm:$0xff]  ;;  %v9044_v30 = vld [vmem:[#allocation3 + $0xd0] sm:$0xff] }
 0x576   : > { %16267 = vmatmul.mubr.msk.f32.gmra.mrb[70].mxu0 %vm22421_vm14, %v9091_v10  ;;  %vm22430_vm7 = vmmov %vm22422_vm0  ;;  %v9045_v28 = vld [vmem:[#allocation3 + $0xd8] sm:$0xff]  ;;  %v9046_v43 = vld [vmem:[#allocation3 + $0xe0] sm:$0xff] }
 0x577   : > { %16271 = vmatprep.mubr.msk.f32.mxu0 %vm22422_vm0, %v9018_v21  ;;  %vm22431_vm1 = vmmov %vm22422_vm0  ;;  %v9047_v0 = vld [vmem:[#allocation3 + $0xe8] sm:$0xff]  ;;  %v9048_v3 = vld [vmem:[#allocation3 + $0xf0] sm:$0xff] }
 0x578   : > { %vm22432_vm12 = vmmov %vm22422_vm0  ;;  %v9049_v34 = vld [vmem:[#allocation3 + $0xf8] sm:$0xff]  ;;  %v9050_v22 = vld [vmem:[#allocation3 + $0x100] sm:$0xff] }
 0x579   : > { %vm22433_vm13 = vmmov %vm22422_vm0  ;;  %v9051_v17 = vld [vmem:[#allocation3 + $0x108] sm:$0xff]  ;;  %v9052_v2 = vld [vmem:[#allocation3 + $0x110] sm:$0xff] }
 0x57a   : > { %16272 = vmatmul.mubr.msk.f32.vlgmr.msra.gmra.mrb[36].mxu0 %vm22423_vm3, %v9019_v31  ;;  %vm22434_vm4 = vmmov %vm22422_vm0  ;;  %v9806_v38 = vld [vmem:[#allocation3 + $0x2] sm:$0xff]  ;;  %v9053_v9 = vld [vmem:[#allocation3 + $0x118] sm:$0xff] }
 0x57b   : > { %16326 = vmatpush3.msk.msra.mxu0 %vm22424_vm11, %v20758_v49  ;;  %16274 = vmatprep.mubr.msk.f32.mxu0 %vm22425_vm6, %v9020_v15  ;;  %v9026_v49 = vld [vmem:[#allocation3 + $0x40] sm:$0xff]  ;;  %vm22435_vm2 = vmmov %vm22422_vm0  ;;  %v9807_v26 = vld [vmem:[#allocation3 + $0xa] sm:$0xff] }
 0x57c   : > { %16381 = vmatprep.subr.msk.mxu0 %vm22426_vm5, %v20949_v27  ;;  %vm22436_vm9 = vmmov %vm22422_vm0  ;;  %v20994_v4 = vld [vmem:[%s21512_s1 + $0x58] sm:$0xf]  ;;  %v21005_v1 = vld [vmem:[#allocation3 + $0x1a] sm:$0xff] }
 0x57d   : > { %vm22437_vm14 = vmmov %vm22422_vm0  ;;  %v20997_v59 = vld [vmem:[#allocation3 + $0x12] sm:$0xff]  ;;  %v21009_v53 = vld [vmem:[#allocation3 + $0x22] sm:$0xff] }
 0x57e   : > { %16275 = vmatmul.mubr.msk.f32.gmra.mrb[38].mxu0 %vm22427_vm15, %v9021_v11  ;;  %vm22438_vm3 = vmmov %vm22422_vm0  ;;  %v21013_v41 = vld [vmem:[#allocation3 + $0x2a] sm:$0xff]  ;;  %v21017_v8 = vld [vmem:[#allocation3 + $0x32] sm:$0xff] }
 0x57f   : > { %16277 = vmatprep.mubr.msk.f32.mxu0 %vm22428_vm8, %v9022_v39  ;;  %vm22439_vm11 = vmmov %vm22422_vm0  ;;  %v21021_v6 = vld [vmem:[#allocation3 + $0x3a] sm:$0xff]  ;;  %v21025_v25 = vld [vmem:[#allocation3 + $0x42] sm:$0xff] }
 0x580   : > { %vm22440_vm6 = vmmov %vm22422_vm0  ;;  %v21029_v18 = vld [vmem:[#allocation3 + $0x4a] sm:$0xff]  ;;  %v21033_v48 = vld [vmem:[#allocation3 + $0x52] sm:$0xff] }
 0x581   : > { %vm22441_vm5 = vmmov %vm22422_vm0  ;;  %v9817_v58 = vld [vmem:[#allocation3 + $0x5a] sm:$0xff]  ;;  %v9818_v47 = vld [vmem:[#allocation3 + $0x62] sm:$0xff] }
 0x582   : > { %16278 = vmatmul.mubr.msk.f32.gmra.mrb[40].mxu0 %vm22429_vm10, %v9023_v63  ;;  %vm22442_vm15 = vmmov %vm22422_vm0  ;;  %v9819_v29 = vld [vmem:[#allocation3 + $0x6a] sm:$0xff]  ;;  %v9820_v36 = vld [vmem:[#allocation3 + $0x72] sm:$0xff] }
 0x583   : > { %16280 = vmatprep.mubr.msk.f32.mxu0 %vm22430_vm7, %v9024_v50  ;;  %vm22443_vm8 = vmmov %vm22422_vm0  ;;  %v9821_v14 = vld [vmem:[#allocation3 + $0x7a] sm:$0xff]  ;;  %v9822_v61 = vld [vmem:[#allocation3 + $0x82] sm:$0xff] }
 0x584   : > { %vm22444_vm10 = vmmov %vm22422_vm0  ;;  %v9823_v19 = vld [vmem:[#allocation3 + $0x8a] sm:$0xff]  ;;  %v9824_v52 = vld [vmem:[#allocation3 + $0x92] sm:$0xff] }
 0x585   : > { %vm22445_vm7 = vmmov %vm22422_vm0  ;;  %v9825_v56 = vld [vmem:[#allocation3 + $0x9a] sm:$0xff]  ;;  %v9826_v37 = vld [vmem:[#allocation3 + $0xa2] sm:$0xff] }
 0x586   : > { %16281 = vmatmul.mubr.msk.f32.gmra.mrb[42].mxu0 %vm22431_vm1, %v9025_v60  ;;  %vm22446_vm1 = vmmov %vm22422_vm0  ;;  %v9827_v51 = vld [vmem:[#allocation3 + $0xaa] sm:$0xff]  ;;  %v9828_v62 = vld [vmem:[#allocation3 + $0xb2] sm:$0xff] }
 0x587   : > { %16283 = vmatprep.mubr.msk.f32.mxu0 %vm22432_vm12, %v9026_v49  ;;  %vm22447_vm12 = vmmov %vm22422_vm0  ;;  %v9829_v12 = vld [vmem:[#allocation3 + $0xba] sm:$0xff]  ;;  %v9830_v7 = vld [vmem:[#allocation3 + $0xc2] sm:$0xff] }
 0x588   : > { %v9831_v10 = vld [vmem:[#allocation3 + $0xca] sm:$0xff]  ;;  %v9832_v21 = vld [vmem:[#allocation3 + $0xd2] sm:$0xff]  ;;  %v9833_v31 = vld [vmem:[#allocation3 + $0xda] sm:$0xff] }
 0x589   : > { %v9835_v15 = vld [vmem:[#allocation3 + $0xea] sm:$0xff]  ;;  %v9836_v11 = vld [vmem:[#allocation3 + $0xf2] sm:$0xff]  ;;  %v9837_v39 = vld [vmem:[#allocation3 + $0xfa] sm:$0xff] }
 0x58a   : > { %16284 = vmatmul.mubr.msk.f32.gmra.mrb[44].mxu0 %vm22433_vm13, %v9027_v32  ;;  %vm22448_vm13 = vmmov %vm22422_vm0  ;;  %v9838_v63 = vld [vmem:[#allocation3 + $0x102] sm:$0xff]  ;;  %v9839_v50 = vld [vmem:[#allocation3 + $0x10a] sm:$0xff] }
 0x58b   : > { %16286 = vmatprep.mubr.msk.f32.mxu0 %vm22434_vm4, %v9028_v33  ;;  %vm22449_vm4 = vmmov %vm22422_vm0  ;;  %v9840_v60 = vld [vmem:[#allocation3 + $0x112] sm:$0xff]  ;;  %v9841_v49 = vld [vmem:[#allocation3 + $0x11a] sm:$0xff] }
 0x58c   : > { %v14050_v32 = vld [vmem:[%s21512_s1 + $0x5c] sm:$0xf]  ;;  %v10270_v33 = vld [vmem:[#allocation3 + $0x122] sm:$0xff] }
 0x58e   : > { %16287 = vmatmul.mubr.msk.f32.gmra.mrb[46].mxu0 %vm22435_vm2, %v9029_v42  ;;  %vm22450_vm2 = vmmov %vm22422_vm0  ;;  %v10271_v42 = vld [vmem:[#allocation3 + $0x12a] sm:$0xff] }
 0x58f   : > { %16289 = vmatprep.mubr.msk.f32.mxu0 %vm22436_vm9, %v9030_v5  ;;  %vm22451_vm9 = vmmov %vm22422_vm0  ;;  %v10666_v5 = vld [vmem:[#allocation3 + $0x13] sm:$0xff] }
 0x592   : > { %16290 = vmatmul.mubr.msk.f32.gmra.mrb[48].mxu0 %vm22437_vm14, %v9031_v35  ;;  %vm22452_vm14 = vmmov %vm22422_vm0  ;;  %v10667_v35 = vld [vmem:[#allocation3 + $0x1b] sm:$0xff] }
 0x593   : > { %16292 = vmatprep.mubr.msk.f32.mxu0 %vm22422_vm0, %v9032_v23  ;;  %v21117_v23 = vld [vmem:[%s21512_s1 + $0x60] sm:$0xf] }
 0x596   : > { %16293 = vmatmul.mubr.msk.f32.gmra.mrb[50].mxu0 %vm22438_vm3, %v9033_v13  ;;  %vm22453_vm3 = vmmov %vm22422_vm0  ;;  %v10668_v13 = vld [vmem:[#allocation3 + $0x23] sm:$0xff] }
 0x597   : > { %16295 = vmatprep.mubr.msk.f32.mxu0 %vm22439_vm11, %v9034_v54  ;;  %vm22454_vm11 = vmmov %vm22422_vm0  ;;  %v10669_v54 = vld [vmem:[#allocation3 + $0x2b] sm:$0xff] }
 0x59a   : > { %16296 = vmatmul.mubr.msk.f32.gmra.mrb[52].mxu0 %vm22440_vm6, %v9035_v16  ;;  %vm22455_vm6 = vmmov %vm22422_vm0  ;;  %v10670_v16 = vld [vmem:[#allocation3 + $0x33] sm:$0xff] }
 0x59b   : > { %16298 = vmatprep.mubr.msk.f32.mxu0 %vm22441_vm5, %v9036_v20  ;;  %vm22456_vm5 = vmmov %vm22422_vm0  ;;  %v10671_v20 = vld [vmem:[#allocation3 + $0x3b] sm:$0xff] }
 0x59e   : > { %16299 = vmatmul.mubr.msk.f32.gmra.mrb[54].mxu0 %vm22442_vm15, %v9037_v24  ;;  %vm22457_vm15 = vmmov %vm22422_vm0  ;;  %v10672_v24 = vld [vmem:[#allocation3 + $0x43] sm:$0xff] }
 0x59f   : > { %16301 = vmatprep.mubr.msk.f32.mxu0 %vm22443_vm8, %v9038_v46  ;;  %vm22458_vm8 = vmmov %vm22422_vm0  ;;  %v10673_v46 = vld [vmem:[#allocation3 + $0x4b] sm:$0xff] }
 0x5a2   : > { %16302 = vmatmul.mubr.msk.f32.gmra.mrb[56].mxu0 %vm22444_vm10, %v9039_v40  ;;  %vm22459_vm10 = vmmov %vm22422_vm0  ;;  %v10674_v40 = vld [vmem:[#allocation3 + $0x53] sm:$0xff] }
 0x5a3   : > { %16304 = vmatprep.mubr.msk.f32.mxu0 %vm22445_vm7, %v9040_v44  ;;  %vm22460_vm7 = vcmask 1043456   ;;  %v10675_v44 = vld [vmem:[#allocation3 + $0x5b] sm:$0xff] }
 0x5a6   : > { %16305 = vmatmul.mubr.msk.f32.gmra.mrb[58].mxu0 %vm22446_vm1, %v9041_v57  ;;  %vm22461_vm1 = vmmov %vm22422_vm0  ;;  %v10676_v57 = vld [vmem:[#allocation3 + $0x63] sm:$0xff] }
 0x5a7   : > { %16307 = vmatprep.mubr.msk.f32.mxu0 %vm22447_vm12, %v9042_v45  ;;  %vm22462_vm12 = vmmov %vm22460_vm7  ;;  %v10677_v45 = vld [vmem:[#allocation3 + $0x6b] sm:$0xff] }
 0x5aa   : > { %16308 = vmatmul.mubr.msk.f32.gmra.mrb[60].mxu0 %vm22448_vm13, %v9043_v55  ;;  %vm22463_vm13 = vmmov %vm22422_vm0  ;;  %v10678_v55 = vld [vmem:[#allocation3 + $0x73] sm:$0xff] }
 0x5ab   : > { %16310 = vmatprep.mubr.msk.f32.mxu0 %vm22449_vm4, %v9044_v30  ;;  %vm22464_vm4 = vmmov %vm22422_vm0  ;;  %v10679_v30 = vld [vmem:[#allocation3 + $0x7b] sm:$0xff] }
 0x5ae   : > { %16311 = vmatmul.mubr.msk.f32.gmra.mrb[62].mxu0 %vm22450_vm2, %v9045_v28  ;;  %vm22465_vm2 = vmmov %vm22422_vm0  ;;  %v10680_v28 = vld [vmem:[#allocation3 + $0x83] sm:$0xff] }
 0x5af   : > { %16313 = vmatprep.mubr.msk.f32.mxu0 %vm22451_vm9, %v9046_v43  ;;  %vm22466_vm9 = vmmov %vm22422_vm0  ;;  %v10681_v43 = vld [vmem:[#allocation3 + $0x8b] sm:$0xff] }
 0x5b2   : > { %16314 = vmatmul.mubr.msk.f32.gmra.mrb[64].mxu0 %vm22452_vm14, %v9047_v0  ;;  %vm22467_vm14 = vmmov %vm22422_vm0  ;;  %v10682_v0 = vld [vmem:[#allocation3 + $0x93] sm:$0xff] }
 0x5b3   : > { %16316 = vmatprep.mubr.msk.f32.mxu0 %vm22422_vm0, %v9048_v3  ;;  %v10683_v3 = vld [vmem:[#allocation3 + $0x9b] sm:$0xff] }
 0x5b6   : > { %16317 = vmatmul.mubr.msk.f32.gmra.mrb[66].mxu0 %vm22453_vm3, %v9049_v34  ;;  %vm22468_vm3 = vmmov %vm22422_vm0  ;;  %v10684_v34 = vld [vmem:[#allocation3 + $0xa3] sm:$0xff] }
 0x5b7   : > { %16319 = vmatprep.mubr.msk.f32.mxu0 %vm22454_vm11, %v9050_v22  ;;  %vm22469_vm11 = vmmov %vm22422_vm0  ;;  %v10685_v22 = vld [vmem:[#allocation3 + $0xab] sm:$0xff] }
 0x5ba   : > { %16320 = vmatmul.mubr.msk.f32.gmra.mrb[68].mxu0 %vm22455_vm6, %v9051_v17  ;;  %vm22470_vm6 = vmmov %vm22422_vm0  ;;  %v10686_v17 = vld [vmem:[#allocation3 + $0xb3] sm:$0xff] }
 0x5bb   : > { %16322 = vmatprep.mubr.msk.f32.mxu0 %vm22456_vm5, %v9052_v2  ;;  %vm22471_vm5 = vmmov %vm22422_vm0  ;;  %v10687_v2 = vld [vmem:[#allocation3 + $0xbb] sm:$0xff] }
 0x5be   : > { %16323 = vmatmul.mubr.msk.f32.gmra.mrb[70].mxu0 %vm22457_vm15, %v9053_v9  ;;  %vm22472_vm15 = vmmov %vm22422_vm0  ;;  %v10689_v9 = vld [vmem:[#allocation3 + $0xcb] sm:$0xff] }
 0x5bf   : > { %16327 = vmatprep.mubr.msk.f32.mxu0 %vm22458_vm8, %v9806_v38  ;;  %vm22473_vm8 = vmmov %vm22422_vm0  ;;  %v10688_v38 = vld [vmem:[#allocation3 + $0xc3] sm:$0xff] }
 0x5c2   : > { %16328 = vmatmul.mubr.msk.f32.vlgmr.msra.gmra.mrb[36].mxu0 %vm22459_vm10, %v9807_v26  ;;  %vm22474_vm10 = vmmov %vm22422_vm0  ;;  %v10690_v26 = vld [vmem:[#allocation3 + $0xd3] sm:$0xff] }
 0x5c3   : > { %16382 = vmatpush3.msk.msra.mxu0 %vm22460_vm7, %v20949_v27  ;;  %16330 = vmatprep.mubr.msk.f32.mxu0 %vm22461_vm1, %v20997_v59  ;;  %vm22475_vm7 = vmmov %vm22422_vm0  ;;  %v9834_v27 = vld [vmem:[#allocation3 + $0xe2] sm:$0xff] }
 0x5c4   : > { %16437 = vmatprep.subr.msk.mxu0 %vm22462_vm12, %v20994_v4  ;;  %vm22476_vm1 = vmmov %vm22422_vm0 }
 0x5c5   : > { %vm22477_vm12 = vmmov %vm22422_vm0 }
 0x5c6   : > { %16331 = vmatmul.mubr.msk.f32.gmra.mrb[38].mxu0 %vm22463_vm13, %v21005_v1  ;;  %vm22478_vm13 = vmmov %vm22422_vm0 }
 0x5c7   : > { %16333 = vmatprep.mubr.msk.f32.mxu0 %vm22464_vm4, %v21009_v53  ;;  %vm22479_vm4 = vmmov %vm22422_vm0 }
 0x5ca   : > { %16334 = vmatmul.mubr.msk.f32.gmra.mrb[40].mxu0 %vm22465_vm2, %v21013_v41  ;;  %vm22480_vm2 = vmmov %vm22422_vm0 }
 0x5cb   : > { %16336 = vmatprep.mubr.msk.f32.mxu0 %vm22466_vm9, %v21017_v8  ;;  %vm22481_vm9 = vmmov %vm22422_vm0 }
 0x5ce   : > { %16337 = vmatmul.mubr.msk.f32.gmra.mrb[42].mxu0 %vm22467_vm14, %v21021_v6  ;;  %vm22482_vm14 = vmmov %vm22422_vm0 }
 0x5cf   : > { %16339 = vmatprep.mubr.msk.f32.mxu0 %vm22422_vm0, %v21025_v25 }
 0x5d2   : > { %16340 = vmatmul.mubr.msk.f32.gmra.mrb[44].mxu0 %vm22468_vm3, %v21029_v18  ;;  %vm22483_vm3 = vmmov %vm22422_vm0 }
 0x5d3   : > { %16342 = vmatprep.mubr.msk.f32.mxu0 %vm22469_vm11, %v21033_v48  ;;  %vm22484_vm11 = vmmov %vm22422_vm0 }
 0x5d6   : > { %16343 = vmatmul.mubr.msk.f32.gmra.mrb[46].mxu0 %vm22470_vm6, %v9817_v58  ;;  %vm22485_vm6 = vmmov %vm22422_vm0 }
 0x5d7   : > { %16345 = vmatprep.mubr.msk.f32.mxu0 %vm22471_vm5, %v9818_v47  ;;  %vm22486_vm5 = vmmov %vm22422_vm0 }
 0x5da   : > { %16346 = vmatmul.mubr.msk.f32.gmra.mrb[48].mxu0 %vm22472_vm15, %v9819_v29  ;;  %vm22487_vm15 = vmmov %vm22422_vm0 }
 0x5db   : > { %16348 = vmatprep.mubr.msk.f32.mxu0 %vm22473_vm8, %v9820_v36  ;;  %vm22488_vm8 = vmmov %vm22422_vm0 }
 0x5de   : > { %16349 = vmatmul.mubr.msk.f32.gmra.mrb[50].mxu0 %vm22474_vm10, %v9821_v14  ;;  %vm22489_vm10 = vmmov %vm22422_vm0 }
 0x5df   : > { %16351 = vmatprep.mubr.msk.f32.mxu0 %vm22475_vm7, %v9822_v61  ;;  %vm22490_vm7 = vmmov %vm22422_vm0 }
 0x5e2   : > { %16352 = vmatmul.mubr.msk.f32.gmra.mrb[52].mxu0 %vm22476_vm1, %v9823_v19  ;;  %vm22491_vm1 = vmmov %vm22422_vm0 }
 0x5e3   : > { %16354 = vmatprep.mubr.msk.f32.mxu0 %vm22477_vm12, %v9824_v52  ;;  %vm22492_vm12 = vmmov %vm22422_vm0 }
 0x5e6   : > { %16355 = vmatmul.mubr.msk.f32.gmra.mrb[54].mxu0 %vm22478_vm13, %v9825_v56  ;;  %vm22493_vm13 = vmmov %vm22422_vm0 }
 0x5e7   : > { %16357 = vmatprep.mubr.msk.f32.mxu0 %vm22479_vm4, %v9826_v37  ;;  %vm22494_vm4 = vmmov %vm22422_vm0 }
 0x5ea   : > { %16358 = vmatmul.mubr.msk.f32.gmra.mrb[56].mxu0 %vm22480_vm2, %v9827_v51  ;;  %vm22495_vm2 = vmmov %vm22422_vm0 }
 0x5eb   : > { %16360 = vmatprep.mubr.msk.f32.mxu0 %vm22481_vm9, %v9828_v62  ;;  %vm22496_vm9 = vcmask 1043456  }
 0x5ee   : > { %16361 = vmatmul.mubr.msk.f32.gmra.mrb[58].mxu0 %vm22482_vm14, %v9829_v12  ;;  %vm22497_vm14 = vmmov %vm22422_vm0 }
 0x5ef   : > { %16363 = vmatprep.mubr.msk.f32.mxu0 %vm22422_vm0, %v9830_v7  ;;  %vm22498_vm0 = vmmov %vm22496_vm9 }
 0x5f2   : > { %16364 = vmatmul.mubr.msk.f32.gmra.mrb[60].mxu0 %vm22483_vm3, %v9831_v10  ;;  %vm22499_vm3 = vmmov %vm22491_vm1 }
 0x5f3   : > { %16366 = vmatprep.mubr.msk.f32.mxu0 %vm22484_vm11, %v9832_v21  ;;  %vm22500_vm11 = vmmov %vm22491_vm1 }
 0x5f6   : > { %16367 = vmatmul.mubr.msk.f32.gmra.mrb[62].mxu0 %vm22485_vm6, %v9833_v31  ;;  %vm22501_vm6 = vmmov %vm22491_vm1 }
 0x5f7   : > { %16369 = vmatprep.mubr.msk.f32.mxu0 %vm22486_vm5, %v9834_v27  ;;  %vm22502_vm5 = vmmov %vm22491_vm1 }
 0x5fa   : > { %16370 = vmatmul.mubr.msk.f32.gmra.mrb[64].mxu0 %vm22487_vm15, %v9835_v15  ;;  %vm22503_vm15 = vmmov %vm22491_vm1 }
 0x5fb   : > { %16372 = vmatprep.mubr.msk.f32.mxu0 %vm22488_vm8, %v9836_v11  ;;  %vm22504_vm8 = vmmov %vm22491_vm1 }
 0x5fe   : > { %16373 = vmatmul.mubr.msk.f32.gmra.mrb[66].mxu0 %vm22489_vm10, %v9837_v39  ;;  %vm22505_vm10 = vmmov %vm22491_vm1 }
 0x5ff   : > { %16375 = vmatprep.mubr.msk.f32.mxu0 %vm22490_vm7, %v9838_v63  ;;  %vm22506_vm7 = vmmov %vm22491_vm1 }
 0x602   : > { %16376 = vmatmul.mubr.msk.f32.gmra.mrb[68].mxu0 %vm22491_vm1, %v9839_v50 }
 0x603   : > { %16378 = vmatprep.mubr.msk.f32.mxu0 %vm22492_vm12, %v9840_v60  ;;  %vm22507_vm12 = vmmov %vm22491_vm1 }
 0x606   : > { %16379 = vmatmul.mubr.msk.f32.gmra.mrb[70].mxu0 %vm22493_vm13, %v9841_v49  ;;  %vm22508_vm13 = vmmov %vm22491_vm1 }
 0x607   : > { %16383 = vmatprep.mubr.msk.f32.mxu0 %vm22494_vm4, %v20997_v59  ;;  %vm22509_vm4 = vmmov %vm22491_vm1  ;;  %v10692_v59 = vld [vmem:[#allocation3 + $0xe3] sm:$0xff] }
 0x60a   : > { %16384 = vmatmul.mubr.msk.f32.vlgmr.msra.gmra.mrb[36].mxu0 %vm22495_vm2, %v21005_v1  ;;  %vm22510_vm2 = vmmov %vm22491_vm1  ;;  %v10693_v1 = vld [vmem:[#allocation3 + $0xeb] sm:$0xff] }
 0x60b   : > { %16438 = vmatpush3.msk.msra.mxu0 %vm22496_vm9, %v20994_v4  ;;  %16386 = vmatprep.mubr.msk.f32.mxu0 %vm22497_vm14, %v21009_v53  ;;  %vm22511_vm9 = vmmov %vm22491_vm1  ;;  %v10691_v4 = vld [vmem:[#allocation3 + $0xdb] sm:$0xff]  ;;  %v10694_v53 = vld [vmem:[#allocation3 + $0xf3] sm:$0xff] }
 0x60c   : > { %16493 = vmatprep.subr.msk.mxu0 %vm22498_vm0, %v14050_v32  ;;  %vm22512_vm14 = vmmov %vm22491_vm1 }
 0x60d   : > { %vm22513_vm0 = vmmov %vm22491_vm1 }
 0x60e   : > { %16387 = vmatmul.mubr.msk.f32.gmra.mrb[38].mxu0 %vm22499_vm3, %v21013_v41  ;;  %vm22514_vm3 = vmmov %vm22513_vm0  ;;  %v10695_v41 = vld [vmem:[#allocation3 + $0xfb] sm:$0xff] }
 0x60f   : > { %16389 = vmatprep.mubr.msk.f32.mxu0 %vm22500_vm11, %v21017_v8  ;;  %vm22515_vm11 = vmmov %vm22513_vm0  ;;  %v10696_v8 = vld [vmem:[#allocation3 + $0x103] sm:$0xff] }
 0x612   : > { %16390 = vmatmul.mubr.msk.f32.gmra.mrb[40].mxu0 %vm22501_vm6, %v21021_v6  ;;  %vm22516_vm6 = vmmov %vm22513_vm0  ;;  %v10697_v6 = vld [vmem:[#allocation3 + $0x10b] sm:$0xff] }
 0x613   : > { %16392 = vmatprep.mubr.msk.f32.mxu0 %vm22502_vm5, %v21025_v25  ;;  %vm22517_vm5 = vmmov %vm22513_vm0  ;;  %v10698_v25 = vld [vmem:[#allocation3 + $0x113] sm:$0xff] }
 0x616   : > { %16393 = vmatmul.mubr.msk.f32.gmra.mrb[42].mxu0 %vm22503_vm15, %v21029_v18  ;;  %vm22518_vm15 = vmmov %vm22513_vm0  ;;  %v10699_v18 = vld [vmem:[#allocation3 + $0x11b] sm:$0xff] }
 0x617   : > { %16395 = vmatprep.mubr.msk.f32.mxu0 %vm22504_vm8, %v21033_v48  ;;  %vm22519_vm8 = vmmov %vm22513_vm0  ;;  %v10700_v48 = vld [vmem:[#allocation3 + $0x123] sm:$0xff] }
 0x61a   : > { %16396 = vmatmul.mubr.msk.f32.gmra.mrb[44].mxu0 %vm22505_vm10, %v9817_v58  ;;  %vm22520_vm10 = vmmov %vm22513_vm0  ;;  %v10701_v58 = vld [vmem:[#allocation3 + $0x12b] sm:$0xff] }
 0x61b   : > { %16398 = vmatprep.mubr.msk.f32.mxu0 %vm22506_vm7, %v9818_v47  ;;  %vm22521_vm7 = vmmov %vm22513_vm0  ;;  %v11096_v47 = vld [vmem:[#allocation3 + $0x14] sm:$0xff] }
 0x61e   : > { %16399 = vmatmul.mubr.msk.f32.gmra.mrb[46].mxu0 %vm22491_vm1, %v9819_v29  ;;  %vm22522_vm1 = vmmov %vm22513_vm0  ;;  %v11097_v29 = vld [vmem:[#allocation3 + $0x1c] sm:$0xff] }
 0x61f   : > { %16401 = vmatprep.mubr.msk.f32.mxu0 %vm22507_vm12, %v9820_v36  ;;  %vm22523_vm12 = vmmov %vm22513_vm0  ;;  %v21161_v36 = vld [vmem:[%s21512_s1 + $0x64] sm:$0xf] }
 0x622   : > { %16402 = vmatmul.mubr.msk.f32.gmra.mrb[48].mxu0 %vm22508_vm13, %v9821_v14  ;;  %vm22524_vm13 = vmmov %vm22513_vm0  ;;  %v21164_v14 = vld [vmem:[#allocation3 + $0x24] sm:$0xff] }
 0x623   : > { %16404 = vmatprep.mubr.msk.f32.mxu0 %vm22509_vm4, %v9822_v61  ;;  %vm22525_vm4 = vmmov %vm22513_vm0  ;;  %v21172_v61 = vld [vmem:[#allocation3 + $0x2c] sm:$0xff] }
 0x626   : > { %16405 = vmatmul.mubr.msk.f32.gmra.mrb[50].mxu0 %vm22510_vm2, %v9823_v19  ;;  %vm22526_vm2 = vmmov %vm22513_vm0  ;;  %v21176_v19 = vld [vmem:[#allocation3 + $0x34] sm:$0xff] }
 0x627   : > { %16407 = vmatprep.mubr.msk.f32.mxu0 %vm22511_vm9, %v9824_v52  ;;  %vm22527_vm9 = vmmov %vm22513_vm0  ;;  %v21180_v52 = vld [vmem:[#allocation3 + $0x3c] sm:$0xff] }
 0x62a   : > { %16408 = vmatmul.mubr.msk.f32.gmra.mrb[52].mxu0 %vm22512_vm14, %v9825_v56  ;;  %vm22528_vm14 = vmmov %vm22513_vm0  ;;  %v21184_v56 = vld [vmem:[#allocation3 + $0x44] sm:$0xff] }
 0x62b   : > { %16410 = vmatprep.mubr.msk.f32.mxu0 %vm22513_vm0, %v9826_v37  ;;  %v21188_v37 = vld [vmem:[#allocation3 + $0x4c] sm:$0xff] }
 0x62e   : > { %16411 = vmatmul.mubr.msk.f32.gmra.mrb[54].mxu0 %vm22514_vm3, %v9827_v51  ;;  %vm22529_vm3 = vmmov %vm22513_vm0  ;;  %v21192_v51 = vld [vmem:[#allocation3 + $0x54] sm:$0xff] }
 0x62f   : > { %16413 = vmatprep.mubr.msk.f32.mxu0 %vm22515_vm11, %v9828_v62  ;;  %vm22530_vm11 = vmmov %vm22513_vm0  ;;  %v21196_v62 = vld [vmem:[#allocation3 + $0x5c] sm:$0xff] }
 0x632   : > { %16414 = vmatmul.mubr.msk.f32.gmra.mrb[56].mxu0 %vm22516_vm6, %v9829_v12  ;;  %vm22531_vm6 = vmmov %vm22513_vm0  ;;  %v21200_v12 = vld [vmem:[#allocation3 + $0x64] sm:$0xff] }
 0x633   : > { %16416 = vmatprep.mubr.msk.f32.mxu0 %vm22517_vm5, %v9830_v7  ;;  %vm22532_vm5 = vcmask 1043456   ;;  %v11107_v7 = vld [vmem:[#allocation3 + $0x6c] sm:$0xff] }
 0x636   : > { %16417 = vmatmul.mubr.msk.f32.gmra.mrb[58].mxu0 %vm22518_vm15, %v9831_v10  ;;  %vm22533_vm15 = vmmov %vm22513_vm0  ;;  %v11108_v10 = vld [vmem:[#allocation3 + $0x74] sm:$0xff] }
 0x637   : > { %16419 = vmatprep.mubr.msk.f32.mxu0 %vm22519_vm8, %v9832_v21  ;;  %vm22534_vm8 = vmmov %vm22532_vm5  ;;  %v11109_v21 = vld [vmem:[#allocation3 + $0x7c] sm:$0xff] }
 0x63a   : > { %16420 = vmatmul.mubr.msk.f32.gmra.mrb[60].mxu0 %vm22520_vm10, %v9833_v31  ;;  %vm22535_vm10 = vmmov %vm22513_vm0  ;;  %v11110_v31 = vld [vmem:[#allocation3 + $0x84] sm:$0xff] }
 0x63b   : > { %16422 = vmatprep.mubr.msk.f32.mxu0 %vm22521_vm7, %v9834_v27  ;;  %vm22536_vm7 = vmmov %vm22513_vm0  ;;  %v11111_v27 = vld [vmem:[#allocation3 + $0x8c] sm:$0xff] }
 0x63e   : > { %16423 = vmatmul.mubr.msk.f32.gmra.mrb[62].mxu0 %vm22522_vm1, %v9835_v15  ;;  %vm22537_vm1 = vmmov %vm22513_vm0  ;;  %v11112_v15 = vld [vmem:[#allocation3 + $0x94] sm:$0xff] }
 0x63f   : > { %16425 = vmatprep.mubr.msk.f32.mxu0 %vm22523_vm12, %v9836_v11  ;;  %vm22538_vm12 = vmmov %vm22513_vm0  ;;  %v11113_v11 = vld [vmem:[#allocation3 + $0x9c] sm:$0xff] }
 0x642   : > { %16426 = vmatmul.mubr.msk.f32.gmra.mrb[64].mxu0 %vm22524_vm13, %v9837_v39  ;;  %vm22539_vm13 = vmmov %vm22513_vm0  ;;  %v11114_v39 = vld [vmem:[#allocation3 + $0xa4] sm:$0xff] }
 0x643   : > { %16428 = vmatprep.mubr.msk.f32.mxu0 %vm22525_vm4, %v9838_v63  ;;  %vm22540_vm4 = vmmov %vm22513_vm0  ;;  %v11115_v63 = vld [vmem:[#allocation3 + $0xac] sm:$0xff] }
 0x646   : > { %16429 = vmatmul.mubr.msk.f32.gmra.mrb[66].mxu0 %vm22526_vm2, %v9839_v50  ;;  %vm22541_vm2 = vmmov %vm22513_vm0  ;;  %v11116_v50 = vld [vmem:[#allocation3 + $0xb4] sm:$0xff] }
 0x647   : > { %16431 = vmatprep.mubr.msk.f32.mxu0 %vm22527_vm9, %v9840_v60  ;;  %vm22542_vm9 = vmmov %vm22513_vm0  ;;  %v11117_v60 = vld [vmem:[#allocation3 + $0xbc] sm:$0xff] }
 0x64a   : > { %16432 = vmatmul.mubr.msk.f32.gmra.mrb[68].mxu0 %vm22528_vm14, %v9841_v49  ;;  %vm22543_vm14 = vmmov %vm22513_vm0  ;;  %v11118_v49 = vld [vmem:[#allocation3 + $0xc4] sm:$0xff] }
 0x64b   : > { %16434 = vmatprep.mubr.msk.f32.mxu0 %vm22513_vm0, %v10270_v33  ;;  %v11120_v33 = vld [vmem:[#allocation3 + $0xd4] sm:$0xff] }
 0x64e   : > { %16435 = vmatmul.mubr.msk.f32.gmra.mrb[70].mxu0 %vm22529_vm3, %v10271_v42  ;;  %vm22544_vm3 = vmmov %vm22513_vm0  ;;  %v11121_v42 = vld [vmem:[#allocation3 + $0xdc] sm:$0xff] }
 0x64f   : > { %16439 = vmatprep.mubr.msk.f32.mxu0 %vm22530_vm11, %v10666_v5  ;;  %vm22545_vm11 = vmmov %vm22513_vm0  ;;  %v11122_v5 = vld [vmem:[#allocation3 + $0xe4] sm:$0xff] }
 0x652   : > { %16440 = vmatmul.mubr.msk.f32.vlgmr.msra.gmra.mrb[36].mxu0 %vm22531_vm6, %v10667_v35  ;;  %vm22546_vm6 = vmmov %vm22513_vm0  ;;  %v11123_v35 = vld [vmem:[#allocation3 + $0xec] sm:$0xff] }
 0x653   : > { %16494 = vmatpush3.msk.msra.mxu0 %vm22532_vm5, %v14050_v32  ;;  %16442 = vmatprep.mubr.msk.f32.mxu0 %vm22533_vm15, %v10668_v13  ;;  %vm22547_vm5 = vmmov %vm22513_vm0  ;;  %v11119_v32 = vld [vmem:[#allocation3 + $0xcc] sm:$0xff]  ;;  %v11125_v13 = vld [vmem:[#allocation3 + $0xfc] sm:$0xff] }
 0x654   : > { %16549 = vmatprep.subr.msk.mxu0 %vm22534_vm8, %v21117_v23  ;;  %vm22548_vm15 = vmmov %vm22513_vm0 }
 0x655   : > { %vm22549_vm8 = vmmov %vm22513_vm0 }
 0x656   : > { %16443 = vmatmul.mubr.msk.f32.gmra.mrb[38].mxu0 %vm22535_vm10, %v10669_v54  ;;  %vm22550_vm10 = vmmov %vm22513_vm0  ;;  %v11126_v54 = vld [vmem:[#allocation3 + $0x104] sm:$0xff] }
 0x657   : > { %16445 = vmatprep.mubr.msk.f32.mxu0 %vm22536_vm7, %v10670_v16  ;;  %vm22551_vm7 = vmmov %vm22513_vm0  ;;  %v11127_v16 = vld [vmem:[#allocation3 + $0x10c] sm:$0xff] }
 0x65a   : > { %16446 = vmatmul.mubr.msk.f32.gmra.mrb[40].mxu0 %vm22537_vm1, %v10671_v20  ;;  %vm22552_vm1 = vmmov %vm22513_vm0  ;;  %v11128_v20 = vld [vmem:[#allocation3 + $0x114] sm:$0xff] }
 0x65b   : > { %16448 = vmatprep.mubr.msk.f32.mxu0 %vm22538_vm12, %v10672_v24  ;;  %vm22553_vm12 = vmmov %vm22513_vm0  ;;  %v11129_v24 = vld [vmem:[#allocation3 + $0x11c] sm:$0xff] }
 0x65e   : > { %16449 = vmatmul.mubr.msk.f32.gmra.mrb[42].mxu0 %vm22539_vm13, %v10673_v46  ;;  %vm22554_vm13 = vmmov %vm22513_vm0  ;;  %v11130_v46 = vld [vmem:[#allocation3 + $0x124] sm:$0xff] }
 0x65f   : > { %16451 = vmatprep.mubr.msk.f32.mxu0 %vm22540_vm4, %v10674_v40  ;;  %vm22555_vm4 = vmmov %vm22513_vm0  ;;  %v11131_v40 = vld [vmem:[#allocation3 + $0x12c] sm:$0xff] }
 0x662   : > { %16452 = vmatmul.mubr.msk.f32.gmra.mrb[44].mxu0 %vm22541_vm2, %v10675_v44  ;;  %vm22556_vm2 = vmmov %vm22513_vm0  ;;  %v14164_v44 = vld [vmem:[%s21512_s1 + $0x68] sm:$0xf] }
 0x663   : > { %16454 = vmatprep.mubr.msk.f32.mxu0 %vm22542_vm9, %v10676_v57  ;;  %vm22557_vm9 = vmmov %vm22513_vm0  ;;  %v11560_v57 = vld [vmem:[#allocation3 + $0x134] sm:$0xff] }
 0x666   : > { %16455 = vmatmul.mubr.msk.f32.gmra.mrb[46].mxu0 %vm22543_vm14, %v10677_v45  ;;  %vm22558_vm14 = vmmov %vm22513_vm0  ;;  %v11561_v45 = vld [vmem:[#allocation3 + $0x13c] sm:$0xff] }
 0x667   : > { %16457 = vmatprep.mubr.msk.f32.mxu0 %vm22513_vm0, %v10678_v55  ;;  %v11956_v55 = vld [vmem:[#allocation3 + $0x25] sm:$0xff] }
 0x66a   : > { %16458 = vmatmul.mubr.msk.f32.gmra.mrb[48].mxu0 %vm22544_vm3, %v10679_v30  ;;  %vm22559_vm3 = vmmov %vm22513_vm0  ;;  %v11957_v30 = vld [vmem:[#allocation3 + $0x2d] sm:$0xff] }
 0x66b   : > { %16460 = vmatprep.mubr.msk.f32.mxu0 %vm22545_vm11, %v10680_v28  ;;  %vm22560_vm11 = vmmov %vm22513_vm0  ;;  %v11958_v28 = vld [vmem:[#allocation3 + $0x35] sm:$0xff] }
 0x66e   : > { %16461 = vmatmul.mubr.msk.f32.gmra.mrb[50].mxu0 %vm22546_vm6, %v10681_v43  ;;  %vm22561_vm6 = vmmov %vm22513_vm0  ;;  %v11959_v43 = vld [vmem:[#allocation3 + $0x3d] sm:$0xff] }
 0x66f   : > { %16463 = vmatprep.mubr.msk.f32.mxu0 %vm22547_vm5, %v10682_v0  ;;  %vm22562_vm5 = vmmov %vm22513_vm0  ;;  %v11960_v0 = vld [vmem:[#allocation3 + $0x45] sm:$0xff] }
 0x672   : > { %16464 = vmatmul.mubr.msk.f32.gmra.mrb[52].mxu0 %vm22548_vm15, %v10683_v3  ;;  %vm22563_vm15 = vmmov %vm22513_vm0  ;;  %v11961_v3 = vld [vmem:[#allocation3 + $0x4d] sm:$0xff] }
 0x673   : > { %16466 = vmatprep.mubr.msk.f32.mxu0 %vm22549_vm8, %v10684_v34  ;;  %vm22564_vm8 = vmmov %vm22513_vm0  ;;  %v11962_v34 = vld [vmem:[#allocation3 + $0x55] sm:$0xff] }
 0x676   : > { %16467 = vmatmul.mubr.msk.f32.gmra.mrb[54].mxu0 %vm22550_vm10, %v10685_v22  ;;  %vm22565_vm10 = vmmov %vm22513_vm0  ;;  %v11963_v22 = vld [vmem:[#allocation3 + $0x5d] sm:$0xff] }
 0x677   : > { %16469 = vmatprep.mubr.msk.f32.mxu0 %vm22551_vm7, %v10686_v17  ;;  %vm22566_vm7 = vmmov %vm22513_vm0  ;;  %v11964_v17 = vld [vmem:[#allocation3 + $0x65] sm:$0xff] }
 0x67a   : > { %16470 = vmatmul.mubr.msk.f32.gmra.mrb[56].mxu0 %vm22552_vm1, %v10687_v2  ;;  %vm22567_vm1 = vmmov %vm22513_vm0  ;;  %v11965_v2 = vld [vmem:[#allocation3 + $0x6d] sm:$0xff] }
 0x67b   : > { %16472 = vmatprep.mubr.msk.f32.mxu0 %vm22553_vm12, %v10688_v38  ;;  %vm22568_vm12 = vcmask 1043456   ;;  %v11966_v38 = vld [vmem:[#allocation3 + $0x75] sm:$0xff] }
 0x67e   : > { %16473 = vmatmul.mubr.msk.f32.gmra.mrb[58].mxu0 %vm22554_vm13, %v10689_v9  ;;  %vm22569_vm13 = vmmov %vm22513_vm0  ;;  %v11967_v9 = vld [vmem:[#allocation3 + $0x7d] sm:$0xff] }
 0x67f   : > { %16475 = vmatprep.mubr.msk.f32.mxu0 %vm22555_vm4, %v10690_v26  ;;  %vm22570_vm4 = vmmov %vm22568_vm12  ;;  %v11968_v26 = vld [vmem:[#allocation3 + $0x85] sm:$0xff] }
 0x682   : > { %16476 = vmatmul.mubr.msk.f32.gmra.mrb[60].mxu0 %vm22556_vm2, %v10691_v4  ;;  %vm22571_vm2 = vmmov %vm22513_vm0  ;;  %v11969_v4 = vld [vmem:[#allocation3 + $0x8d] sm:$0xff] }
 0x683   : > { %16478 = vmatprep.mubr.msk.f32.mxu0 %vm22557_vm9, %v10692_v59  ;;  %vm22572_vm9 = vmmov %vm22513_vm0  ;;  %v11970_v59 = vld [vmem:[#allocation3 + $0x95] sm:$0xff] }
 0x686   : > { %16479 = vmatmul.mubr.msk.f32.gmra.mrb[62].mxu0 %vm22558_vm14, %v10693_v1  ;;  %vm22573_vm14 = vmmov %vm22513_vm0  ;;  %v11971_v1 = vld [vmem:[#allocation3 + $0x9d] sm:$0xff] }
 0x687   : > { %16481 = vmatprep.mubr.msk.f32.mxu0 %vm22513_vm0, %v10694_v53  ;;  %v11972_v53 = vld [vmem:[#allocation3 + $0xa5] sm:$0xff] }
 0x68a   : > { %16482 = vmatmul.mubr.msk.f32.gmra.mrb[64].mxu0 %vm22559_vm3, %v10695_v41  ;;  %vm22574_vm3 = vmmov %vm22513_vm0  ;;  %v11973_v41 = vld [vmem:[#allocation3 + $0xad] sm:$0xff] }
 0x68b   : > { %16484 = vmatprep.mubr.msk.f32.mxu0 %vm22560_vm11, %v10696_v8  ;;  %vm22575_vm11 = vmmov %vm22513_vm0  ;;  %v11974_v8 = vld [vmem:[#allocation3 + $0xb5] sm:$0xff] }
 0x68e   : > { %16485 = vmatmul.mubr.msk.f32.gmra.mrb[66].mxu0 %vm22561_vm6, %v10697_v6  ;;  %vm22576_vm6 = vmmov %vm22513_vm0  ;;  %v11975_v6 = vld [vmem:[#allocation3 + $0xbd] sm:$0xff] }
 0x68f   : > { %16487 = vmatprep.mubr.msk.f32.mxu0 %vm22562_vm5, %v10698_v25  ;;  %vm22577_vm5 = vmmov %vm22513_vm0  ;;  %v11976_v25 = vld [vmem:[#allocation3 + $0xc5] sm:$0xff] }
 0x692   : > { %16488 = vmatmul.mubr.msk.f32.gmra.mrb[68].mxu0 %vm22563_vm15, %v10699_v18  ;;  %vm22578_vm15 = vmmov %vm22513_vm0  ;;  %v11977_v18 = vld [vmem:[#allocation3 + $0xcd] sm:$0xff] }
 0x693   : > { %16490 = vmatprep.mubr.msk.f32.mxu0 %vm22564_vm8, %v10700_v48  ;;  %vm22579_vm8 = vmmov %vm22513_vm0  ;;  %v11978_v48 = vld [vmem:[#allocation3 + $0xd5] sm:$0xff] }
 0x696   : > { %16491 = vmatmul.mubr.msk.f32.gmra.mrb[70].mxu0 %vm22565_vm10, %v10701_v58  ;;  %vm22580_vm10 = vmmov %vm22513_vm0  ;;  %v11979_v58 = vld [vmem:[#allocation3 + $0xdd] sm:$0xff] }
 0x697   : > { %16495 = vmatprep.mubr.msk.f32.mxu0 %vm22566_vm7, %v11096_v47  ;;  %vm22581_vm7 = vmmov %vm22513_vm0  ;;  %v11980_v47 = vld [vmem:[#allocation3 + $0xe5] sm:$0xff] }
 0x69a   : > { %16496 = vmatmul.mubr.msk.f32.vlgmr.msra.gmra.mrb[36].mxu0 %vm22567_vm1, %v11097_v29  ;;  %vm22582_vm1 = vmmov %vm22513_vm0  ;;  %v11981_v29 = vld [vmem:[#allocation3 + $0xed] sm:$0xff] }
 0x69b   : > { %16550 = vmatpush3.msk.msra.mxu0 %vm22568_vm12, %v21117_v23  ;;  %16498 = vmatprep.mubr.msk.f32.mxu0 %vm22569_vm13, %v21164_v14  ;;  %vm22583_vm12 = vmmov %vm22513_vm0  ;;  %v11124_v23 = vld [vmem:[#allocation3 + $0xf4] sm:$0xff] }
 0x69c   : > { %16605 = vmatprep.subr.msk.mxu0 %vm22570_vm4, %v21161_v36  ;;  %vm22584_vm13 = vmmov %vm22513_vm0 }
 0x69d   : > { %vm22585_vm4 = vmmov %vm22513_vm0 }
 0x69e   : > { %16499 = vmatmul.mubr.msk.f32.gmra.mrb[38].mxu0 %vm22571_vm2, %v21172_v61  ;;  %vm22586_vm2 = vmmov %vm22513_vm0 }
 0x69f   : > { %16501 = vmatprep.mubr.msk.f32.mxu0 %vm22572_vm9, %v21176_v19  ;;  %vm22587_vm9 = vmmov %vm22513_vm0 }
 0x6a2   : > { %16502 = vmatmul.mubr.msk.f32.gmra.mrb[40].mxu0 %vm22573_vm14, %v21180_v52  ;;  %vm22588_vm14 = vmmov %vm22513_vm0 }
 0x6a3   : > { %16504 = vmatprep.mubr.msk.f32.mxu0 %vm22513_vm0, %v21184_v56 }
 0x6a6   : > { %16505 = vmatmul.mubr.msk.f32.gmra.mrb[42].mxu0 %vm22574_vm3, %v21188_v37  ;;  %vm22589_vm3 = vmmov %vm22513_vm0 }
 0x6a7   : > { %16507 = vmatprep.mubr.msk.f32.mxu0 %vm22575_vm11, %v21192_v51  ;;  %vm22590_vm11 = vmmov %vm22513_vm0 }
 0x6aa   : > { %16508 = vmatmul.mubr.msk.f32.gmra.mrb[44].mxu0 %vm22576_vm6, %v21196_v62  ;;  %vm22591_vm6 = vmmov %vm22513_vm0 }
 0x6ab   : > { %16510 = vmatprep.mubr.msk.f32.mxu0 %vm22577_vm5, %v21200_v12  ;;  %vm22592_vm5 = vmmov %vm22513_vm0 }
 0x6ae   : > { %16511 = vmatmul.mubr.msk.f32.gmra.mrb[46].mxu0 %vm22578_vm15, %v11107_v7  ;;  %vm22593_vm15 = vmmov %vm22513_vm0 }
 0x6af   : > { %16513 = vmatprep.mubr.msk.f32.mxu0 %vm22579_vm8, %v11108_v10  ;;  %vm22594_vm8 = vmmov %vm22513_vm0 }
 0x6b2   : > { %16514 = vmatmul.mubr.msk.f32.gmra.mrb[48].mxu0 %vm22580_vm10, %v11109_v21  ;;  %vm22595_vm10 = vmmov %vm22513_vm0 }
 0x6b3   : > { %16516 = vmatprep.mubr.msk.f32.mxu0 %vm22581_vm7, %v11110_v31  ;;  %vm22596_vm7 = vmmov %vm22513_vm0 }
 0x6b6   : > { %16517 = vmatmul.mubr.msk.f32.gmra.mrb[50].mxu0 %vm22582_vm1, %v11111_v27  ;;  %vm22597_vm1 = vmmov %vm22513_vm0 }
 0x6b7   : > { %16519 = vmatprep.mubr.msk.f32.mxu0 %vm22583_vm12, %v11112_v15  ;;  %vm22598_vm12 = vmmov %vm22513_vm0 }
 0x6ba   : > { %16520 = vmatmul.mubr.msk.f32.gmra.mrb[52].mxu0 %vm22584_vm13, %v11113_v11  ;;  %vm22599_vm13 = vmmov %vm22513_vm0 }
 0x6bb   : > { %16522 = vmatprep.mubr.msk.f32.mxu0 %vm22585_vm4, %v11114_v39  ;;  %vm22600_vm4 = vmmov %vm22513_vm0 }
 0x6be   : > { %16523 = vmatmul.mubr.msk.f32.gmra.mrb[54].mxu0 %vm22586_vm2, %v11115_v63  ;;  %vm22601_vm2 = vmmov %vm22513_vm0 }
 0x6bf   : > { %16525 = vmatprep.mubr.msk.f32.mxu0 %vm22587_vm9, %v11116_v50  ;;  %vm22602_vm9 = vmmov %vm22513_vm0 }
 0x6c2   : > { %16526 = vmatmul.mubr.msk.f32.gmra.mrb[56].mxu0 %vm22588_vm14, %v11117_v60  ;;  %vm22603_vm14 = vmmov %vm22513_vm0 }
 0x6c3   : > { %16528 = vmatprep.mubr.msk.f32.mxu0 %vm22513_vm0, %v11118_v49  ;;  %vm22604_vm0 = vcmask 1043456  }
 0x6c6   : > { %16529 = vmatmul.mubr.msk.f32.gmra.mrb[58].mxu0 %vm22589_vm3, %v11119_v32  ;;  %vm22605_vm3 = vmmov %vm22597_vm1 }
 0x6c7   : > { %16531 = vmatprep.mubr.msk.f32.mxu0 %vm22590_vm11, %v11120_v33  ;;  %vm22606_vm11 = vmmov %vm22604_vm0 }
 0x6ca   : > { %16532 = vmatmul.mubr.msk.f32.gmra.mrb[60].mxu0 %vm22591_vm6, %v11121_v42  ;;  %vm22607_vm6 = vmmov %vm22597_vm1 }
 0x6cb   : > { %16534 = vmatprep.mubr.msk.f32.mxu0 %vm22592_vm5, %v11122_v5  ;;  %vm22608_vm5 = vmmov %vm22597_vm1 }
 0x6ce   : > { %16535 = vmatmul.mubr.msk.f32.gmra.mrb[62].mxu0 %vm22593_vm15, %v11123_v35  ;;  %vm22609_vm15 = vmmov %vm22597_vm1 }
 0x6cf   : > { %16537 = vmatprep.mubr.msk.f32.mxu0 %vm22594_vm8, %v11124_v23  ;;  %vm22610_vm8 = vmmov %vm22597_vm1 }
 0x6d2   : > { %16538 = vmatmul.mubr.msk.f32.gmra.mrb[64].mxu0 %vm22595_vm10, %v11125_v13  ;;  %vm22611_vm10 = vmmov %vm22597_vm1 }
 0x6d3   : > { %16540 = vmatprep.mubr.msk.f32.mxu0 %vm22596_vm7, %v11126_v54  ;;  %vm22612_vm7 = vmmov %vm22597_vm1 }
 0x6d6   : > { %16541 = vmatmul.mubr.msk.f32.gmra.mrb[66].mxu0 %vm22597_vm1, %v11127_v16 }
 0x6d7   : > { %16543 = vmatprep.mubr.msk.f32.mxu0 %vm22598_vm12, %v11128_v20  ;;  %vm22613_vm12 = vmmov %vm22597_vm1 }
 0x6da   : > { %16544 = vmatmul.mubr.msk.f32.gmra.mrb[68].mxu0 %vm22599_vm13, %v11129_v24  ;;  %vm22614_vm13 = vmmov %vm22597_vm1 }
 0x6db   : > { %16546 = vmatprep.mubr.msk.f32.mxu0 %vm22600_vm4, %v11130_v46  ;;  %vm22615_vm4 = vmmov %vm22597_vm1 }
 0x6de   : > { %16547 = vmatmul.mubr.msk.f32.gmra.mrb[70].mxu0 %vm22601_vm2, %v11131_v40  ;;  %vm22616_vm2 = vmmov %vm22597_vm1 }
 0x6df   : > { %16551 = vmatprep.mubr.msk.f32.mxu0 %vm22602_vm9, %v21164_v14  ;;  %vm22617_vm9 = vmmov %vm22597_vm1  ;;  %v11983_v14 = vld [vmem:[#allocation3 + $0xfd] sm:$0xff] }
 0x6e2   : > { %16552 = vmatmul.mubr.msk.f32.vlgmr.msra.gmra.mrb[36].mxu0 %vm22603_vm14, %v21172_v61  ;;  %vm22618_vm14 = vmmov %vm22597_vm1  ;;  %v11984_v61 = vld [vmem:[#allocation3 + $0x105] sm:$0xff] }
 0x6e3   : > { %16606 = vmatpush3.msk.msra.mxu0 %vm22604_vm0, %v21161_v36  ;;  %16554 = vmatprep.mubr.msk.f32.mxu0 %vm22605_vm3, %v21176_v19  ;;  %vm22619_vm0 = vmmov %vm22597_vm1  ;;  %v11982_v36 = vld [vmem:[#allocation3 + $0xf5] sm:$0xff]  ;;  %v11985_v19 = vld [vmem:[#allocation3 + $0x10d] sm:$0xff] }
 0x6e4   : > { %16661 = vmatprep.subr.msk.mxu0 %vm22606_vm11, %v14164_v44  ;;  %vm22620_vm3 = vmmov %vm22619_vm0 }
 0x6e5   : > { %vm22621_vm11 = vmmov %vm22619_vm0 }
 0x6e6   : > { %16555 = vmatmul.mubr.msk.f32.gmra.mrb[38].mxu0 %vm22607_vm6, %v21180_v52  ;;  %vm22622_vm6 = vmmov %vm22619_vm0  ;;  %v11986_v52 = vld [vmem:[#allocation3 + $0x115] sm:$0xff] }
 0x6e7   : > { %16557 = vmatprep.mubr.msk.f32.mxu0 %vm22608_vm5, %v21184_v56  ;;  %vm22623_vm5 = vmmov %vm22619_vm0  ;;  %v11987_v56 = vld [vmem:[#allocation3 + $0x11d] sm:$0xff] }
 0x6ea   : > { %16558 = vmatmul.mubr.msk.f32.gmra.mrb[40].mxu0 %vm22609_vm15, %v21188_v37  ;;  %vm22624_vm15 = vmmov %vm22619_vm0  ;;  %v11988_v37 = vld [vmem:[#allocation3 + $0x125] sm:$0xff] }
 0x6eb   : > { %16560 = vmatprep.mubr.msk.f32.mxu0 %vm22610_vm8, %v21192_v51  ;;  %vm22625_vm8 = vmmov %vm22619_vm0  ;;  %v11990_v51 = vld [vmem:[#allocation3 + $0x135] sm:$0xff] }
 0x6ee   : > { %16561 = vmatmul.mubr.msk.f32.gmra.mrb[42].mxu0 %vm22611_vm10, %v21196_v62  ;;  %vm22626_vm10 = vmmov %vm22619_vm0  ;;  %v11989_v62 = vld [vmem:[#allocation3 + $0x12d] sm:$0xff] }
 0x6ef   : > { %16563 = vmatprep.mubr.msk.f32.mxu0 %vm22612_vm7, %v21200_v12  ;;  %vm22627_vm7 = vmmov %vm22619_vm0  ;;  %v11991_v12 = vld [vmem:[#allocation3 + $0x13d] sm:$0xff] }
 0x6f2   : > { %16564 = vmatmul.mubr.msk.f32.gmra.mrb[44].mxu0 %vm22597_vm1, %v11107_v7  ;;  %vm22628_vm1 = vmmov %vm22619_vm0  ;;  %v12386_v7 = vld [vmem:[#allocation3 + $0x26] sm:$0xff] }
 0x6f3   : > { %16566 = vmatprep.mubr.msk.f32.mxu0 %vm22613_vm12, %v11108_v10  ;;  %vm22629_vm12 = vmmov %vm22619_vm0  ;;  %v12387_v10 = vld [vmem:[#allocation3 + $0x2e] sm:$0xff] }
 0x6f6   : > { %16567 = vmatmul.mubr.msk.f32.gmra.mrb[46].mxu0 %vm22614_vm13, %v11109_v21  ;;  %vm22630_vm13 = vmmov %vm22619_vm0  ;;  %v12388_v21 = vld [vmem:[#allocation3 + $0x36] sm:$0xff] }
 0x6f7   : > { %16569 = vmatprep.mubr.msk.f32.mxu0 %vm22615_vm4, %v11110_v31  ;;  %vm22631_vm4 = vmmov %vm22619_vm0  ;;  %v12389_v31 = vld [vmem:[#allocation3 + $0x3e] sm:$0xff] }
 0x6fa   : > { %16570 = vmatmul.mubr.msk.f32.gmra.mrb[48].mxu0 %vm22616_vm2, %v11111_v27  ;;  %vm22632_vm2 = vmmov %vm22619_vm0  ;;  %v12390_v27 = vld [vmem:[#allocation3 + $0x46] sm:$0xff] }
 0x6fb   : > { %16572 = vmatprep.mubr.msk.f32.mxu0 %vm22617_vm9, %v11112_v15  ;;  %vm22633_vm9 = vmmov %vm22619_vm0  ;;  %v12391_v15 = vld [vmem:[#allocation3 + $0x4e] sm:$0xff] }
 0x6fe   : > { %16573 = vmatmul.mubr.msk.f32.gmra.mrb[50].mxu0 %vm22618_vm14, %v11113_v11  ;;  %vm22634_vm14 = vmmov %vm22619_vm0  ;;  %v12392_v11 = vld [vmem:[#allocation3 + $0x56] sm:$0xff] }
 0x6ff   : > { %16575 = vmatprep.mubr.msk.f32.mxu0 %vm22619_vm0, %v11114_v39  ;;  %v12393_v39 = vld [vmem:[#allocation3 + $0x5e] sm:$0xff] }
 0x702   : > { %16576 = vmatmul.mubr.msk.f32.gmra.mrb[52].mxu0 %vm22620_vm3, %v11115_v63  ;;  %vm22635_vm3 = vmmov %vm22619_vm0  ;;  %v12394_v63 = vld [vmem:[#allocation3 + $0x66] sm:$0xff] }
 0x703   : > { %16578 = vmatprep.mubr.msk.f32.mxu0 %vm22621_vm11, %v11116_v50  ;;  %vm22636_vm11 = vmmov %vm22619_vm0  ;;  %v12395_v50 = vld [vmem:[#allocation3 + $0x6e] sm:$0xff] }
 0x706   : > { %16579 = vmatmul.mubr.msk.f32.gmra.mrb[54].mxu0 %vm22622_vm6, %v11117_v60  ;;  %vm22637_vm6 = vmmov %vm22619_vm0  ;;  %v12396_v60 = vld [vmem:[#allocation3 + $0x76] sm:$0xff] }
 0x707   : > { %16581 = vmatprep.mubr.msk.f32.mxu0 %vm22623_vm5, %v11118_v49  ;;  %vm22638_vm5 = vmmov %vm22619_vm0  ;;  %v12397_v49 = vld [vmem:[#allocation3 + $0x7e] sm:$0xff] }
 0x70a   : > { %16582 = vmatmul.mubr.msk.f32.gmra.mrb[56].mxu0 %vm22624_vm15, %v11119_v32  ;;  %vm22639_vm15 = vmmov %vm22619_vm0  ;;  %v12398_v32 = vld [vmem:[#allocation3 + $0x86] sm:$0xff] }
 0x70b   : > { %16584 = vmatprep.mubr.msk.f32.mxu0 %vm22625_vm8, %v11120_v33  ;;  %vm22640_vm8 = vcmask 1043456   ;;  %v12399_v33 = vld [vmem:[#allocation3 + $0x8e] sm:$0xff] }
 0x70e   : > { %16585 = vmatmul.mubr.msk.f32.gmra.mrb[58].mxu0 %vm22626_vm10, %v11121_v42  ;;  %vm22641_vm10 = vmmov %vm22619_vm0  ;;  %v12400_v42 = vld [vmem:[#allocation3 + $0x96] sm:$0xff] }
 0x70f   : > { %16587 = vmatprep.mubr.msk.f32.mxu0 %vm22627_vm7, %v11122_v5  ;;  %vm22642_vm7 = vmmov %vm22619_vm0  ;;  %v12401_v5 = vld [vmem:[#allocation3 + $0x9e] sm:$0xff] }
 0x712   : > { %16588 = vmatmul.mubr.msk.f32.gmra.mrb[60].mxu0 %vm22628_vm1, %v11123_v35  ;;  %vm22643_vm1 = vmmov %vm22619_vm0  ;;  %v12402_v35 = vld [vmem:[#allocation3 + $0xa6] sm:$0xff] }
 0x713   : > { %16590 = vmatprep.mubr.msk.f32.mxu0 %vm22629_vm12, %v11124_v23  ;;  %vm22644_vm12 = vmmov %vm22619_vm0  ;;  %v12403_v23 = vld [vmem:[#allocation3 + $0xae] sm:$0xff] }
 0x716   : > { %16591 = vmatmul.mubr.msk.f32.gmra.mrb[62].mxu0 %vm22630_vm13, %v11125_v13  ;;  %vm22645_vm13 = vmmov %vm22619_vm0  ;;  %v12404_v13 = vld [vmem:[#allocation3 + $0xb6] sm:$0xff] }
 0x717   : > { %16593 = vmatprep.mubr.msk.f32.mxu0 %vm22631_vm4, %v11126_v54  ;;  %vm22646_vm4 = vmmov %vm22619_vm0  ;;  %v12405_v54 = vld [vmem:[#allocation3 + $0xbe] sm:$0xff] }
 0x71a   : > { %16594 = vmatmul.mubr.msk.f32.gmra.mrb[64].mxu0 %vm22632_vm2, %v11127_v16  ;;  %vm22647_vm2 = vmmov %vm22619_vm0  ;;  %v12406_v16 = vld [vmem:[#allocation3 + $0xc6] sm:$0xff] }
 0x71b   : > { %16596 = vmatprep.mubr.msk.f32.mxu0 %vm22633_vm9, %v11128_v20  ;;  %vm22648_vm9 = vmmov %vm22619_vm0  ;;  %v12407_v20 = vld [vmem:[#allocation3 + $0xce] sm:$0xff] }
 0x71e   : > { %16597 = vmatmul.mubr.msk.f32.gmra.mrb[66].mxu0 %vm22634_vm14, %v11129_v24  ;;  %vm22649_vm14 = vmmov %vm22619_vm0  ;;  %v12408_v24 = vld [vmem:[#allocation3 + $0xd6] sm:$0xff] }
 0x71f   : > { %16599 = vmatprep.mubr.msk.f32.mxu0 %vm22619_vm0, %v11130_v46  ;;  %v12409_v46 = vld [vmem:[#allocation3 + $0xde] sm:$0xff] }
 0x722   : > { %16600 = vmatmul.mubr.msk.f32.gmra.mrb[68].mxu0 %vm22635_vm3, %v11131_v40  ;;  %vm22650_vm3 = vmmov %vm22619_vm0  ;;  %v12410_v40 = vld [vmem:[#allocation3 + $0xe6] sm:$0xff] }
 0x723   : > { %16602 = vmatprep.mubr.msk.f32.mxu0 %vm22636_vm11, %v11560_v57  ;;  %vm22651_vm11 = vmmov %vm22619_vm0  ;;  %v12412_v57 = vld [vmem:[#allocation3 + $0xf6] sm:$0xff] }
 0x726   : > { %16603 = vmatmul.mubr.msk.f32.gmra.mrb[70].mxu0 %vm22637_vm6, %v11561_v45  ;;  %vm22652_vm6 = vmmov %vm22619_vm0  ;;  %v12413_v45 = vld [vmem:[#allocation3 + $0xfe] sm:$0xff] }
 0x727   : > { %16607 = vmatprep.mubr.msk.f32.mxu0 %vm22638_vm5, %v11956_v55  ;;  %vm22653_vm5 = vmmov %vm22619_vm0  ;;  %v12414_v55 = vld [vmem:[#allocation3 + $0x106] sm:$0xff] }
 0x72a   : > { %16608 = vmatmul.mubr.msk.f32.vlgmr.msra.gmra.mrb[36].mxu0 %vm22639_vm15, %v11957_v30  ;;  %vm22654_vm15 = vmmov %vm22619_vm0  ;;  %v12415_v30 = vld [vmem:[#allocation3 + $0x10e] sm:$0xff] }
 0x72b   : > { %16662 = vmatpush3.msk.msra.mxu0 %vm22640_vm8, %v14164_v44  ;;  %16610 = vmatprep.mubr.msk.f32.mxu0 %vm22641_vm10, %v11958_v28  ;;  %vm22655_vm8 = vmmov %vm22619_vm0  ;;  %v12411_v44 = vld [vmem:[#allocation3 + $0xee] sm:$0xff]  ;;  %v12416_v28 = vld [vmem:[#allocation3 + $0x116] sm:$0xff] }
 0x72c   : > { %vm22656_vm10 = vmmov %vm22619_vm0 }
 0x72e   : > { %16611 = vmatmul.mubr.msk.f32.gmra.mrb[38].mxu0 %vm22642_vm7, %v11959_v43  ;;  %vm22657_vm7 = vmmov %vm22619_vm0  ;;  %v12417_v43 = vld [vmem:[#allocation3 + $0x11e] sm:$0xff] }
 0x72f   : > { %16613 = vmatprep.mubr.msk.f32.mxu0 %vm22643_vm1, %v11960_v0  ;;  %vm22658_vm1 = vmmov %vm22619_vm0  ;;  %v12418_v0 = vld [vmem:[#allocation3 + $0x126] sm:$0xff] }
 0x732   : > { %16614 = vmatmul.mubr.msk.f32.gmra.mrb[40].mxu0 %vm22644_vm12, %v11961_v3  ;;  %vm22659_vm12 = vmmov %vm22619_vm0  ;;  %v12420_v3 = vld [vmem:[#allocation3 + $0x136] sm:$0xff] }
 0x733   : > { %16616 = vmatprep.mubr.msk.f32.mxu0 %vm22645_vm13, %v11962_v34  ;;  %vm22660_vm13 = vmmov %vm22619_vm0  ;;  %v12419_v34 = vld [vmem:[#allocation3 + $0x12e] sm:$0xff] }
 0x736   : > { %16617 = vmatmul.mubr.msk.f32.gmra.mrb[42].mxu0 %vm22646_vm4, %v11963_v22  ;;  %vm22661_vm4 = vmmov %vm22619_vm0  ;;  %v12421_v22 = vld [vmem:[#allocation3 + $0x13e] sm:$0xff] }
 0x737   : > { %16619 = vmatprep.mubr.msk.f32.mxu0 %vm22647_vm2, %v11964_v17  ;;  %vm22662_vm2 = vmmov %vm22619_vm0  ;;  %v21356_v17 = vld [vmem:[%s21513_s2 + $0x2] ss:$0 sm:$0xff] }
 0x73a   : > { %16620 = vmatmul.mubr.msk.f32.gmra.mrb[44].mxu0 %vm22648_vm9, %v11965_v2  ;;  %vm22663_vm9 = vmmov %vm22619_vm0 }
 0x73b   : > { %16622 = vmatprep.mubr.msk.f32.mxu0 %vm22649_vm14, %v11966_v38  ;;  %vm22664_vm14 = vmmov %vm22619_vm0 }
 0x73e   : > { %16623 = vmatmul.mubr.msk.f32.gmra.mrb[46].mxu0 %vm22619_vm0, %v11967_v9 }
 0x73f   : > { %16625 = vmatprep.mubr.msk.f32.mxu0 %vm22650_vm3, %v11968_v26  ;;  %vm22665_vm3 = vmmov %vm22619_vm0 }
 0x742   : > { %16626 = vmatmul.mubr.msk.f32.gmra.mrb[48].mxu0 %vm22651_vm11, %v11969_v4  ;;  %vm22666_vm11 = vmmov %vm22619_vm0 }
 0x743   : > { %16628 = vmatprep.mubr.msk.f32.mxu0 %vm22652_vm6, %v11970_v59  ;;  %vm22667_vm6 = vmmov %vm22619_vm0 }
 0x746   : > { %16629 = vmatmul.mubr.msk.f32.gmra.mrb[50].mxu0 %vm22653_vm5, %v11971_v1  ;;  %vm22668_vm5 = vmmov %vm22619_vm0 }
 0x747   : > { %16631 = vmatprep.mubr.msk.f32.mxu0 %vm22654_vm15, %v11972_v53  ;;  %vm22669_vm15 = vmmov %vm22619_vm0 }
 0x74a   : > { %16632 = vmatmul.mubr.msk.f32.gmra.mrb[52].mxu0 %vm22655_vm8, %v11973_v41  ;;  %vm22670_vm8 = vmmov %vm22619_vm0  ;;  %v12969_v41 = vld [vmem:[%s17732_s25 + $0x1b] sm:$0xff] }
 0x74b   : > { %16634 = vmatprep.mubr.msk.f32.mxu0 %vm22656_vm10, %v11974_v8  ;;  %vm22671_vm10 = vmmov %vm22619_vm0 }
 0x74e   : > { %16635 = vmatmul.mubr.msk.f32.gmra.mrb[54].mxu0 %vm22657_vm7, %v11975_v6  ;;  %vm22672_vm7 = vmmov %vm22619_vm0 }
 0x74f   : > { %16637 = vmatprep.mubr.msk.f32.mxu0 %vm22658_vm1, %v11976_v25  ;;  %vm22673_vm1 = vmmov %vm22619_vm0 }
 0x752   : > { %16638 = vmatmul.mubr.msk.f32.gmra.mrb[56].mxu0 %vm22659_vm12, %v11977_v18  ;;  %vm22674_vm12 = vmmov %vm22619_vm0 }
 0x753   : > { %16640 = vmatprep.mubr.msk.f32.mxu0 %vm22660_vm13, %v11978_v48  ;;  %vm22675_vm13 = vmmov %vm22619_vm0  ;;  %v12968_v48 = vld [vmem:[%s17732_s25 + $0x13] sm:$0xff] }
 0x756   : > { %16641 = vmatmul.mubr.msk.f32.gmra.mrb[58].mxu0 %vm22661_vm4, %v11979_v58  ;;  %vm22676_vm4 = vmmov %vm22619_vm0 }
 0x757   : > { %16643 = vmatprep.mubr.msk.f32.mxu0 %vm22662_vm2, %v11980_v47  ;;  %vm22677_vm2 = vmmov %vm22619_vm0 }
 0x75a   : > { %16644 = vmatmul.mubr.msk.f32.gmra.mrb[60].mxu0 %vm22663_vm9, %v11981_v29  ;;  %vm22678_vm9 = vmmov %vm22619_vm0 }
 0x75b   : > { %16646 = vmatprep.mubr.msk.f32.mxu0 %vm22664_vm14, %v11982_v36  ;;  %vm22679_vm14 = vmmov %vm22619_vm0 }
 0x75e   : > { %16647 = vmatmul.mubr.msk.f32.gmra.mrb[62].mxu0 %vm22619_vm0, %v11983_v14 }
 0x75f   : > { %16649 = vmatprep.mubr.msk.f32.mxu0 %vm22665_vm3, %v11984_v61  ;;  %vm22680_vm3 = vmmov %vm22619_vm0 }
 0x762   : > { %16650 = vmatmul.mubr.msk.f32.gmra.mrb[64].mxu0 %vm22666_vm11, %v11985_v19  ;;  %vm22681_vm11 = vmmov %vm22619_vm0 }
 0x763   : > { %16652 = vmatprep.mubr.msk.f32.mxu0 %vm22667_vm6, %v11986_v52  ;;  %vm22682_vm6 = vmmov %vm22619_vm0 }
 0x766   : > { %16653 = vmatmul.mubr.msk.f32.gmra.mrb[66].mxu0 %vm22668_vm5, %v11987_v56  ;;  %vm22683_vm5 = vmmov %vm22619_vm0  ;;  %v12971_v56 = vld [vmem:[%s17732_s25 + $0x2b] sm:$0xff] }
 0x767   : > { %16655 = vmatprep.mubr.msk.f32.mxu0 %vm22669_vm15, %v11988_v37  ;;  %vm22684_vm15 = vmmov %vm22619_vm0 }
 0x76a   : > { %16656 = vmatmul.mubr.msk.f32.gmra.mrb[68].mxu0 %vm22670_vm8, %v11989_v62  ;;  %vm22685_vm8 = vmmov %vm22619_vm0 }
 0x76b   : > { %16658 = vmatprep.mubr.msk.f32.mxu0 %vm22671_vm10, %v11990_v51  ;;  %vm22686_vm10 = vmmov %vm22619_vm0 }
 0x76e   : > { %16659 = vmatmul.mubr.msk.f32.gmra.mrb[70].mxu0 %vm22672_vm7, %v11991_v12  ;;  %vm22687_vm7 = vmmov %vm22619_vm0 }
 0x76f   : > { %16663 = vmatprep.mubr.msk.f32.mxu0 %vm22673_vm1, %v12386_v7  ;;  %vm22688_vm1 = vmmov %vm22619_vm0  ;;  %v12970_v7 = vld [vmem:[%s17732_s25 + $0x23] sm:$0xff] }
 0x772   : > { %16664 = vmatmul.mubr.msk.f32.vlgmr.msra.gmra.mrb[36].mxu0 %vm22674_vm12, %v12387_v10  ;;  %vm22689_vm12 = vmmov %vm22619_vm0 }
 0x773   : > { %16666 = vmatprep.mubr.msk.f32.mxu0 %vm22675_vm13, %v12388_v21  ;;  %vm22690_vm13 = vmmov %vm22619_vm0 }
 0x776   : > { %16667 = vmatmul.mubr.msk.f32.gmra.mrb[38].mxu0 %vm22676_vm4, %v12389_v31  ;;  %vm22691_vm4 = vmmov %vm22619_vm0 }
 0x777   : > { %16669 = vmatprep.mubr.msk.f32.mxu0 %vm22677_vm2, %v12390_v27  ;;  %vm22692_vm2 = vmmov %vm22619_vm0 }
 0x77a   : > { %16670 = vmatmul.mubr.msk.f32.gmra.mrb[40].mxu0 %vm22678_vm9, %v12391_v15  ;;  %vm22693_vm9 = vmmov %vm22619_vm0 }
 0x77b   : > { %16672 = vmatprep.mubr.msk.f32.mxu0 %vm22679_vm14, %v12392_v11  ;;  %vm22694_vm14 = vmmov %vm22619_vm0 }
 0x77e   : > { %16673 = vmatmul.mubr.msk.f32.gmra.mrb[42].mxu0 %vm22619_vm0, %v12393_v39 }
 0x77f   : > { %16675 = vmatprep.mubr.msk.f32.mxu0 %vm22680_vm3, %v12394_v63  ;;  %vm22695_vm3 = vmmov %vm22619_vm0 }
 0x782   : > { %16676 = vmatmul.mubr.msk.f32.gmra.mrb[44].mxu0 %vm22681_vm11, %v12395_v50  ;;  %vm22696_vm11 = vmmov %vm22619_vm0  ;;  %v12973_v50 = vld [vmem:[%s17732_s25 + $0x3b] sm:$0xff] }
 0x783   : > { %16678 = vmatprep.mubr.msk.f32.mxu0 %vm22682_vm6, %v12396_v60  ;;  %vm22697_vm6 = vmmov %vm22619_vm0 }
 0x786   : > { %16679 = vmatmul.mubr.msk.f32.gmra.mrb[46].mxu0 %vm22683_vm5, %v12397_v49  ;;  %vm22698_vm5 = vmmov %vm22619_vm0 }
 0x787   : > { %16681 = vmatprep.mubr.msk.f32.mxu0 %vm22684_vm15, %v12398_v32  ;;  %vm22699_vm15 = vmmov %vm22619_vm0 }
 0x78a   : > { %16682 = vmatmul.mubr.msk.f32.gmra.mrb[48].mxu0 %vm22685_vm8, %v12399_v33  ;;  %vm22700_vm8 = vmmov %vm22619_vm0 }
 0x78b   : > { %16684 = vmatprep.mubr.msk.f32.mxu0 %vm22686_vm10, %v12400_v42  ;;  %vm22701_vm10 = vmmov %vm22619_vm0  ;;  %v12972_v42 = vld [vmem:[%s17732_s25 + $0x33] sm:$0xff] }
 0x78e   : > { %16685 = vmatmul.mubr.msk.f32.gmra.mrb[50].mxu0 %vm22687_vm7, %v12401_v5  ;;  %vm22702_vm7 = vmmov %vm22619_vm0 }
 0x78f   : > { %16687 = vmatprep.mubr.msk.f32.mxu0 %vm22688_vm1, %v12402_v35  ;;  %vm22703_vm1 = vmmov %vm22619_vm0 }
 0x792   : > { %16688 = vmatmul.mubr.msk.f32.gmra.mrb[52].mxu0 %vm22689_vm12, %v12403_v23  ;;  %vm22704_vm12 = vmmov %vm22619_vm0 }
 0x793   : > { %16690 = vmatprep.mubr.msk.f32.mxu0 %vm22690_vm13, %v12404_v13  ;;  %vm22705_vm13 = vmmov %vm22619_vm0 }
 0x796   : > { %16691 = vmatmul.mubr.msk.f32.gmra.mrb[54].mxu0 %vm22691_vm4, %v12405_v54  ;;  %vm22706_vm4 = vmmov %vm22619_vm0 }
 0x797   : > { %16693 = vmatprep.mubr.msk.f32.mxu0 %vm22692_vm2, %v12406_v16 }
 0x79a   : > { %16694 = vmatmul.mubr.msk.f32.gmra.mrb[56].mxu0 %vm22693_vm9, %v12407_v20 }
 0x79b   : > { %16696 = vmatprep.mubr.msk.f32.mxu0 %vm22694_vm14, %v12408_v24 }
 0x79e   : > { %16697 = vmatmul.mubr.msk.f32.gmra.mrb[58].mxu0 %vm22619_vm0, %v12409_v46  ;;  %v12975_v46 = vld [vmem:[%s17732_s25 + $0x4b] sm:$0xff] }
 0x79f   : > { %16699 = vmatprep.mubr.msk.f32.mxu0 %vm22695_vm3, %v12410_v40  ;;  %vm22707_vm3 = vmmov %vm22703_vm1 }
 0x7a2   : > { %16700 = vmatmul.mubr.msk.f32.gmra.mrb[60].mxu0 %vm22696_vm11, %v12411_v44  ;;  %vm22708_vm11 = vmmov %vm22703_vm1 }
 0x7a3   : > { %16702 = vmatprep.mubr.msk.f32.mxu0 %vm22697_vm6, %v12412_v57 }
 0x7a6   : > { %16703 = vmatmul.mubr.msk.f32.gmra.mrb[62].mxu0 %vm22698_vm5, %v12413_v45 }
 0x7a7   : > { %16705 = vmatprep.mubr.msk.f32.mxu0 %vm22699_vm15, %v12414_v55  ;;  %vm22709_vm15 = vmmov %vm22703_vm1  ;;  %v12974_v55 = vld [vmem:[%s17732_s25 + $0x43] sm:$0xff] }
 0x7aa   : > { %16706 = vmatmul.mubr.msk.f32.gmra.mrb[64].mxu0 %vm22700_vm8, %v12415_v30  ;;  %vm22710_vm8 = vmmov %vm22703_vm1 }
 0x7ab   : > { %16708 = vmatprep.mubr.msk.f32.mxu0 %vm22701_vm10, %v12416_v28 }
 0x7ae   : > { %16709 = vmatmul.mubr.msk.f32.gmra.mrb[66].mxu0 %vm22702_vm7, %v12417_v43 }
 0x7af   : > { %16711 = vmatprep.mubr.msk.f32.mxu0 %vm22703_vm1, %v12418_v0 }
 0x7b2   : > { %16712 = vmatmul.mubr.msk.f32.gmra.mrb[68].mxu0 %vm22704_vm12, %v12419_v34  ;;  %vm22711_vm12 = vmmov %vm22703_vm1 }
 0x7b3   : > { %16714 = vmatprep.mubr.msk.f32.mxu0 %vm22705_vm13, %v12420_v3 }
 0x7b6   : > { %16715 = vmatmul.mubr.msk.f32.gmra.mrb[70].mxu0 %vm22706_vm4, %v12421_v22 }
 0x845   : > { %v16665_v2 = vpop.f32.mrb[36].mxu0 }
 0x846   : > { %v12825_v38 = vadd.f32 %v16665_v2, %v21356_v17  ;;  %v12601_v9 = vpop.f32.mrb[37].mxu0 }
 0x847   : > { %v12824_v26 = vadd.f32 %v21356_v17, %v12601_v9 }
 0x848   : > { %vm12861_vm2 = vcmp.ge.f32.partialorder %v12825_v38, 0.0  ;;  %v12897_v4 = vmul.f32 0.2, %v12825_v38 }
 0x849   : > { %vm12860_vm9 = vcmp.ge.f32.partialorder %v12824_v26, 0.0  ;;  %v12896_v59 = vmul.f32 0.2, %v12824_v26  ;;  %v16668_v1 = vpop.f32.mrb[38].mxu0 }
 0x84a   : > { %v12933_v53 = vsel %vm12861_vm2, %v12825_v38, %v12897_v4  ;;  %v12827_v8 = vadd.f32 %v16668_v1, %v21356_v17  ;;  %v12611_v6 = vpop.f32.mrb[39].mxu0  ;;  %v12977_v38 = vld [vmem:[%s17732_s25 + $0x5b] sm:$0xff]  ;;  %vm22712_vm2 = vmmov %vm22703_vm1  ;;  %v12976_v1 = vld [vmem:[%s17732_s25 + $0x53] sm:$0xff] }
 0x84b   : > { %v13005_v25 = vmul.f32 0.2, %v12933_v53  ;;  %v12932_v18 = vsel %vm12860_vm9, %v12824_v26, %v12896_v59  ;;  %v12826_v58 = vadd.f32 %v21356_v17, %v12611_v6  ;;  %vm22713_vm9 = vmmov %vm22703_vm1 }
 0x84c   : > { %v13004_v47 = vmul.f32 0.2, %v12932_v18  ;;  %vm12863_vm14 = vcmp.ge.f32.partialorder %v12827_v8, 0.0  ;;  %v12899_v29 = vmul.f32 0.2, %v12827_v8 }
 0x84d   : > { %v13041_v36 = vadd.f32 %v13005_v25, %v12969_v41  ;;  %vm12862_vm0 = vcmp.ge.f32.partialorder %v12826_v58, 0.0  ;;  %v12898_v14 = vmul.f32 0.2, %v12826_v58  ;;  %v16671_v61 = vpop.f32.mrb[40].mxu0 }
 0x84e   : > { %v13040_v19 = vadd.f32 %v13004_v47, %v12968_v48  ;;  %v12935_v52 = vsel %vm12863_vm14, %v12827_v8, %v12899_v29  ;;  %v12829_v37 = vadd.f32 %v16671_v61, %v21356_v17  ;;  %v12621_v51 = vpop.f32.mrb[41].mxu0  ;;  %v12979_v47 = vld [vmem:[%s17732_s25 + $0x6b] sm:$0xff] }
 0x84f   : > { %13077 = vst.msk [vmem:[%s21368_s13 + $0x8] sm:$0xff] %vm22707_vm3, %v13041_v36  ;;  %v13007_v62 = vmul.f32 0.2, %v12935_v52  ;;  %v12934_v12 = vsel %vm12862_vm0, %v12826_v58, %v12898_v14  ;;  %v12828_v10 = vadd.f32 %v21356_v17, %v12621_v51  ;;  %vm22714_vm3 = vmmov %vm22703_vm1 }
 0x850   : > { %13076 = vst.msk [vmem:[%s21368_s13] sm:$0xff] %vm22708_vm11, %v13040_v19  ;;  %v13006_v21 = vmul.f32 0.2, %v12934_v12  ;;  %vm12865_vm6 = vcmp.ge.f32.partialorder %v12829_v37, 0.0  ;;  %v12901_v31 = vmul.f32 0.2, %v12829_v37  ;;  %vm22715_vm11 = vmmov %vm22703_vm1 }
 0x851   : > { %v13043_v27 = vadd.f32 %v13007_v62, %v12971_v56  ;;  %vm12864_vm5 = vcmp.ge.f32.partialorder %v12828_v10, 0.0  ;;  %v12900_v15 = vmul.f32 0.2, %v12828_v10  ;;  %v16674_v11 = vpop.f32.mrb[42].mxu0  ;;  %v12978_v19 = vld [vmem:[%s17732_s25 + $0x63] sm:$0xff] }
 0x852   : > { %v13042_v39 = vadd.f32 %v13006_v21, %v12970_v7  ;;  %v12937_v63 = vsel %vm12865_vm6, %v12829_v37, %v12901_v31  ;;  %v12831_v60 = vadd.f32 %v16674_v11, %v21356_v17  ;;  %v12631_v49 = vpop.f32.mrb[43].mxu0  ;;  %v12981_v21 = vld [vmem:[%s17732_s25 + $0x7b] sm:$0xff] }
 0x853   : > { %13079 = vst.msk [vmem:[%s21368_s13 + $0x18] sm:$0xff] %vm22709_vm15, %v13043_v27  ;;  %v13009_v32 = vmul.f32 0.2, %v12937_v63  ;;  %v12936_v33 = vsel %vm12864_vm5, %v12828_v10, %v12900_v15  ;;  %v12830_v5 = vadd.f32 %v21356_v17, %v12631_v49  ;;  %vm22716_vm15 = vmmov %vm22703_vm1 }
 0x854   : > { %13078 = vst.msk [vmem:[%s21368_s13 + $0x10] sm:$0xff] %vm22710_vm8, %v13042_v39  ;;  %v13008_v35 = vmul.f32 0.2, %v12936_v33  ;;  %vm12867_vm10 = vcmp.ge.f32.partialorder %v12831_v60, 0.0  ;;  %v12903_v23 = vmul.f32 0.2, %v12831_v60  ;;  %vm22717_vm8 = vmmov %vm22703_vm1 }
 0x855   : > { %v13045_v13 = vadd.f32 %v13009_v32, %v12973_v50  ;;  %vm12866_vm7 = vcmp.ge.f32.partialorder %v12830_v5, 0.0  ;;  %v12902_v54 = vmul.f32 0.2, %v12830_v5  ;;  %v16677_v16 = vpop.f32.mrb[44].mxu0  ;;  %v12980_v39 = vld [vmem:[%s17732_s25 + $0x73] sm:$0xff] }
 0x856   : > { %v13044_v20 = vadd.f32 %v13008_v35, %v12972_v42  ;;  %v12939_v24 = vsel %vm12867_vm10, %v12831_v60, %v12903_v23  ;;  %v12833_v40 = vadd.f32 %v16677_v16, %v21356_v17  ;;  %v12641_v44 = vpop.f32.mrb[45].mxu0  ;;  %v12983_v35 = vld [vmem:[%s17732_s25 + $0x8b] sm:$0xff] }
 0x857   : > { %13081 = vst.msk [vmem:[%s21368_s13 + $0x28] sm:$0xff] %vm22703_vm1, %v13045_v13  ;;  %v13011_v57 = vmul.f32 0.2, %v12939_v24  ;;  %v12938_v45 = vsel %vm12866_vm7, %v12830_v5, %v12902_v54  ;;  %v12832_v30 = vadd.f32 %v21356_v17, %v12641_v44 }
 0x858   : > { %13080 = vst.msk [vmem:[%s21368_s13 + $0x20] sm:$0xff] %vm22711_vm12, %v13044_v20  ;;  %v13010_v28 = vmul.f32 0.2, %v12938_v45  ;;  %vm12869_vm13 = vcmp.ge.f32.partialorder %v12833_v40, 0.0  ;;  %v12905_v43 = vmul.f32 0.2, %v12833_v40  ;;  %vm22718_vm12 = vmmov %vm22703_vm1 }
 0x859   : > { %v13047_v0 = vadd.f32 %v13011_v57, %v12975_v46  ;;  %vm12868_vm4 = vcmp.ge.f32.partialorder %v12832_v30, 0.0  ;;  %v12904_v3 = vmul.f32 0.2, %v12832_v30  ;;  %v16680_v34 = vpop.f32.mrb[46].mxu0  ;;  %v12982_v20 = vld [vmem:[%s17732_s25 + $0x83] sm:$0xff] }
 0x85a   : > { %v13046_v22 = vadd.f32 %v13010_v28, %v12974_v55  ;;  %v12941_v2 = vsel %vm12869_vm13, %v12833_v40, %v12905_v43  ;;  %v12835_v9 = vadd.f32 %v16680_v34, %v21356_v17  ;;  %v12651_v26 = vpop.f32.mrb[47].mxu0  ;;  %v12985_v28 = vld [vmem:[%s17732_s25 + $0x9b] sm:$0xff] }
 0x85b   : > { %13083 = vst.msk [vmem:[%s21368_s13 + $0x38] sm:$0xff] %vm22712_vm2, %v13047_v0  ;;  %v13013_v4 = vmul.f32 0.2, %v12941_v2  ;;  %v12940_v59 = vsel %vm12868_vm4, %v12832_v30, %v12904_v3  ;;  %v12834_v53 = vadd.f32 %v21356_v17, %v12651_v26  ;;  %vm22719_vm2 = vmmov %vm22703_vm1 }
 0x85c   : > { %13082 = vst.msk [vmem:[%s21368_s13 + $0x30] sm:$0xff] %vm22713_vm9, %v13046_v22  ;;  %v13012_v41 = vmul.f32 0.2, %v12940_v59  ;;  %vm12871_vm14 = vcmp.ge.f32.partialorder %v12835_v9, 0.0  ;;  %v12907_v8 = vmul.f32 0.2, %v12835_v9  ;;  %vm22720_vm9 = vmmov %vm22703_vm1 }
 0x85d   : > { %v13049_v6 = vadd.f32 %v13013_v4, %v12977_v38  ;;  %vm12870_vm0 = vcmp.ge.f32.partialorder %v12834_v53, 0.0  ;;  %v12906_v25 = vmul.f32 0.2, %v12834_v53  ;;  %v16683_v18 = vpop.f32.mrb[48].mxu0  ;;  %v12984_v22 = vld [vmem:[%s17732_s25 + $0x93] sm:$0xff] }
 0x85e   : > { %v13048_v48 = vadd.f32 %v13012_v41, %v12976_v1  ;;  %v12943_v58 = vsel %vm12871_vm14, %v12835_v9, %v12907_v8  ;;  %v12837_v29 = vadd.f32 %v16683_v18, %v21356_v17  ;;  %v12661_v36 = vpop.f32.mrb[49].mxu0  ;;  %v12987_v41 = vld [vmem:[%s17732_s25 + $0xab] sm:$0xff] }
 0x85f   : > { %13085 = vst.msk [vmem:[%s21368_s13 + $0x48] sm:$0xff] %vm22714_vm3, %v13049_v6  ;;  %v13015_v14 = vmul.f32 0.2, %v12943_v58  ;;  %v12942_v61 = vsel %vm12870_vm0, %v12834_v53, %v12906_v25  ;;  %v12836_v52 = vadd.f32 %v21356_v17, %v12661_v36  ;;  %vm22721_vm3 = vmmov %vm22703_vm1 }
 0x860   : > { %13084 = vst.msk [vmem:[%s21368_s13 + $0x40] sm:$0xff] %vm22715_vm11, %v13048_v48  ;;  %v13014_v56 = vmul.f32 0.2, %v12942_v61  ;;  %vm12873_vm6 = vcmp.ge.f32.partialorder %v12837_v29, 0.0  ;;  %v12909_v37 = vmul.f32 0.2, %v12837_v29  ;;  %vm22722_vm11 = vmmov %vm22703_vm1 }
 0x861   : > { %v13051_v51 = vadd.f32 %v13015_v14, %v12979_v47  ;;  %vm12872_vm5 = vcmp.ge.f32.partialorder %v12836_v52, 0.0  ;;  %v12908_v62 = vmul.f32 0.2, %v12836_v52  ;;  %v16686_v12 = vpop.f32.mrb[50].mxu0  ;;  %v12986_v48 = vld [vmem:[%s17732_s25 + $0xa3] sm:$0xff] }
 0x862   : > { %v13050_v7 = vadd.f32 %v13014_v56, %v12978_v19  ;;  %v12945_v10 = vsel %vm12873_vm6, %v12837_v29, %v12909_v37  ;;  %v12839_v31 = vadd.f32 %v16686_v12, %v21356_v17  ;;  %v12671_v27 = vpop.f32.mrb[51].mxu0  ;;  %v12989_v56 = vld [vmem:[%s17732_s25 + $0xbb] sm:$0xff] }
 0x863   : > { %13087 = vst.msk [vmem:[%s21368_s13 + $0x58] sm:$0xff] %vm22716_vm15, %v13051_v51  ;;  %v13017_v15 = vmul.f32 0.2, %v12945_v10  ;;  %v12944_v11 = vsel %vm12872_vm5, %v12836_v52, %v12908_v62  ;;  %v12838_v63 = vadd.f32 %v21356_v17, %v12671_v27  ;;  %vm22723_vm15 = vmmov %vm22703_vm1 }
 0x864   : > { %13086 = vst.msk [vmem:[%s21368_s13 + $0x50] sm:$0xff] %vm22717_vm8, %v13050_v7  ;;  %v13016_v50 = vmul.f32 0.2, %v12944_v11  ;;  %vm12875_vm10 = vcmp.ge.f32.partialorder %v12839_v31, 0.0  ;;  %v12911_v60 = vmul.f32 0.2, %v12839_v31  ;;  %vm22724_vm8 = vmmov %vm22703_vm1 }
 0x865   : > { %v13053_v49 = vadd.f32 %v13017_v15, %v12981_v21  ;;  %vm12874_vm7 = vcmp.ge.f32.partialorder %v12838_v63, 0.0  ;;  %v12910_v32 = vmul.f32 0.2, %v12838_v63  ;;  %v16689_v33 = vpop.f32.mrb[52].mxu0  ;;  %v12988_v7 = vld [vmem:[%s17732_s25 + $0xb3] sm:$0xff] }
 0x866   : > { %v13052_v42 = vadd.f32 %v13016_v50, %v12980_v39  ;;  %v12947_v5 = vsel %vm12875_vm10, %v12839_v31, %v12911_v60  ;;  %v12841_v23 = vadd.f32 %v16689_v33, %v21356_v17  ;;  %v12681_v13 = vpop.f32.mrb[53].mxu0  ;;  %v12991_v50 = vld [vmem:[%s17732_s25 + $0xcb] sm:$0xff] }
 0x867   : > { %13089 = vst.msk [vmem:[%s21368_s13 + $0x68] sm:$0xff] %vm22703_vm1, %v13053_v49  ;;  %v13019_v54 = vmul.f32 0.2, %v12947_v5  ;;  %v12946_v16 = vsel %vm12874_vm7, %v12838_v63, %v12910_v32  ;;  %v12840_v24 = vadd.f32 %v21356_v17, %v12681_v13 }
 0x868   : > { %13088 = vst.msk [vmem:[%s21368_s13 + $0x60] sm:$0xff] %vm22718_vm12, %v13052_v42  ;;  %v13018_v46 = vmul.f32 0.2, %v12946_v16  ;;  %vm12877_vm13 = vcmp.ge.f32.partialorder %v12841_v23, 0.0  ;;  %v12913_v40 = vmul.f32 0.2, %v12841_v23  ;;  %vm22725_vm12 = vmmov %vm22703_vm1 }
 0x869   : > { %v13055_v44 = vadd.f32 %v13019_v54, %v12983_v35  ;;  %vm12876_vm4 = vcmp.ge.f32.partialorder %v12840_v24, 0.0  ;;  %v12912_v57 = vmul.f32 0.2, %v12840_v24  ;;  %v16692_v45 = vpop.f32.mrb[54].mxu0  ;;  %v12990_v42 = vld [vmem:[%s17732_s25 + $0xc3] sm:$0xff] }
 0x86a   : > { %v13054_v55 = vadd.f32 %v13018_v46, %v12982_v20  ;;  %v12949_v30 = vsel %vm12877_vm13, %v12841_v23, %v12913_v40  ;;  %v12843_v43 = vadd.f32 %v16692_v45, %v21356_v17  ;;  %v12691_v0 = vpop.f32.mrb[55].mxu0  ;;  %v12993_v46 = vld [vmem:[%s17732_s25 + $0xdb] sm:$0xff] }
 0x86b   : > { %13091 = vst.msk [vmem:[%s21368_s13 + $0x78] sm:$0xff] %vm22719_vm2, %v13055_v44  ;;  %v13021_v3 = vmul.f32 0.2, %v12949_v30  ;;  %v12948_v34 = vsel %vm12876_vm4, %v12840_v24, %v12912_v57  ;;  %v12842_v2 = vadd.f32 %v21356_v17, %v12691_v0  ;;  %vm22726_vm2 = vmmov %vm22703_vm1 }
 0x86c   : > { %13090 = vst.msk [vmem:[%s21368_s13 + $0x70] sm:$0xff] %vm22720_vm9, %v13054_v55  ;;  %v13020_v38 = vmul.f32 0.2, %v12948_v34  ;;  %vm12879_vm14 = vcmp.ge.f32.partialorder %v12843_v43, 0.0  ;;  %v12915_v9 = vmul.f32 0.2, %v12843_v43  ;;  %vm22727_vm9 = vmmov %vm22703_vm1 }
 0x86d   : > { %v13057_v26 = vadd.f32 %v13021_v3, %v12985_v28  ;;  %vm12878_vm0 = vcmp.ge.f32.partialorder %v12842_v2, 0.0  ;;  %v12914_v4 = vmul.f32 0.2, %v12842_v2  ;;  %v16695_v59 = vpop.f32.mrb[56].mxu0  ;;  %v12992_v55 = vld [vmem:[%s17732_s25 + $0xd3] sm:$0xff] }
 0x86e   : > { %v13056_v1 = vadd.f32 %v13020_v38, %v12984_v22  ;;  %v12951_v53 = vsel %vm12879_vm14, %v12843_v43, %v12915_v9  ;;  %v12845_v8 = vadd.f32 %v16695_v59, %v21356_v17  ;;  %v12701_v6 = vpop.f32.mrb[57].mxu0  ;;  %v12995_v38 = vld [vmem:[%s17732_s25 + $0xeb] sm:$0xff] }
 0x86f   : > { %13093 = vst.msk [vmem:[%s21368_s13 + $0x88] sm:$0xff] %vm22721_vm3, %v13057_v26  ;;  %v13023_v25 = vmul.f32 0.2, %v12951_v53  ;;  %v12950_v18 = vsel %vm12878_vm0, %v12842_v2, %v12914_v4  ;;  %v12844_v58 = vadd.f32 %v21356_v17, %v12701_v6  ;;  %vm22728_vm3 = vmmov %vm22703_vm1 }
 0x870   : > { %13092 = vst.msk [vmem:[%s21368_s13 + $0x80] sm:$0xff] %vm22722_vm11, %v13056_v1  ;;  %v13022_v47 = vmul.f32 0.2, %v12950_v18  ;;  %vm12881_vm6 = vcmp.ge.f32.partialorder %v12845_v8, 0.0  ;;  %v12917_v29 = vmul.f32 0.2, %v12845_v8  ;;  %vm22729_vm11 = vmmov %vm22703_vm1 }
 0x871   : > { %v13059_v36 = vadd.f32 %v13023_v25, %v12987_v41  ;;  %vm12880_vm5 = vcmp.ge.f32.partialorder %v12844_v58, 0.0  ;;  %v12916_v14 = vmul.f32 0.2, %v12844_v58  ;;  %v16698_v61 = vpop.f32.mrb[58].mxu0  ;;  %v12994_v1 = vld [vmem:[%s17732_s25 + $0xe3] sm:$0xff] }
 0x872   : > { %v13058_v19 = vadd.f32 %v13022_v47, %v12986_v48  ;;  %v12953_v52 = vsel %vm12881_vm6, %v12845_v8, %v12917_v29  ;;  %v12847_v37 = vadd.f32 %v16698_v61, %v21356_v17  ;;  %v12711_v51 = vpop.f32.mrb[59].mxu0  ;;  %v12997_v47 = vld [vmem:[%s17732_s25 + $0xfb] sm:$0xff] }
 0x873   : > { %13095 = vst.msk [vmem:[%s21368_s13 + $0x98] sm:$0xff] %vm22723_vm15, %v13059_v36  ;;  %v13025_v62 = vmul.f32 0.2, %v12953_v52  ;;  %v12952_v12 = vsel %vm12880_vm5, %v12844_v58, %v12916_v14  ;;  %v12846_v10 = vadd.f32 %v21356_v17, %v12711_v51  ;;  %vm22730_vm15 = vmmov %vm22703_vm1 }
 0x874   : > { %13094 = vst.msk [vmem:[%s21368_s13 + $0x90] sm:$0xff] %vm22724_vm8, %v13058_v19  ;;  %v13024_v21 = vmul.f32 0.2, %v12952_v12  ;;  %vm12883_vm10 = vcmp.ge.f32.partialorder %v12847_v37, 0.0  ;;  %v12919_v31 = vmul.f32 0.2, %v12847_v37  ;;  %vm22731_vm8 = vmmov %vm22703_vm1 }
 0x875   : > { %v13061_v27 = vadd.f32 %v13025_v62, %v12989_v56  ;;  %vm12882_vm7 = vcmp.ge.f32.partialorder %v12846_v10, 0.0  ;;  %v12918_v15 = vmul.f32 0.2, %v12846_v10  ;;  %v16701_v11 = vpop.f32.mrb[60].mxu0  ;;  %v12996_v19 = vld [vmem:[%s17732_s25 + $0xf3] sm:$0xff] }
 0x876   : > { %v13060_v39 = vadd.f32 %v13024_v21, %v12988_v7  ;;  %v12955_v63 = vsel %vm12883_vm10, %v12847_v37, %v12919_v31  ;;  %v12849_v60 = vadd.f32 %v16701_v11, %v21356_v17  ;;  %v12721_v49 = vpop.f32.mrb[61].mxu0  ;;  %v12999_v21 = vld [vmem:[%s17732_s25 + $0x10b] sm:$0xff] }
 0x877   : > { %13097 = vst.msk [vmem:[%s21368_s13 + $0xa8] sm:$0xff] %vm22703_vm1, %v13061_v27  ;;  %v13027_v32 = vmul.f32 0.2, %v12955_v63  ;;  %v12954_v33 = vsel %vm12882_vm7, %v12846_v10, %v12918_v15  ;;  %v12848_v5 = vadd.f32 %v21356_v17, %v12721_v49 }
 0x878   : > { %13096 = vst.msk [vmem:[%s21368_s13 + $0xa0] sm:$0xff] %vm22725_vm12, %v13060_v39  ;;  %v13026_v35 = vmul.f32 0.2, %v12954_v33  ;;  %vm12885_vm13 = vcmp.ge.f32.partialorder %v12849_v60, 0.0  ;;  %v12921_v23 = vmul.f32 0.2, %v12849_v60  ;;  %vm22732_vm12 = vmmov %vm22703_vm1 }
 0x879   : > { %v13063_v13 = vadd.f32 %v13027_v32, %v12991_v50  ;;  %vm12884_vm4 = vcmp.ge.f32.partialorder %v12848_v5, 0.0  ;;  %v12920_v54 = vmul.f32 0.2, %v12848_v5  ;;  %v16704_v16 = vpop.f32.mrb[62].mxu0  ;;  %v12998_v39 = vld [vmem:[%s17732_s25 + $0x103] sm:$0xff] }
 0x87a   : > { %v13062_v20 = vadd.f32 %v13026_v35, %v12990_v42  ;;  %v12957_v24 = vsel %vm12885_vm13, %v12849_v60, %v12921_v23  ;;  %v12851_v40 = vadd.f32 %v16704_v16, %v21356_v17  ;;  %v12731_v44 = vpop.f32.mrb[63].mxu0  ;;  %v13001_v35 = vld [vmem:[%s17732_s25 + $0x11b] sm:$0xff] }
 0x87b   : > { %13099 = vst.msk [vmem:[%s21368_s13 + $0xb8] sm:$0xff] %vm22726_vm2, %v13063_v13  ;;  %v13029_v57 = vmul.f32 0.2, %v12957_v24  ;;  %v12956_v45 = vsel %vm12884_vm4, %v12848_v5, %v12920_v54  ;;  %v12850_v30 = vadd.f32 %v21356_v17, %v12731_v44  ;;  %vm22733_vm2 = vmmov %vm22703_vm1 }
 0x87c   : > { %13098 = vst.msk [vmem:[%s21368_s13 + $0xb0] sm:$0xff] %vm22727_vm9, %v13062_v20  ;;  %v13028_v28 = vmul.f32 0.2, %v12956_v45  ;;  %vm12887_vm14 = vcmp.ge.f32.partialorder %v12851_v40, 0.0  ;;  %v12923_v43 = vmul.f32 0.2, %v12851_v40  ;;  %vm22734_vm9 = vmmov %vm22703_vm1 }
 0x87d   : > { %v13065_v0 = vadd.f32 %v13029_v57, %v12993_v46  ;;  %vm12886_vm0 = vcmp.ge.f32.partialorder %v12850_v30, 0.0  ;;  %v12922_v3 = vmul.f32 0.2, %v12850_v30  ;;  %v16707_v34 = vpop.f32.mrb[64].mxu0  ;;  %v13000_v20 = vld [vmem:[%s17732_s25 + $0x113] sm:$0xff] }
 0x87e   : > { %v13064_v22 = vadd.f32 %v13028_v28, %v12992_v55  ;;  %v12959_v2 = vsel %vm12887_vm14, %v12851_v40, %v12923_v43  ;;  %v12853_v9 = vadd.f32 %v16707_v34, %v21356_v17  ;;  %v12741_v26 = vpop.f32.mrb[65].mxu0 }
 0x87f   : > { %13101 = vst.msk [vmem:[%s21368_s13 + $0xc8] sm:$0xff] %vm22728_vm3, %v13065_v0  ;;  %v13031_v4 = vmul.f32 0.2, %v12959_v2  ;;  %v12958_v59 = vsel %vm12886_vm0, %v12850_v30, %v12922_v3  ;;  %v12852_v53 = vadd.f32 %v21356_v17, %v12741_v26  ;;  %v13003_v30 = vld [vmem:[%s17732_s25 + $0x12b] sm:$0xff]  ;;  %vm22735_vm3 = vmmov %vm22703_vm1  ;;  %v13002_v0 = vld [vmem:[%s17732_s25 + $0x123] sm:$0xff] }
 0x880   : > { %13100 = vst.msk [vmem:[%s21368_s13 + $0xc0] sm:$0xff] %vm22729_vm11, %v13064_v22  ;;  %v13030_v41 = vmul.f32 0.2, %v12958_v59  ;;  %vm12889_vm6 = vcmp.ge.f32.partialorder %v12853_v9, 0.0  ;;  %v12925_v8 = vmul.f32 0.2, %v12853_v9  ;;  %vm22736_vm11 = vmmov %vm22703_vm1 }
 0x881   : > { %v13067_v6 = vadd.f32 %v13031_v4, %v12995_v38  ;;  %vm12888_vm5 = vcmp.ge.f32.partialorder %v12852_v53, 0.0  ;;  %v12924_v25 = vmul.f32 0.2, %v12852_v53  ;;  %v16710_v18 = vpop.f32.mrb[66].mxu0 }
 0x882   : > { %v13066_v48 = vadd.f32 %v13030_v41, %v12994_v1  ;;  %v12961_v58 = vsel %vm12889_vm6, %v12853_v9, %v12925_v8  ;;  %v12855_v29 = vadd.f32 %v16710_v18, %v21356_v17  ;;  %v12751_v36 = vpop.f32.mrb[67].mxu0  ;;  %vm22737_vm6 = vmmov %vm22703_vm1 }
 0x883   : > { %13103 = vst.msk [vmem:[%s21368_s13 + $0xd8] sm:$0xff] %vm22730_vm15, %v13067_v6  ;;  %v13033_v14 = vmul.f32 0.2, %v12961_v58  ;;  %v12960_v61 = vsel %vm12888_vm5, %v12852_v53, %v12924_v25  ;;  %v12854_v52 = vadd.f32 %v21356_v17, %v12751_v36  ;;  %vm22738_vm5 = vmmov %vm22703_vm1 }
 0x884   : > { %13102 = vst.msk [vmem:[%s21368_s13 + $0xd0] sm:$0xff] %vm22731_vm8, %v13066_v48  ;;  %v13032_v56 = vmul.f32 0.2, %v12960_v61  ;;  %vm12891_vm10 = vcmp.ge.f32.partialorder %v12855_v29, 0.0  ;;  %v12927_v37 = vmul.f32 0.2, %v12855_v29 }
 0x885   : > { %v13069_v51 = vadd.f32 %v13033_v14, %v12997_v47  ;;  %vm12890_vm7 = vcmp.ge.f32.partialorder %v12854_v52, 0.0  ;;  %v12926_v62 = vmul.f32 0.2, %v12854_v52  ;;  %v16713_v12 = vpop.f32.mrb[68].mxu0 }
 0x886   : > { %v13068_v7 = vadd.f32 %v13032_v56, %v12996_v19  ;;  %v12963_v10 = vsel %vm12891_vm10, %v12855_v29, %v12927_v37  ;;  %v12857_v31 = vadd.f32 %v16713_v12, %v21356_v17  ;;  %v12761_v27 = vpop.f32.mrb[69].mxu0 }
 0x887   : > { %13105 = vst.msk [vmem:[%s21368_s13 + $0xe8] sm:$0xff] %vm22703_vm1, %v13069_v51  ;;  %v13035_v15 = vmul.f32 0.2, %v12963_v10  ;;  %v12962_v11 = vsel %vm12890_vm7, %v12854_v52, %v12926_v62  ;;  %v12856_v63 = vadd.f32 %v21356_v17, %v12761_v27 }
 0x888   : > { %13104 = vst.msk [vmem:[%s21368_s13 + $0xe0] sm:$0xff] %vm22732_vm12, %v13068_v7  ;;  %v13034_v50 = vmul.f32 0.2, %v12962_v11  ;;  %vm12893_vm13 = vcmp.ge.f32.partialorder %v12857_v31, 0.0  ;;  %v12929_v60 = vmul.f32 0.2, %v12857_v31 }
 0x889   : > { %v13071_v49 = vadd.f32 %v13035_v15, %v12999_v21  ;;  %vm12892_vm4 = vcmp.ge.f32.partialorder %v12856_v63, 0.0  ;;  %v12928_v32 = vmul.f32 0.2, %v12856_v63  ;;  %v16716_v33 = vpop.f32.mrb[70].mxu0 }
 0x88a   : > { %v13070_v42 = vadd.f32 %v13034_v50, %v12998_v39  ;;  %v12965_v5 = vsel %vm12893_vm13, %v12857_v31, %v12929_v60  ;;  %v12859_v23 = vadd.f32 %v16716_v33, %v21356_v17  ;;  %v12771_v13 = vpop.f32.mrb[71].mxu0 }
 0x88b   : > { %13107 = vst.msk [vmem:[%s21368_s13 + $0xf8] sm:$0xff] %vm22733_vm2, %v13071_v49  ;;  %v13037_v54 = vmul.f32 0.2, %v12965_v5  ;;  %v12964_v16 = vsel %vm12892_vm4, %v12856_v63, %v12928_v32  ;;  %v12858_v24 = vadd.f32 %v21356_v17, %v12771_v13 }
 0x88c   : > { %13106 = vst.msk [vmem:[%s21368_s13 + $0xf0] sm:$0xff] %vm22734_vm9, %v13070_v42  ;;  %v13036_v46 = vmul.f32 0.2, %v12964_v16  ;;  %vm12895_vm14 = vcmp.ge.f32.partialorder %v12859_v23, 0.0  ;;  %v12931_v40 = vmul.f32 0.2, %v12859_v23 }
 0x88d   : > { %v13073_v44 = vadd.f32 %v13037_v54, %v13001_v35  ;;  %vm12894_vm0 = vcmp.ge.f32.partialorder %v12858_v24, 0.0  ;;  %v12930_v57 = vmul.f32 0.2, %v12858_v24 }
 0x88e   : > { %v13072_v45 = vadd.f32 %v13036_v46, %v13000_v20  ;;  %v12967_v55 = vsel %vm12895_vm14, %v12859_v23, %v12931_v40 }
 0x88f   : > { %13109 = vst.msk [vmem:[%s21368_s13 + $0x108] sm:$0xff] %vm22735_vm3, %v13073_v44  ;;  %v13039_v28 = vmul.f32 0.2, %v12967_v55  ;;  %v12966_v43 = vsel %vm12894_vm0, %v12858_v24, %v12930_v57 }
 0x890   : > { %13108 = vst.msk [vmem:[%s21368_s13 + $0x100] sm:$0xff] %vm22736_vm11, %v13072_v45  ;;  %v13038_v17 = vmul.f32 0.2, %v12966_v43 }
 0x891   : > { %v13075_v3 = vadd.f32 %v13039_v28, %v13003_v30 }
 0x892   : > { %v13074_v34 = vadd.f32 %v13038_v17, %v13002_v0 }
 0x893   : > { %13111 = vst.msk [vmem:[%s21368_s13 + $0x118] sm:$0xff] %vm22737_vm6, %v13075_v3 }
 0x894   : > { %13110 = vst.msk [vmem:[%s21368_s13 + $0x110] sm:$0xff] %vm22738_vm5, %v13074_v34 }
 0x895 PF: > { %s13_s12 = sadd.s32 1, %s17673_s12  }
 0x896   : > { %p10_p4 = scmp.ge.s32.totalorder %s13_s12, 4  }
 0x898   :  { %12 = sbr.rel (!%p10_p4) target bundleno = 1 (0x1), region = 90 }

</bundles_post_ra>
